<compile_context>
chip_gen: v7x
topology: tpu7x:2x2x1
jax: 0.10.0
libtpu: 0.0.40
codegen_flags: <defaults>
</compile_context>

<pallas_src>
import jax
import jax.numpy as jnp
from jax.experimental import pallas as pl
from jax.experimental.pallas import tpu as pltpu

_TK = 128          # K-tile for the matmul reduction grid
_TM_MAX = 512      # cap on the M tile (VMEM budget ~3 MiB/step, fits v7x)
_EPS = 1e-5        # BatchNorm eps (PyTorch default)
_GROWTH = 32       # DenseNet-121 growth rate (fixed by the architecture)


def round_up(x, m):
    return ((x + m - 1) // m) * m


# ----------------------------------------------------------------------------
# Pallas kernels
# ----------------------------------------------------------------------------
def _make_mm_kernel(pre, post, post_relu, post_sigmoid):
    """Fused (BN+ReLU prologue) -> bf16 matmul -> (BN / bias + ReLU/Sigmoid)."""

    def kernel(*refs):
        idx = 0
        a_ref = refs[idx]; idx += 1
        w_ref = refs[idx]; idx += 1
        if pre:
            pre_s_ref = refs[idx]; pre_b_ref = refs[idx + 1]; idx += 2
        if post:
            post_s_ref = refs[idx]; post_b_ref = refs[idx + 1]; idx += 2
        o_ref = refs[idx]
        acc_ref = refs[idx + 1]

        k = pl.program_id(1)

        @pl.when(k == 0)
        def _init():
            acc_ref[...] = jnp.zeros_like(acc_ref)

        if pre:
            # pre-activation BatchNorm + ReLU on the im2col columns (f32 VPU,
            # then cast back to bf16 to feed the MXU)
            a = a_ref[...].astype(jnp.float32)
            a = jnp.maximum(a * pre_s_ref[...] + pre_b_ref[...], 0.0)
            a = a.astype(jnp.bfloat16)
        else:
            a = a_ref[...]
        acc_ref[...] += jnp.dot(a, w_ref[...],
                                preferred_element_type=jnp.float32)

        @pl.when(k == pl.num_programs(1) - 1)
        def _finish():
            r = acc_ref[...]
            if post:  # per-output-channel affine (BatchNorm or Linear bias)
                r = r * post_s_ref[...] + post_b_ref[...]
            if post_relu:
                r = jnp.maximum(r, 0.0)
            if post_sigmoid:
                r = 1.0 / (1.0 + jnp.exp(-r))
            o_ref[...] = r.astype(o_ref.dtype)

    return kernel


def fused_matmul(a, w, *, tile_m, pre_scale=None, pre_bias=None,
                 post_scale=None, post_bias=None, post_relu=False,
                 post_sigmoid=False, out_dtype=jnp.bfloat16):
    """a: (Mp, Kp) bf16, w: (Kp, Np) bf16; Mp % tile_m == 0, Kp % 128 == 0,
    Np % 128 == 0, tile_m % 16 == 0."""
    Mp, Kp = a.shape
    _, Np = w.shape
    nm, nk = Mp // tile_m, Kp // _TK
    pre = pre_scale is not None
    post = post_scale is not None

    in_specs = [
        pl.BlockSpec((tile_m, _TK), lambda m, k: (m, k)),
        pl.BlockSpec((_TK, Np), lambda m, k: (k, 0)),
    ]
    inputs = [a, w]
    if pre:
        in_specs += [pl.BlockSpec((1, _TK), lambda m, k: (0, k)),
                     pl.BlockSpec((1, _TK), lambda m, k: (0, k))]
        inputs += [pre_scale, pre_bias]
    if post:
        in_specs += [pl.BlockSpec((1, Np), lambda m, k: (0, 0)),
                     pl.BlockSpec((1, Np), lambda m, k: (0, 0))]
        inputs += [post_scale, post_bias]

    kernel = _make_mm_kernel(pre, post, post_relu, post_sigmoid)
    return pl.pallas_call(
        kernel,
        out_shape=jax.ShapeDtypeStruct((Mp, Np), out_dtype),
        grid_spec=pltpu.PrefetchScalarGridSpec(
            num_scalar_prefetch=0,
            grid=(nm, nk),
            in_specs=in_specs,
            out_specs=pl.BlockSpec((tile_m, Np), lambda m, k: (m, 0)),
            scratch_shapes=[pltpu.VMEM((tile_m, Np), jnp.float32)],
        ),
        compiler_params=pltpu.CompilerParams(
            dimension_semantics=("parallel", "arbitrary")),
    )(*inputs)


def conv_mm(a, w_padded, n_out, *, pre=None, post=None, post_relu=False,
            post_sigmoid=False, out_dtype=jnp.bfloat16):
    """Run one convolution-as-matmul through the fused Pallas kernel.

    a        : (M, Ka) activations / im2col patches (any float dtype).
    w_padded : (Kp, Np) bf16 weight, already zero-padded to 128 multiples.
    n_out    : true number of output channels (Python int, static).
    pre/post : optional (scale, bias) f32 tuples of true length.
    """
    Kp, Np = w_padded.shape
    M, Ka = a.shape
    a = a.astype(jnp.bfloat16)
    if Ka < Kp:
        a = jnp.pad(a, ((0, 0), (0, Kp - Ka)))
    tile_m = min(_TM_MAX, round_up(M, 16))
    Mp = round_up(M, tile_m)
    if Mp > M:
        a = jnp.pad(a, ((0, Mp - M), (0, 0)))

    kw = {}
    if pre is not None:
        s, b = pre
        kw["pre_scale"] = jnp.pad(s.astype(jnp.float32),
                                  (0, Kp - s.shape[0])).reshape(1, Kp)
        kw["pre_bias"] = jnp.pad(b.astype(jnp.float32),
                                 (0, Kp - b.shape[0])).reshape(1, Kp)
    if post is not None:
        s, b = post
        kw["post_scale"] = jnp.pad(s.astype(jnp.float32),
                                   (0, Np - s.shape[0])).reshape(1, Np)
        kw["post_bias"] = jnp.pad(b.astype(jnp.float32),
                                  (0, Np - b.shape[0])).reshape(1, Np)

    out = fused_matmul(a, w_padded, tile_m=tile_m, post_relu=post_relu,
                       post_sigmoid=post_sigmoid, out_dtype=out_dtype, **kw)
    return out[:M, :n_out]


def _bn_relu_kernel(x_ref, s_ref, b_ref, o_ref):
    x = x_ref[...].astype(jnp.float32)
    o_ref[...] = jnp.maximum(x * s_ref[...] + b_ref[...], 0.0)


def bn_relu_pallas(x2d, scale, bias):
    """Elementwise y = relu(x * scale + bias), row-tiled with a parallel grid."""
    M, C = x2d.shape
    Cp = round_up(C, 128)
    tile_m = min(_TM_MAX, round_up(M, 16))
    Mp = round_up(M, tile_m)
    xp = x2d
    if Mp > M or Cp > C:
        xp = jnp.pad(x2d, ((0, Mp - M), (0, Cp - C)))
    sp = jnp.pad(scale.astype(jnp.float32), (0, Cp - C)).reshape(1, Cp)
    bp = jnp.pad(bias.astype(jnp.float32), (0, Cp - C)).reshape(1, Cp)
    out = pl.pallas_call(
        _bn_relu_kernel,
        out_shape=jax.ShapeDtypeStruct((Mp, Cp), jnp.float32),
        grid=(Mp // tile_m,),
        in_specs=[pl.BlockSpec((tile_m, Cp), lambda i: (i, 0)),
                  pl.BlockSpec((1, Cp), lambda i: (0, 0)),
                  pl.BlockSpec((1, Cp), lambda i: (0, 0))],
        out_specs=pl.BlockSpec((tile_m, Cp), lambda i: (i, 0)),
        compiler_params=pltpu.CompilerParams(
            dimension_semantics=("parallel",)),
    )(xp, sp, bp)
    return out[:M, :C]


# ----------------------------------------------------------------------------
# Plain-JAX glue
# ----------------------------------------------------------------------------
def im2col(x, kh, kw, stride, pad):
    """x: NHWC -> patches (N*OH*OW, kh*kw*C), row order (kh, kw, C)."""
    n, h, w, c = x.shape
    xp = jnp.pad(x, ((0, 0), (pad, pad), (pad, pad), (0, 0)))
    oh = (h + 2 * pad - kh) // stride + 1
    ow = (w + 2 * pad - kw) // stride + 1
    pieces = []
    for i in range(kh):
        for j in range(kw):
            pieces.append(xp[:, i:i + stride * oh:stride,
                             j:j + stride * ow:stride, :])
    p = jnp.stack(pieces, axis=3)                    # (n, oh, ow, kh*kw, c)
    return p.reshape(n * oh * ow, kh * kw * c), oh, ow


def max_pool_3x3_s2_p1(x):
    return jax.lax.reduce_window(
        x, jnp.array(-jnp.inf, x.dtype), jax.lax.max,
        window_dimensions=(1, 3, 3, 1),
        window_strides=(1, 2, 2, 1),
        padding=((0, 0), (1, 1), (1, 1), (0, 0)))


def avg_pool_2x2(x):
    n, h, w, c = x.shape
    y = x.astype(jnp.float32).reshape(n, h // 2, 2, w // 2, 2, c)
    return y.mean(axis=(2, 4)).astype(jnp.bfloat16)


# ----------------------------------------------------------------------------
# Deterministic parameter initialization (synthetic, not a checkpoint load)
# ----------------------------------------------------------------------------
def _conv_w(key, kh, kw, cin, cout):
    std = (2.0 / (kh * kw * cin)) ** 0.5
    return std * jax.random.normal(key, (kh * kw * cin, cout), jnp.float32)


def _bn_p(key, c):
    k1, k2, k3, k4 = jax.random.split(key, 4)
    return dict(gamma=1.0 + 0.1 * jax.random.normal(k1, (c,), jnp.float32),
                beta=0.1 * jax.random.normal(k2, (c,), jnp.float32),
                mean=0.1 * jax.random.normal(k3, (c,), jnp.float32),
                var=1.0 + 0.1 * jax.random.uniform(k4, (c,), jnp.float32))


def init_densenet121_params(key, out_features=14, growth=_GROWTH,
                            block_config=(6, 12, 24, 16),
                            init_features=64, bn_size=4):
    counter = [0]

    def nk():
        counter[0] += 1
        return jax.random.fold_in(key, counter[0])

    params = {"conv0": _conv_w(nk(), 7, 7, 3, init_features),
              "norm0": _bn_p(nk(), init_features)}
    c = init_features
    blocks, transitions = [], []
    for bi, n_layers in enumerate(block_config):
        layers = []
        for li in range(n_layers):
            cin = c + li * growth
            layers.append(dict(
                norm1=_bn_p(nk(), cin),
                conv1=_conv_w(nk(), 1, 1, cin, bn_size * growth),
                norm2=_bn_p(nk(), bn_size * growth),
                conv2=_conv_w(nk(), 3, 3, bn_size * growth, growth)))
        blocks.append(layers)
        c = c + n_layers * growth
        if bi != len(block_config) - 1:
            transitions.append(dict(norm=_bn_p(nk(), c),
                                    conv=_conv_w(nk(), 1, 1, c, c // 2)))
            c = c // 2
    params["blocks"] = blocks
    params["transitions"] = transitions
    params["norm5"] = _bn_p(nk(), c)                 # c == 1024
    params["classifier"] = dict(
        w=(1.0 / (c ** 0.5)) * jax.random.normal(nk(), (c, out_features), jnp.float32),
        b=0.01 * jax.random.normal(nk(), (out_features,), jnp.float32))
    return params


# ----------------------------------------------------------------------------
# One-time parameter preprocessing (outside jit): fold BN, pad + bf16 weights
# ----------------------------------------------------------------------------
def preprocess_params(params):
    def conv(w):
        K, N = w.shape
        Kp, Np = round_up(K, 128), round_up(N, 128)
        return jnp.pad(w, ((0, Kp - K), (0, Np - N))).astype(jnp.bfloat16)

    def bn(p):
        s = p["gamma"] * jax.lax.rsqrt(p["var"] + _EPS)
        return s, p["beta"] - p["mean"] * s

    pp = dict(conv0=conv(params["conv0"]), norm0=bn(params["norm0"]))
    pp["blocks"] = [
        [dict(norm1=bn(l["norm1"]), conv1=conv(l["conv1"]),
              norm2=bn(l["norm2"]), conv2=conv(l["conv2"]))
         for l in layers]
        for layers in params["blocks"]]
    pp["transitions"] = [dict(norm=bn(t["norm"]), conv=conv(t["conv"]))
                         for t in params["transitions"]]
    pp["norm5"] = bn(params["norm5"])
    pp["classifier"] = dict(w=conv(params["classifier"]["w"]),
                            b=params["classifier"]["b"])
    return pp


# ----------------------------------------------------------------------------
# Forward pass
# ----------------------------------------------------------------------------
def _dense_block(layers, y):
    """torchvision _DenseBlock, with the feature concat replaced by a
    preallocated bf16 channel slab updated in place (dynamic_update_slice)."""
    n, h, w, c0 = y.shape
    c_total = c0 + len(layers) * _GROWTH          # multiple of 128 in DN-121
    slab = jnp.pad(y.astype(jnp.bfloat16),
                   ((0, 0), (0, 0), (0, 0), (0, c_total - c0)))
    cin = c0
    for lp in layers:
        kp = round_up(cin, 128)                   # per-layer K padding only
        bneck = lp["norm2"][0].shape[0]           # 128 (bn_size * growth)
        # slab channels >= cin are still zero, so the prefix slice already
        # carries the K padding — no extra zero materialization.
        x = slab[:, :, :, :kp].reshape(n * h * w, kp)
        # 1x1 bottleneck: norm1/relu1 fused prologue, norm2/relu2 epilogue
        y1 = conv_mm(x, lp["conv1"], bneck,
                     pre=lp["norm1"], post=lp["norm2"], post_relu=True)
        y1 = y1.reshape(n, h, w, bneck)
        # 3x3 conv, stride 1, pad 1 (input already normalized + ReLU'd)
        patches, oh, ow = im2col(y1, 3, 3, 1, 1)
        nf = conv_mm(patches, lp["conv2"], _GROWTH).reshape(n, oh, ow, _GROWTH)
        slab = jax.lax.dynamic_update_slice(slab, nf, (0, 0, 0, cin))
        cin += _GROWTH
    return slab                                   # (n, h, w, c_total)


def _transition(tp, x):
    n, h, w, c = x.shape
    y = conv_mm(x.reshape(n * h * w, c), tp["conv"], c // 2, pre=tp["norm"])
    y = y.reshape(n, h, w, c // 2)
    return avg_pool_2x2(y)


def densenet121_forward(pp, x_nchw):
    # layout: NCHW input (PyTorch convention) -> bf16 NHWC for the TPU path
    x = jnp.transpose(x_nchw, (0, 2, 3, 1)).astype(jnp.bfloat16)
    n = x.shape[0]

    # stem: conv0 7x7 s2 p3 with norm0+relu0 fused epilogue, maxpool 3x3 s2 p1
    c0 = pp["norm0"][0].shape[0]
    patches, oh, ow = im2col(x, 7, 7, 2, 3)
    y = conv_mm(patches, pp["conv0"], c0, post=pp["norm0"], post_relu=True)
    y = y.reshape(n, oh, ow, c0)
    y = max_pool_3x3_s2_p1(y)

    # dense blocks + transitions
    for bi, layers in enumerate(pp["blocks"]):
        y = _dense_block(layers, y)
        if bi < len(pp["transitions"]):
            y = _transition(pp["transitions"][bi], y)

    # norm5 + relu (Pallas elementwise), global average pool, Linear + Sigmoid
    n_, h_, w_, c_ = y.shape
    s5, b5 = pp["norm5"]
    flat = bn_relu_pallas(y.reshape(n_ * h_ * w_, c_), s5, b5)
    pooled = flat.reshape(n_, h_, w_, c_).mean(axis=(1, 2))   # (n, 1024) f32
    cls_b = pp["classifier"]["b"]
    n_out = cls_b.shape[0]
    out = conv_mm(pooled, pp["classifier"]["w"], n_out,
                  post=(jnp.ones((n_out,), jnp.float32), cls_b),
                  post_sigmoid=True, out_dtype=jnp.float32)
    return out                                               # (n, 14) in (0, 1)


# ----------------------------------------------------------------------------
if __name__ == "__main__":
    key = jax.random.PRNGKey(0)
    pkey, xkey = jax.random.split(key)

    params = init_densenet121_params(pkey, out_features=14)
    pparams = preprocess_params(params)    # fold BN, pad + bf16 weights (once)

    # Small input consistent with DenseNet121's stride-32 feature extractor:
    # 32x32 -> 16 -> 8 -> 4 -> 2 -> 1 spatial before global average pooling.
    x = jax.random.normal(xkey, (2, 3, 32, 32), jnp.float32)

    fwd = jax.jit(densenet121_forward)
    out = jax.block_until_ready(fwd(pparams, x))

    assert out.shape == (2, 14), out.shape
    assert bool(jnp.all(jnp.isfinite(out)))
    assert bool(jnp.all((out >= 0.0) & (out <= 1.0)))  # sigmoid output range
    print("KERNEL_OK")
</pallas_src>

<mosaic_0001>
module attributes {stable_mosaic.version = 11 : i64} {
  func.func @kernel(%arg0: i32, %arg1: i32, %arg2: memref<512x128xbf16, #tpu.memory_space<vmem>>, %arg3: memref<128x128xbf16, #tpu.memory_space<vmem>>, %arg4: memref<1x128xf32, #tpu.memory_space<vmem>>, %arg5: memref<1x128xf32, #tpu.memory_space<vmem>>, %arg6: memref<512x128xbf16, #tpu.memory_space<vmem>>, %arg7: memref<512x128xf32, #tpu.memory_space<vmem>>) attributes {dimension_semantics = [#tpu.dimension_semantics<parallel>, #tpu.dimension_semantics<arbitrary>], iteration_bounds = array<i64: 1, 2>, scalar_prefetch = 0 : i64, scratch_operands = 1 : i64, tpu.core_type = #tpu.core_type<tc>, window_params = [{transform_indices = @transform_0, window_bounds = array<i64: 512, 128>}, {transform_indices = @transform_1, window_bounds = array<i64: 128, 128>}, {pipeline_mode = #tpu.pipeline_mode<synchronous>, transform_indices = @transform_2, window_bounds = array<i64: 1, 128>}, {pipeline_mode = #tpu.pipeline_mode<synchronous>, transform_indices = @transform_3, window_bounds = array<i64: 1, 128>}, {transform_indices = @transform_4, window_bounds = array<i64: 512, 128>}]} {
    %c0_i32 = arith.constant 0 : i32
    %0 = arith.cmpi eq, %arg1, %c0_i32 : i32
    %1 = arith.extui %0 : i1 to i32
    %c0_i32_0 = arith.constant 0 : i32
    %2 = arith.cmpi ne, %1, %c0_i32_0 : i32
    scf.if %2 {
      %cst_9 = arith.constant 0.000000e+00 : f32
      %12 = vector.broadcast %cst_9 : f32 to vector<512x128xf32>
      %c0_10 = arith.constant 0 : index
      %c0_11 = arith.constant 0 : index
      %13 = vector.load %arg7[%c0_10, %c0_11] : memref<512x128xf32, #tpu.memory_space<vmem>>, vector<512x128xf32>
      tpu.vector_store %arg7[%c0_10, %c0_11], %12 {strides = array<i32>} : memref<512x128xf32, #tpu.memory_space<vmem>>, vector<512x128xf32>,
    } else {
    }
    %c0 = arith.constant 0 : index
    %c0_1 = arith.constant 0 : index
    %3 = vector.load %arg2[%c0, %c0_1] : memref<512x128xbf16, #tpu.memory_space<vmem>>, vector<512x128xbf16>
    %c0_2 = arith.constant 0 : index
    %c0_3 = arith.constant 0 : index
    %4 = vector.load %arg7[%c0_2, %c0_3] : memref<512x128xf32, #tpu.memory_space<vmem>>, vector<512x128xf32>
    %c0_4 = arith.constant 0 : index
    %c0_5 = arith.constant 0 : index
    %5 = vector.load %arg3[%c0_4, %c0_5] : memref<128x128xbf16, #tpu.memory_space<vmem>>, vector<128x128xbf16>
    %cst = arith.constant dense<0.000000e+00> : vector<512x128xf32>
    %6 = tpu.matmul %3, %5, %cst {dimension_numbers = #tpu.dot_dimension_numbers<[1], [0], [0], [1], [0, 0, 1, 1], [], []>} : vector<512x128xbf16>, vector<128x128xbf16>, vector<512x128xf32> -> vector<512x128xf32>
    %7 = arith.addf %4, %6 : vector<512x128xf32>
    %c0_6 = arith.constant 0 : index
    %c0_7 = arith.constant 0 : index
    %8 = vector.load %arg7[%c0_6, %c0_7] : memref<512x128xf32, #tpu.memory_space<vmem>>, vector<512x128xf32>
    tpu.vector_store %arg7[%c0_6, %c0_7], %7 {strides = array<i32>} : memref<512x128xf32, #tpu.memory_space<vmem>>, vector<512x128xf32>,
    %c1_i32 = arith.constant 1 : i32
    %9 = arith.cmpi eq, %arg1, %c1_i32 : i32
    %10 = arith.extui %9 : i1 to i32
    %c0_i32_8 = arith.constant 0 : i32
    %11 = arith.cmpi ne, %10, %c0_i32_8 : i32
    scf.if %11 {
      %c0_9 = arith.constant 0 : index
      %c0_10 = arith.constant 0 : index
      %12 = vector.load %arg7[%c0_9, %c0_10] : memref<512x128xf32, #tpu.memory_space<vmem>>, vector<512x128xf32>
      %c0_11 = arith.constant 0 : index
      %c0_12 = arith.constant 0 : index
      %13 = vector.load %arg4[%c0_11, %c0_12] : memref<1x128xf32, #tpu.memory_space<vmem>>, vector<1x128xf32>
      %14 = vector.broadcast %13 : vector<1x128xf32> to vector<512x128xf32>
      %15 = arith.mulf %12, %14 : vector<512x128xf32>
      %c0_13 = arith.constant 0 : index
      %c0_14 = arith.constant 0 : index
      %16 = vector.load %arg5[%c0_13, %c0_14] : memref<1x128xf32, #tpu.memory_space<vmem>>, vector<1x128xf32>
      %17 = vector.broadcast %16 : vector<1x128xf32> to vector<512x128xf32>
      %18 = arith.addf %15, %17 : vector<512x128xf32>
      %cst_15 = arith.constant 0.000000e+00 : f32
      %19 = vector.broadcast %cst_15 : f32 to vector<512x128xf32>
      %20 = arith.maximumf %18, %19 : vector<512x128xf32>
      %21 = arith.truncf %20 : vector<512x128xf32> to vector<512x128xbf16>
      %c0_16 = arith.constant 0 : index
      %c0_17 = arith.constant 0 : index
      %22 = vector.load %arg6[%c0_16, %c0_17] : memref<512x128xbf16, #tpu.memory_space<vmem>>, vector<512x128xbf16>
      tpu.vector_store %arg6[%c0_16, %c0_17], %21 {strides = array<i32>} : memref<512x128xbf16, #tpu.memory_space<vmem>>, vector<512x128xbf16>,
    } else {
    }
    return
  }
  func.func @transform_0(%arg0: i32, %arg1: i32) -> (i32, i32) {
    %c0_i32 = arith.constant 0 : i32
    return %arg0, %arg1 : i32, i32
  }
  func.func @transform_1(%arg0: i32, %arg1: i32) -> (i32, i32) {
    %c0_i32 = arith.constant 0 : i32
    %c0_i32_0 = arith.constant 0 : i32
    return %arg1, %c0_i32 : i32, i32
  }
  func.func @transform_2(%arg0: i32, %arg1: i32) -> (i32, i32) {
    %c0_i32 = arith.constant 0 : i32
    %c0_i32_0 = arith.constant 0 : i32
    %c0_i32_1 = arith.constant 0 : i32
    return %c0_i32, %c0_i32_0 : i32, i32
  }
  func.func @transform_3(%arg0: i32, %arg1: i32) -> (i32, i32) {
    %c0_i32 = arith.constant 0 : i32
    %c0_i32_0 = arith.constant 0 : i32
    %c0_i32_1 = arith.constant 0 : i32
    return %c0_i32, %c0_i32_0 : i32, i32
  }
  func.func @transform_4(%arg0: i32, %arg1: i32) -> (i32, i32) {
    %c0_i32 = arith.constant 0 : i32
    %c0_i32_0 = arith.constant 0 : i32
    return %arg0, %c0_i32 : i32, i32
  }
}

module attributes {stable_mosaic.version = 11 : i64} {
  func.func @kernel(%arg0: i32, %arg1: i32, %arg2: memref<128x128xbf16, #tpu.memory_space<vmem>>, %arg3: memref<128x128xbf16, #tpu.memory_space<vmem>>, %arg4: memref<1x128xf32, #tpu.memory_space<vmem>>, %arg5: memref<1x128xf32, #tpu.memory_space<vmem>>, %arg6: memref<1x128xf32, #tpu.memory_space<vmem>>, %arg7: memref<1x128xf32, #tpu.memory_space<vmem>>, %arg8: memref<128x128xbf16, #tpu.memory_space<vmem>>, %arg9: memref<128x128xf32, #tpu.memory_space<vmem>>) attributes {dimension_semantics = [#tpu.dimension_semantics<parallel>, #tpu.dimension_semantics<arbitrary>], iteration_bounds = array<i64: 1, 1>, scalar_prefetch = 0 : i64, scratch_operands = 1 : i64, tpu.core_type = #tpu.core_type<tc>, window_params = [{transform_indices = @transform_0, window_bounds = array<i64: 128, 128>}, {transform_indices = @transform_1, window_bounds = array<i64: 128, 128>}, {transform_indices = @transform_2, window_bounds = array<i64: 1, 128>}, {transform_indices = @transform_3, window_bounds = array<i64: 1, 128>}, {pipeline_mode = #tpu.pipeline_mode<synchronous>, transform_indices = @transform_4, window_bounds = array<i64: 1, 128>}, {pipeline_mode = #tpu.pipeline_mode<synchronous>, transform_indices = @transform_5, window_bounds = array<i64: 1, 128>}, {transform_indices = @transform_6, window_bounds = array<i64: 128, 128>}]} {
    %c0_i32 = arith.constant 0 : i32
    %0 = arith.cmpi eq, %arg1, %c0_i32 : i32
    %1 = arith.extui %0 : i1 to i32
    %c0_i32_0 = arith.constant 0 : i32
    %2 = arith.cmpi ne, %1, %c0_i32_0 : i32
    scf.if %2 {
      %cst_15 = arith.constant 0.000000e+00 : f32
      %22 = vector.broadcast %cst_15 : f32 to vector<128x128xf32>
      %c0_16 = arith.constant 0 : index
      %c0_17 = arith.constant 0 : index
      %23 = vector.load %arg9[%c0_16, %c0_17] : memref<128x128xf32, #tpu.memory_space<vmem>>, vector<128x128xf32>
      tpu.vector_store %arg9[%c0_16, %c0_17], %22 {strides = array<i32>} : memref<128x128xf32, #tpu.memory_space<vmem>>, vector<128x128xf32>,
    } else {
    }
    %c0 = arith.constant 0 : index
    %c0_1 = arith.constant 0 : index
    %3 = vector.load %arg2[%c0, %c0_1] : memref<128x128xbf16, #tpu.memory_space<vmem>>, vector<128x128xbf16>
    %4 = arith.extf %3 : vector<128x128xbf16> to vector<128x128xf32>
    %c0_2 = arith.constant 0 : index
    %c0_3 = arith.constant 0 : index
    %5 = vector.load %arg4[%c0_2, %c0_3] : memref<1x128xf32, #tpu.memory_space<vmem>>, vector<1x128xf32>
    %6 = vector.broadcast %5 : vector<1x128xf32> to vector<128x128xf32>
    %7 = arith.mulf %4, %6 : vector<128x128xf32>
    %c0_4 = arith.constant 0 : index
    %c0_5 = arith.constant 0 : index
    %8 = vector.load %arg5[%c0_4, %c0_5] : memref<1x128xf32, #tpu.memory_space<vmem>>, vector<1x128xf32>
    %9 = vector.broadcast %8 : vector<1x128xf32> to vector<128x128xf32>
    %10 = arith.addf %7, %9 : vector<128x128xf32>
    %cst = arith.constant 0.000000e+00 : f32
    %11 = vector.broadcast %cst : f32 to vector<128x128xf32>
    %12 = arith.maximumf %10, %11 : vector<128x128xf32>
    %13 = arith.truncf %12 : vector<128x128xf32> to vector<128x128xbf16>
    %c0_6 = arith.constant 0 : index
    %c0_7 = arith.constant 0 : index
    %14 = vector.load %arg9[%c0_6, %c0_7] : memref<128x128xf32, #tpu.memory_space<vmem>>, vector<128x128xf32>
    %c0_8 = arith.constant 0 : index
    %c0_9 = arith.constant 0 : index
    %15 = vector.load %arg3[%c0_8, %c0_9] : memref<128x128xbf16, #tpu.memory_space<vmem>>, vector<128x128xbf16>
    %cst_10 = arith.constant dense<0.000000e+00> : vector<128x128xf32>
    %16 = tpu.matmul %13, %15, %cst_10 {dimension_numbers = #tpu.dot_dimension_numbers<[1], [0], [0], [1], [0, 0, 1, 1], [], []>} : vector<128x128xbf16>, vector<128x128xbf16>, vector<128x128xf32> -> vector<128x128xf32>
    %17 = arith.addf %14, %16 : vector<128x128xf32>
    %c0_11 = arith.constant 0 : index
    %c0_12 = arith.constant 0 : index
    %18 = vector.load %arg9[%c0_11, %c0_12] : memref<128x128xf32, #tpu.memory_space<vmem>>, vector<128x128xf32>
    tpu.vector_store %arg9[%c0_11, %c0_12], %17 {strides = array<i32>} : memref<128x128xf32, #tpu.memory_space<vmem>>, vector<128x128xf32>,
    %c0_i32_13 = arith.constant 0 : i32
    %19 = arith.cmpi eq, %arg1, %c0_i32_13 : i32
    %20 = arith.extui %19 : i1 to i32
    %c0_i32_14 = arith.constant 0 : i32
    %21 = arith.cmpi ne, %20, %c0_i32_14 : i32
    scf.if %21 {
      %c0_15 = arith.constant 0 : index
      %c0_16 = arith.constant 0 : index
      %22 = vector.load %arg9[%c0_15, %c0_16] : memref<128x128xf32, #tpu.memory_space<vmem>>, vector<128x128xf32>
      %c0_17 = arith.constant 0 : index
      %c0_18 = arith.constant 0 : index
      %23 = vector.load %arg6[%c0_17, %c0_18] : memref<1x128xf32, #tpu.memory_space<vmem>>, vector<1x128xf32>
      %24 = vector.broadcast %23 : vector<1x128xf32> to vector<128x128xf32>
      %25 = arith.mulf %22, %24 : vector<128x128xf32>
      %c0_19 = arith.constant 0 : index
      %c0_20 = arith.constant 0 : index
      %26 = vector.load %arg7[%c0_19, %c0_20] : memref<1x128xf32, #tpu.memory_space<vmem>>, vector<1x128xf32>
      %27 = vector.broadcast %26 : vector<1x128xf32> to vector<128x128xf32>
      %28 = arith.addf %25, %27 : vector<128x128xf32>
      %cst_21 = arith.constant 0.000000e+00 : f32
      %29 = vector.broadcast %cst_21 : f32 to vector<128x128xf32>
      %30 = arith.maximumf %28, %29 : vector<128x128xf32>
      %31 = arith.truncf %30 : vector<128x128xf32> to vector<128x128xbf16>
      %c0_22 = arith.constant 0 : index
      %c0_23 = arith.constant 0 : index
      %32 = vector.load %arg8[%c0_22, %c0_23] : memref<128x128xbf16, #tpu.memory_space<vmem>>, vector<128x128xbf16>
      tpu.vector_store %arg8[%c0_22, %c0_23], %31 {strides = array<i32>} : memref<128x128xbf16, #tpu.memory_space<vmem>>, vector<128x128xbf16>,
    } else {
    }
    return
  }
  func.func @transform_0(%arg0: i32, %arg1: i32) -> (i32, i32) {
    %c0_i32 = arith.constant 0 : i32
    return %arg0, %arg1 : i32, i32
  }
  func.func @transform_1(%arg0: i32, %arg1: i32) -> (i32, i32) {
    %c0_i32 = arith.constant 0 : i32
    %c0_i32_0 = arith.constant 0 : i32
    return %arg1, %c0_i32 : i32, i32
  }
  func.func @transform_2(%arg0: i32, %arg1: i32) -> (i32, i32) {
    %c0_i32 = arith.constant 0 : i32
    %c0_i32_0 = arith.constant 0 : i32
    return %c0_i32, %arg1 : i32, i32
  }
  func.func @transform_3(%arg0: i32, %arg1: i32) -> (i32, i32) {
    %c0_i32 = arith.constant 0 : i32
    %c0_i32_0 = arith.constant 0 : i32
    return %c0_i32, %arg1 : i32, i32
  }
  func.func @transform_4(%arg0: i32, %arg1: i32) -> (i32, i32) {
    %c0_i32 = arith.constant 0 : i32
    %c0_i32_0 = arith.constant 0 : i32
    %c0_i32_1 = arith.constant 0 : i32
    return %c0_i32, %c0_i32_0 : i32, i32
  }
  func.func @transform_5(%arg0: i32, %arg1: i32) -> (i32, i32) {
    %c0_i32 = arith.constant 0 : i32
    %c0_i32_0 = arith.constant 0 : i32
    %c0_i32_1 = arith.constant 0 : i32
    return %c0_i32, %c0_i32_0 : i32, i32
  }
  func.func @transform_6(%arg0: i32, %arg1: i32) -> (i32, i32) {
    %c0_i32 = arith.constant 0 : i32
    %c0_i32_0 = arith.constant 0 : i32
    return %arg0, %c0_i32 : i32, i32
  }
}

module attributes {stable_mosaic.version = 11 : i64} {
  func.func @kernel(%arg0: i32, %arg1: i32, %arg2: memref<128x128xbf16, #tpu.memory_space<vmem>>, %arg3: memref<128x128xbf16, #tpu.memory_space<vmem>>, %arg4: memref<128x128xbf16, #tpu.memory_space<vmem>>, %arg5: memref<128x128xf32, #tpu.memory_space<vmem>>) attributes {dimension_semantics = [#tpu.dimension_semantics<parallel>, #tpu.dimension_semantics<arbitrary>], iteration_bounds = array<i64: 1, 9>, scalar_prefetch = 0 : i64, scratch_operands = 1 : i64, tpu.core_type = #tpu.core_type<tc>, window_params = [{transform_indices = @transform_0, window_bounds = array<i64: 128, 128>}, {transform_indices = @transform_1, window_bounds = array<i64: 128, 128>}, {transform_indices = @transform_2, window_bounds = array<i64: 128, 128>}]} {
    %c0_i32 = arith.constant 0 : i32
    %0 = arith.cmpi eq, %arg1, %c0_i32 : i32
    %1 = arith.extui %0 : i1 to i32
    %c0_i32_0 = arith.constant 0 : i32
    %2 = arith.cmpi ne, %1, %c0_i32_0 : i32
    scf.if %2 {
      %cst_9 = arith.constant 0.000000e+00 : f32
      %12 = vector.broadcast %cst_9 : f32 to vector<128x128xf32>
      %c0_10 = arith.constant 0 : index
      %c0_11 = arith.constant 0 : index
      %13 = vector.load %arg5[%c0_10, %c0_11] : memref<128x128xf32, #tpu.memory_space<vmem>>, vector<128x128xf32>
      tpu.vector_store %arg5[%c0_10, %c0_11], %12 {strides = array<i32>} : memref<128x128xf32, #tpu.memory_space<vmem>>, vector<128x128xf32>,
    } else {
    }
    %c0 = arith.constant 0 : index
    %c0_1 = arith.constant 0 : index
    %3 = vector.load %arg2[%c0, %c0_1] : memref<128x128xbf16, #tpu.memory_space<vmem>>, vector<128x128xbf16>
    %c0_2 = arith.constant 0 : index
    %c0_3 = arith.constant 0 : index
    %4 = vector.load %arg5[%c0_2, %c0_3] : memref<128x128xf32, #tpu.memory_space<vmem>>, vector<128x128xf32>
    %c0_4 = arith.constant 0 : index
    %c0_5 = arith.constant 0 : index
    %5 = vector.load %arg3[%c0_4, %c0_5] : memref<128x128xbf16, #tpu.memory_space<vmem>>, vector<128x128xbf16>
    %cst = arith.constant dense<0.000000e+00> : vector<128x128xf32>
    %6 = tpu.matmul %3, %5, %cst {dimension_numbers = #tpu.dot_dimension_numbers<[1], [0], [0], [1], [0, 0, 1, 1], [], []>} : vector<128x128xbf16>, vector<128x128xbf16>, vector<128x128xf32> -> vector<128x128xf32>
    %7 = arith.addf %4, %6 : vector<128x128xf32>
    %c0_6 = arith.constant 0 : index
    %c0_7 = arith.constant 0 : index
    %8 = vector.load %arg5[%c0_6, %c0_7] : memref<128x128xf32, #tpu.memory_space<vmem>>, vector<128x128xf32>
    tpu.vector_store %arg5[%c0_6, %c0_7], %7 {strides = array<i32>} : memref<128x128xf32, #tpu.memory_space<vmem>>, vector<128x128xf32>,
    %c8_i32 = arith.constant 8 : i32
    %9 = arith.cmpi eq, %arg1, %c8_i32 : i32
    %10 = arith.extui %9 : i1 to i32
    %c0_i32_8 = arith.constant 0 : i32
    %11 = arith.cmpi ne, %10, %c0_i32_8 : i32
    scf.if %11 {
      %c0_9 = arith.constant 0 : index
      %c0_10 = arith.constant 0 : index
      %12 = vector.load %arg5[%c0_9, %c0_10] : memref<128x128xf32, #tpu.memory_space<vmem>>, vector<128x128xf32>
      %13 = arith.truncf %12 : vector<128x128xf32> to vector<128x128xbf16>
      %c0_11 = arith.constant 0 : index
      %c0_12 = arith.constant 0 : index
      %14 = vector.load %arg4[%c0_11, %c0_12] : memref<128x128xbf16, #tpu.memory_space<vmem>>, vector<128x128xbf16>
      tpu.vector_store %arg4[%c0_11, %c0_12], %13 {strides = array<i32>} : memref<128x128xbf16, #tpu.memory_space<vmem>>, vector<128x128xbf16>,
    } else {
    }
    return
  }
  func.func @transform_0(%arg0: i32, %arg1: i32) -> (i32, i32) {
    %c0_i32 = arith.constant 0 : i32
    return %arg0, %arg1 : i32, i32
  }
  func.func @transform_1(%arg0: i32, %arg1: i32) -> (i32, i32) {
    %c0_i32 = arith.constant 0 : i32
    %c0_i32_0 = arith.constant 0 : i32
    return %arg1, %c0_i32 : i32, i32
  }
  func.func @transform_2(%arg0: i32, %arg1: i32) -> (i32, i32) {
    %c0_i32 = arith.constant 0 : i32
    %c0_i32_0 = arith.constant 0 : i32
    return %arg0, %c0_i32 : i32, i32
  }
}

module attributes {stable_mosaic.version = 11 : i64} {
  func.func @kernel(%arg0: i32, %arg1: i32, %arg2: memref<128x128xbf16, #tpu.memory_space<vmem>>, %arg3: memref<128x128xbf16, #tpu.memory_space<vmem>>, %arg4: memref<1x128xf32, #tpu.memory_space<vmem>>, %arg5: memref<1x128xf32, #tpu.memory_space<vmem>>, %arg6: memref<1x128xf32, #tpu.memory_space<vmem>>, %arg7: memref<1x128xf32, #tpu.memory_space<vmem>>, %arg8: memref<128x128xbf16, #tpu.memory_space<vmem>>, %arg9: memref<128x128xf32, #tpu.memory_space<vmem>>) attributes {dimension_semantics = [#tpu.dimension_semantics<parallel>, #tpu.dimension_semantics<arbitrary>], iteration_bounds = array<i64: 1, 2>, scalar_prefetch = 0 : i64, scratch_operands = 1 : i64, tpu.core_type = #tpu.core_type<tc>, window_params = [{transform_indices = @transform_0, window_bounds = array<i64: 128, 128>}, {transform_indices = @transform_1, window_bounds = array<i64: 128, 128>}, {transform_indices = @transform_2, window_bounds = array<i64: 1, 128>}, {transform_indices = @transform_3, window_bounds = array<i64: 1, 128>}, {pipeline_mode = #tpu.pipeline_mode<synchronous>, transform_indices = @transform_4, window_bounds = array<i64: 1, 128>}, {pipeline_mode = #tpu.pipeline_mode<synchronous>, transform_indices = @transform_5, window_bounds = array<i64: 1, 128>}, {transform_indices = @transform_6, window_bounds = array<i64: 128, 128>}]} {
    %c0_i32 = arith.constant 0 : i32
    %0 = arith.cmpi eq, %arg1, %c0_i32 : i32
    %1 = arith.extui %0 : i1 to i32
    %c0_i32_0 = arith.constant 0 : i32
    %2 = arith.cmpi ne, %1, %c0_i32_0 : i32
    scf.if %2 {
      %cst_14 = arith.constant 0.000000e+00 : f32
      %22 = vector.broadcast %cst_14 : f32 to vector<128x128xf32>
      %c0_15 = arith.constant 0 : index
      %c0_16 = arith.constant 0 : index
      %23 = vector.load %arg9[%c0_15, %c0_16] : memref<128x128xf32, #tpu.memory_space<vmem>>, vector<128x128xf32>
      tpu.vector_store %arg9[%c0_15, %c0_16], %22 {strides = array<i32>} : memref<128x128xf32, #tpu.memory_space<vmem>>, vector<128x128xf32>,
    } else {
    }
    %c0 = arith.constant 0 : index
    %c0_1 = arith.constant 0 : index
    %3 = vector.load %arg2[%c0, %c0_1] : memref<128x128xbf16, #tpu.memory_space<vmem>>, vector<128x128xbf16>
    %4 = arith.extf %3 : vector<128x128xbf16> to vector<128x128xf32>
    %c0_2 = arith.constant 0 : index
    %c0_3 = arith.constant 0 : index
    %5 = vector.load %arg4[%c0_2, %c0_3] : memref<1x128xf32, #tpu.memory_space<vmem>>, vector<1x128xf32>
    %6 = vector.broadcast %5 : vector<1x128xf32> to vector<128x128xf32>
    %7 = arith.mulf %4, %6 : vector<128x128xf32>
    %c0_4 = arith.constant 0 : index
    %c0_5 = arith.constant 0 : index
    %8 = vector.load %arg5[%c0_4, %c0_5] : memref<1x128xf32, #tpu.memory_space<vmem>>, vector<1x128xf32>
    %9 = vector.broadcast %8 : vector<1x128xf32> to vector<128x128xf32>
    %10 = arith.addf %7, %9 : vector<128x128xf32>
    %cst = arith.constant 0.000000e+00 : f32
    %11 = vector.broadcast %cst : f32 to vector<128x128xf32>
    %12 = arith.maximumf %10, %11 : vector<128x128xf32>
    %13 = arith.truncf %12 : vector<128x128xf32> to vector<128x128xbf16>
    %c0_6 = arith.constant 0 : index
    %c0_7 = arith.constant 0 : index
    %14 = vector.load %arg9[%c0_6, %c0_7] : memref<128x128xf32, #tpu.memory_space<vmem>>, vector<128x128xf32>
    %c0_8 = arith.constant 0 : index
    %c0_9 = arith.constant 0 : index
    %15 = vector.load %arg3[%c0_8, %c0_9] : memref<128x128xbf16, #tpu.memory_space<vmem>>, vector<128x128xbf16>
    %cst_10 = arith.constant dense<0.000000e+00> : vector<128x128xf32>
    %16 = tpu.matmul %13, %15, %cst_10 {dimension_numbers = #tpu.dot_dimension_numbers<[1], [0], [0], [1], [0, 0, 1, 1], [], []>} : vector<128x128xbf16>, vector<128x128xbf16>, vector<128x128xf32> -> vector<128x128xf32>
    %17 = arith.addf %14, %16 : vector<128x128xf32>
    %c0_11 = arith.constant 0 : index
    %c0_12 = arith.constant 0 : index
    %18 = vector.load %arg9[%c0_11, %c0_12] : memref<128x128xf32, #tpu.memory_space<vmem>>, vector<128x128xf32>
    tpu.vector_store %arg9[%c0_11, %c0_12], %17 {strides = array<i32>} : memref<128x128xf32, #tpu.memory_space<vmem>>, vector<128x128xf32>,
    %c1_i32 = arith.constant 1 : i32
    %19 = arith.cmpi eq, %arg1, %c1_i32 : i32
    %20 = arith.extui %19 : i1 to i32
    %c0_i32_13 = arith.constant 0 : i32
    %21 = arith.cmpi ne, %20, %c0_i32_13 : i32
    scf.if %21 {
      %c0_14 = arith.constant 0 : index
      %c0_15 = arith.constant 0 : index
      %22 = vector.load %arg9[%c0_14, %c0_15] : memref<128x128xf32, #tpu.memory_space<vmem>>, vector<128x128xf32>
      %c0_16 = arith.constant 0 : index
      %c0_17 = arith.constant 0 : index
      %23 = vector.load %arg6[%c0_16, %c0_17] : memref<1x128xf32, #tpu.memory_space<vmem>>, vector<1x128xf32>
      %24 = vector.broadcast %23 : vector<1x128xf32> to vector<128x128xf32>
      %25 = arith.mulf %22, %24 : vector<128x128xf32>
      %c0_18 = arith.constant 0 : index
      %c0_19 = arith.constant 0 : index
      %26 = vector.load %arg7[%c0_18, %c0_19] : memref<1x128xf32, #tpu.memory_space<vmem>>, vector<1x128xf32>
      %27 = vector.broadcast %26 : vector<1x128xf32> to vector<128x128xf32>
      %28 = arith.addf %25, %27 : vector<128x128xf32>
      %cst_20 = arith.constant 0.000000e+00 : f32
      %29 = vector.broadcast %cst_20 : f32 to vector<128x128xf32>
      %30 = arith.maximumf %28, %29 : vector<128x128xf32>
      %31 = arith.truncf %30 : vector<128x128xf32> to vector<128x128xbf16>
      %c0_21 = arith.constant 0 : index
      %c0_22 = arith.constant 0 : index
      %32 = vector.load %arg8[%c0_21, %c0_22] : memref<128x128xbf16, #tpu.memory_space<vmem>>, vector<128x128xbf16>
      tpu.vector_store %arg8[%c0_21, %c0_22], %31 {strides = array<i32>} : memref<128x128xbf16, #tpu.memory_space<vmem>>, vector<128x128xbf16>,
    } else {
    }
    return
  }
  func.func @transform_0(%arg0: i32, %arg1: i32) -> (i32, i32) {
    %c0_i32 = arith.constant 0 : i32
    return %arg0, %arg1 : i32, i32
  }
  func.func @transform_1(%arg0: i32, %arg1: i32) -> (i32, i32) {
    %c0_i32 = arith.constant 0 : i32
    %c0_i32_0 = arith.constant 0 : i32
    return %arg1, %c0_i32 : i32, i32
  }
  func.func @transform_2(%arg0: i32, %arg1: i32) -> (i32, i32) {
    %c0_i32 = arith.constant 0 : i32
    %c0_i32_0 = arith.constant 0 : i32
    return %c0_i32, %arg1 : i32, i32
  }
  func.func @transform_3(%arg0: i32, %arg1: i32) -> (i32, i32) {
    %c0_i32 = arith.constant 0 : i32
    %c0_i32_0 = arith.constant 0 : i32
    return %c0_i32, %arg1 : i32, i32
  }
  func.func @transform_4(%arg0: i32, %arg1: i32) -> (i32, i32) {
    %c0_i32 = arith.constant 0 : i32
    %c0_i32_0 = arith.constant 0 : i32
    %c0_i32_1 = arith.constant 0 : i32
    return %c0_i32, %c0_i32_0 : i32, i32
  }
  func.func @transform_5(%arg0: i32, %arg1: i32) -> (i32, i32) {
    %c0_i32 = arith.constant 0 : i32
    %c0_i32_0 = arith.constant 0 : i32
    %c0_i32_1 = arith.constant 0 : i32
    return %c0_i32, %c0_i32_0 : i32, i32
  }
  func.func @transform_6(%arg0: i32, %arg1: i32) -> (i32, i32) {
    %c0_i32 = arith.constant 0 : i32
    %c0_i32_0 = arith.constant 0 : i32
    return %arg0, %c0_i32 : i32, i32
  }
}

module attributes {stable_mosaic.version = 11 : i64} {
  func.func @kernel(%arg0: i32, %arg1: i32, %arg2: memref<128x128xbf16, #tpu.memory_space<vmem>>, %arg3: memref<128x128xbf16, #tpu.memory_space<vmem>>, %arg4: memref<1x128xf32, #tpu.memory_space<vmem>>, %arg5: memref<1x128xf32, #tpu.memory_space<vmem>>, %arg6: memref<128x128xbf16, #tpu.memory_space<vmem>>, %arg7: memref<128x128xf32, #tpu.memory_space<vmem>>) attributes {dimension_semantics = [#tpu.dimension_semantics<parallel>, #tpu.dimension_semantics<arbitrary>], iteration_bounds = array<i64: 1, 2>, scalar_prefetch = 0 : i64, scratch_operands = 1 : i64, tpu.core_type = #tpu.core_type<tc>, window_params = [{transform_indices = @transform_0, window_bounds = array<i64: 128, 128>}, {transform_indices = @transform_1, window_bounds = array<i64: 128, 128>}, {transform_indices = @transform_2, window_bounds = array<i64: 1, 128>}, {transform_indices = @transform_3, window_bounds = array<i64: 1, 128>}, {transform_indices = @transform_4, window_bounds = array<i64: 128, 128>}]} {
    %c0_i32 = arith.constant 0 : i32
    %0 = arith.cmpi eq, %arg1, %c0_i32 : i32
    %1 = arith.extui %0 : i1 to i32
    %c0_i32_0 = arith.constant 0 : i32
    %2 = arith.cmpi ne, %1, %c0_i32_0 : i32
    scf.if %2 {
      %cst_14 = arith.constant 0.000000e+00 : f32
      %22 = vector.broadcast %cst_14 : f32 to vector<128x128xf32>
      %c0_15 = arith.constant 0 : index
      %c0_16 = arith.constant 0 : index
      %23 = vector.load %arg7[%c0_15, %c0_16] : memref<128x128xf32, #tpu.memory_space<vmem>>, vector<128x128xf32>
      tpu.vector_store %arg7[%c0_15, %c0_16], %22 {strides = array<i32>} : memref<128x128xf32, #tpu.memory_space<vmem>>, vector<128x128xf32>,
    } else {
    }
    %c0 = arith.constant 0 : index
    %c0_1 = arith.constant 0 : index
    %3 = vector.load %arg2[%c0, %c0_1] : memref<128x128xbf16, #tpu.memory_space<vmem>>, vector<128x128xbf16>
    %4 = arith.extf %3 : vector<128x128xbf16> to vector<128x128xf32>
    %c0_2 = arith.constant 0 : index
    %c0_3 = arith.constant 0 : index
    %5 = vector.load %arg4[%c0_2, %c0_3] : memref<1x128xf32, #tpu.memory_space<vmem>>, vector<1x128xf32>
    %6 = vector.broadcast %5 : vector<1x128xf32> to vector<128x128xf32>
    %7 = arith.mulf %4, %6 : vector<128x128xf32>
    %c0_4 = arith.constant 0 : index
    %c0_5 = arith.constant 0 : index
    %8 = vector.load %arg5[%c0_4, %c0_5] : memref<1x128xf32, #tpu.memory_space<vmem>>, vector<1x128xf32>
    %9 = vector.broadcast %8 : vector<1x128xf32> to vector<128x128xf32>
    %10 = arith.addf %7, %9 : vector<128x128xf32>
    %cst = arith.constant 0.000000e+00 : f32
    %11 = vector.broadcast %cst : f32 to vector<128x128xf32>
    %12 = arith.maximumf %10, %11 : vector<128x128xf32>
    %13 = arith.truncf %12 : vector<128x128xf32> to vector<128x128xbf16>
    %c0_6 = arith.constant 0 : index
    %c0_7 = arith.constant 0 : index
    %14 = vector.load %arg7[%c0_6, %c0_7] : memref<128x128xf32, #tpu.memory_space<vmem>>, vector<128x128xf32>
    %c0_8 = arith.constant 0 : index
    %c0_9 = arith.constant 0 : index
    %15 = vector.load %arg3[%c0_8, %c0_9] : memref<128x128xbf16, #tpu.memory_space<vmem>>, vector<128x128xbf16>
    %cst_10 = arith.constant dense<0.000000e+00> : vector<128x128xf32>
    %16 = tpu.matmul %13, %15, %cst_10 {dimension_numbers = #tpu.dot_dimension_numbers<[1], [0], [0], [1], [0, 0, 1, 1], [], []>} : vector<128x128xbf16>, vector<128x128xbf16>, vector<128x128xf32> -> vector<128x128xf32>
    %17 = arith.addf %14, %16 : vector<128x128xf32>
    %c0_11 = arith.constant 0 : index
    %c0_12 = arith.constant 0 : index
    %18 = vector.load %arg7[%c0_11, %c0_12] : memref<128x128xf32, #tpu.memory_space<vmem>>, vector<128x128xf32>
    tpu.vector_store %arg7[%c0_11, %c0_12], %17 {strides = array<i32>} : memref<128x128xf32, #tpu.memory_space<vmem>>, vector<128x128xf32>,
    %c1_i32 = arith.constant 1 : i32
    %19 = arith.cmpi eq, %arg1, %c1_i32 : i32
    %20 = arith.extui %19 : i1 to i32
    %c0_i32_13 = arith.constant 0 : i32
    %21 = arith.cmpi ne, %20, %c0_i32_13 : i32
    scf.if %21 {
      %c0_14 = arith.constant 0 : index
      %c0_15 = arith.constant 0 : index
      %22 = vector.load %arg7[%c0_14, %c0_15] : memref<128x128xf32, #tpu.memory_space<vmem>>, vector<128x128xf32>
      %23 = arith.truncf %22 : vector<128x128xf32> to vector<128x128xbf16>
      %c0_16 = arith.constant 0 : index
      %c0_17 = arith.constant 0 : index
      %24 = vector.load %arg6[%c0_16, %c0_17] : memref<128x128xbf16, #tpu.memory_space<vmem>>, vector<128x128xbf16>
      tpu.vector_store %arg6[%c0_16, %c0_17], %23 {strides = array<i32>} : memref<128x128xbf16, #tpu.memory_space<vmem>>, vector<128x128xbf16>,
    } else {
    }
    return
  }
  func.func @transform_0(%arg0: i32, %arg1: i32) -> (i32, i32) {
    %c0_i32 = arith.constant 0 : i32
    return %arg0, %arg1 : i32, i32
  }
  func.func @transform_1(%arg0: i32, %arg1: i32) -> (i32, i32) {
    %c0_i32 = arith.constant 0 : i32
    %c0_i32_0 = arith.constant 0 : i32
    return %arg1, %c0_i32 : i32, i32
  }
  func.func @transform_2(%arg0: i32, %arg1: i32) -> (i32, i32) {
    %c0_i32 = arith.constant 0 : i32
    %c0_i32_0 = arith.constant 0 : i32
    return %c0_i32, %arg1 : i32, i32
  }
  func.func @transform_3(%arg0: i32, %arg1: i32) -> (i32, i32) {
    %c0_i32 = arith.constant 0 : i32
    %c0_i32_0 = arith.constant 0 : i32
    return %c0_i32, %arg1 : i32, i32
  }
  func.func @transform_4(%arg0: i32, %arg1: i32) -> (i32, i32) {
    %c0_i32 = arith.constant 0 : i32
    %c0_i32_0 = arith.constant 0 : i32
    return %arg0, %c0_i32 : i32, i32
  }
}

module attributes {stable_mosaic.version = 11 : i64} {
  func.func @kernel(%arg0: i32, %arg1: i32, %arg2: memref<32x128xbf16, #tpu.memory_space<vmem>>, %arg3: memref<128x128xbf16, #tpu.memory_space<vmem>>, %arg4: memref<1x128xf32, #tpu.memory_space<vmem>>, %arg5: memref<1x128xf32, #tpu.memory_space<vmem>>, %arg6: memref<1x128xf32, #tpu.memory_space<vmem>>, %arg7: memref<1x128xf32, #tpu.memory_space<vmem>>, %arg8: memref<32x128xbf16, #tpu.memory_space<vmem>>, %arg9: memref<32x128xf32, #tpu.memory_space<vmem>>) attributes {dimension_semantics = [#tpu.dimension_semantics<parallel>, #tpu.dimension_semantics<arbitrary>], iteration_bounds = array<i64: 1, 1>, scalar_prefetch = 0 : i64, scratch_operands = 1 : i64, tpu.core_type = #tpu.core_type<tc>, window_params = [{transform_indices = @transform_0, window_bounds = array<i64: 32, 128>}, {transform_indices = @transform_1, window_bounds = array<i64: 128, 128>}, {transform_indices = @transform_2, window_bounds = array<i64: 1, 128>}, {transform_indices = @transform_3, window_bounds = array<i64: 1, 128>}, {pipeline_mode = #tpu.pipeline_mode<synchronous>, transform_indices = @transform_4, window_bounds = array<i64: 1, 128>}, {pipeline_mode = #tpu.pipeline_mode<synchronous>, transform_indices = @transform_5, window_bounds = array<i64: 1, 128>}, {transform_indices = @transform_6, window_bounds = array<i64: 32, 128>}]} {
    %c0_i32 = arith.constant 0 : i32
    %0 = arith.cmpi eq, %arg1, %c0_i32 : i32
    %1 = arith.extui %0 : i1 to i32
    %c0_i32_0 = arith.constant 0 : i32
    %2 = arith.cmpi ne, %1, %c0_i32_0 : i32
    scf.if %2 {
      %cst_15 = arith.constant 0.000000e+00 : f32
      %22 = vector.broadcast %cst_15 : f32 to vector<32x128xf32>
      %c0_16 = arith.constant 0 : index
      %c0_17 = arith.constant 0 : index
      %23 = vector.load %arg9[%c0_16, %c0_17] : memref<32x128xf32, #tpu.memory_space<vmem>>, vector<32x128xf32>
      tpu.vector_store %arg9[%c0_16, %c0_17], %22 {strides = array<i32>} : memref<32x128xf32, #tpu.memory_space<vmem>>, vector<32x128xf32>,
    } else {
    }
    %c0 = arith.constant 0 : index
    %c0_1 = arith.constant 0 : index
    %3 = vector.load %arg2[%c0, %c0_1] : memref<32x128xbf16, #tpu.memory_space<vmem>>, vector<32x128xbf16>
    %4 = arith.extf %3 : vector<32x128xbf16> to vector<32x128xf32>
    %c0_2 = arith.constant 0 : index
    %c0_3 = arith.constant 0 : index
    %5 = vector.load %arg4[%c0_2, %c0_3] : memref<1x128xf32, #tpu.memory_space<vmem>>, vector<1x128xf32>
    %6 = vector.broadcast %5 : vector<1x128xf32> to vector<32x128xf32>
    %7 = arith.mulf %4, %6 : vector<32x128xf32>
    %c0_4 = arith.constant 0 : index
    %c0_5 = arith.constant 0 : index
    %8 = vector.load %arg5[%c0_4, %c0_5] : memref<1x128xf32, #tpu.memory_space<vmem>>, vector<1x128xf32>
    %9 = vector.broadcast %8 : vector<1x128xf32> to vector<32x128xf32>
    %10 = arith.addf %7, %9 : vector<32x128xf32>
    %cst = arith.constant 0.000000e+00 : f32
    %11 = vector.broadcast %cst : f32 to vector<32x128xf32>
    %12 = arith.maximumf %10, %11 : vector<32x128xf32>
    %13 = arith.truncf %12 : vector<32x128xf32> to vector<32x128xbf16>
    %c0_6 = arith.constant 0 : index
    %c0_7 = arith.constant 0 : index
    %14 = vector.load %arg9[%c0_6, %c0_7] : memref<32x128xf32, #tpu.memory_space<vmem>>, vector<32x128xf32>
    %c0_8 = arith.constant 0 : index
    %c0_9 = arith.constant 0 : index
    %15 = vector.load %arg3[%c0_8, %c0_9] : memref<128x128xbf16, #tpu.memory_space<vmem>>, vector<128x128xbf16>
    %cst_10 = arith.constant dense<0.000000e+00> : vector<32x128xf32>
    %16 = tpu.matmul %13, %15, %cst_10 {dimension_numbers = #tpu.dot_dimension_numbers<[1], [0], [0], [1], [0, 0, 1, 1], [], []>} : vector<32x128xbf16>, vector<128x128xbf16>, vector<32x128xf32> -> vector<32x128xf32>
    %17 = arith.addf %14, %16 : vector<32x128xf32>
    %c0_11 = arith.constant 0 : index
    %c0_12 = arith.constant 0 : index
    %18 = vector.load %arg9[%c0_11, %c0_12] : memref<32x128xf32, #tpu.memory_space<vmem>>, vector<32x128xf32>
    tpu.vector_store %arg9[%c0_11, %c0_12], %17 {strides = array<i32>} : memref<32x128xf32, #tpu.memory_space<vmem>>, vector<32x128xf32>,
    %c0_i32_13 = arith.constant 0 : i32
    %19 = arith.cmpi eq, %arg1, %c0_i32_13 : i32
    %20 = arith.extui %19 : i1 to i32
    %c0_i32_14 = arith.constant 0 : i32
    %21 = arith.cmpi ne, %20, %c0_i32_14 : i32
    scf.if %21 {
      %c0_15 = arith.constant 0 : index
      %c0_16 = arith.constant 0 : index
      %22 = vector.load %arg9[%c0_15, %c0_16] : memref<32x128xf32, #tpu.memory_space<vmem>>, vector<32x128xf32>
      %c0_17 = arith.constant 0 : index
      %c0_18 = arith.constant 0 : index
      %23 = vector.load %arg6[%c0_17, %c0_18] : memref<1x128xf32, #tpu.memory_space<vmem>>, vector<1x128xf32>
      %24 = vector.broadcast %23 : vector<1x128xf32> to vector<32x128xf32>
      %25 = arith.mulf %22, %24 : vector<32x128xf32>
      %c0_19 = arith.constant 0 : index
      %c0_20 = arith.constant 0 : index
      %26 = vector.load %arg7[%c0_19, %c0_20] : memref<1x128xf32, #tpu.memory_space<vmem>>, vector<1x128xf32>
      %27 = vector.broadcast %26 : vector<1x128xf32> to vector<32x128xf32>
      %28 = arith.addf %25, %27 : vector<32x128xf32>
      %cst_21 = arith.constant 0.000000e+00 : f32
      %29 = vector.broadcast %cst_21 : f32 to vector<32x128xf32>
      %30 = arith.maximumf %28, %29 : vector<32x128xf32>
      %31 = arith.truncf %30 : vector<32x128xf32> to vector<32x128xbf16>
      %c0_22 = arith.constant 0 : index
      %c0_23 = arith.constant 0 : index
      %32 = vector.load %arg8[%c0_22, %c0_23] : memref<32x128xbf16, #tpu.memory_space<vmem>>, vector<32x128xbf16>
      tpu.vector_store %arg8[%c0_22, %c0_23], %31 {strides = array<i32>} : memref<32x128xbf16, #tpu.memory_space<vmem>>, vector<32x128xbf16>,
    } else {
    }
    return
  }
  func.func @transform_0(%arg0: i32, %arg1: i32) -> (i32, i32) {
    %c0_i32 = arith.constant 0 : i32
    return %arg0, %arg1 : i32, i32
  }
  func.func @transform_1(%arg0: i32, %arg1: i32) -> (i32, i32) {
    %c0_i32 = arith.constant 0 : i32
    %c0_i32_0 = arith.constant 0 : i32
    return %arg1, %c0_i32 : i32, i32
  }
  func.func @transform_2(%arg0: i32, %arg1: i32) -> (i32, i32) {
    %c0_i32 = arith.constant 0 : i32
    %c0_i32_0 = arith.constant 0 : i32
    return %c0_i32, %arg1 : i32, i32
  }
  func.func @transform_3(%arg0: i32, %arg1: i32) -> (i32, i32) {
    %c0_i32 = arith.constant 0 : i32
    %c0_i32_0 = arith.constant 0 : i32
    return %c0_i32, %arg1 : i32, i32
  }
  func.func @transform_4(%arg0: i32, %arg1: i32) -> (i32, i32) {
    %c0_i32 = arith.constant 0 : i32
    %c0_i32_0 = arith.constant 0 : i32
    %c0_i32_1 = arith.constant 0 : i32
    return %c0_i32, %c0_i32_0 : i32, i32
  }
  func.func @transform_5(%arg0: i32, %arg1: i32) -> (i32, i32) {
    %c0_i32 = arith.constant 0 : i32
    %c0_i32_0 = arith.constant 0 : i32
    %c0_i32_1 = arith.constant 0 : i32
    return %c0_i32, %c0_i32_0 : i32, i32
  }
  func.func @transform_6(%arg0: i32, %arg1: i32) -> (i32, i32) {
    %c0_i32 = arith.constant 0 : i32
    %c0_i32_0 = arith.constant 0 : i32
    return %arg0, %c0_i32 : i32, i32
  }
}

module attributes {stable_mosaic.version = 11 : i64} {
  func.func @kernel(%arg0: i32, %arg1: i32, %arg2: memref<32x128xbf16, #tpu.memory_space<vmem>>, %arg3: memref<128x128xbf16, #tpu.memory_space<vmem>>, %arg4: memref<32x128xbf16, #tpu.memory_space<vmem>>, %arg5: memref<32x128xf32, #tpu.memory_space<vmem>>) attributes {dimension_semantics = [#tpu.dimension_semantics<parallel>, #tpu.dimension_semantics<arbitrary>], iteration_bounds = array<i64: 1, 9>, scalar_prefetch = 0 : i64, scratch_operands = 1 : i64, tpu.core_type = #tpu.core_type<tc>, window_params = [{transform_indices = @transform_0, window_bounds = array<i64: 32, 128>}, {transform_indices = @transform_1, window_bounds = array<i64: 128, 128>}, {transform_indices = @transform_2, window_bounds = array<i64: 32, 128>}]} {
    %c0_i32 = arith.constant 0 : i32
    %0 = arith.cmpi eq, %arg1, %c0_i32 : i32
    %1 = arith.extui %0 : i1 to i32
    %c0_i32_0 = arith.constant 0 : i32
    %2 = arith.cmpi ne, %1, %c0_i32_0 : i32
    scf.if %2 {
      %cst_9 = arith.constant 0.000000e+00 : f32
      %12 = vector.broadcast %cst_9 : f32 to vector<32x128xf32>
      %c0_10 = arith.constant 0 : index
      %c0_11 = arith.constant 0 : index
      %13 = vector.load %arg5[%c0_10, %c0_11] : memref<32x128xf32, #tpu.memory_space<vmem>>, vector<32x128xf32>
      tpu.vector_store %arg5[%c0_10, %c0_11], %12 {strides = array<i32>} : memref<32x128xf32, #tpu.memory_space<vmem>>, vector<32x128xf32>,
    } else {
    }
    %c0 = arith.constant 0 : index
    %c0_1 = arith.constant 0 : index
    %3 = vector.load %arg2[%c0, %c0_1] : memref<32x128xbf16, #tpu.memory_space<vmem>>, vector<32x128xbf16>
    %c0_2 = arith.constant 0 : index
    %c0_3 = arith.constant 0 : index
    %4 = vector.load %arg5[%c0_2, %c0_3] : memref<32x128xf32, #tpu.memory_space<vmem>>, vector<32x128xf32>
    %c0_4 = arith.constant 0 : index
    %c0_5 = arith.constant 0 : index
    %5 = vector.load %arg3[%c0_4, %c0_5] : memref<128x128xbf16, #tpu.memory_space<vmem>>, vector<128x128xbf16>
    %cst = arith.constant dense<0.000000e+00> : vector<32x128xf32>
    %6 = tpu.matmul %3, %5, %cst {dimension_numbers = #tpu.dot_dimension_numbers<[1], [0], [0], [1], [0, 0, 1, 1], [], []>} : vector<32x128xbf16>, vector<128x128xbf16>, vector<32x128xf32> -> vector<32x128xf32>
    %7 = arith.addf %4, %6 : vector<32x128xf32>
    %c0_6 = arith.constant 0 : index
    %c0_7 = arith.constant 0 : index
    %8 = vector.load %arg5[%c0_6, %c0_7] : memref<32x128xf32, #tpu.memory_space<vmem>>, vector<32x128xf32>
    tpu.vector_store %arg5[%c0_6, %c0_7], %7 {strides = array<i32>} : memref<32x128xf32, #tpu.memory_space<vmem>>, vector<32x128xf32>,
    %c8_i32 = arith.constant 8 : i32
    %9 = arith.cmpi eq, %arg1, %c8_i32 : i32
    %10 = arith.extui %9 : i1 to i32
    %c0_i32_8 = arith.constant 0 : i32
    %11 = arith.cmpi ne, %10, %c0_i32_8 : i32
    scf.if %11 {
      %c0_9 = arith.constant 0 : index
      %c0_10 = arith.constant 0 : index
      %12 = vector.load %arg5[%c0_9, %c0_10] : memref<32x128xf32, #tpu.memory_space<vmem>>, vector<32x128xf32>
      %13 = arith.truncf %12 : vector<32x128xf32> to vector<32x128xbf16>
      %c0_11 = arith.constant 0 : index
      %c0_12 = arith.constant 0 : index
      %14 = vector.load %arg4[%c0_11, %c0_12] : memref<32x128xbf16, #tpu.memory_space<vmem>>, vector<32x128xbf16>
      tpu.vector_store %arg4[%c0_11, %c0_12], %13 {strides = array<i32>} : memref<32x128xbf16, #tpu.memory_space<vmem>>, vector<32x128xbf16>,
    } else {
    }
    return
  }
  func.func @transform_0(%arg0: i32, %arg1: i32) -> (i32, i32) {
    %c0_i32 = arith.constant 0 : i32
    return %arg0, %arg1 : i32, i32
  }
  func.func @transform_1(%arg0: i32, %arg1: i32) -> (i32, i32) {
    %c0_i32 = arith.constant 0 : i32
    %c0_i32_0 = arith.constant 0 : i32
    return %arg1, %c0_i32 : i32, i32
  }
  func.func @transform_2(%arg0: i32, %arg1: i32) -> (i32, i32) {
    %c0_i32 = arith.constant 0 : i32
    %c0_i32_0 = arith.constant 0 : i32
    return %arg0, %c0_i32 : i32, i32
  }
}

module attributes {stable_mosaic.version = 11 : i64} {
  func.func @kernel(%arg0: i32, %arg1: i32, %arg2: memref<32x128xbf16, #tpu.memory_space<vmem>>, %arg3: memref<128x128xbf16, #tpu.memory_space<vmem>>, %arg4: memref<1x128xf32, #tpu.memory_space<vmem>>, %arg5: memref<1x128xf32, #tpu.memory_space<vmem>>, %arg6: memref<1x128xf32, #tpu.memory_space<vmem>>, %arg7: memref<1x128xf32, #tpu.memory_space<vmem>>, %arg8: memref<32x128xbf16, #tpu.memory_space<vmem>>, %arg9: memref<32x128xf32, #tpu.memory_space<vmem>>) attributes {dimension_semantics = [#tpu.dimension_semantics<parallel>, #tpu.dimension_semantics<arbitrary>], iteration_bounds = array<i64: 1, 2>, scalar_prefetch = 0 : i64, scratch_operands = 1 : i64, tpu.core_type = #tpu.core_type<tc>, window_params = [{transform_indices = @transform_0, window_bounds = array<i64: 32, 128>}, {transform_indices = @transform_1, window_bounds = array<i64: 128, 128>}, {transform_indices = @transform_2, window_bounds = array<i64: 1, 128>}, {transform_indices = @transform_3, window_bounds = array<i64: 1, 128>}, {pipeline_mode = #tpu.pipeline_mode<synchronous>, transform_indices = @transform_4, window_bounds = array<i64: 1, 128>}, {pipeline_mode = #tpu.pipeline_mode<synchronous>, transform_indices = @transform_5, window_bounds = array<i64: 1, 128>}, {transform_indices = @transform_6, window_bounds = array<i64: 32, 128>}]} {
    %c0_i32 = arith.constant 0 : i32
    %0 = arith.cmpi eq, %arg1, %c0_i32 : i32
    %1 = arith.extui %0 : i1 to i32
    %c0_i32_0 = arith.constant 0 : i32
    %2 = arith.cmpi ne, %1, %c0_i32_0 : i32
    scf.if %2 {
      %cst_14 = arith.constant 0.000000e+00 : f32
      %22 = vector.broadcast %cst_14 : f32 to vector<32x128xf32>
      %c0_15 = arith.constant 0 : index
      %c0_16 = arith.constant 0 : index
      %23 = vector.load %arg9[%c0_15, %c0_16] : memref<32x128xf32, #tpu.memory_space<vmem>>, vector<32x128xf32>
      tpu.vector_store %arg9[%c0_15, %c0_16], %22 {strides = array<i32>} : memref<32x128xf32, #tpu.memory_space<vmem>>, vector<32x128xf32>,
    } else {
    }
    %c0 = arith.constant 0 : index
    %c0_1 = arith.constant 0 : index
    %3 = vector.load %arg2[%c0, %c0_1] : memref<32x128xbf16, #tpu.memory_space<vmem>>, vector<32x128xbf16>
    %4 = arith.extf %3 : vector<32x128xbf16> to vector<32x128xf32>
    %c0_2 = arith.constant 0 : index
    %c0_3 = arith.constant 0 : index
    %5 = vector.load %arg4[%c0_2, %c0_3] : memref<1x128xf32, #tpu.memory_space<vmem>>, vector<1x128xf32>
    %6 = vector.broadcast %5 : vector<1x128xf32> to vector<32x128xf32>
    %7 = arith.mulf %4, %6 : vector<32x128xf32>
    %c0_4 = arith.constant 0 : index
    %c0_5 = arith.constant 0 : index
    %8 = vector.load %arg5[%c0_4, %c0_5] : memref<1x128xf32, #tpu.memory_space<vmem>>, vector<1x128xf32>
    %9 = vector.broadcast %8 : vector<1x128xf32> to vector<32x128xf32>
    %10 = arith.addf %7, %9 : vector<32x128xf32>
    %cst = arith.constant 0.000000e+00 : f32
    %11 = vector.broadcast %cst : f32 to vector<32x128xf32>
    %12 = arith.maximumf %10, %11 : vector<32x128xf32>
    %13 = arith.truncf %12 : vector<32x128xf32> to vector<32x128xbf16>
    %c0_6 = arith.constant 0 : index
    %c0_7 = arith.constant 0 : index
    %14 = vector.load %arg9[%c0_6, %c0_7] : memref<32x128xf32, #tpu.memory_space<vmem>>, vector<32x128xf32>
    %c0_8 = arith.constant 0 : index
    %c0_9 = arith.constant 0 : index
    %15 = vector.load %arg3[%c0_8, %c0_9] : memref<128x128xbf16, #tpu.memory_space<vmem>>, vector<128x128xbf16>
    %cst_10 = arith.constant dense<0.000000e+00> : vector<32x128xf32>
    %16 = tpu.matmul %13, %15, %cst_10 {dimension_numbers = #tpu.dot_dimension_numbers<[1], [0], [0], [1], [0, 0, 1, 1], [], []>} : vector<32x128xbf16>, vector<128x128xbf16>, vector<32x128xf32> -> vector<32x128xf32>
    %17 = arith.addf %14, %16 : vector<32x128xf32>
    %c0_11 = arith.constant 0 : index
    %c0_12 = arith.constant 0 : index
    %18 = vector.load %arg9[%c0_11, %c0_12] : memref<32x128xf32, #tpu.memory_space<vmem>>, vector<32x128xf32>
    tpu.vector_store %arg9[%c0_11, %c0_12], %17 {strides = array<i32>} : memref<32x128xf32, #tpu.memory_space<vmem>>, vector<32x128xf32>,
    %c1_i32 = arith.constant 1 : i32
    %19 = arith.cmpi eq, %arg1, %c1_i32 : i32
    %20 = arith.extui %19 : i1 to i32
    %c0_i32_13 = arith.constant 0 : i32
    %21 = arith.cmpi ne, %20, %c0_i32_13 : i32
    scf.if %21 {
      %c0_14 = arith.constant 0 : index
      %c0_15 = arith.constant 0 : index
      %22 = vector.load %arg9[%c0_14, %c0_15] : memref<32x128xf32, #tpu.memory_space<vmem>>, vector<32x128xf32>
      %c0_16 = arith.constant 0 : index
      %c0_17 = arith.constant 0 : index
      %23 = vector.load %arg6[%c0_16, %c0_17] : memref<1x128xf32, #tpu.memory_space<vmem>>, vector<1x128xf32>
      %24 = vector.broadcast %23 : vector<1x128xf32> to vector<32x128xf32>
      %25 = arith.mulf %22, %24 : vector<32x128xf32>
      %c0_18 = arith.constant 0 : index
      %c0_19 = arith.constant 0 : index
      %26 = vector.load %arg7[%c0_18, %c0_19] : memref<1x128xf32, #tpu.memory_space<vmem>>, vector<1x128xf32>
      %27 = vector.broadcast %26 : vector<1x128xf32> to vector<32x128xf32>
      %28 = arith.addf %25, %27 : vector<32x128xf32>
      %cst_20 = arith.constant 0.000000e+00 : f32
      %29 = vector.broadcast %cst_20 : f32 to vector<32x128xf32>
      %30 = arith.maximumf %28, %29 : vector<32x128xf32>
      %31 = arith.truncf %30 : vector<32x128xf32> to vector<32x128xbf16>
      %c0_21 = arith.constant 0 : index
      %c0_22 = arith.constant 0 : index
      %32 = vector.load %arg8[%c0_21, %c0_22] : memref<32x128xbf16, #tpu.memory_space<vmem>>, vector<32x128xbf16>
      tpu.vector_store %arg8[%c0_21, %c0_22], %31 {strides = array<i32>} : memref<32x128xbf16, #tpu.memory_space<vmem>>, vector<32x128xbf16>,
    } else {
    }
    return
  }
  func.func @transform_0(%arg0: i32, %arg1: i32) -> (i32, i32) {
    %c0_i32 = arith.constant 0 : i32
    return %arg0, %arg1 : i32, i32
  }
  func.func @transform_1(%arg0: i32, %arg1: i32) -> (i32, i32) {
    %c0_i32 = arith.constant 0 : i32
    %c0_i32_0 = arith.constant 0 : i32
    return %arg1, %c0_i32 : i32, i32
  }
  func.func @transform_2(%arg0: i32, %arg1: i32) -> (i32, i32) {
    %c0_i32 = arith.constant 0 : i32
    %c0_i32_0 = arith.constant 0 : i32
    return %c0_i32, %arg1 : i32, i32
  }
  func.func @transform_3(%arg0: i32, %arg1: i32) -> (i32, i32) {
    %c0_i32 = arith.constant 0 : i32
    %c0_i32_0 = arith.constant 0 : i32
    return %c0_i32, %arg1 : i32, i32
  }
  func.func @transform_4(%arg0: i32, %arg1: i32) -> (i32, i32) {
    %c0_i32 = arith.constant 0 : i32
    %c0_i32_0 = arith.constant 0 : i32
    %c0_i32_1 = arith.constant 0 : i32
    return %c0_i32, %c0_i32_0 : i32, i32
  }
  func.func @transform_5(%arg0: i32, %arg1: i32) -> (i32, i32) {
    %c0_i32 = arith.constant 0 : i32
    %c0_i32_0 = arith.constant 0 : i32
    %c0_i32_1 = arith.constant 0 : i32
    return %c0_i32, %c0_i32_0 : i32, i32
  }
  func.func @transform_6(%arg0: i32, %arg1: i32) -> (i32, i32) {
    %c0_i32 = arith.constant 0 : i32
    %c0_i32_0 = arith.constant 0 : i32
    return %arg0, %c0_i32 : i32, i32
  }
}

module attributes {stable_mosaic.version = 11 : i64} {
  func.func @kernel(%arg0: i32, %arg1: i32, %arg2: memref<32x128xbf16, #tpu.memory_space<vmem>>, %arg3: memref<128x128xbf16, #tpu.memory_space<vmem>>, %arg4: memref<1x128xf32, #tpu.memory_space<vmem>>, %arg5: memref<1x128xf32, #tpu.memory_space<vmem>>, %arg6: memref<1x128xf32, #tpu.memory_space<vmem>>, %arg7: memref<1x128xf32, #tpu.memory_space<vmem>>, %arg8: memref<32x128xbf16, #tpu.memory_space<vmem>>, %arg9: memref<32x128xf32, #tpu.memory_space<vmem>>) attributes {dimension_semantics = [#tpu.dimension_semantics<parallel>, #tpu.dimension_semantics<arbitrary>], iteration_bounds = array<i64: 1, 3>, scalar_prefetch = 0 : i64, scratch_operands = 1 : i64, tpu.core_type = #tpu.core_type<tc>, window_params = [{transform_indices = @transform_0, window_bounds = array<i64: 32, 128>}, {transform_indices = @transform_1, window_bounds = array<i64: 128, 128>}, {transform_indices = @transform_2, window_bounds = array<i64: 1, 128>}, {transform_indices = @transform_3, window_bounds = array<i64: 1, 128>}, {pipeline_mode = #tpu.pipeline_mode<synchronous>, transform_indices = @transform_4, window_bounds = array<i64: 1, 128>}, {pipeline_mode = #tpu.pipeline_mode<synchronous>, transform_indices = @transform_5, window_bounds = array<i64: 1, 128>}, {transform_indices = @transform_6, window_bounds = array<i64: 32, 128>}]} {
    %c0_i32 = arith.constant 0 : i32
    %0 = arith.cmpi eq, %arg1, %c0_i32 : i32
    %1 = arith.extui %0 : i1 to i32
    %c0_i32_0 = arith.constant 0 : i32
    %2 = arith.cmpi ne, %1, %c0_i32_0 : i32
    scf.if %2 {
      %cst_14 = arith.constant 0.000000e+00 : f32
      %22 = vector.broadcast %cst_14 : f32 to vector<32x128xf32>
      %c0_15 = arith.constant 0 : index
      %c0_16 = arith.constant 0 : index
      %23 = vector.load %arg9[%c0_15, %c0_16] : memref<32x128xf32, #tpu.memory_space<vmem>>, vector<32x128xf32>
      tpu.vector_store %arg9[%c0_15, %c0_16], %22 {strides = array<i32>} : memref<32x128xf32, #tpu.memory_space<vmem>>, vector<32x128xf32>,
    } else {
    }
    %c0 = arith.constant 0 : index
    %c0_1 = arith.constant 0 : index
    %3 = vector.load %arg2[%c0, %c0_1] : memref<32x128xbf16, #tpu.memory_space<vmem>>, vector<32x128xbf16>
    %4 = arith.extf %3 : vector<32x128xbf16> to vector<32x128xf32>
    %c0_2 = arith.constant 0 : index
    %c0_3 = arith.constant 0 : index
    %5 = vector.load %arg4[%c0_2, %c0_3] : memref<1x128xf32, #tpu.memory_space<vmem>>, vector<1x128xf32>
    %6 = vector.broadcast %5 : vector<1x128xf32> to vector<32x128xf32>
    %7 = arith.mulf %4, %6 : vector<32x128xf32>
    %c0_4 = arith.constant 0 : index
    %c0_5 = arith.constant 0 : index
    %8 = vector.load %arg5[%c0_4, %c0_5] : memref<1x128xf32, #tpu.memory_space<vmem>>, vector<1x128xf32>
    %9 = vector.broadcast %8 : vector<1x128xf32> to vector<32x128xf32>
    %10 = arith.addf %7, %9 : vector<32x128xf32>
    %cst = arith.constant 0.000000e+00 : f32
    %11 = vector.broadcast %cst : f32 to vector<32x128xf32>
    %12 = arith.maximumf %10, %11 : vector<32x128xf32>
    %13 = arith.truncf %12 : vector<32x128xf32> to vector<32x128xbf16>
    %c0_6 = arith.constant 0 : index
    %c0_7 = arith.constant 0 : index
    %14 = vector.load %arg9[%c0_6, %c0_7] : memref<32x128xf32, #tpu.memory_space<vmem>>, vector<32x128xf32>
    %c0_8 = arith.constant 0 : index
    %c0_9 = arith.constant 0 : index
    %15 = vector.load %arg3[%c0_8, %c0_9] : memref<128x128xbf16, #tpu.memory_space<vmem>>, vector<128x128xbf16>
    %cst_10 = arith.constant dense<0.000000e+00> : vector<32x128xf32>
    %16 = tpu.matmul %13, %15, %cst_10 {dimension_numbers = #tpu.dot_dimension_numbers<[1], [0], [0], [1], [0, 0, 1, 1], [], []>} : vector<32x128xbf16>, vector<128x128xbf16>, vector<32x128xf32> -> vector<32x128xf32>
    %17 = arith.addf %14, %16 : vector<32x128xf32>
    %c0_11 = arith.constant 0 : index
    %c0_12 = arith.constant 0 : index
    %18 = vector.load %arg9[%c0_11, %c0_12] : memref<32x128xf32, #tpu.memory_space<vmem>>, vector<32x128xf32>
    tpu.vector_store %arg9[%c0_11, %c0_12], %17 {strides = array<i32>} : memref<32x128xf32, #tpu.memory_space<vmem>>, vector<32x128xf32>,
    %c2_i32 = arith.constant 2 : i32
    %19 = arith.cmpi eq, %arg1, %c2_i32 : i32
    %20 = arith.extui %19 : i1 to i32
    %c0_i32_13 = arith.constant 0 : i32
    %21 = arith.cmpi ne, %20, %c0_i32_13 : i32
    scf.if %21 {
      %c0_14 = arith.constant 0 : index
      %c0_15 = arith.constant 0 : index
      %22 = vector.load %arg9[%c0_14, %c0_15] : memref<32x128xf32, #tpu.memory_space<vmem>>, vector<32x128xf32>
      %c0_16 = arith.constant 0 : index
      %c0_17 = arith.constant 0 : index
      %23 = vector.load %arg6[%c0_16, %c0_17] : memref<1x128xf32, #tpu.memory_space<vmem>>, vector<1x128xf32>
      %24 = vector.broadcast %23 : vector<1x128xf32> to vector<32x128xf32>
      %25 = arith.mulf %22, %24 : vector<32x128xf32>
      %c0_18 = arith.constant 0 : index
      %c0_19 = arith.constant 0 : index
      %26 = vector.load %arg7[%c0_18, %c0_19] : memref<1x128xf32, #tpu.memory_space<vmem>>, vector<1x128xf32>
      %27 = vector.broadcast %26 : vector<1x128xf32> to vector<32x128xf32>
      %28 = arith.addf %25, %27 : vector<32x128xf32>
      %cst_20 = arith.constant 0.000000e+00 : f32
      %29 = vector.broadcast %cst_20 : f32 to vector<32x128xf32>
      %30 = arith.maximumf %28, %29 : vector<32x128xf32>
      %31 = arith.truncf %30 : vector<32x128xf32> to vector<32x128xbf16>
      %c0_21 = arith.constant 0 : index
      %c0_22 = arith.constant 0 : index
      %32 = vector.load %arg8[%c0_21, %c0_22] : memref<32x128xbf16, #tpu.memory_space<vmem>>, vector<32x128xbf16>
      tpu.vector_store %arg8[%c0_21, %c0_22], %31 {strides = array<i32>} : memref<32x128xbf16, #tpu.memory_space<vmem>>, vector<32x128xbf16>,
    } else {
    }
    return
  }
  func.func @transform_0(%arg0: i32, %arg1: i32) -> (i32, i32) {
    %c0_i32 = arith.constant 0 : i32
    return %arg0, %arg1 : i32, i32
  }
  func.func @transform_1(%arg0: i32, %arg1: i32) -> (i32, i32) {
    %c0_i32 = arith.constant 0 : i32
    %c0_i32_0 = arith.constant 0 : i32
    return %arg1, %c0_i32 : i32, i32
  }
  func.func @transform_2(%arg0: i32, %arg1: i32) -> (i32, i32) {
    %c0_i32 = arith.constant 0 : i32
    %c0_i32_0 = arith.constant 0 : i32
    return %c0_i32, %arg1 : i32, i32
  }
  func.func @transform_3(%arg0: i32, %arg1: i32) -> (i32, i32) {
    %c0_i32 = arith.constant 0 : i32
    %c0_i32_0 = arith.constant 0 : i32
    return %c0_i32, %arg1 : i32, i32
  }
  func.func @transform_4(%arg0: i32, %arg1: i32) -> (i32, i32) {
    %c0_i32 = arith.constant 0 : i32
    %c0_i32_0 = arith.constant 0 : i32
    %c0_i32_1 = arith.constant 0 : i32
    return %c0_i32, %c0_i32_0 : i32, i32
  }
  func.func @transform_5(%arg0: i32, %arg1: i32) -> (i32, i32) {
    %c0_i32 = arith.constant 0 : i32
    %c0_i32_0 = arith.constant 0 : i32
    %c0_i32_1 = arith.constant 0 : i32
    return %c0_i32, %c0_i32_0 : i32, i32
  }
  func.func @transform_6(%arg0: i32, %arg1: i32) -> (i32, i32) {
    %c0_i32 = arith.constant 0 : i32
    %c0_i32_0 = arith.constant 0 : i32
    return %arg0, %c0_i32 : i32, i32
  }
}

module attributes {stable_mosaic.version = 11 : i64} {
  func.func @kernel(%arg0: i32, %arg1: i32, %arg2: memref<32x128xbf16, #tpu.memory_space<vmem>>, %arg3: memref<128x128xbf16, #tpu.memory_space<vmem>>, %arg4: memref<1x128xf32, #tpu.memory_space<vmem>>, %arg5: memref<1x128xf32, #tpu.memory_space<vmem>>, %arg6: memref<1x128xf32, #tpu.memory_space<vmem>>, %arg7: memref<1x128xf32, #tpu.memory_space<vmem>>, %arg8: memref<32x128xbf16, #tpu.memory_space<vmem>>, %arg9: memref<32x128xf32, #tpu.memory_space<vmem>>) attributes {dimension_semantics = [#tpu.dimension_semantics<parallel>, #tpu.dimension_semantics<arbitrary>], iteration_bounds = array<i64: 1, 4>, scalar_prefetch = 0 : i64, scratch_operands = 1 : i64, tpu.core_type = #tpu.core_type<tc>, window_params = [{transform_indices = @transform_0, window_bounds = array<i64: 32, 128>}, {transform_indices = @transform_1, window_bounds = array<i64: 128, 128>}, {transform_indices = @transform_2, window_bounds = array<i64: 1, 128>}, {transform_indices = @transform_3, window_bounds = array<i64: 1, 128>}, {pipeline_mode = #tpu.pipeline_mode<synchronous>, transform_indices = @transform_4, window_bounds = array<i64: 1, 128>}, {pipeline_mode = #tpu.pipeline_mode<synchronous>, transform_indices = @transform_5, window_bounds = array<i64: 1, 128>}, {transform_indices = @transform_6, window_bounds = array<i64: 32, 128>}]} {
    %c0_i32 = arith.constant 0 : i32
    %0 = arith.cmpi eq, %arg1, %c0_i32 : i32
    %1 = arith.extui %0 : i1 to i32
    %c0_i32_0 = arith.constant 0 : i32
    %2 = arith.cmpi ne, %1, %c0_i32_0 : i32
    scf.if %2 {
      %cst_14 = arith.constant 0.000000e+00 : f32
      %22 = vector.broadcast %cst_14 : f32 to vector<32x128xf32>
      %c0_15 = arith.constant 0 : index
      %c0_16 = arith.constant 0 : index
      %23 = vector.load %arg9[%c0_15, %c0_16] : memref<32x128xf32, #tpu.memory_space<vmem>>, vector<32x128xf32>
      tpu.vector_store %arg9[%c0_15, %c0_16], %22 {strides = array<i32>} : memref<32x128xf32, #tpu.memory_space<vmem>>, vector<32x128xf32>,
    } else {
    }
    %c0 = arith.constant 0 : index
    %c0_1 = arith.constant 0 : index
    %3 = vector.load %arg2[%c0, %c0_1] : memref<32x128xbf16, #tpu.memory_space<vmem>>, vector<32x128xbf16>
    %4 = arith.extf %3 : vector<32x128xbf16> to vector<32x128xf32>
    %c0_2 = arith.constant 0 : index
    %c0_3 = arith.constant 0 : index
    %5 = vector.load %arg4[%c0_2, %c0_3] : memref<1x128xf32, #tpu.memory_space<vmem>>, vector<1x128xf32>
    %6 = vector.broadcast %5 : vector<1x128xf32> to vector<32x128xf32>
    %7 = arith.mulf %4, %6 : vector<32x128xf32>
    %c0_4 = arith.constant 0 : index
    %c0_5 = arith.constant 0 : index
    %8 = vector.load %arg5[%c0_4, %c0_5] : memref<1x128xf32, #tpu.memory_space<vmem>>, vector<1x128xf32>
    %9 = vector.broadcast %8 : vector<1x128xf32> to vector<32x128xf32>
    %10 = arith.addf %7, %9 : vector<32x128xf32>
    %cst = arith.constant 0.000000e+00 : f32
    %11 = vector.broadcast %cst : f32 to vector<32x128xf32>
    %12 = arith.maximumf %10, %11 : vector<32x128xf32>
    %13 = arith.truncf %12 : vector<32x128xf32> to vector<32x128xbf16>
    %c0_6 = arith.constant 0 : index
    %c0_7 = arith.constant 0 : index
    %14 = vector.load %arg9[%c0_6, %c0_7] : memref<32x128xf32, #tpu.memory_space<vmem>>, vector<32x128xf32>
    %c0_8 = arith.constant 0 : index
    %c0_9 = arith.constant 0 : index
    %15 = vector.load %arg3[%c0_8, %c0_9] : memref<128x128xbf16, #tpu.memory_space<vmem>>, vector<128x128xbf16>
    %cst_10 = arith.constant dense<0.000000e+00> : vector<32x128xf32>
    %16 = tpu.matmul %13, %15, %cst_10 {dimension_numbers = #tpu.dot_dimension_numbers<[1], [0], [0], [1], [0, 0, 1, 1], [], []>} : vector<32x128xbf16>, vector<128x128xbf16>, vector<32x128xf32> -> vector<32x128xf32>
    %17 = arith.addf %14, %16 : vector<32x128xf32>
    %c0_11 = arith.constant 0 : index
    %c0_12 = arith.constant 0 : index
    %18 = vector.load %arg9[%c0_11, %c0_12] : memref<32x128xf32, #tpu.memory_space<vmem>>, vector<32x128xf32>
    tpu.vector_store %arg9[%c0_11, %c0_12], %17 {strides = array<i32>} : memref<32x128xf32, #tpu.memory_space<vmem>>, vector<32x128xf32>,
    %c3_i32 = arith.constant 3 : i32
    %19 = arith.cmpi eq, %arg1, %c3_i32 : i32
    %20 = arith.extui %19 : i1 to i32
    %c0_i32_13 = arith.constant 0 : i32
    %21 = arith.cmpi ne, %20, %c0_i32_13 : i32
    scf.if %21 {
      %c0_14 = arith.constant 0 : index
      %c0_15 = arith.constant 0 : index
      %22 = vector.load %arg9[%c0_14, %c0_15] : memref<32x128xf32, #tpu.memory_space<vmem>>, vector<32x128xf32>
      %c0_16 = arith.constant 0 : index
      %c0_17 = arith.constant 0 : index
      %23 = vector.load %arg6[%c0_16, %c0_17] : memref<1x128xf32, #tpu.memory_space<vmem>>, vector<1x128xf32>
      %24 = vector.broadcast %23 : vector<1x128xf32> to vector<32x128xf32>
      %25 = arith.mulf %22, %24 : vector<32x128xf32>
      %c0_18 = arith.constant 0 : index
      %c0_19 = arith.constant 0 : index
      %26 = vector.load %arg7[%c0_18, %c0_19] : memref<1x128xf32, #tpu.memory_space<vmem>>, vector<1x128xf32>
      %27 = vector.broadcast %26 : vector<1x128xf32> to vector<32x128xf32>
      %28 = arith.addf %25, %27 : vector<32x128xf32>
      %cst_20 = arith.constant 0.000000e+00 : f32
      %29 = vector.broadcast %cst_20 : f32 to vector<32x128xf32>
      %30 = arith.maximumf %28, %29 : vector<32x128xf32>
      %31 = arith.truncf %30 : vector<32x128xf32> to vector<32x128xbf16>
      %c0_21 = arith.constant 0 : index
      %c0_22 = arith.constant 0 : index
      %32 = vector.load %arg8[%c0_21, %c0_22] : memref<32x128xbf16, #tpu.memory_space<vmem>>, vector<32x128xbf16>
      tpu.vector_store %arg8[%c0_21, %c0_22], %31 {strides = array<i32>} : memref<32x128xbf16, #tpu.memory_space<vmem>>, vector<32x128xbf16>,
    } else {
    }
    return
  }
  func.func @transform_0(%arg0: i32, %arg1: i32) -> (i32, i32) {
    %c0_i32 = arith.constant 0 : i32
    return %arg0, %arg1 : i32, i32
  }
  func.func @transform_1(%arg0: i32, %arg1: i32) -> (i32, i32) {
    %c0_i32 = arith.constant 0 : i32
    %c0_i32_0 = arith.constant 0 : i32
    return %arg1, %c0_i32 : i32, i32
  }
  func.func @transform_2(%arg0: i32, %arg1: i32) -> (i32, i32) {
    %c0_i32 = arith.constant 0 : i32
    %c0_i32_0 = arith.constant 0 : i32
    return %c0_i32, %arg1 : i32, i32
  }
  func.func @transform_3(%arg0: i32, %arg1: i32) -> (i32, i32) {
    %c0_i32 = arith.constant 0 : i32
    %c0_i32_0 = arith.constant 0 : i32
    return %c0_i32, %arg1 : i32, i32
  }
  func.func @transform_4(%arg0: i32, %arg1: i32) -> (i32, i32) {
    %c0_i32 = arith.constant 0 : i32
    %c0_i32_0 = arith.constant 0 : i32
    %c0_i32_1 = arith.constant 0 : i32
    return %c0_i32, %c0_i32_0 : i32, i32
  }
  func.func @transform_5(%arg0: i32, %arg1: i32) -> (i32, i32) {
    %c0_i32 = arith.constant 0 : i32
    %c0_i32_0 = arith.constant 0 : i32
    %c0_i32_1 = arith.constant 0 : i32
    return %c0_i32, %c0_i32_0 : i32, i32
  }
  func.func @transform_6(%arg0: i32, %arg1: i32) -> (i32, i32) {
    %c0_i32 = arith.constant 0 : i32
    %c0_i32_0 = arith.constant 0 : i32
    return %arg0, %c0_i32 : i32, i32
  }
}

module attributes {stable_mosaic.version = 11 : i64} {
  func.func @kernel(%arg0: i32, %arg1: i32, %arg2: memref<32x128xbf16, #tpu.memory_space<vmem>>, %arg3: memref<128x256xbf16, #tpu.memory_space<vmem>>, %arg4: memref<1x128xf32, #tpu.memory_space<vmem>>, %arg5: memref<1x128xf32, #tpu.memory_space<vmem>>, %arg6: memref<32x256xbf16, #tpu.memory_space<vmem>>, %arg7: memref<32x256xf32, #tpu.memory_space<vmem>>) attributes {dimension_semantics = [#tpu.dimension_semantics<parallel>, #tpu.dimension_semantics<arbitrary>], iteration_bounds = array<i64: 1, 4>, scalar_prefetch = 0 : i64, scratch_operands = 1 : i64, tpu.core_type = #tpu.core_type<tc>, window_params = [{transform_indices = @transform_0, window_bounds = array<i64: 32, 128>}, {transform_indices = @transform_1, window_bounds = array<i64: 128, 256>}, {transform_indices = @transform_2, window_bounds = array<i64: 1, 128>}, {transform_indices = @transform_3, window_bounds = array<i64: 1, 128>}, {transform_indices = @transform_4, window_bounds = array<i64: 32, 256>}]} {
    %c0_i32 = arith.constant 0 : i32
    %0 = arith.cmpi eq, %arg1, %c0_i32 : i32
    %1 = arith.extui %0 : i1 to i32
    %c0_i32_0 = arith.constant 0 : i32
    %2 = arith.cmpi ne, %1, %c0_i32_0 : i32
    scf.if %2 {
      %cst_14 = arith.constant 0.000000e+00 : f32
      %22 = vector.broadcast %cst_14 : f32 to vector<32x256xf32>
      %c0_15 = arith.constant 0 : index
      %c0_16 = arith.constant 0 : index
      %23 = vector.load %arg7[%c0_15, %c0_16] : memref<32x256xf32, #tpu.memory_space<vmem>>, vector<32x256xf32>
      tpu.vector_store %arg7[%c0_15, %c0_16], %22 {strides = array<i32>} : memref<32x256xf32, #tpu.memory_space<vmem>>, vector<32x256xf32>,
    } else {
    }
    %c0 = arith.constant 0 : index
    %c0_1 = arith.constant 0 : index
    %3 = vector.load %arg2[%c0, %c0_1] : memref<32x128xbf16, #tpu.memory_space<vmem>>, vector<32x128xbf16>
    %4 = arith.extf %3 : vector<32x128xbf16> to vector<32x128xf32>
    %c0_2 = arith.constant 0 : index
    %c0_3 = arith.constant 0 : index
    %5 = vector.load %arg4[%c0_2, %c0_3] : memref<1x128xf32, #tpu.memory_space<vmem>>, vector<1x128xf32>
    %6 = vector.broadcast %5 : vector<1x128xf32> to vector<32x128xf32>
    %7 = arith.mulf %4, %6 : vector<32x128xf32>
    %c0_4 = arith.constant 0 : index
    %c0_5 = arith.constant 0 : index
    %8 = vector.load %arg5[%c0_4, %c0_5] : memref<1x128xf32, #tpu.memory_space<vmem>>, vector<1x128xf32>
    %9 = vector.broadcast %8 : vector<1x128xf32> to vector<32x128xf32>
    %10 = arith.addf %7, %9 : vector<32x128xf32>
    %cst = arith.constant 0.000000e+00 : f32
    %11 = vector.broadcast %cst : f32 to vector<32x128xf32>
    %12 = arith.maximumf %10, %11 : vector<32x128xf32>
    %13 = arith.truncf %12 : vector<32x128xf32> to vector<32x128xbf16>
    %c0_6 = arith.constant 0 : index
    %c0_7 = arith.constant 0 : index
    %14 = vector.load %arg7[%c0_6, %c0_7] : memref<32x256xf32, #tpu.memory_space<vmem>>, vector<32x256xf32>
    %c0_8 = arith.constant 0 : index
    %c0_9 = arith.constant 0 : index
    %15 = vector.load %arg3[%c0_8, %c0_9] : memref<128x256xbf16, #tpu.memory_space<vmem>>, vector<128x256xbf16>
    %cst_10 = arith.constant dense<0.000000e+00> : vector<32x256xf32>
    %16 = tpu.matmul %13, %15, %cst_10 {dimension_numbers = #tpu.dot_dimension_numbers<[1], [0], [0], [1], [0, 0, 1, 1], [], []>} : vector<32x128xbf16>, vector<128x256xbf16>, vector<32x256xf32> -> vector<32x256xf32>
    %17 = arith.addf %14, %16 : vector<32x256xf32>
    %c0_11 = arith.constant 0 : index
    %c0_12 = arith.constant 0 : index
    %18 = vector.load %arg7[%c0_11, %c0_12] : memref<32x256xf32, #tpu.memory_space<vmem>>, vector<32x256xf32>
    tpu.vector_store %arg7[%c0_11, %c0_12], %17 {strides = array<i32>} : memref<32x256xf32, #tpu.memory_space<vmem>>, vector<32x256xf32>,
    %c3_i32 = arith.constant 3 : i32
    %19 = arith.cmpi eq, %arg1, %c3_i32 : i32
    %20 = arith.extui %19 : i1 to i32
    %c0_i32_13 = arith.constant 0 : i32
    %21 = arith.cmpi ne, %20, %c0_i32_13 : i32
    scf.if %21 {
      %c0_14 = arith.constant 0 : index
      %c0_15 = arith.constant 0 : index
      %22 = vector.load %arg7[%c0_14, %c0_15] : memref<32x256xf32, #tpu.memory_space<vmem>>, vector<32x256xf32>
      %23 = arith.truncf %22 : vector<32x256xf32> to vector<32x256xbf16>
      %c0_16 = arith.constant 0 : index
      %c0_17 = arith.constant 0 : index
      %24 = vector.load %arg6[%c0_16, %c0_17] : memref<32x256xbf16, #tpu.memory_space<vmem>>, vector<32x256xbf16>
      tpu.vector_store %arg6[%c0_16, %c0_17], %23 {strides = array<i32>} : memref<32x256xbf16, #tpu.memory_space<vmem>>, vector<32x256xbf16>,
    } else {
    }
    return
  }
  func.func @transform_0(%arg0: i32, %arg1: i32) -> (i32, i32) {
    %c0_i32 = arith.constant 0 : i32
    return %arg0, %arg1 : i32, i32
  }
  func.func @transform_1(%arg0: i32, %arg1: i32) -> (i32, i32) {
    %c0_i32 = arith.constant 0 : i32
    %c0_i32_0 = arith.constant 0 : i32
    return %arg1, %c0_i32 : i32, i32
  }
  func.func @transform_2(%arg0: i32, %arg1: i32) -> (i32, i32) {
    %c0_i32 = arith.constant 0 : i32
    %c0_i32_0 = arith.constant 0 : i32
    return %c0_i32, %arg1 : i32, i32
  }
  func.func @transform_3(%arg0: i32, %arg1: i32) -> (i32, i32) {
    %c0_i32 = arith.constant 0 : i32
    %c0_i32_0 = arith.constant 0 : i32
    return %c0_i32, %arg1 : i32, i32
  }
  func.func @transform_4(%arg0: i32, %arg1: i32) -> (i32, i32) {
    %c0_i32 = arith.constant 0 : i32
    %c0_i32_0 = arith.constant 0 : i32
    return %arg0, %c0_i32 : i32, i32
  }
}

module attributes {stable_mosaic.version = 11 : i64} {
  func.func @kernel(%arg0: i32, %arg1: i32, %arg2: memref<16x128xbf16, #tpu.memory_space<vmem>>, %arg3: memref<128x128xbf16, #tpu.memory_space<vmem>>, %arg4: memref<1x128xf32, #tpu.memory_space<vmem>>, %arg5: memref<1x128xf32, #tpu.memory_space<vmem>>, %arg6: memref<1x128xf32, #tpu.memory_space<vmem>>, %arg7: memref<1x128xf32, #tpu.memory_space<vmem>>, %arg8: memref<16x128xbf16, #tpu.memory_space<vmem>>, %arg9: memref<16x128xf32, #tpu.memory_space<vmem>>) attributes {dimension_semantics = [#tpu.dimension_semantics<parallel>, #tpu.dimension_semantics<arbitrary>], iteration_bounds = array<i64: 1, 2>, scalar_prefetch = 0 : i64, scratch_operands = 1 : i64, tpu.core_type = #tpu.core_type<tc>, window_params = [{transform_indices = @transform_0, window_bounds = array<i64: 16, 128>}, {transform_indices = @transform_1, window_bounds = array<i64: 128, 128>}, {transform_indices = @transform_2, window_bounds = array<i64: 1, 128>}, {transform_indices = @transform_3, window_bounds = array<i64: 1, 128>}, {pipeline_mode = #tpu.pipeline_mode<synchronous>, transform_indices = @transform_4, window_bounds = array<i64: 1, 128>}, {pipeline_mode = #tpu.pipeline_mode<synchronous>, transform_indices = @transform_5, window_bounds = array<i64: 1, 128>}, {transform_indices = @transform_6, window_bounds = array<i64: 16, 128>}]} {
    %c0_i32 = arith.constant 0 : i32
    %0 = arith.cmpi eq, %arg1, %c0_i32 : i32
    %1 = arith.extui %0 : i1 to i32
    %c0_i32_0 = arith.constant 0 : i32
    %2 = arith.cmpi ne, %1, %c0_i32_0 : i32
    scf.if %2 {
      %cst_14 = arith.constant 0.000000e+00 : f32
      %22 = vector.broadcast %cst_14 : f32 to vector<16x128xf32>
      %c0_15 = arith.constant 0 : index
      %c0_16 = arith.constant 0 : index
      %23 = vector.load %arg9[%c0_15, %c0_16] : memref<16x128xf32, #tpu.memory_space<vmem>>, vector<16x128xf32>
      tpu.vector_store %arg9[%c0_15, %c0_16], %22 {strides = array<i32>} : memref<16x128xf32, #tpu.memory_space<vmem>>, vector<16x128xf32>,
    } else {
    }
    %c0 = arith.constant 0 : index
    %c0_1 = arith.constant 0 : index
    %3 = vector.load %arg2[%c0, %c0_1] : memref<16x128xbf16, #tpu.memory_space<vmem>>, vector<16x128xbf16>
    %4 = arith.extf %3 : vector<16x128xbf16> to vector<16x128xf32>
    %c0_2 = arith.constant 0 : index
    %c0_3 = arith.constant 0 : index
    %5 = vector.load %arg4[%c0_2, %c0_3] : memref<1x128xf32, #tpu.memory_space<vmem>>, vector<1x128xf32>
    %6 = vector.broadcast %5 : vector<1x128xf32> to vector<16x128xf32>
    %7 = arith.mulf %4, %6 : vector<16x128xf32>
    %c0_4 = arith.constant 0 : index
    %c0_5 = arith.constant 0 : index
    %8 = vector.load %arg5[%c0_4, %c0_5] : memref<1x128xf32, #tpu.memory_space<vmem>>, vector<1x128xf32>
    %9 = vector.broadcast %8 : vector<1x128xf32> to vector<16x128xf32>
    %10 = arith.addf %7, %9 : vector<16x128xf32>
    %cst = arith.constant 0.000000e+00 : f32
    %11 = vector.broadcast %cst : f32 to vector<16x128xf32>
    %12 = arith.maximumf %10, %11 : vector<16x128xf32>
    %13 = arith.truncf %12 : vector<16x128xf32> to vector<16x128xbf16>
    %c0_6 = arith.constant 0 : index
    %c0_7 = arith.constant 0 : index
    %14 = vector.load %arg9[%c0_6, %c0_7] : memref<16x128xf32, #tpu.memory_space<vmem>>, vector<16x128xf32>
    %c0_8 = arith.constant 0 : index
    %c0_9 = arith.constant 0 : index
    %15 = vector.load %arg3[%c0_8, %c0_9] : memref<128x128xbf16, #tpu.memory_space<vmem>>, vector<128x128xbf16>
    %cst_10 = arith.constant dense<0.000000e+00> : vector<16x128xf32>
    %16 = tpu.matmul %13, %15, %cst_10 {dimension_numbers = #tpu.dot_dimension_numbers<[1], [0], [0], [1], [0, 0, 1, 1], [], []>} : vector<16x128xbf16>, vector<128x128xbf16>, vector<16x128xf32> -> vector<16x128xf32>
    %17 = arith.addf %14, %16 : vector<16x128xf32>
    %c0_11 = arith.constant 0 : index
    %c0_12 = arith.constant 0 : index
    %18 = vector.load %arg9[%c0_11, %c0_12] : memref<16x128xf32, #tpu.memory_space<vmem>>, vector<16x128xf32>
    tpu.vector_store %arg9[%c0_11, %c0_12], %17 {strides = array<i32>} : memref<16x128xf32, #tpu.memory_space<vmem>>, vector<16x128xf32>,
    %c1_i32 = arith.constant 1 : i32
    %19 = arith.cmpi eq, %arg1, %c1_i32 : i32
    %20 = arith.extui %19 : i1 to i32
    %c0_i32_13 = arith.constant 0 : i32
    %21 = arith.cmpi ne, %20, %c0_i32_13 : i32
    scf.if %21 {
      %c0_14 = arith.constant 0 : index
      %c0_15 = arith.constant 0 : index
      %22 = vector.load %arg9[%c0_14, %c0_15] : memref<16x128xf32, #tpu.memory_space<vmem>>, vector<16x128xf32>
      %c0_16 = arith.constant 0 : index
      %c0_17 = arith.constant 0 : index
      %23 = vector.load %arg6[%c0_16, %c0_17] : memref<1x128xf32, #tpu.memory_space<vmem>>, vector<1x128xf32>
      %24 = vector.broadcast %23 : vector<1x128xf32> to vector<16x128xf32>
      %25 = arith.mulf %22, %24 : vector<16x128xf32>
      %c0_18 = arith.constant 0 : index
      %c0_19 = arith.constant 0 : index
      %26 = vector.load %arg7[%c0_18, %c0_19] : memref<1x128xf32, #tpu.memory_space<vmem>>, vector<1x128xf32>
      %27 = vector.broadcast %26 : vector<1x128xf32> to vector<16x128xf32>
      %28 = arith.addf %25, %27 : vector<16x128xf32>
      %cst_20 = arith.constant 0.000000e+00 : f32
      %29 = vector.broadcast %cst_20 : f32 to vector<16x128xf32>
      %30 = arith.maximumf %28, %29 : vector<16x128xf32>
      %31 = arith.truncf %30 : vector<16x128xf32> to vector<16x128xbf16>
      %c0_21 = arith.constant 0 : index
      %c0_22 = arith.constant 0 : index
      %32 = vector.load %arg8[%c0_21, %c0_22] : memref<16x128xbf16, #tpu.memory_space<vmem>>, vector<16x128xbf16>
      tpu.vector_store %arg8[%c0_21, %c0_22], %31 {strides = array<i32>} : memref<16x128xbf16, #tpu.memory_space<vmem>>, vector<16x128xbf16>,
    } else {
    }
    return
  }
  func.func @transform_0(%arg0: i32, %arg1: i32) -> (i32, i32) {
    %c0_i32 = arith.constant 0 : i32
    return %arg0, %arg1 : i32, i32
  }
  func.func @transform_1(%arg0: i32, %arg1: i32) -> (i32, i32) {
    %c0_i32 = arith.constant 0 : i32
    %c0_i32_0 = arith.constant 0 : i32
    return %arg1, %c0_i32 : i32, i32
  }
  func.func @transform_2(%arg0: i32, %arg1: i32) -> (i32, i32) {
    %c0_i32 = arith.constant 0 : i32
    %c0_i32_0 = arith.constant 0 : i32
    return %c0_i32, %arg1 : i32, i32
  }
  func.func @transform_3(%arg0: i32, %arg1: i32) -> (i32, i32) {
    %c0_i32 = arith.constant 0 : i32
    %c0_i32_0 = arith.constant 0 : i32
    return %c0_i32, %arg1 : i32, i32
  }
  func.func @transform_4(%arg0: i32, %arg1: i32) -> (i32, i32) {
    %c0_i32 = arith.constant 0 : i32
    %c0_i32_0 = arith.constant 0 : i32
    %c0_i32_1 = arith.constant 0 : i32
    return %c0_i32, %c0_i32_0 : i32, i32
  }
  func.func @transform_5(%arg0: i32, %arg1: i32) -> (i32, i32) {
    %c0_i32 = arith.constant 0 : i32
    %c0_i32_0 = arith.constant 0 : i32
    %c0_i32_1 = arith.constant 0 : i32
    return %c0_i32, %c0_i32_0 : i32, i32
  }
  func.func @transform_6(%arg0: i32, %arg1: i32) -> (i32, i32) {
    %c0_i32 = arith.constant 0 : i32
    %c0_i32_0 = arith.constant 0 : i32
    return %arg0, %c0_i32 : i32, i32
  }
}

module attributes {stable_mosaic.version = 11 : i64} {
  func.func @kernel(%arg0: i32, %arg1: i32, %arg2: memref<16x128xbf16, #tpu.memory_space<vmem>>, %arg3: memref<128x128xbf16, #tpu.memory_space<vmem>>, %arg4: memref<16x128xbf16, #tpu.memory_space<vmem>>, %arg5: memref<16x128xf32, #tpu.memory_space<vmem>>) attributes {dimension_semantics = [#tpu.dimension_semantics<parallel>, #tpu.dimension_semantics<arbitrary>], iteration_bounds = array<i64: 1, 9>, scalar_prefetch = 0 : i64, scratch_operands = 1 : i64, tpu.core_type = #tpu.core_type<tc>, window_params = [{transform_indices = @transform_0, window_bounds = array<i64: 16, 128>}, {transform_indices = @transform_1, window_bounds = array<i64: 128, 128>}, {transform_indices = @transform_2, window_bounds = array<i64: 16, 128>}]} {
    %c0_i32 = arith.constant 0 : i32
    %0 = arith.cmpi eq, %arg1, %c0_i32 : i32
    %1 = arith.extui %0 : i1 to i32
    %c0_i32_0 = arith.constant 0 : i32
    %2 = arith.cmpi ne, %1, %c0_i32_0 : i32
    scf.if %2 {
      %cst_9 = arith.constant 0.000000e+00 : f32
      %12 = vector.broadcast %cst_9 : f32 to vector<16x128xf32>
      %c0_10 = arith.constant 0 : index
      %c0_11 = arith.constant 0 : index
      %13 = vector.load %arg5[%c0_10, %c0_11] : memref<16x128xf32, #tpu.memory_space<vmem>>, vector<16x128xf32>
      tpu.vector_store %arg5[%c0_10, %c0_11], %12 {strides = array<i32>} : memref<16x128xf32, #tpu.memory_space<vmem>>, vector<16x128xf32>,
    } else {
    }
    %c0 = arith.constant 0 : index
    %c0_1 = arith.constant 0 : index
    %3 = vector.load %arg2[%c0, %c0_1] : memref<16x128xbf16, #tpu.memory_space<vmem>>, vector<16x128xbf16>
    %c0_2 = arith.constant 0 : index
    %c0_3 = arith.constant 0 : index
    %4 = vector.load %arg5[%c0_2, %c0_3] : memref<16x128xf32, #tpu.memory_space<vmem>>, vector<16x128xf32>
    %c0_4 = arith.constant 0 : index
    %c0_5 = arith.constant 0 : index
    %5 = vector.load %arg3[%c0_4, %c0_5] : memref<128x128xbf16, #tpu.memory_space<vmem>>, vector<128x128xbf16>
    %cst = arith.constant dense<0.000000e+00> : vector<16x128xf32>
    %6 = tpu.matmul %3, %5, %cst {dimension_numbers = #tpu.dot_dimension_numbers<[1], [0], [0], [1], [0, 0, 1, 1], [], []>} : vector<16x128xbf16>, vector<128x128xbf16>, vector<16x128xf32> -> vector<16x128xf32>
    %7 = arith.addf %4, %6 : vector<16x128xf32>
    %c0_6 = arith.constant 0 : index
    %c0_7 = arith.constant 0 : index
    %8 = vector.load %arg5[%c0_6, %c0_7] : memref<16x128xf32, #tpu.memory_space<vmem>>, vector<16x128xf32>
    tpu.vector_store %arg5[%c0_6, %c0_7], %7 {strides = array<i32>} : memref<16x128xf32, #tpu.memory_space<vmem>>, vector<16x128xf32>,
    %c8_i32 = arith.constant 8 : i32
    %9 = arith.cmpi eq, %arg1, %c8_i32 : i32
    %10 = arith.extui %9 : i1 to i32
    %c0_i32_8 = arith.constant 0 : i32
    %11 = arith.cmpi ne, %10, %c0_i32_8 : i32
    scf.if %11 {
      %c0_9 = arith.constant 0 : index
      %c0_10 = arith.constant 0 : index
      %12 = vector.load %arg5[%c0_9, %c0_10] : memref<16x128xf32, #tpu.memory_space<vmem>>, vector<16x128xf32>
      %13 = arith.truncf %12 : vector<16x128xf32> to vector<16x128xbf16>
      %c0_11 = arith.constant 0 : index
      %c0_12 = arith.constant 0 : index
      %14 = vector.load %arg4[%c0_11, %c0_12] : memref<16x128xbf16, #tpu.memory_space<vmem>>, vector<16x128xbf16>
      tpu.vector_store %arg4[%c0_11, %c0_12], %13 {strides = array<i32>} : memref<16x128xbf16, #tpu.memory_space<vmem>>, vector<16x128xbf16>,
    } else {
    }
    return
  }
  func.func @transform_0(%arg0: i32, %arg1: i32) -> (i32, i32) {
    %c0_i32 = arith.constant 0 : i32
    return %arg0, %arg1 : i32, i32
  }
  func.func @transform_1(%arg0: i32, %arg1: i32) -> (i32, i32) {
    %c0_i32 = arith.constant 0 : i32
    %c0_i32_0 = arith.constant 0 : i32
    return %arg1, %c0_i32 : i32, i32
  }
  func.func @transform_2(%arg0: i32, %arg1: i32) -> (i32, i32) {
    %c0_i32 = arith.constant 0 : i32
    %c0_i32_0 = arith.constant 0 : i32
    return %arg0, %c0_i32 : i32, i32
  }
}

module attributes {stable_mosaic.version = 11 : i64} {
  func.func @kernel(%arg0: i32, %arg1: i32, %arg2: memref<16x128xbf16, #tpu.memory_space<vmem>>, %arg3: memref<128x128xbf16, #tpu.memory_space<vmem>>, %arg4: memref<1x128xf32, #tpu.memory_space<vmem>>, %arg5: memref<1x128xf32, #tpu.memory_space<vmem>>, %arg6: memref<1x128xf32, #tpu.memory_space<vmem>>, %arg7: memref<1x128xf32, #tpu.memory_space<vmem>>, %arg8: memref<16x128xbf16, #tpu.memory_space<vmem>>, %arg9: memref<16x128xf32, #tpu.memory_space<vmem>>) attributes {dimension_semantics = [#tpu.dimension_semantics<parallel>, #tpu.dimension_semantics<arbitrary>], iteration_bounds = array<i64: 1, 3>, scalar_prefetch = 0 : i64, scratch_operands = 1 : i64, tpu.core_type = #tpu.core_type<tc>, window_params = [{transform_indices = @transform_0, window_bounds = array<i64: 16, 128>}, {transform_indices = @transform_1, window_bounds = array<i64: 128, 128>}, {transform_indices = @transform_2, window_bounds = array<i64: 1, 128>}, {transform_indices = @transform_3, window_bounds = array<i64: 1, 128>}, {pipeline_mode = #tpu.pipeline_mode<synchronous>, transform_indices = @transform_4, window_bounds = array<i64: 1, 128>}, {pipeline_mode = #tpu.pipeline_mode<synchronous>, transform_indices = @transform_5, window_bounds = array<i64: 1, 128>}, {transform_indices = @transform_6, window_bounds = array<i64: 16, 128>}]} {
    %c0_i32 = arith.constant 0 : i32
    %0 = arith.cmpi eq, %arg1, %c0_i32 : i32
    %1 = arith.extui %0 : i1 to i32
    %c0_i32_0 = arith.constant 0 : i32
    %2 = arith.cmpi ne, %1, %c0_i32_0 : i32
    scf.if %2 {
      %cst_14 = arith.constant 0.000000e+00 : f32
      %22 = vector.broadcast %cst_14 : f32 to vector<16x128xf32>
      %c0_15 = arith.constant 0 : index
      %c0_16 = arith.constant 0 : index
      %23 = vector.load %arg9[%c0_15, %c0_16] : memref<16x128xf32, #tpu.memory_space<vmem>>, vector<16x128xf32>
      tpu.vector_store %arg9[%c0_15, %c0_16], %22 {strides = array<i32>} : memref<16x128xf32, #tpu.memory_space<vmem>>, vector<16x128xf32>,
    } else {
    }
    %c0 = arith.constant 0 : index
    %c0_1 = arith.constant 0 : index
    %3 = vector.load %arg2[%c0, %c0_1] : memref<16x128xbf16, #tpu.memory_space<vmem>>, vector<16x128xbf16>
    %4 = arith.extf %3 : vector<16x128xbf16> to vector<16x128xf32>
    %c0_2 = arith.constant 0 : index
    %c0_3 = arith.constant 0 : index
    %5 = vector.load %arg4[%c0_2, %c0_3] : memref<1x128xf32, #tpu.memory_space<vmem>>, vector<1x128xf32>
    %6 = vector.broadcast %5 : vector<1x128xf32> to vector<16x128xf32>
    %7 = arith.mulf %4, %6 : vector<16x128xf32>
    %c0_4 = arith.constant 0 : index
    %c0_5 = arith.constant 0 : index
    %8 = vector.load %arg5[%c0_4, %c0_5] : memref<1x128xf32, #tpu.memory_space<vmem>>, vector<1x128xf32>
    %9 = vector.broadcast %8 : vector<1x128xf32> to vector<16x128xf32>
    %10 = arith.addf %7, %9 : vector<16x128xf32>
    %cst = arith.constant 0.000000e+00 : f32
    %11 = vector.broadcast %cst : f32 to vector<16x128xf32>
    %12 = arith.maximumf %10, %11 : vector<16x128xf32>
    %13 = arith.truncf %12 : vector<16x128xf32> to vector<16x128xbf16>
    %c0_6 = arith.constant 0 : index
    %c0_7 = arith.constant 0 : index
    %14 = vector.load %arg9[%c0_6, %c0_7] : memref<16x128xf32, #tpu.memory_space<vmem>>, vector<16x128xf32>
    %c0_8 = arith.constant 0 : index
    %c0_9 = arith.constant 0 : index
    %15 = vector.load %arg3[%c0_8, %c0_9] : memref<128x128xbf16, #tpu.memory_space<vmem>>, vector<128x128xbf16>
    %cst_10 = arith.constant dense<0.000000e+00> : vector<16x128xf32>
    %16 = tpu.matmul %13, %15, %cst_10 {dimension_numbers = #tpu.dot_dimension_numbers<[1], [0], [0], [1], [0, 0, 1, 1], [], []>} : vector<16x128xbf16>, vector<128x128xbf16>, vector<16x128xf32> -> vector<16x128xf32>
    %17 = arith.addf %14, %16 : vector<16x128xf32>
    %c0_11 = arith.constant 0 : index
    %c0_12 = arith.constant 0 : index
    %18 = vector.load %arg9[%c0_11, %c0_12] : memref<16x128xf32, #tpu.memory_space<vmem>>, vector<16x128xf32>
    tpu.vector_store %arg9[%c0_11, %c0_12], %17 {strides = array<i32>} : memref<16x128xf32, #tpu.memory_space<vmem>>, vector<16x128xf32>,
    %c2_i32 = arith.constant 2 : i32
    %19 = arith.cmpi eq, %arg1, %c2_i32 : i32
    %20 = arith.extui %19 : i1 to i32
    %c0_i32_13 = arith.constant 0 : i32
    %21 = arith.cmpi ne, %20, %c0_i32_13 : i32
    scf.if %21 {
      %c0_14 = arith.constant 0 : index
      %c0_15 = arith.constant 0 : index
      %22 = vector.load %arg9[%c0_14, %c0_15] : memref<16x128xf32, #tpu.memory_space<vmem>>, vector<16x128xf32>
      %c0_16 = arith.constant 0 : index
      %c0_17 = arith.constant 0 : index
      %23 = vector.load %arg6[%c0_16, %c0_17] : memref<1x128xf32, #tpu.memory_space<vmem>>, vector<1x128xf32>
      %24 = vector.broadcast %23 : vector<1x128xf32> to vector<16x128xf32>
      %25 = arith.mulf %22, %24 : vector<16x128xf32>
      %c0_18 = arith.constant 0 : index
      %c0_19 = arith.constant 0 : index
      %26 = vector.load %arg7[%c0_18, %c0_19] : memref<1x128xf32, #tpu.memory_space<vmem>>, vector<1x128xf32>
      %27 = vector.broadcast %26 : vector<1x128xf32> to vector<16x128xf32>
      %28 = arith.addf %25, %27 : vector<16x128xf32>
      %cst_20 = arith.constant 0.000000e+00 : f32
      %29 = vector.broadcast %cst_20 : f32 to vector<16x128xf32>
      %30 = arith.maximumf %28, %29 : vector<16x128xf32>
      %31 = arith.truncf %30 : vector<16x128xf32> to vector<16x128xbf16>
      %c0_21 = arith.constant 0 : index
      %c0_22 = arith.constant 0 : index
      %32 = vector.load %arg8[%c0_21, %c0_22] : memref<16x128xbf16, #tpu.memory_space<vmem>>, vector<16x128xbf16>
      tpu.vector_store %arg8[%c0_21, %c0_22], %31 {strides = array<i32>} : memref<16x128xbf16, #tpu.memory_space<vmem>>, vector<16x128xbf16>,
    } else {
    }
    return
  }
  func.func @transform_0(%arg0: i32, %arg1: i32) -> (i32, i32) {
    %c0_i32 = arith.constant 0 : i32
    return %arg0, %arg1 : i32, i32
  }
  func.func @transform_1(%arg0: i32, %arg1: i32) -> (i32, i32) {
    %c0_i32 = arith.constant 0 : i32
    %c0_i32_0 = arith.constant 0 : i32
    return %arg1, %c0_i32 : i32, i32
  }
  func.func @transform_2(%arg0: i32, %arg1: i32) -> (i32, i32) {
    %c0_i32 = arith.constant 0 : i32
    %c0_i32_0 = arith.constant 0 : i32
    return %c0_i32, %arg1 : i32, i32
  }
  func.func @transform_3(%arg0: i32, %arg1: i32) -> (i32, i32) {
    %c0_i32 = arith.constant 0 : i32
    %c0_i32_0 = arith.constant 0 : i32
    return %c0_i32, %arg1 : i32, i32
  }
  func.func @transform_4(%arg0: i32, %arg1: i32) -> (i32, i32) {
    %c0_i32 = arith.constant 0 : i32
    %c0_i32_0 = arith.constant 0 : i32
    %c0_i32_1 = arith.constant 0 : i32
    return %c0_i32, %c0_i32_0 : i32, i32
  }
  func.func @transform_5(%arg0: i32, %arg1: i32) -> (i32, i32) {
    %c0_i32 = arith.constant 0 : i32
    %c0_i32_0 = arith.constant 0 : i32
    %c0_i32_1 = arith.constant 0 : i32
    return %c0_i32, %c0_i32_0 : i32, i32
  }
  func.func @transform_6(%arg0: i32, %arg1: i32) -> (i32, i32) {
    %c0_i32 = arith.constant 0 : i32
    %c0_i32_0 = arith.constant 0 : i32
    return %arg0, %c0_i32 : i32, i32
  }
}

module attributes {stable_mosaic.version = 11 : i64} {
  func.func @kernel(%arg0: i32, %arg1: i32, %arg2: memref<16x128xbf16, #tpu.memory_space<vmem>>, %arg3: memref<128x128xbf16, #tpu.memory_space<vmem>>, %arg4: memref<1x128xf32, #tpu.memory_space<vmem>>, %arg5: memref<1x128xf32, #tpu.memory_space<vmem>>, %arg6: memref<1x128xf32, #tpu.memory_space<vmem>>, %arg7: memref<1x128xf32, #tpu.memory_space<vmem>>, %arg8: memref<16x128xbf16, #tpu.memory_space<vmem>>, %arg9: memref<16x128xf32, #tpu.memory_space<vmem>>) attributes {dimension_semantics = [#tpu.dimension_semantics<parallel>, #tpu.dimension_semantics<arbitrary>], iteration_bounds = array<i64: 1, 4>, scalar_prefetch = 0 : i64, scratch_operands = 1 : i64, tpu.core_type = #tpu.core_type<tc>, window_params = [{transform_indices = @transform_0, window_bounds = array<i64: 16, 128>}, {transform_indices = @transform_1, window_bounds = array<i64: 128, 128>}, {transform_indices = @transform_2, window_bounds = array<i64: 1, 128>}, {transform_indices = @transform_3, window_bounds = array<i64: 1, 128>}, {pipeline_mode = #tpu.pipeline_mode<synchronous>, transform_indices = @transform_4, window_bounds = array<i64: 1, 128>}, {pipeline_mode = #tpu.pipeline_mode<synchronous>, transform_indices = @transform_5, window_bounds = array<i64: 1, 128>}, {transform_indices = @transform_6, window_bounds = array<i64: 16, 128>}]} {
    %c0_i32 = arith.constant 0 : i32
    %0 = arith.cmpi eq, %arg1, %c0_i32 : i32
    %1 = arith.extui %0 : i1 to i32
    %c0_i32_0 = arith.constant 0 : i32
    %2 = arith.cmpi ne, %1, %c0_i32_0 : i32
    scf.if %2 {
      %cst_14 = arith.constant 0.000000e+00 : f32
      %22 = vector.broadcast %cst_14 : f32 to vector<16x128xf32>
      %c0_15 = arith.constant 0 : index
      %c0_16 = arith.constant 0 : index
      %23 = vector.load %arg9[%c0_15, %c0_16] : memref<16x128xf32, #tpu.memory_space<vmem>>, vector<16x128xf32>
      tpu.vector_store %arg9[%c0_15, %c0_16], %22 {strides = array<i32>} : memref<16x128xf32, #tpu.memory_space<vmem>>, vector<16x128xf32>,
    } else {
    }
    %c0 = arith.constant 0 : index
    %c0_1 = arith.constant 0 : index
    %3 = vector.load %arg2[%c0, %c0_1] : memref<16x128xbf16, #tpu.memory_space<vmem>>, vector<16x128xbf16>
    %4 = arith.extf %3 : vector<16x128xbf16> to vector<16x128xf32>
    %c0_2 = arith.constant 0 : index
    %c0_3 = arith.constant 0 : index
    %5 = vector.load %arg4[%c0_2, %c0_3] : memref<1x128xf32, #tpu.memory_space<vmem>>, vector<1x128xf32>
    %6 = vector.broadcast %5 : vector<1x128xf32> to vector<16x128xf32>
    %7 = arith.mulf %4, %6 : vector<16x128xf32>
    %c0_4 = arith.constant 0 : index
    %c0_5 = arith.constant 0 : index
    %8 = vector.load %arg5[%c0_4, %c0_5] : memref<1x128xf32, #tpu.memory_space<vmem>>, vector<1x128xf32>
    %9 = vector.broadcast %8 : vector<1x128xf32> to vector<16x128xf32>
    %10 = arith.addf %7, %9 : vector<16x128xf32>
    %cst = arith.constant 0.000000e+00 : f32
    %11 = vector.broadcast %cst : f32 to vector<16x128xf32>
    %12 = arith.maximumf %10, %11 : vector<16x128xf32>
    %13 = arith.truncf %12 : vector<16x128xf32> to vector<16x128xbf16>
    %c0_6 = arith.constant 0 : index
    %c0_7 = arith.constant 0 : index
    %14 = vector.load %arg9[%c0_6, %c0_7] : memref<16x128xf32, #tpu.memory_space<vmem>>, vector<16x128xf32>
    %c0_8 = arith.constant 0 : index
    %c0_9 = arith.constant 0 : index
    %15 = vector.load %arg3[%c0_8, %c0_9] : memref<128x128xbf16, #tpu.memory_space<vmem>>, vector<128x128xbf16>
    %cst_10 = arith.constant dense<0.000000e+00> : vector<16x128xf32>
    %16 = tpu.matmul %13, %15, %cst_10 {dimension_numbers = #tpu.dot_dimension_numbers<[1], [0], [0], [1], [0, 0, 1, 1], [], []>} : vector<16x128xbf16>, vector<128x128xbf16>, vector<16x128xf32> -> vector<16x128xf32>
    %17 = arith.addf %14, %16 : vector<16x128xf32>
    %c0_11 = arith.constant 0 : index
    %c0_12 = arith.constant 0 : index
    %18 = vector.load %arg9[%c0_11, %c0_12] : memref<16x128xf32, #tpu.memory_space<vmem>>, vector<16x128xf32>
    tpu.vector_store %arg9[%c0_11, %c0_12], %17 {strides = array<i32>} : memref<16x128xf32, #tpu.memory_space<vmem>>, vector<16x128xf32>,
    %c3_i32 = arith.constant 3 : i32
    %19 = arith.cmpi eq, %arg1, %c3_i32 : i32
    %20 = arith.extui %19 : i1 to i32
    %c0_i32_13 = arith.constant 0 : i32
    %21 = arith.cmpi ne, %20, %c0_i32_13 : i32
    scf.if %21 {
      %c0_14 = arith.constant 0 : index
      %c0_15 = arith.constant 0 : index
      %22 = vector.load %arg9[%c0_14, %c0_15] : memref<16x128xf32, #tpu.memory_space<vmem>>, vector<16x128xf32>
      %c0_16 = arith.constant 0 : index
      %c0_17 = arith.constant 0 : index
      %23 = vector.load %arg6[%c0_16, %c0_17] : memref<1x128xf32, #tpu.memory_space<vmem>>, vector<1x128xf32>
      %24 = vector.broadcast %23 : vector<1x128xf32> to vector<16x128xf32>
      %25 = arith.mulf %22, %24 : vector<16x128xf32>
      %c0_18 = arith.constant 0 : index
      %c0_19 = arith.constant 0 : index
      %26 = vector.load %arg7[%c0_18, %c0_19] : memref<1x128xf32, #tpu.memory_space<vmem>>, vector<1x128xf32>
      %27 = vector.broadcast %26 : vector<1x128xf32> to vector<16x128xf32>
      %28 = arith.addf %25, %27 : vector<16x128xf32>
      %cst_20 = arith.constant 0.000000e+00 : f32
      %29 = vector.broadcast %cst_20 : f32 to vector<16x128xf32>
      %30 = arith.maximumf %28, %29 : vector<16x128xf32>
      %31 = arith.truncf %30 : vector<16x128xf32> to vector<16x128xbf16>
      %c0_21 = arith.constant 0 : index
      %c0_22 = arith.constant 0 : index
      %32 = vector.load %arg8[%c0_21, %c0_22] : memref<16x128xbf16, #tpu.memory_space<vmem>>, vector<16x128xbf16>
      tpu.vector_store %arg8[%c0_21, %c0_22], %31 {strides = array<i32>} : memref<16x128xbf16, #tpu.memory_space<vmem>>, vector<16x128xbf16>,
    } else {
    }
    return
  }
  func.func @transform_0(%arg0: i32, %arg1: i32) -> (i32, i32) {
    %c0_i32 = arith.constant 0 : i32
    return %arg0, %arg1 : i32, i32
  }
  func.func @transform_1(%arg0: i32, %arg1: i32) -> (i32, i32) {
    %c0_i32 = arith.constant 0 : i32
    %c0_i32_0 = arith.constant 0 : i32
    return %arg1, %c0_i32 : i32, i32
  }
  func.func @transform_2(%arg0: i32, %arg1: i32) -> (i32, i32) {
    %c0_i32 = arith.constant 0 : i32
    %c0_i32_0 = arith.constant 0 : i32
    return %c0_i32, %arg1 : i32, i32
  }
  func.func @transform_3(%arg0: i32, %arg1: i32) -> (i32, i32) {
    %c0_i32 = arith.constant 0 : i32
    %c0_i32_0 = arith.constant 0 : i32
    return %c0_i32, %arg1 : i32, i32
  }
  func.func @transform_4(%arg0: i32, %arg1: i32) -> (i32, i32) {
    %c0_i32 = arith.constant 0 : i32
    %c0_i32_0 = arith.constant 0 : i32
    %c0_i32_1 = arith.constant 0 : i32
    return %c0_i32, %c0_i32_0 : i32, i32
  }
  func.func @transform_5(%arg0: i32, %arg1: i32) -> (i32, i32) {
    %c0_i32 = arith.constant 0 : i32
    %c0_i32_0 = arith.constant 0 : i32
    %c0_i32_1 = arith.constant 0 : i32
    return %c0_i32, %c0_i32_0 : i32, i32
  }
  func.func @transform_6(%arg0: i32, %arg1: i32) -> (i32, i32) {
    %c0_i32 = arith.constant 0 : i32
    %c0_i32_0 = arith.constant 0 : i32
    return %arg0, %c0_i32 : i32, i32
  }
}

module attributes {stable_mosaic.version = 11 : i64} {
  func.func @kernel(%arg0: i32, %arg1: i32, %arg2: memref<16x128xbf16, #tpu.memory_space<vmem>>, %arg3: memref<128x128xbf16, #tpu.memory_space<vmem>>, %arg4: memref<1x128xf32, #tpu.memory_space<vmem>>, %arg5: memref<1x128xf32, #tpu.memory_space<vmem>>, %arg6: memref<1x128xf32, #tpu.memory_space<vmem>>, %arg7: memref<1x128xf32, #tpu.memory_space<vmem>>, %arg8: memref<16x128xbf16, #tpu.memory_space<vmem>>, %arg9: memref<16x128xf32, #tpu.memory_space<vmem>>) attributes {dimension_semantics = [#tpu.dimension_semantics<parallel>, #tpu.dimension_semantics<arbitrary>], iteration_bounds = array<i64: 1, 5>, scalar_prefetch = 0 : i64, scratch_operands = 1 : i64, tpu.core_type = #tpu.core_type<tc>, window_params = [{transform_indices = @transform_0, window_bounds = array<i64: 16, 128>}, {transform_indices = @transform_1, window_bounds = array<i64: 128, 128>}, {transform_indices = @transform_2, window_bounds = array<i64: 1, 128>}, {transform_indices = @transform_3, window_bounds = array<i64: 1, 128>}, {pipeline_mode = #tpu.pipeline_mode<synchronous>, transform_indices = @transform_4, window_bounds = array<i64: 1, 128>}, {pipeline_mode = #tpu.pipeline_mode<synchronous>, transform_indices = @transform_5, window_bounds = array<i64: 1, 128>}, {transform_indices = @transform_6, window_bounds = array<i64: 16, 128>}]} {
    %c0_i32 = arith.constant 0 : i32
    %0 = arith.cmpi eq, %arg1, %c0_i32 : i32
    %1 = arith.extui %0 : i1 to i32
    %c0_i32_0 = arith.constant 0 : i32
    %2 = arith.cmpi ne, %1, %c0_i32_0 : i32
    scf.if %2 {
      %cst_14 = arith.constant 0.000000e+00 : f32
      %22 = vector.broadcast %cst_14 : f32 to vector<16x128xf32>
      %c0_15 = arith.constant 0 : index
      %c0_16 = arith.constant 0 : index
      %23 = vector.load %arg9[%c0_15, %c0_16] : memref<16x128xf32, #tpu.memory_space<vmem>>, vector<16x128xf32>
      tpu.vector_store %arg9[%c0_15, %c0_16], %22 {strides = array<i32>} : memref<16x128xf32, #tpu.memory_space<vmem>>, vector<16x128xf32>,
    } else {
    }
    %c0 = arith.constant 0 : index
    %c0_1 = arith.constant 0 : index
    %3 = vector.load %arg2[%c0, %c0_1] : memref<16x128xbf16, #tpu.memory_space<vmem>>, vector<16x128xbf16>
    %4 = arith.extf %3 : vector<16x128xbf16> to vector<16x128xf32>
    %c0_2 = arith.constant 0 : index
    %c0_3 = arith.constant 0 : index
    %5 = vector.load %arg4[%c0_2, %c0_3] : memref<1x128xf32, #tpu.memory_space<vmem>>, vector<1x128xf32>
    %6 = vector.broadcast %5 : vector<1x128xf32> to vector<16x128xf32>
    %7 = arith.mulf %4, %6 : vector<16x128xf32>
    %c0_4 = arith.constant 0 : index
    %c0_5 = arith.constant 0 : index
    %8 = vector.load %arg5[%c0_4, %c0_5] : memref<1x128xf32, #tpu.memory_space<vmem>>, vector<1x128xf32>
    %9 = vector.broadcast %8 : vector<1x128xf32> to vector<16x128xf32>
    %10 = arith.addf %7, %9 : vector<16x128xf32>
    %cst = arith.constant 0.000000e+00 : f32
    %11 = vector.broadcast %cst : f32 to vector<16x128xf32>
    %12 = arith.maximumf %10, %11 : vector<16x128xf32>
    %13 = arith.truncf %12 : vector<16x128xf32> to vector<16x128xbf16>
    %c0_6 = arith.constant 0 : index
    %c0_7 = arith.constant 0 : index
    %14 = vector.load %arg9[%c0_6, %c0_7] : memref<16x128xf32, #tpu.memory_space<vmem>>, vector<16x128xf32>
    %c0_8 = arith.constant 0 : index
    %c0_9 = arith.constant 0 : index
    %15 = vector.load %arg3[%c0_8, %c0_9] : memref<128x128xbf16, #tpu.memory_space<vmem>>, vector<128x128xbf16>
    %cst_10 = arith.constant dense<0.000000e+00> : vector<16x128xf32>
    %16 = tpu.matmul %13, %15, %cst_10 {dimension_numbers = #tpu.dot_dimension_numbers<[1], [0], [0], [1], [0, 0, 1, 1], [], []>} : vector<16x128xbf16>, vector<128x128xbf16>, vector<16x128xf32> -> vector<16x128xf32>
    %17 = arith.addf %14, %16 : vector<16x128xf32>
    %c0_11 = arith.constant 0 : index
    %c0_12 = arith.constant 0 : index
    %18 = vector.load %arg9[%c0_11, %c0_12] : memref<16x128xf32, #tpu.memory_space<vmem>>, vector<16x128xf32>
    tpu.vector_store %arg9[%c0_11, %c0_12], %17 {strides = array<i32>} : memref<16x128xf32, #tpu.memory_space<vmem>>, vector<16x128xf32>,
    %c4_i32 = arith.constant 4 : i32
    %19 = arith.cmpi eq, %arg1, %c4_i32 : i32
    %20 = arith.extui %19 : i1 to i32
    %c0_i32_13 = arith.constant 0 : i32
    %21 = arith.cmpi ne, %20, %c0_i32_13 : i32
    scf.if %21 {
      %c0_14 = arith.constant 0 : index
      %c0_15 = arith.constant 0 : index
      %22 = vector.load %arg9[%c0_14, %c0_15] : memref<16x128xf32, #tpu.memory_space<vmem>>, vector<16x128xf32>
      %c0_16 = arith.constant 0 : index
      %c0_17 = arith.constant 0 : index
      %23 = vector.load %arg6[%c0_16, %c0_17] : memref<1x128xf32, #tpu.memory_space<vmem>>, vector<1x128xf32>
      %24 = vector.broadcast %23 : vector<1x128xf32> to vector<16x128xf32>
      %25 = arith.mulf %22, %24 : vector<16x128xf32>
      %c0_18 = arith.constant 0 : index
      %c0_19 = arith.constant 0 : index
      %26 = vector.load %arg7[%c0_18, %c0_19] : memref<1x128xf32, #tpu.memory_space<vmem>>, vector<1x128xf32>
      %27 = vector.broadcast %26 : vector<1x128xf32> to vector<16x128xf32>
      %28 = arith.addf %25, %27 : vector<16x128xf32>
      %cst_20 = arith.constant 0.000000e+00 : f32
      %29 = vector.broadcast %cst_20 : f32 to vector<16x128xf32>
      %30 = arith.maximumf %28, %29 : vector<16x128xf32>
      %31 = arith.truncf %30 : vector<16x128xf32> to vector<16x128xbf16>
      %c0_21 = arith.constant 0 : index
      %c0_22 = arith.constant 0 : index
      %32 = vector.load %arg8[%c0_21, %c0_22] : memref<16x128xbf16, #tpu.memory_space<vmem>>, vector<16x128xbf16>
      tpu.vector_store %arg8[%c0_21, %c0_22], %31 {strides = array<i32>} : memref<16x128xbf16, #tpu.memory_space<vmem>>, vector<16x128xbf16>,
    } else {
    }
    return
  }
  func.func @transform_0(%arg0: i32, %arg1: i32) -> (i32, i32) {
    %c0_i32 = arith.constant 0 : i32
    return %arg0, %arg1 : i32, i32
  }
  func.func @transform_1(%arg0: i32, %arg1: i32) -> (i32, i32) {
    %c0_i32 = arith.constant 0 : i32
    %c0_i32_0 = arith.constant 0 : i32
    return %arg1, %c0_i32 : i32, i32
  }
  func.func @transform_2(%arg0: i32, %arg1: i32) -> (i32, i32) {
    %c0_i32 = arith.constant 0 : i32
    %c0_i32_0 = arith.constant 0 : i32
    return %c0_i32, %arg1 : i32, i32
  }
  func.func @transform_3(%arg0: i32, %arg1: i32) -> (i32, i32) {
    %c0_i32 = arith.constant 0 : i32
    %c0_i32_0 = arith.constant 0 : i32
    return %c0_i32, %arg1 : i32, i32
  }
  func.func @transform_4(%arg0: i32, %arg1: i32) -> (i32, i32) {
    %c0_i32 = arith.constant 0 : i32
    %c0_i32_0 = arith.constant 0 : i32
    %c0_i32_1 = arith.constant 0 : i32
    return %c0_i32, %c0_i32_0 : i32, i32
  }
  func.func @transform_5(%arg0: i32, %arg1: i32) -> (i32, i32) {
    %c0_i32 = arith.constant 0 : i32
    %c0_i32_0 = arith.constant 0 : i32
    %c0_i32_1 = arith.constant 0 : i32
    return %c0_i32, %c0_i32_0 : i32, i32
  }
  func.func @transform_6(%arg0: i32, %arg1: i32) -> (i32, i32) {
    %c0_i32 = arith.constant 0 : i32
    %c0_i32_0 = arith.constant 0 : i32
    return %arg0, %c0_i32 : i32, i32
  }
}

module attributes {stable_mosaic.version = 11 : i64} {
  func.func @kernel(%arg0: i32, %arg1: i32, %arg2: memref<16x128xbf16, #tpu.memory_space<vmem>>, %arg3: memref<128x128xbf16, #tpu.memory_space<vmem>>, %arg4: memref<1x128xf32, #tpu.memory_space<vmem>>, %arg5: memref<1x128xf32, #tpu.memory_space<vmem>>, %arg6: memref<1x128xf32, #tpu.memory_space<vmem>>, %arg7: memref<1x128xf32, #tpu.memory_space<vmem>>, %arg8: memref<16x128xbf16, #tpu.memory_space<vmem>>, %arg9: memref<16x128xf32, #tpu.memory_space<vmem>>) attributes {dimension_semantics = [#tpu.dimension_semantics<parallel>, #tpu.dimension_semantics<arbitrary>], iteration_bounds = array<i64: 1, 6>, scalar_prefetch = 0 : i64, scratch_operands = 1 : i64, tpu.core_type = #tpu.core_type<tc>, window_params = [{transform_indices = @transform_0, window_bounds = array<i64: 16, 128>}, {transform_indices = @transform_1, window_bounds = array<i64: 128, 128>}, {transform_indices = @transform_2, window_bounds = array<i64: 1, 128>}, {transform_indices = @transform_3, window_bounds = array<i64: 1, 128>}, {pipeline_mode = #tpu.pipeline_mode<synchronous>, transform_indices = @transform_4, window_bounds = array<i64: 1, 128>}, {pipeline_mode = #tpu.pipeline_mode<synchronous>, transform_indices = @transform_5, window_bounds = array<i64: 1, 128>}, {transform_indices = @transform_6, window_bounds = array<i64: 16, 128>}]} {
    %c0_i32 = arith.constant 0 : i32
    %0 = arith.cmpi eq, %arg1, %c0_i32 : i32
    %1 = arith.extui %0 : i1 to i32
    %c0_i32_0 = arith.constant 0 : i32
    %2 = arith.cmpi ne, %1, %c0_i32_0 : i32
    scf.if %2 {
      %cst_14 = arith.constant 0.000000e+00 : f32
      %22 = vector.broadcast %cst_14 : f32 to vector<16x128xf32>
      %c0_15 = arith.constant 0 : index
      %c0_16 = arith.constant 0 : index
      %23 = vector.load %arg9[%c0_15, %c0_16] : memref<16x128xf32, #tpu.memory_space<vmem>>, vector<16x128xf32>
      tpu.vector_store %arg9[%c0_15, %c0_16], %22 {strides = array<i32>} : memref<16x128xf32, #tpu.memory_space<vmem>>, vector<16x128xf32>,
    } else {
    }
    %c0 = arith.constant 0 : index
    %c0_1 = arith.constant 0 : index
    %3 = vector.load %arg2[%c0, %c0_1] : memref<16x128xbf16, #tpu.memory_space<vmem>>, vector<16x128xbf16>
    %4 = arith.extf %3 : vector<16x128xbf16> to vector<16x128xf32>
    %c0_2 = arith.constant 0 : index
    %c0_3 = arith.constant 0 : index
    %5 = vector.load %arg4[%c0_2, %c0_3] : memref<1x128xf32, #tpu.memory_space<vmem>>, vector<1x128xf32>
    %6 = vector.broadcast %5 : vector<1x128xf32> to vector<16x128xf32>
    %7 = arith.mulf %4, %6 : vector<16x128xf32>
    %c0_4 = arith.constant 0 : index
    %c0_5 = arith.constant 0 : index
    %8 = vector.load %arg5[%c0_4, %c0_5] : memref<1x128xf32, #tpu.memory_space<vmem>>, vector<1x128xf32>
    %9 = vector.broadcast %8 : vector<1x128xf32> to vector<16x128xf32>
    %10 = arith.addf %7, %9 : vector<16x128xf32>
    %cst = arith.constant 0.000000e+00 : f32
    %11 = vector.broadcast %cst : f32 to vector<16x128xf32>
    %12 = arith.maximumf %10, %11 : vector<16x128xf32>
    %13 = arith.truncf %12 : vector<16x128xf32> to vector<16x128xbf16>
    %c0_6 = arith.constant 0 : index
    %c0_7 = arith.constant 0 : index
    %14 = vector.load %arg9[%c0_6, %c0_7] : memref<16x128xf32, #tpu.memory_space<vmem>>, vector<16x128xf32>
    %c0_8 = arith.constant 0 : index
    %c0_9 = arith.constant 0 : index
    %15 = vector.load %arg3[%c0_8, %c0_9] : memref<128x128xbf16, #tpu.memory_space<vmem>>, vector<128x128xbf16>
    %cst_10 = arith.constant dense<0.000000e+00> : vector<16x128xf32>
    %16 = tpu.matmul %13, %15, %cst_10 {dimension_numbers = #tpu.dot_dimension_numbers<[1], [0], [0], [1], [0, 0, 1, 1], [], []>} : vector<16x128xbf16>, vector<128x128xbf16>, vector<16x128xf32> -> vector<16x128xf32>
    %17 = arith.addf %14, %16 : vector<16x128xf32>
    %c0_11 = arith.constant 0 : index
    %c0_12 = arith.constant 0 : index
    %18 = vector.load %arg9[%c0_11, %c0_12] : memref<16x128xf32, #tpu.memory_space<vmem>>, vector<16x128xf32>
    tpu.vector_store %arg9[%c0_11, %c0_12], %17 {strides = array<i32>} : memref<16x128xf32, #tpu.memory_space<vmem>>, vector<16x128xf32>,
    %c5_i32 = arith.constant 5 : i32
    %19 = arith.cmpi eq, %arg1, %c5_i32 : i32
    %20 = arith.extui %19 : i1 to i32
    %c0_i32_13 = arith.constant 0 : i32
    %21 = arith.cmpi ne, %20, %c0_i32_13 : i32
    scf.if %21 {
      %c0_14 = arith.constant 0 : index
      %c0_15 = arith.constant 0 : index
      %22 = vector.load %arg9[%c0_14, %c0_15] : memref<16x128xf32, #tpu.memory_space<vmem>>, vector<16x128xf32>
      %c0_16 = arith.constant 0 : index
      %c0_17 = arith.constant 0 : index
      %23 = vector.load %arg6[%c0_16, %c0_17] : memref<1x128xf32, #tpu.memory_space<vmem>>, vector<1x128xf32>
      %24 = vector.broadcast %23 : vector<1x128xf32> to vector<16x128xf32>
      %25 = arith.mulf %22, %24 : vector<16x128xf32>
      %c0_18 = arith.constant 0 : index
      %c0_19 = arith.constant 0 : index
      %26 = vector.load %arg7[%c0_18, %c0_19] : memref<1x128xf32, #tpu.memory_space<vmem>>, vector<1x128xf32>
      %27 = vector.broadcast %26 : vector<1x128xf32> to vector<16x128xf32>
      %28 = arith.addf %25, %27 : vector<16x128xf32>
      %cst_20 = arith.constant 0.000000e+00 : f32
      %29 = vector.broadcast %cst_20 : f32 to vector<16x128xf32>
      %30 = arith.maximumf %28, %29 : vector<16x128xf32>
      %31 = arith.truncf %30 : vector<16x128xf32> to vector<16x128xbf16>
      %c0_21 = arith.constant 0 : index
      %c0_22 = arith.constant 0 : index
      %32 = vector.load %arg8[%c0_21, %c0_22] : memref<16x128xbf16, #tpu.memory_space<vmem>>, vector<16x128xbf16>
      tpu.vector_store %arg8[%c0_21, %c0_22], %31 {strides = array<i32>} : memref<16x128xbf16, #tpu.memory_space<vmem>>, vector<16x128xbf16>,
    } else {
    }
    return
  }
  func.func @transform_0(%arg0: i32, %arg1: i32) -> (i32, i32) {
    %c0_i32 = arith.constant 0 : i32
    return %arg0, %arg1 : i32, i32
  }
  func.func @transform_1(%arg0: i32, %arg1: i32) -> (i32, i32) {
    %c0_i32 = arith.constant 0 : i32
    %c0_i32_0 = arith.constant 0 : i32
    return %arg1, %c0_i32 : i32, i32
  }
  func.func @transform_2(%arg0: i32, %arg1: i32) -> (i32, i32) {
    %c0_i32 = arith.constant 0 : i32
    %c0_i32_0 = arith.constant 0 : i32
    return %c0_i32, %arg1 : i32, i32
  }
  func.func @transform_3(%arg0: i32, %arg1: i32) -> (i32, i32) {
    %c0_i32 = arith.constant 0 : i32
    %c0_i32_0 = arith.constant 0 : i32
    return %c0_i32, %arg1 : i32, i32
  }
  func.func @transform_4(%arg0: i32, %arg1: i32) -> (i32, i32) {
    %c0_i32 = arith.constant 0 : i32
    %c0_i32_0 = arith.constant 0 : i32
    %c0_i32_1 = arith.constant 0 : i32
    return %c0_i32, %c0_i32_0 : i32, i32
  }
  func.func @transform_5(%arg0: i32, %arg1: i32) -> (i32, i32) {
    %c0_i32 = arith.constant 0 : i32
    %c0_i32_0 = arith.constant 0 : i32
    %c0_i32_1 = arith.constant 0 : i32
    return %c0_i32, %c0_i32_0 : i32, i32
  }
  func.func @transform_6(%arg0: i32, %arg1: i32) -> (i32, i32) {
    %c0_i32 = arith.constant 0 : i32
    %c0_i32_0 = arith.constant 0 : i32
    return %arg0, %c0_i32 : i32, i32
  }
}

module attributes {stable_mosaic.version = 11 : i64} {
  func.func @kernel(%arg0: i32, %arg1: i32, %arg2: memref<16x128xbf16, #tpu.memory_space<vmem>>, %arg3: memref<128x128xbf16, #tpu.memory_space<vmem>>, %arg4: memref<1x128xf32, #tpu.memory_space<vmem>>, %arg5: memref<1x128xf32, #tpu.memory_space<vmem>>, %arg6: memref<1x128xf32, #tpu.memory_space<vmem>>, %arg7: memref<1x128xf32, #tpu.memory_space<vmem>>, %arg8: memref<16x128xbf16, #tpu.memory_space<vmem>>, %arg9: memref<16x128xf32, #tpu.memory_space<vmem>>) attributes {dimension_semantics = [#tpu.dimension_semantics<parallel>, #tpu.dimension_semantics<arbitrary>], iteration_bounds = array<i64: 1, 7>, scalar_prefetch = 0 : i64, scratch_operands = 1 : i64, tpu.core_type = #tpu.core_type<tc>, window_params = [{transform_indices = @transform_0, window_bounds = array<i64: 16, 128>}, {transform_indices = @transform_1, window_bounds = array<i64: 128, 128>}, {transform_indices = @transform_2, window_bounds = array<i64: 1, 128>}, {transform_indices = @transform_3, window_bounds = array<i64: 1, 128>}, {pipeline_mode = #tpu.pipeline_mode<synchronous>, transform_indices = @transform_4, window_bounds = array<i64: 1, 128>}, {pipeline_mode = #tpu.pipeline_mode<synchronous>, transform_indices = @transform_5, window_bounds = array<i64: 1, 128>}, {transform_indices = @transform_6, window_bounds = array<i64: 16, 128>}]} {
    %c0_i32 = arith.constant 0 : i32
    %0 = arith.cmpi eq, %arg1, %c0_i32 : i32
    %1 = arith.extui %0 : i1 to i32
    %c0_i32_0 = arith.constant 0 : i32
    %2 = arith.cmpi ne, %1, %c0_i32_0 : i32
    scf.if %2 {
      %cst_14 = arith.constant 0.000000e+00 : f32
      %22 = vector.broadcast %cst_14 : f32 to vector<16x128xf32>
      %c0_15 = arith.constant 0 : index
      %c0_16 = arith.constant 0 : index
      %23 = vector.load %arg9[%c0_15, %c0_16] : memref<16x128xf32, #tpu.memory_space<vmem>>, vector<16x128xf32>
      tpu.vector_store %arg9[%c0_15, %c0_16], %22 {strides = array<i32>} : memref<16x128xf32, #tpu.memory_space<vmem>>, vector<16x128xf32>,
    } else {
    }
    %c0 = arith.constant 0 : index
    %c0_1 = arith.constant 0 : index
    %3 = vector.load %arg2[%c0, %c0_1] : memref<16x128xbf16, #tpu.memory_space<vmem>>, vector<16x128xbf16>
    %4 = arith.extf %3 : vector<16x128xbf16> to vector<16x128xf32>
    %c0_2 = arith.constant 0 : index
    %c0_3 = arith.constant 0 : index
    %5 = vector.load %arg4[%c0_2, %c0_3] : memref<1x128xf32, #tpu.memory_space<vmem>>, vector<1x128xf32>
    %6 = vector.broadcast %5 : vector<1x128xf32> to vector<16x128xf32>
    %7 = arith.mulf %4, %6 : vector<16x128xf32>
    %c0_4 = arith.constant 0 : index
    %c0_5 = arith.constant 0 : index
    %8 = vector.load %arg5[%c0_4, %c0_5] : memref<1x128xf32, #tpu.memory_space<vmem>>, vector<1x128xf32>
    %9 = vector.broadcast %8 : vector<1x128xf32> to vector<16x128xf32>
    %10 = arith.addf %7, %9 : vector<16x128xf32>
    %cst = arith.constant 0.000000e+00 : f32
    %11 = vector.broadcast %cst : f32 to vector<16x128xf32>
    %12 = arith.maximumf %10, %11 : vector<16x128xf32>
    %13 = arith.truncf %12 : vector<16x128xf32> to vector<16x128xbf16>
    %c0_6 = arith.constant 0 : index
    %c0_7 = arith.constant 0 : index
    %14 = vector.load %arg9[%c0_6, %c0_7] : memref<16x128xf32, #tpu.memory_space<vmem>>, vector<16x128xf32>
    %c0_8 = arith.constant 0 : index
    %c0_9 = arith.constant 0 : index
    %15 = vector.load %arg3[%c0_8, %c0_9] : memref<128x128xbf16, #tpu.memory_space<vmem>>, vector<128x128xbf16>
    %cst_10 = arith.constant dense<0.000000e+00> : vector<16x128xf32>
    %16 = tpu.matmul %13, %15, %cst_10 {dimension_numbers = #tpu.dot_dimension_numbers<[1], [0], [0], [1], [0, 0, 1, 1], [], []>} : vector<16x128xbf16>, vector<128x128xbf16>, vector<16x128xf32> -> vector<16x128xf32>
    %17 = arith.addf %14, %16 : vector<16x128xf32>
    %c0_11 = arith.constant 0 : index
    %c0_12 = arith.constant 0 : index
    %18 = vector.load %arg9[%c0_11, %c0_12] : memref<16x128xf32, #tpu.memory_space<vmem>>, vector<16x128xf32>
    tpu.vector_store %arg9[%c0_11, %c0_12], %17 {strides = array<i32>} : memref<16x128xf32, #tpu.memory_space<vmem>>, vector<16x128xf32>,
    %c6_i32 = arith.constant 6 : i32
    %19 = arith.cmpi eq, %arg1, %c6_i32 : i32
    %20 = arith.extui %19 : i1 to i32
    %c0_i32_13 = arith.constant 0 : i32
    %21 = arith.cmpi ne, %20, %c0_i32_13 : i32
    scf.if %21 {
      %c0_14 = arith.constant 0 : index
      %c0_15 = arith.constant 0 : index
      %22 = vector.load %arg9[%c0_14, %c0_15] : memref<16x128xf32, #tpu.memory_space<vmem>>, vector<16x128xf32>
      %c0_16 = arith.constant 0 : index
      %c0_17 = arith.constant 0 : index
      %23 = vector.load %arg6[%c0_16, %c0_17] : memref<1x128xf32, #tpu.memory_space<vmem>>, vector<1x128xf32>
      %24 = vector.broadcast %23 : vector<1x128xf32> to vector<16x128xf32>
      %25 = arith.mulf %22, %24 : vector<16x128xf32>
      %c0_18 = arith.constant 0 : index
      %c0_19 = arith.constant 0 : index
      %26 = vector.load %arg7[%c0_18, %c0_19] : memref<1x128xf32, #tpu.memory_space<vmem>>, vector<1x128xf32>
      %27 = vector.broadcast %26 : vector<1x128xf32> to vector<16x128xf32>
      %28 = arith.addf %25, %27 : vector<16x128xf32>
      %cst_20 = arith.constant 0.000000e+00 : f32
      %29 = vector.broadcast %cst_20 : f32 to vector<16x128xf32>
      %30 = arith.maximumf %28, %29 : vector<16x128xf32>
      %31 = arith.truncf %30 : vector<16x128xf32> to vector<16x128xbf16>
      %c0_21 = arith.constant 0 : index
      %c0_22 = arith.constant 0 : index
      %32 = vector.load %arg8[%c0_21, %c0_22] : memref<16x128xbf16, #tpu.memory_space<vmem>>, vector<16x128xbf16>
      tpu.vector_store %arg8[%c0_21, %c0_22], %31 {strides = array<i32>} : memref<16x128xbf16, #tpu.memory_space<vmem>>, vector<16x128xbf16>,
    } else {
    }
    return
  }
  func.func @transform_0(%arg0: i32, %arg1: i32) -> (i32, i32) {
    %c0_i32 = arith.constant 0 : i32
    return %arg0, %arg1 : i32, i32
  }
  func.func @transform_1(%arg0: i32, %arg1: i32) -> (i32, i32) {
    %c0_i32 = arith.constant 0 : i32
    %c0_i32_0 = arith.constant 0 : i32
    return %arg1, %c0_i32 : i32, i32
  }
  func.func @transform_2(%arg0: i32, %arg1: i32) -> (i32, i32) {
    %c0_i32 = arith.constant 0 : i32
    %c0_i32_0 = arith.constant 0 : i32
    return %c0_i32, %arg1 : i32, i32
  }
  func.func @transform_3(%arg0: i32, %arg1: i32) -> (i32, i32) {
    %c0_i32 = arith.constant 0 : i32
    %c0_i32_0 = arith.constant 0 : i32
    return %c0_i32, %arg1 : i32, i32
  }
  func.func @transform_4(%arg0: i32, %arg1: i32) -> (i32, i32) {
    %c0_i32 = arith.constant 0 : i32
    %c0_i32_0 = arith.constant 0 : i32
    %c0_i32_1 = arith.constant 0 : i32
    return %c0_i32, %c0_i32_0 : i32, i32
  }
  func.func @transform_5(%arg0: i32, %arg1: i32) -> (i32, i32) {
    %c0_i32 = arith.constant 0 : i32
    %c0_i32_0 = arith.constant 0 : i32
    %c0_i32_1 = arith.constant 0 : i32
    return %c0_i32, %c0_i32_0 : i32, i32
  }
  func.func @transform_6(%arg0: i32, %arg1: i32) -> (i32, i32) {
    %c0_i32 = arith.constant 0 : i32
    %c0_i32_0 = arith.constant 0 : i32
    return %arg0, %c0_i32 : i32, i32
  }
}

module attributes {stable_mosaic.version = 11 : i64} {
  func.func @kernel(%arg0: i32, %arg1: i32, %arg2: memref<16x128xbf16, #tpu.memory_space<vmem>>, %arg3: memref<128x128xbf16, #tpu.memory_space<vmem>>, %arg4: memref<1x128xf32, #tpu.memory_space<vmem>>, %arg5: memref<1x128xf32, #tpu.memory_space<vmem>>, %arg6: memref<1x128xf32, #tpu.memory_space<vmem>>, %arg7: memref<1x128xf32, #tpu.memory_space<vmem>>, %arg8: memref<16x128xbf16, #tpu.memory_space<vmem>>, %arg9: memref<16x128xf32, #tpu.memory_space<vmem>>) attributes {dimension_semantics = [#tpu.dimension_semantics<parallel>, #tpu.dimension_semantics<arbitrary>], iteration_bounds = array<i64: 1, 8>, scalar_prefetch = 0 : i64, scratch_operands = 1 : i64, tpu.core_type = #tpu.core_type<tc>, window_params = [{transform_indices = @transform_0, window_bounds = array<i64: 16, 128>}, {transform_indices = @transform_1, window_bounds = array<i64: 128, 128>}, {transform_indices = @transform_2, window_bounds = array<i64: 1, 128>}, {transform_indices = @transform_3, window_bounds = array<i64: 1, 128>}, {pipeline_mode = #tpu.pipeline_mode<synchronous>, transform_indices = @transform_4, window_bounds = array<i64: 1, 128>}, {pipeline_mode = #tpu.pipeline_mode<synchronous>, transform_indices = @transform_5, window_bounds = array<i64: 1, 128>}, {transform_indices = @transform_6, window_bounds = array<i64: 16, 128>}]} {
    %c0_i32 = arith.constant 0 : i32
    %0 = arith.cmpi eq, %arg1, %c0_i32 : i32
    %1 = arith.extui %0 : i1 to i32
    %c0_i32_0 = arith.constant 0 : i32
    %2 = arith.cmpi ne, %1, %c0_i32_0 : i32
    scf.if %2 {
      %cst_14 = arith.constant 0.000000e+00 : f32
      %22 = vector.broadcast %cst_14 : f32 to vector<16x128xf32>
      %c0_15 = arith.constant 0 : index
      %c0_16 = arith.constant 0 : index
      %23 = vector.load %arg9[%c0_15, %c0_16] : memref<16x128xf32, #tpu.memory_space<vmem>>, vector<16x128xf32>
      tpu.vector_store %arg9[%c0_15, %c0_16], %22 {strides = array<i32>} : memref<16x128xf32, #tpu.memory_space<vmem>>, vector<16x128xf32>,
    } else {
    }
    %c0 = arith.constant 0 : index
    %c0_1 = arith.constant 0 : index
    %3 = vector.load %arg2[%c0, %c0_1] : memref<16x128xbf16, #tpu.memory_space<vmem>>, vector<16x128xbf16>
    %4 = arith.extf %3 : vector<16x128xbf16> to vector<16x128xf32>
    %c0_2 = arith.constant 0 : index
    %c0_3 = arith.constant 0 : index
    %5 = vector.load %arg4[%c0_2, %c0_3] : memref<1x128xf32, #tpu.memory_space<vmem>>, vector<1x128xf32>
    %6 = vector.broadcast %5 : vector<1x128xf32> to vector<16x128xf32>
    %7 = arith.mulf %4, %6 : vector<16x128xf32>
    %c0_4 = arith.constant 0 : index
    %c0_5 = arith.constant 0 : index
    %8 = vector.load %arg5[%c0_4, %c0_5] : memref<1x128xf32, #tpu.memory_space<vmem>>, vector<1x128xf32>
    %9 = vector.broadcast %8 : vector<1x128xf32> to vector<16x128xf32>
    %10 = arith.addf %7, %9 : vector<16x128xf32>
    %cst = arith.constant 0.000000e+00 : f32
    %11 = vector.broadcast %cst : f32 to vector<16x128xf32>
    %12 = arith.maximumf %10, %11 : vector<16x128xf32>
    %13 = arith.truncf %12 : vector<16x128xf32> to vector<16x128xbf16>
    %c0_6 = arith.constant 0 : index
    %c0_7 = arith.constant 0 : index
    %14 = vector.load %arg9[%c0_6, %c0_7] : memref<16x128xf32, #tpu.memory_space<vmem>>, vector<16x128xf32>
    %c0_8 = arith.constant 0 : index
    %c0_9 = arith.constant 0 : index
    %15 = vector.load %arg3[%c0_8, %c0_9] : memref<128x128xbf16, #tpu.memory_space<vmem>>, vector<128x128xbf16>
    %cst_10 = arith.constant dense<0.000000e+00> : vector<16x128xf32>
    %16 = tpu.matmul %13, %15, %cst_10 {dimension_numbers = #tpu.dot_dimension_numbers<[1], [0], [0], [1], [0, 0, 1, 1], [], []>} : vector<16x128xbf16>, vector<128x128xbf16>, vector<16x128xf32> -> vector<16x128xf32>
    %17 = arith.addf %14, %16 : vector<16x128xf32>
    %c0_11 = arith.constant 0 : index
    %c0_12 = arith.constant 0 : index
    %18 = vector.load %arg9[%c0_11, %c0_12] : memref<16x128xf32, #tpu.memory_space<vmem>>, vector<16x128xf32>
    tpu.vector_store %arg9[%c0_11, %c0_12], %17 {strides = array<i32>} : memref<16x128xf32, #tpu.memory_space<vmem>>, vector<16x128xf32>,
    %c7_i32 = arith.constant 7 : i32
    %19 = arith.cmpi eq, %arg1, %c7_i32 : i32
    %20 = arith.extui %19 : i1 to i32
    %c0_i32_13 = arith.constant 0 : i32
    %21 = arith.cmpi ne, %20, %c0_i32_13 : i32
    scf.if %21 {
      %c0_14 = arith.constant 0 : index
      %c0_15 = arith.constant 0 : index
      %22 = vector.load %arg9[%c0_14, %c0_15] : memref<16x128xf32, #tpu.memory_space<vmem>>, vector<16x128xf32>
      %c0_16 = arith.constant 0 : index
      %c0_17 = arith.constant 0 : index
      %23 = vector.load %arg6[%c0_16, %c0_17] : memref<1x128xf32, #tpu.memory_space<vmem>>, vector<1x128xf32>
      %24 = vector.broadcast %23 : vector<1x128xf32> to vector<16x128xf32>
      %25 = arith.mulf %22, %24 : vector<16x128xf32>
      %c0_18 = arith.constant 0 : index
      %c0_19 = arith.constant 0 : index
      %26 = vector.load %arg7[%c0_18, %c0_19] : memref<1x128xf32, #tpu.memory_space<vmem>>, vector<1x128xf32>
      %27 = vector.broadcast %26 : vector<1x128xf32> to vector<16x128xf32>
      %28 = arith.addf %25, %27 : vector<16x128xf32>
      %cst_20 = arith.constant 0.000000e+00 : f32
      %29 = vector.broadcast %cst_20 : f32 to vector<16x128xf32>
      %30 = arith.maximumf %28, %29 : vector<16x128xf32>
      %31 = arith.truncf %30 : vector<16x128xf32> to vector<16x128xbf16>
      %c0_21 = arith.constant 0 : index
      %c0_22 = arith.constant 0 : index
      %32 = vector.load %arg8[%c0_21, %c0_22] : memref<16x128xbf16, #tpu.memory_space<vmem>>, vector<16x128xbf16>
      tpu.vector_store %arg8[%c0_21, %c0_22], %31 {strides = array<i32>} : memref<16x128xbf16, #tpu.memory_space<vmem>>, vector<16x128xbf16>,
    } else {
    }
    return
  }
  func.func @transform_0(%arg0: i32, %arg1: i32) -> (i32, i32) {
    %c0_i32 = arith.constant 0 : i32
    return %arg0, %arg1 : i32, i32
  }
  func.func @transform_1(%arg0: i32, %arg1: i32) -> (i32, i32) {
    %c0_i32 = arith.constant 0 : i32
    %c0_i32_0 = arith.constant 0 : i32
    return %arg1, %c0_i32 : i32, i32
  }
  func.func @transform_2(%arg0: i32, %arg1: i32) -> (i32, i32) {
    %c0_i32 = arith.constant 0 : i32
    %c0_i32_0 = arith.constant 0 : i32
    return %c0_i32, %arg1 : i32, i32
  }
  func.func @transform_3(%arg0: i32, %arg1: i32) -> (i32, i32) {
    %c0_i32 = arith.constant 0 : i32
    %c0_i32_0 = arith.constant 0 : i32
    return %c0_i32, %arg1 : i32, i32
  }
  func.func @transform_4(%arg0: i32, %arg1: i32) -> (i32, i32) {
    %c0_i32 = arith.constant 0 : i32
    %c0_i32_0 = arith.constant 0 : i32
    %c0_i32_1 = arith.constant 0 : i32
    return %c0_i32, %c0_i32_0 : i32, i32
  }
  func.func @transform_5(%arg0: i32, %arg1: i32) -> (i32, i32) {
    %c0_i32 = arith.constant 0 : i32
    %c0_i32_0 = arith.constant 0 : i32
    %c0_i32_1 = arith.constant 0 : i32
    return %c0_i32, %c0_i32_0 : i32, i32
  }
  func.func @transform_6(%arg0: i32, %arg1: i32) -> (i32, i32) {
    %c0_i32 = arith.constant 0 : i32
    %c0_i32_0 = arith.constant 0 : i32
    return %arg0, %c0_i32 : i32, i32
  }
}

module attributes {stable_mosaic.version = 11 : i64} {
  func.func @kernel(%arg0: i32, %arg1: i32, %arg2: memref<16x128xbf16, #tpu.memory_space<vmem>>, %arg3: memref<128x512xbf16, #tpu.memory_space<vmem>>, %arg4: memref<1x128xf32, #tpu.memory_space<vmem>>, %arg5: memref<1x128xf32, #tpu.memory_space<vmem>>, %arg6: memref<16x512xbf16, #tpu.memory_space<vmem>>, %arg7: memref<16x512xf32, #tpu.memory_space<vmem>>) attributes {dimension_semantics = [#tpu.dimension_semantics<parallel>, #tpu.dimension_semantics<arbitrary>], iteration_bounds = array<i64: 1, 8>, scalar_prefetch = 0 : i64, scratch_operands = 1 : i64, tpu.core_type = #tpu.core_type<tc>, window_params = [{transform_indices = @transform_0, window_bounds = array<i64: 16, 128>}, {transform_indices = @transform_1, window_bounds = array<i64: 128, 512>}, {transform_indices = @transform_2, window_bounds = array<i64: 1, 128>}, {transform_indices = @transform_3, window_bounds = array<i64: 1, 128>}, {transform_indices = @transform_4, window_bounds = array<i64: 16, 512>}]} {
    %c0_i32 = arith.constant 0 : i32
    %0 = arith.cmpi eq, %arg1, %c0_i32 : i32
    %1 = arith.extui %0 : i1 to i32
    %c0_i32_0 = arith.constant 0 : i32
    %2 = arith.cmpi ne, %1, %c0_i32_0 : i32
    scf.if %2 {
      %cst_14 = arith.constant 0.000000e+00 : f32
      %22 = vector.broadcast %cst_14 : f32 to vector<16x512xf32>
      %c0_15 = arith.constant 0 : index
      %c0_16 = arith.constant 0 : index
      %23 = vector.load %arg7[%c0_15, %c0_16] : memref<16x512xf32, #tpu.memory_space<vmem>>, vector<16x512xf32>
      tpu.vector_store %arg7[%c0_15, %c0_16], %22 {strides = array<i32>} : memref<16x512xf32, #tpu.memory_space<vmem>>, vector<16x512xf32>,
    } else {
    }
    %c0 = arith.constant 0 : index
    %c0_1 = arith.constant 0 : index
    %3 = vector.load %arg2[%c0, %c0_1] : memref<16x128xbf16, #tpu.memory_space<vmem>>, vector<16x128xbf16>
    %4 = arith.extf %3 : vector<16x128xbf16> to vector<16x128xf32>
    %c0_2 = arith.constant 0 : index
    %c0_3 = arith.constant 0 : index
    %5 = vector.load %arg4[%c0_2, %c0_3] : memref<1x128xf32, #tpu.memory_space<vmem>>, vector<1x128xf32>
    %6 = vector.broadcast %5 : vector<1x128xf32> to vector<16x128xf32>
    %7 = arith.mulf %4, %6 : vector<16x128xf32>
    %c0_4 = arith.constant 0 : index
    %c0_5 = arith.constant 0 : index
    %8 = vector.load %arg5[%c0_4, %c0_5] : memref<1x128xf32, #tpu.memory_space<vmem>>, vector<1x128xf32>
    %9 = vector.broadcast %8 : vector<1x128xf32> to vector<16x128xf32>
    %10 = arith.addf %7, %9 : vector<16x128xf32>
    %cst = arith.constant 0.000000e+00 : f32
    %11 = vector.broadcast %cst : f32 to vector<16x128xf32>
    %12 = arith.maximumf %10, %11 : vector<16x128xf32>
    %13 = arith.truncf %12 : vector<16x128xf32> to vector<16x128xbf16>
    %c0_6 = arith.constant 0 : index
    %c0_7 = arith.constant 0 : index
    %14 = vector.load %arg7[%c0_6, %c0_7] : memref<16x512xf32, #tpu.memory_space<vmem>>, vector<16x512xf32>
    %c0_8 = arith.constant 0 : index
    %c0_9 = arith.constant 0 : index
    %15 = vector.load %arg3[%c0_8, %c0_9] : memref<128x512xbf16, #tpu.memory_space<vmem>>, vector<128x512xbf16>
    %cst_10 = arith.constant dense<0.000000e+00> : vector<16x512xf32>
    %16 = tpu.matmul %13, %15, %cst_10 {dimension_numbers = #tpu.dot_dimension_numbers<[1], [0], [0], [1], [0, 0, 1, 1], [], []>} : vector<16x128xbf16>, vector<128x512xbf16>, vector<16x512xf32> -> vector<16x512xf32>
    %17 = arith.addf %14, %16 : vector<16x512xf32>
    %c0_11 = arith.constant 0 : index
    %c0_12 = arith.constant 0 : index
    %18 = vector.load %arg7[%c0_11, %c0_12] : memref<16x512xf32, #tpu.memory_space<vmem>>, vector<16x512xf32>
    tpu.vector_store %arg7[%c0_11, %c0_12], %17 {strides = array<i32>} : memref<16x512xf32, #tpu.memory_space<vmem>>, vector<16x512xf32>,
    %c7_i32 = arith.constant 7 : i32
    %19 = arith.cmpi eq, %arg1, %c7_i32 : i32
    %20 = arith.extui %19 : i1 to i32
    %c0_i32_13 = arith.constant 0 : i32
    %21 = arith.cmpi ne, %20, %c0_i32_13 : i32
    scf.if %21 {
      %c0_14 = arith.constant 0 : index
      %c0_15 = arith.constant 0 : index
      %22 = vector.load %arg7[%c0_14, %c0_15] : memref<16x512xf32, #tpu.memory_space<vmem>>, vector<16x512xf32>
      %23 = arith.truncf %22 : vector<16x512xf32> to vector<16x512xbf16>
      %c0_16 = arith.constant 0 : index
      %c0_17 = arith.constant 0 : index
      %24 = vector.load %arg6[%c0_16, %c0_17] : memref<16x512xbf16, #tpu.memory_space<vmem>>, vector<16x512xbf16>
      tpu.vector_store %arg6[%c0_16, %c0_17], %23 {strides = array<i32>} : memref<16x512xbf16, #tpu.memory_space<vmem>>, vector<16x512xbf16>,
    } else {
    }
    return
  }
  func.func @transform_0(%arg0: i32, %arg1: i32) -> (i32, i32) {
    %c0_i32 = arith.constant 0 : i32
    return %arg0, %arg1 : i32, i32
  }
  func.func @transform_1(%arg0: i32, %arg1: i32) -> (i32, i32) {
    %c0_i32 = arith.constant 0 : i32
    %c0_i32_0 = arith.constant 0 : i32
    return %arg1, %c0_i32 : i32, i32
  }
  func.func @transform_2(%arg0: i32, %arg1: i32) -> (i32, i32) {
    %c0_i32 = arith.constant 0 : i32
    %c0_i32_0 = arith.constant 0 : i32
    return %c0_i32, %arg1 : i32, i32
  }
  func.func @transform_3(%arg0: i32, %arg1: i32) -> (i32, i32) {
    %c0_i32 = arith.constant 0 : i32
    %c0_i32_0 = arith.constant 0 : i32
    return %c0_i32, %arg1 : i32, i32
  }
  func.func @transform_4(%arg0: i32, %arg1: i32) -> (i32, i32) {
    %c0_i32 = arith.constant 0 : i32
    %c0_i32_0 = arith.constant 0 : i32
    return %arg0, %c0_i32 : i32, i32
  }
}

module attributes {stable_mosaic.version = 11 : i64} {
  func.func @_bn_relu_kernel(%arg0: i32, %arg1: memref<16x1024xbf16, #tpu.memory_space<vmem>>, %arg2: memref<1x1024xf32, #tpu.memory_space<vmem>>, %arg3: memref<1x1024xf32, #tpu.memory_space<vmem>>, %arg4: memref<16x1024xf32, #tpu.memory_space<vmem>>) attributes {dimension_semantics = [#tpu.dimension_semantics<parallel>], iteration_bounds = array<i64: 1>, scalar_prefetch = 0 : i64, scratch_operands = 0 : i64, tpu.core_type = #tpu.core_type<tc>, window_params = [{transform_indices = @transform_0, window_bounds = array<i64: 16, 1024>}, {pipeline_mode = #tpu.pipeline_mode<synchronous>, transform_indices = @transform_1, window_bounds = array<i64: 1, 1024>}, {pipeline_mode = #tpu.pipeline_mode<synchronous>, transform_indices = @transform_2, window_bounds = array<i64: 1, 1024>}, {transform_indices = @transform_3, window_bounds = array<i64: 16, 1024>}]} {
    %c0 = arith.constant 0 : index
    %c0_0 = arith.constant 0 : index
    %0 = vector.load %arg1[%c0, %c0_0] : memref<16x1024xbf16, #tpu.memory_space<vmem>>, vector<16x1024xbf16>
    %1 = arith.extf %0 : vector<16x1024xbf16> to vector<16x1024xf32>
    %c0_1 = arith.constant 0 : index
    %c0_2 = arith.constant 0 : index
    %2 = vector.load %arg2[%c0_1, %c0_2] : memref<1x1024xf32, #tpu.memory_space<vmem>>, vector<1x1024xf32>
    %3 = vector.broadcast %2 : vector<1x1024xf32> to vector<16x1024xf32>
    %4 = arith.mulf %1, %3 : vector<16x1024xf32>
    %c0_3 = arith.constant 0 : index
    %c0_4 = arith.constant 0 : index
    %5 = vector.load %arg3[%c0_3, %c0_4] : memref<1x1024xf32, #tpu.memory_space<vmem>>, vector<1x1024xf32>
    %6 = vector.broadcast %5 : vector<1x1024xf32> to vector<16x1024xf32>
    %7 = arith.addf %4, %6 : vector<16x1024xf32>
    %cst = arith.constant 0.000000e+00 : f32
    %8 = vector.broadcast %cst : f32 to vector<16x1024xf32>
    %9 = arith.maximumf %7, %8 : vector<16x1024xf32>
    %c0_5 = arith.constant 0 : index
    %c0_6 = arith.constant 0 : index
    %10 = vector.load %arg4[%c0_5, %c0_6] : memref<16x1024xf32, #tpu.memory_space<vmem>>, vector<16x1024xf32>
    tpu.vector_store %arg4[%c0_5, %c0_6], %9 {strides = array<i32>} : memref<16x1024xf32, #tpu.memory_space<vmem>>, vector<16x1024xf32>,
    return
  }
  func.func @transform_0(%arg0: i32) -> (i32, i32) {
    %c0_i32 = arith.constant 0 : i32
    %c0_i32_0 = arith.constant 0 : i32
    return %arg0, %c0_i32 : i32, i32
  }
  func.func @transform_1(%arg0: i32) -> (i32, i32) {
    %c0_i32 = arith.constant 0 : i32
    %c0_i32_0 = arith.constant 0 : i32
    %c0_i32_1 = arith.constant 0 : i32
    return %c0_i32, %c0_i32_0 : i32, i32
  }
  func.func @transform_2(%arg0: i32) -> (i32, i32) {
    %c0_i32 = arith.constant 0 : i32
    %c0_i32_0 = arith.constant 0 : i32
    %c0_i32_1 = arith.constant 0 : i32
    return %c0_i32, %c0_i32_0 : i32, i32
  }
  func.func @transform_3(%arg0: i32) -> (i32, i32) {
    %c0_i32 = arith.constant 0 : i32
    %c0_i32_0 = arith.constant 0 : i32
    return %arg0, %c0_i32 : i32, i32
  }
}

module attributes {stable_mosaic.version = 11 : i64} {
  func.func @kernel(%arg0: i32, %arg1: i32, %arg2: memref<16x128xbf16, #tpu.memory_space<vmem>>, %arg3: memref<128x128xbf16, #tpu.memory_space<vmem>>, %arg4: memref<1x128xf32, #tpu.memory_space<vmem>>, %arg5: memref<1x128xf32, #tpu.memory_space<vmem>>, %arg6: memref<16x128xf32, #tpu.memory_space<vmem>>, %arg7: memref<16x128xf32, #tpu.memory_space<vmem>>) attributes {dimension_semantics = [#tpu.dimension_semantics<parallel>, #tpu.dimension_semantics<arbitrary>], iteration_bounds = array<i64: 1, 8>, scalar_prefetch = 0 : i64, scratch_operands = 1 : i64, tpu.core_type = #tpu.core_type<tc>, window_params = [{transform_indices = @transform_0, window_bounds = array<i64: 16, 128>}, {transform_indices = @transform_1, window_bounds = array<i64: 128, 128>}, {pipeline_mode = #tpu.pipeline_mode<synchronous>, transform_indices = @transform_2, window_bounds = array<i64: 1, 128>}, {pipeline_mode = #tpu.pipeline_mode<synchronous>, transform_indices = @transform_3, window_bounds = array<i64: 1, 128>}, {transform_indices = @transform_4, window_bounds = array<i64: 16, 128>}]} {
    %c0_i32 = arith.constant 0 : i32
    %0 = arith.cmpi eq, %arg1, %c0_i32 : i32
    %1 = arith.extui %0 : i1 to i32
    %c0_i32_0 = arith.constant 0 : i32
    %2 = arith.cmpi ne, %1, %c0_i32_0 : i32
    scf.if %2 {
      %cst_9 = arith.constant 0.000000e+00 : f32
      %12 = vector.broadcast %cst_9 : f32 to vector<16x128xf32>
      %c0_10 = arith.constant 0 : index
      %c0_11 = arith.constant 0 : index
      %13 = vector.load %arg7[%c0_10, %c0_11] : memref<16x128xf32, #tpu.memory_space<vmem>>, vector<16x128xf32>
      tpu.vector_store %arg7[%c0_10, %c0_11], %12 {strides = array<i32>} : memref<16x128xf32, #tpu.memory_space<vmem>>, vector<16x128xf32>,
    } else {
    }
    %c0 = arith.constant 0 : index
    %c0_1 = arith.constant 0 : index
    %3 = vector.load %arg2[%c0, %c0_1] : memref<16x128xbf16, #tpu.memory_space<vmem>>, vector<16x128xbf16>
    %c0_2 = arith.constant 0 : index
    %c0_3 = arith.constant 0 : index
    %4 = vector.load %arg7[%c0_2, %c0_3] : memref<16x128xf32, #tpu.memory_space<vmem>>, vector<16x128xf32>
    %c0_4 = arith.constant 0 : index
    %c0_5 = arith.constant 0 : index
    %5 = vector.load %arg3[%c0_4, %c0_5] : memref<128x128xbf16, #tpu.memory_space<vmem>>, vector<128x128xbf16>
    %cst = arith.constant dense<0.000000e+00> : vector<16x128xf32>
    %6 = tpu.matmul %3, %5, %cst {dimension_numbers = #tpu.dot_dimension_numbers<[1], [0], [0], [1], [0, 0, 1, 1], [], []>} : vector<16x128xbf16>, vector<128x128xbf16>, vector<16x128xf32> -> vector<16x128xf32>
    %7 = arith.addf %4, %6 : vector<16x128xf32>
    %c0_6 = arith.constant 0 : index
    %c0_7 = arith.constant 0 : index
    %8 = vector.load %arg7[%c0_6, %c0_7] : memref<16x128xf32, #tpu.memory_space<vmem>>, vector<16x128xf32>
    tpu.vector_store %arg7[%c0_6, %c0_7], %7 {strides = array<i32>} : memref<16x128xf32, #tpu.memory_space<vmem>>, vector<16x128xf32>,
    %c7_i32 = arith.constant 7 : i32
    %9 = arith.cmpi eq, %arg1, %c7_i32 : i32
    %10 = arith.extui %9 : i1 to i32
    %c0_i32_8 = arith.constant 0 : i32
    %11 = arith.cmpi ne, %10, %c0_i32_8 : i32
    scf.if %11 {
      %c0_9 = arith.constant 0 : index
      %c0_10 = arith.constant 0 : index
      %12 = vector.load %arg7[%c0_9, %c0_10] : memref<16x128xf32, #tpu.memory_space<vmem>>, vector<16x128xf32>
      %c0_11 = arith.constant 0 : index
      %c0_12 = arith.constant 0 : index
      %13 = vector.load %arg4[%c0_11, %c0_12] : memref<1x128xf32, #tpu.memory_space<vmem>>, vector<1x128xf32>
      %14 = vector.broadcast %13 : vector<1x128xf32> to vector<16x128xf32>
      %15 = arith.mulf %12, %14 : vector<16x128xf32>
      %c0_13 = arith.constant 0 : index
      %c0_14 = arith.constant 0 : index
      %16 = vector.load %arg5[%c0_13, %c0_14] : memref<1x128xf32, #tpu.memory_space<vmem>>, vector<1x128xf32>
      %17 = vector.broadcast %16 : vector<1x128xf32> to vector<16x128xf32>
      %18 = arith.addf %15, %17 : vector<16x128xf32>
      %cst_15 = arith.constant 0.000000e+00 : f32
      %19 = vector.broadcast %cst_15 : f32 to vector<16x128xf32>
      %20 = arith.subf %19, %18 : vector<16x128xf32>
      %21 = math.exp %20 : vector<16x128xf32>
      %cst_16 = arith.constant 1.000000e+00 : f32
      %22 = vector.broadcast %cst_16 : f32 to vector<16x128xf32>
      %23 = arith.addf %22, %21 : vector<16x128xf32>
      %cst_17 = arith.constant 1.000000e+00 : f32
      %24 = vector.broadcast %cst_17 : f32 to vector<16x128xf32>
      %25 = arith.divf %24, %23 : vector<16x128xf32>
      %c0_18 = arith.constant 0 : index
      %c0_19 = arith.constant 0 : index
      %26 = vector.load %arg6[%c0_18, %c0_19] : memref<16x128xf32, #tpu.memory_space<vmem>>, vector<16x128xf32>
      tpu.vector_store %arg6[%c0_18, %c0_19], %25 {strides = array<i32>} : memref<16x128xf32, #tpu.memory_space<vmem>>, vector<16x128xf32>,
    } else {
    }
    return
  }
  func.func @transform_0(%arg0: i32, %arg1: i32) -> (i32, i32) {
    %c0_i32 = arith.constant 0 : i32
    return %arg0, %arg1 : i32, i32
  }
  func.func @transform_1(%arg0: i32, %arg1: i32) -> (i32, i32) {
    %c0_i32 = arith.constant 0 : i32
    %c0_i32_0 = arith.constant 0 : i32
    return %arg1, %c0_i32 : i32, i32
  }
  func.func @transform_2(%arg0: i32, %arg1: i32) -> (i32, i32) {
    %c0_i32 = arith.constant 0 : i32
    %c0_i32_0 = arith.constant 0 : i32
    %c0_i32_1 = arith.constant 0 : i32
    return %c0_i32, %c0_i32_0 : i32, i32
  }
  func.func @transform_3(%arg0: i32, %arg1: i32) -> (i32, i32) {
    %c0_i32 = arith.constant 0 : i32
    %c0_i32_0 = arith.constant 0 : i32
    %c0_i32_1 = arith.constant 0 : i32
    return %c0_i32, %c0_i32_0 : i32, i32
  }
  func.func @transform_4(%arg0: i32, %arg1: i32) -> (i32, i32) {
    %c0_i32 = arith.constant 0 : i32
    %c0_i32_0 = arith.constant 0 : i32
    return %arg0, %c0_i32 : i32, i32
  }
}

</mosaic_0001>

<bundles_post_ra>
// kernel: densenet121_forward.123
= control target key start
LH: loop header
LB: loop body
LE: loop exit
PB: predicated region body
PF: predicated region fallthrough
CT: control target
= control target key end

     0   :  { %s895_s1 = inlined_call_operand.vmem [shape: bf16[128,128], index: 1, kind: input, shape index: {}]   ;;  %s896_s0 = inlined_call_operand.vmem [shape: bf16[128,128], index: 0, kind: input, shape index: {}]   ;;  %s897_s2 = inlined_call_operand.vmem [shape: f32[1,128], index: 2, kind: input, shape index: {}]   ;;  %s898_s3 = inlined_call_operand.vmem [shape: f32[1,128], index: 3, kind: input, shape index: {}]   ;;  %s899_s4 = inlined_call_operand.vmem [shape: f32[1,128], index: 4, kind: input, shape index: {}]   ;;  %s900_s5 = inlined_call_operand.vmem [shape: f32[1,128], index: 5, kind: input, shape index: {}]   ;;  %s901_s6 = inlined_call_operand.vmem [shape: bf16[128,128], index: 6, kind: output, shape index: {}]  }
   0x1   :  { %v714_v0 = vld [vmem:[%s895_s1] sm:$0xff]   ;;  %v715_v1 = vld [vmem:[%s895_s1 + $0x8] sm:$0xff]   ;;  %v716_v2 = vld [vmem:[%s895_s1 + $0x10] sm:$0xff]  }
   0x2   :  { %666 = vmatprep.subr.bf16.mxu0 %v714_v0  ;;  %698 = vmatprep.subr.bf16.mxu1 %v714_v0  ;;  %v717_v3 = vld [vmem:[%s895_s1 + $0x18] sm:$0xff]   ;;  %v565_v4 = vld [vmem:[%s896_s0] sm:$0xff]   ;;  %v636_v9 = vld [vmem:[%s896_s0 + $0x8] sm:$0xff]  }
   0x3   :  { %667 = vmatpush3.bf16.msra.mxu0 %v714_v0  ;;  %706 = vmatpush3.bf16.msra.mxu1 %v714_v0  ;;  %v775_v5 = vld [vmem:[%s897_s2] ss:$0 sm:$0xff]  ;;  %v566_v6 = vunpack.c.l.bf16 %v565_v4  ;;  %v567_v7 = vunpack.c.h.bf16 %v565_v4  ;;  %v640_v13 = vld [vmem:[%s896_s0 + $0x28] sm:$0xff]   ;;  %v637_v16 = vld [vmem:[%s896_s0 + $0x10] sm:$0xff]   ;;  %v570_v20 = vunpack.c.l.bf16 %v636_v9  ;;  %v571_v21 = vunpack.c.h.bf16 %v636_v9 }
   0x4   :  { %668 = vmatprep.subr.bf16.mxu0 %v715_v1  ;;  %699 = vmatprep.subr.bf16.mxu1 %v715_v1  ;;  %v639_v8 = vld [vmem:[%s896_s0 + $0x20] sm:$0xff]   ;;  %v586_v24 = vunpack.c.l.bf16 %v640_v13  ;;  %v587_v25 = vunpack.c.h.bf16 %v640_v13  ;;  %v574_v28 = vunpack.c.l.bf16 %v637_v16  ;;  %v641_v31 = vld [vmem:[%s896_s0 + $0x30] sm:$0xff]   ;;  %v719_v32 = vld [vmem:[%s895_s1 + $0x28] sm:$0xff]   ;;  %v575_v40 = vunpack.c.h.bf16 %v637_v16 }
   0x5   :  { %v786_v10 = vld [vmem:[%s898_s3] ss:$0 sm:$0xff]  ;;  %v582_v11 = vunpack.c.l.bf16 %v639_v8  ;;  %v583_v12 = vunpack.c.h.bf16 %v639_v8  ;;  %v83_v14 = vmul.f32 %v566_v6, %v775_v5  ;;  %v84_v15 = vmul.f32 %v567_v7, %v775_v5  ;;  %v638_v44 = vld [vmem:[%s896_s0 + $0x18] sm:$0xff]   ;;  %v720_v48 = vld [vmem:[%s895_s1 + $0x30] sm:$0xff]  }
   0x6   :  { %v718_v17 = vld [vmem:[%s895_s1 + $0x20] sm:$0xff]   ;;  %v85_v35 = vmul.f32 %v570_v20, %v775_v5  ;;  %v86_v36 = vmul.f32 %v571_v21, %v775_v5  ;;  %v93_v38 = vmul.f32 %v586_v24, %v775_v5  ;;  %v94_v39 = vmul.f32 %v587_v25, %v775_v5  ;;  %v642_v47 = vld [vmem:[%s896_s0 + $0x38] sm:$0xff]  }
   0x7   :  { %669 = vmatpush3.bf16.msra.mxu0 %v715_v1  ;;  %707 = vmatpush3.bf16.msra.mxu1 %v715_v1  ;;  %v91_v18 = vmul.f32 %v582_v11, %v775_v5  ;;  %v92_v19 = vmul.f32 %v583_v12, %v775_v5  ;;  %v106_v22 = vadd.f32 %v786_v10, %v83_v14  ;;  %v590_v43 = vunpack.c.l.bf16 %v641_v31  ;;  %v721_v63 = vld [vmem:[%s895_s1 + $0x38] sm:$0xff]  }
   0x8   :  { %670 = vmatprep.subr.bf16.mxu0 %v716_v2  ;;  %700 = vmatprep.subr.bf16.mxu1 %v716_v2  ;;  %v107_v23 = vadd.f32 %v786_v10, %v84_v15  ;;  %v87_v42 = vmul.f32 %v574_v28, %v775_v5  ;;  %v88_v45 = vmul.f32 %v575_v40, %v775_v5  ;;  %v591_v46 = vunpack.c.h.bf16 %v641_v31  ;;  %v853_v28 = vld [vmem:[%s900_s5] ss:$0 sm:$0xff] }
   0x9   :  { %v114_v26 = vadd.f32 %v786_v10, %v91_v18  ;;  %v115_v27 = vadd.f32 %v786_v10, %v92_v19  ;;  %v122_v29 = vmax.f32 %v106_v22, 0.0  ;;  %v108_v49 = vadd.f32 %v786_v10, %v85_v35 }
   0xa   :  { %v123_v30 = vmax.f32 %v107_v23, 0.0  ;;  %v109_v50 = vadd.f32 %v786_v10, %v86_v36  ;;  %v95_v51 = vmul.f32 %v590_v43, %v775_v5  ;;  %v116_v52 = vadd.f32 %v786_v10, %v93_v38 }
   0xb   :  { %671 = vmatpush3.bf16.msra.mxu0 %v716_v2  ;;  %708 = vmatpush3.bf16.msra.mxu1 %v716_v2  ;;  %v130_v33 = vmax.f32 %v114_v26, 0.0  ;;  %v131_v34 = vmax.f32 %v115_v27, 0.0  ;;  %v117_v53 = vadd.f32 %v786_v10, %v94_v39  ;;  %v96_v54 = vmul.f32 %v591_v46, %v775_v5 }
   0xc   :  { %672 = vmatprep.subr.bf16.mxu0 %v717_v3  ;;  %701 = vmatprep.subr.bf16.mxu1 %v717_v3  ;;  %v138_v37 = vpack.c.bf16 %v123_v30, %v122_v29  ;;  %v578_v55 = vunpack.c.l.bf16 %v638_v44  ;;  %v110_v56 = vadd.f32 %v786_v10, %v87_v42  ;;  %v579_v57 = vunpack.c.h.bf16 %v638_v44 }
   0xd   :  { %v142_v41 = vpack.c.bf16 %v131_v34, %v130_v33  ;;  %v594_v58 = vunpack.c.l.bf16 %v642_v47  ;;  %v595_v59 = vunpack.c.h.bf16 %v642_v47  ;;  %v111_v60 = vadd.f32 %v786_v10, %v88_v45 }
   0xe   :  { %682 = vmatprep.mubr.bf16.mxu0 %v138_v37  ;;  %v118_v61 = vadd.f32 %v786_v10, %v95_v51  ;;  %v119_v62 = vadd.f32 %v786_v10, %v96_v54  ;;  %v124_v0 = vmax.f32 %v108_v49, 0.0  ;;  %v125_v1 = vmax.f32 %v109_v50, 0.0 }
   0xf   :  { %673 = vmatpush3.bf16.msra.mxu0 %v717_v3  ;;  %709 = vmatpush3.bf16.msra.mxu1 %v717_v3  ;;  %v132_v2 = vmax.f32 %v116_v52, 0.0  ;;  %v133_v3 = vmax.f32 %v117_v53, 0.0  ;;  %v89_v4 = vmul.f32 %v578_v55, %v775_v5  ;;  %v90_v6 = vmul.f32 %v579_v57, %v775_v5 }
  0x10   :  { %674 = vmatprep.subr.bf16.mxu0 %v718_v17  ;;  %702 = vmatprep.subr.bf16.mxu1 %v718_v17  ;;  %v97_v7 = vmul.f32 %v594_v58, %v775_v5  ;;  %v98_v8 = vmul.f32 %v595_v59, %v775_v5  ;;  %v126_v9 = vmax.f32 %v110_v56, 0.0  ;;  %v127_v11 = vmax.f32 %v111_v60, 0.0 }
  0x11   :  { %690 = vmatprep.mubr.bf16.mxu1 %v142_v41  ;;  %v134_v12 = vmax.f32 %v118_v61, 0.0  ;;  %v135_v13 = vmax.f32 %v119_v62, 0.0  ;;  %v139_v14 = vpack.c.bf16 %v125_v1, %v124_v0  ;;  %v143_v15 = vpack.c.bf16 %v133_v3, %v132_v2 }
  0x12   :  { %v112_v16 = vadd.f32 %v786_v10, %v89_v4  ;;  %v120_v18 = vadd.f32 %v786_v10, %v97_v7  ;;  %v121_v19 = vadd.f32 %v786_v10, %v98_v8  ;;  %v140_v5 = vpack.c.bf16 %v127_v11, %v126_v9 }
  0x13   :  { %675 = vmatpush3.bf16.msra.mxu0 %v718_v17  ;;  %710 = vmatpush3.bf16.msra.mxu1 %v718_v17  ;;  %v113_v17 = vadd.f32 %v786_v10, %v90_v6  ;;  %v144_v20 = vpack.c.bf16 %v135_v13, %v134_v12  ;;  %v530_v10 = vld [vmem:[%s899_s4] ss:$0 sm:$0xff] }
  0x14   :  { %676 = vmatprep.subr.bf16.mxu0 %v719_v32  ;;  %703 = vmatprep.subr.bf16.mxu1 %v719_v32  ;;  %v128_v21 = vmax.f32 %v112_v16, 0.0  ;;  %v136_v23 = vmax.f32 %v120_v18, 0.0  ;;  %v137_v24 = vmax.f32 %v121_v19, 0.0 }
  0x15   :  { %v129_v22 = vmax.f32 %v113_v17, 0.0 }
  0x16   :  { %v145_v26 = vpack.c.bf16 %v137_v24, %v136_v23 }
  0x17   :  { %677 = vmatpush3.bf16.msra.mxu0 %v719_v32  ;;  %711 = vmatpush3.bf16.msra.mxu1 %v719_v32  ;;  %v141_v25 = vpack.c.bf16 %v129_v22, %v128_v21 }
  0x18   :  { %678 = vmatprep.subr.bf16.mxu0 %v720_v48  ;;  %704 = vmatprep.subr.bf16.mxu1 %v720_v48 }
  0x1b   :  { %679 = vmatpush3.bf16.msra.mxu0 %v720_v48  ;;  %712 = vmatpush3.bf16.msra.mxu1 %v720_v48 }
  0x1c   :  { %680 = vmatprep.subr.bf16.mxu0 %v721_v63  ;;  %705 = vmatprep.subr.bf16.mxu1 %v721_v63 }
  0x1f   :  { %681 = vmatpush3.bf16.msra.mxu0 %v721_v63  ;;  %713 = vmatpush3.bf16.msra.mxu1 %v721_v63 }
  0x22   :  { %683 = vmatmul.mubr.bf16.vlgmr.msra.gmra.mrb[0].mxu0 %v139_v14  ;;  %691 = vmatmul.mubr.bf16.vlgmr.msra.gmra.mrb[0].mxu1 %v143_v15 }
  0x23   :  { %686 = vmatprep.mubr.bf16.mxu0 %v140_v5  ;;  %694 = vmatprep.mubr.bf16.mxu1 %v144_v20 }
  0x2a   :  { %687 = vmatmul.mubr.bf16.gmra.mrb[4].mxu0 %v141_v25  ;;  %695 = vmatmul.mubr.bf16.gmra.mrb[4].mxu1 %v145_v26 }
  0xf5   :  { %v684_v27 = vpop.f32.mrb[0].mxu0  ;;  %v692_v29 = vpop.f32.mrb[0].mxu1 }
  0xf6   :  { %v383_v30 = vmul.f32 %v684_v27, %v530_v10  ;;  %v391_v31 = vmul.f32 %v692_v29, %v530_v10  ;;  %v260_v32 = vpop.f32.mrb[1].mxu0  ;;  %v292_v33 = vpop.f32.mrb[1].mxu1 }
  0xf7   :  { %v381_v34 = vmul.f32 %v530_v10, %v260_v32  ;;  %v389_v35 = vmul.f32 %v530_v10, %v292_v33  ;;  %v685_v36 = vpop.f32.mrb[2].mxu0  ;;  %v693_v37 = vpop.f32.mrb[2].mxu1 }
  0xf8   :  { %v406_v38 = vadd.f32 %v853_v28, %v383_v30  ;;  %v414_v39 = vadd.f32 %v853_v28, %v391_v31  ;;  %v384_v40 = vmul.f32 %v685_v36, %v530_v10  ;;  %v392_v41 = vmul.f32 %v693_v37, %v530_v10  ;;  %v263_v42 = vpop.f32.mrb[3].mxu0  ;;  %v295_v43 = vpop.f32.mrb[3].mxu1 }
  0xf9   :  { %v404_v44 = vadd.f32 %v853_v28, %v381_v34  ;;  %v412_v45 = vadd.f32 %v853_v28, %v389_v35  ;;  %v382_v46 = vmul.f32 %v530_v10, %v263_v42  ;;  %v390_v47 = vmul.f32 %v530_v10, %v295_v43 }
  0xfa   :  { %v407_v48 = vadd.f32 %v853_v28, %v384_v40  ;;  %v415_v49 = vadd.f32 %v853_v28, %v392_v41  ;;  %v422_v52 = vmax.f32 %v406_v38, 0.0  ;;  %v430_v53 = vmax.f32 %v414_v39, 0.0 }
  0xfb   :  { %v405_v50 = vadd.f32 %v853_v28, %v382_v46  ;;  %v413_v51 = vadd.f32 %v853_v28, %v390_v47  ;;  %v420_v56 = vmax.f32 %v404_v44, 0.0  ;;  %v428_v57 = vmax.f32 %v412_v45, 0.0 }
  0xfc   :  { %v423_v54 = vmax.f32 %v407_v48, 0.0  ;;  %v431_v55 = vmax.f32 %v415_v49, 0.0 }
  0xfd   :  { %v421_v58 = vmax.f32 %v405_v50, 0.0  ;;  %v429_v59 = vmax.f32 %v413_v51, 0.0  ;;  %v688_v60 = vpop.f32.mrb[4].mxu0  ;;  %v696_v61 = vpop.f32.mrb[4].mxu1 }
  0xfe   :  { %v604_v62 = vpack.c.bf16 %v423_v54, %v422_v52  ;;  %v624_v63 = vpack.c.bf16 %v431_v55, %v430_v53  ;;  %v387_v0 = vmul.f32 %v688_v60, %v530_v10  ;;  %v395_v1 = vmul.f32 %v696_v61, %v530_v10  ;;  %v276_v2 = vpop.f32.mrb[5].mxu0  ;;  %v308_v3 = vpop.f32.mrb[5].mxu1 }
  0xff   :  { %v599_v4 = vpack.c.bf16 %v421_v58, %v420_v56  ;;  %v619_v6 = vpack.c.bf16 %v429_v59, %v428_v57  ;;  %v385_v7 = vmul.f32 %v530_v10, %v276_v2  ;;  %v393_v8 = vmul.f32 %v530_v10, %v308_v3  ;;  %v689_v9 = vpop.f32.mrb[6].mxu0  ;;  %v697_v11 = vpop.f32.mrb[6].mxu1 }
 0x100   :  { %643 = vst [vmem:[%s901_s6 + $0x8] sm:$0xff] %v604_v62   ;;  %647 = vst [vmem:[%s901_s6 + $0x28] sm:$0xff] %v624_v63   ;;  %v410_v12 = vadd.f32 %v853_v28, %v387_v0  ;;  %v418_v13 = vadd.f32 %v853_v28, %v395_v1  ;;  %v388_v14 = vmul.f32 %v689_v9, %v530_v10  ;;  %v279_v16 = vpop.f32.mrb[7].mxu0  ;;  %v311_v17 = vpop.f32.mrb[7].mxu1 }
 0x101   :  { %v396_v15 = vmul.f32 %v697_v11, %v530_v10  ;;  %600 = vst [vmem:[%s901_s6] sm:$0xff] %v599_v4   ;;  %646 = vst [vmem:[%s901_s6 + $0x20] sm:$0xff] %v619_v6   ;;  %v408_v18 = vadd.f32 %v853_v28, %v385_v7  ;;  %v416_v19 = vadd.f32 %v853_v28, %v393_v8 }
 0x102   :  { %v386_v5 = vmul.f32 %v530_v10, %v279_v16  ;;  %v394_v20 = vmul.f32 %v530_v10, %v311_v17  ;;  %v411_v21 = vadd.f32 %v853_v28, %v388_v14  ;;  %v426_v25 = vmax.f32 %v410_v12, 0.0 }
 0x103   :  { %v419_v22 = vadd.f32 %v853_v28, %v396_v15  ;;  %v434_v26 = vmax.f32 %v418_v13, 0.0  ;;  %v424_v30 = vmax.f32 %v408_v18, 0.0  ;;  %v432_v31 = vmax.f32 %v416_v19, 0.0 }
 0x104   :  { %v409_v23 = vadd.f32 %v853_v28, %v386_v5  ;;  %v417_v24 = vadd.f32 %v853_v28, %v394_v20  ;;  %v427_v27 = vmax.f32 %v411_v21, 0.0 }
 0x105   :  { %v435_v29 = vmax.f32 %v419_v22, 0.0 }
 0x106   :  { %v425_v32 = vmax.f32 %v409_v23, 0.0  ;;  %v433_v33 = vmax.f32 %v417_v24, 0.0  ;;  %v614_v34 = vpack.c.bf16 %v427_v27, %v426_v25 }
 0x107   :  { %v634_v35 = vpack.c.bf16 %v435_v29, %v434_v26 }
 0x108   :  { %v609_v36 = vpack.c.bf16 %v425_v32, %v424_v30  ;;  %v629_v10 = vpack.c.bf16 %v433_v33, %v432_v31  ;;  %645 = vst [vmem:[%s901_s6 + $0x18] sm:$0xff] %v614_v34  }
 0x109   :  { %649 = vst [vmem:[%s901_s6 + $0x38] sm:$0xff] %v634_v35  }
 0x10a   :  { %644 = vst [vmem:[%s901_s6 + $0x10] sm:$0xff] %v609_v36   ;;  %648 = vst [vmem:[%s901_s6 + $0x30] sm:$0xff] %v629_v10  }

// kernel: densenet121_forward.122
= control target key start
LH: loop header
LB: loop body
LE: loop exit
PB: predicated region body
PF: predicated region fallthrough
CT: control target
= control target key end

     0   :  { %s2737_s15 = smov 0   ;;  %s2739_s16 = smov 0   ;;  %s3278_s0 = inlined_call_operand.vmem [shape: bf16[512,256], index: 0, kind: input, shape index: {}]   ;;  %s3279_s1 = inlined_call_operand.vmem [shape: bf16[256,128], index: 1, kind: input, shape index: {}]   ;;  %s3280_s2 = inlined_call_operand.vmem [shape: f32[1,128], index: 2, kind: input, shape index: {}]   ;;  %s3281_s3 = inlined_call_operand.vmem [shape: f32[1,128], index: 3, kind: input, shape index: {}]   ;;  %s3282_s4 = inlined_call_operand.vmem [shape: bf16[512,128], index: 4, kind: output, shape index: {}]  }
   0x1   :  { %s2741_s17 = smov 0   ;;  %s2743_s18 = smov 0  }
   0x2   :  { %s2745_s19 = smov 0  }
   0x3 LB: > { %s23_s20 = sadd.s32 1, %s2705_s18  ;;  %p42_p1 = scmp.ne.s32.totalorder %s2697_s16, %s2693_s15  ;;  %s2709_s19 = sphi %s2745_s19, %s14_s19   ;;  %s2705_s18 = sphi %s2743_s18, %s3286_s18   ;;  %s2701_s17 = sphi %s2741_s17, %s3285_s17   ;;  %s2697_s16 = sphi %s2739_s16, %s3284_s16   ;;  %s2693_s15 = sphi %s2737_s15, %s3283_s15  }
   0x4   : > { %p24_p0 = scmp.ge.s32.totalorder %s23_s20, 2  ;;  %p43_p2 = scmp.eq.s32.totalorder %s2709_s19, 0 }
   0x5   : > { %s35_s22 = sadd.s32 1, %s2697_s16  ;;  %p2080_p5 = scmp.ge.s32.totalorder %s2709_s19, 2 }
   0x6   : > { %s3288_s20 = smov (%p24_p0, %s23_s20), 0  ;;  %p44_p3 = por %p43_p2, %p42_p1 }
   0x7   : > { %s31_s21 = ssub.s32 %s2705_s18, %s3288_s20  ;;  %168 = sbr.rel (%p2080_p5) target bundleno = 60 (0x3c), region = 24 }
   0x8   : > { %p33_p4 = scmp.eq.s32.totalorder %s31_s21, 0 }
   0xa   : > { %s2772_s23 = scalar_select %p33_p4, %s2697_s16, %s35_s22  }
   0xe   : > { %171 = sbr.rel (!%p44_p3) target bundleno = 60 (0x3c), region = 28  ;;  %s173_s24 = sand.u32 (%p44_p3), 1, %s2697_s16  }
   0xf   : > { %s2082_s25 = sshll.u32 (%p44_p3), %s2705_s18, 2  ;;  %s2081_s26 = sshll.u32 (%p44_p3), %s173_s24, 8 }
  0x10   : > { %s2780_s29 = scalar_lea.vmem (%p44_p3), %s3278_s0, %s2082_s25  ;;  %s2784_s30 = scalar_lea.vmem (%p44_p3), [#allocation3], %s2081_s26 }
  0x11   : > { %v196_v0 = vld [vmem:[%s2780_s29] sm:$0xf] (%p44_p3)  ;;  %v198_v1 = vld [vmem:[%s2780_s29 + $0x8] sm:$0xf] (%p44_p3)  ;;  %v200_v2 = vld [vmem:[%s2780_s29 + $0x10] sm:$0xf] (%p44_p3) }
  0x12   : > { %197 = vst [vmem:[%s2784_s30] sm:$0xf] (%p44_p3), %v196_v0  ;;  %199 = vst [vmem:[%s2784_s30 + $0x4] sm:$0xf] (%p44_p3), %v198_v1  ;;  %v202_v3 = vld [vmem:[%s2780_s29 + $0x18] sm:$0xf] (%p44_p3) }
  0x13   : > { %v204_v4 = vld [vmem:[%s2780_s29 + $0x20] sm:$0xf] (%p44_p3)  ;;  %201 = vst [vmem:[%s2784_s30 + $0x8] sm:$0xf] (%p44_p3), %v200_v2  ;;  %203 = vst [vmem:[%s2784_s30 + $0xc] sm:$0xf] (%p44_p3), %v202_v3 }
  0x14   : > { %205 = vst [vmem:[%s2784_s30 + $0x10] sm:$0xf] (%p44_p3), %v204_v4  ;;  %v206_v5 = vld [vmem:[%s2780_s29 + $0x28] sm:$0xf] (%p44_p3)  ;;  %v208_v6 = vld [vmem:[%s2780_s29 + $0x30] sm:$0xf] (%p44_p3) }
  0x15   : > { %v210_v7 = vld [vmem:[%s2780_s29 + $0x38] sm:$0xf]  ;;  %207 = vst [vmem:[%s2784_s30 + $0x14] sm:$0xf] %v206_v5  ;;  %209 = vst [vmem:[%s2784_s30 + $0x18] sm:$0xf] %v208_v6 }
  0x16   : > { %211 = vst [vmem:[%s2784_s30 + $0x1c] sm:$0xf] %v210_v7  ;;  %v212_v8 = vld [vmem:[%s2780_s29 + $0x40] sm:$0xf]  ;;  %v214_v9 = vld [vmem:[%s2780_s29 + $0x48] sm:$0xf] }
  0x17   : > { %v216_v10 = vld [vmem:[%s2780_s29 + $0x50] sm:$0xf]  ;;  %213 = vst [vmem:[%s2784_s30 + $0x20] sm:$0xf] %v212_v8  ;;  %215 = vst [vmem:[%s2784_s30 + $0x24] sm:$0xf] %v214_v9 }
  0x18   : > { %217 = vst [vmem:[%s2784_s30 + $0x28] sm:$0xf] %v216_v10  ;;  %v218_v11 = vld [vmem:[%s2780_s29 + $0x58] sm:$0xf]  ;;  %v220_v12 = vld [vmem:[%s2780_s29 + $0x60] sm:$0xf] }
  0x19   : > { %v222_v13 = vld [vmem:[%s2780_s29 + $0x68] sm:$0xf]  ;;  %219 = vst [vmem:[%s2784_s30 + $0x2c] sm:$0xf] %v218_v11  ;;  %221 = vst [vmem:[%s2784_s30 + $0x30] sm:$0xf] %v220_v12 }
  0x1a   : > { %223 = vst [vmem:[%s2784_s30 + $0x34] sm:$0xf] %v222_v13  ;;  %v224_v14 = vld [vmem:[%s2780_s29 + $0x70] sm:$0xf]  ;;  %v226_v15 = vld [vmem:[%s2780_s29 + $0x78] sm:$0xf] }
  0x1b   : > { %v228_v16 = vld [vmem:[%s2780_s29 + $0x80] sm:$0xf]  ;;  %225 = vst [vmem:[%s2784_s30 + $0x38] sm:$0xf] %v224_v14  ;;  %227 = vst [vmem:[%s2784_s30 + $0x3c] sm:$0xf] %v226_v15 }
  0x1c   : > { %229 = vst [vmem:[%s2784_s30 + $0x40] sm:$0xf] %v228_v16  ;;  %v230_v17 = vld [vmem:[%s2780_s29 + $0x88] sm:$0xf]  ;;  %v232_v18 = vld [vmem:[%s2780_s29 + $0x90] sm:$0xf] }
  0x1d   : > { %v234_v19 = vld [vmem:[%s2780_s29 + $0x98] sm:$0xf]  ;;  %231 = vst [vmem:[%s2784_s30 + $0x44] sm:$0xf] %v230_v17  ;;  %233 = vst [vmem:[%s2784_s30 + $0x48] sm:$0xf] %v232_v18 }
  0x1e   : > { %235 = vst [vmem:[%s2784_s30 + $0x4c] sm:$0xf] %v234_v19  ;;  %v236_v20 = vld [vmem:[%s2780_s29 + $0xa0] sm:$0xf]  ;;  %v238_v21 = vld [vmem:[%s2780_s29 + $0xa8] sm:$0xf] }
  0x1f   : > { %v240_v22 = vld [vmem:[%s2780_s29 + $0xb0] sm:$0xf]  ;;  %237 = vst [vmem:[%s2784_s30 + $0x50] sm:$0xf] %v236_v20  ;;  %239 = vst [vmem:[%s2784_s30 + $0x54] sm:$0xf] %v238_v21 }
  0x20   : > { %241 = vst [vmem:[%s2784_s30 + $0x58] sm:$0xf] %v240_v22  ;;  %v242_v23 = vld [vmem:[%s2780_s29 + $0xb8] sm:$0xf]  ;;  %v244_v24 = vld [vmem:[%s2780_s29 + $0xc0] sm:$0xf] }
  0x21   : > { %v246_v25 = vld [vmem:[%s2780_s29 + $0xc8] sm:$0xf]  ;;  %243 = vst [vmem:[%s2784_s30 + $0x5c] sm:$0xf] %v242_v23  ;;  %245 = vst [vmem:[%s2784_s30 + $0x60] sm:$0xf] %v244_v24 }
  0x22   : > { %247 = vst [vmem:[%s2784_s30 + $0x64] sm:$0xf] %v246_v25  ;;  %v248_v26 = vld [vmem:[%s2780_s29 + $0xd0] sm:$0xf]  ;;  %v250_v27 = vld [vmem:[%s2780_s29 + $0xd8] sm:$0xf] }
  0x23   : > { %v252_v28 = vld [vmem:[%s2780_s29 + $0xe0] sm:$0xf]  ;;  %249 = vst [vmem:[%s2784_s30 + $0x68] sm:$0xf] %v248_v26  ;;  %251 = vst [vmem:[%s2784_s30 + $0x6c] sm:$0xf] %v250_v27 }
  0x24   : > { %253 = vst [vmem:[%s2784_s30 + $0x70] sm:$0xf] %v252_v28  ;;  %v254_v29 = vld [vmem:[%s2780_s29 + $0xe8] sm:$0xf]  ;;  %v256_v30 = vld [vmem:[%s2780_s29 + $0xf0] sm:$0xf] }
  0x25   : > { %v258_v31 = vld [vmem:[%s2780_s29 + $0xf8] sm:$0xf]  ;;  %255 = vst [vmem:[%s2784_s30 + $0x74] sm:$0xf] %v254_v29  ;;  %257 = vst [vmem:[%s2784_s30 + $0x78] sm:$0xf] %v256_v30 }
  0x26   : > { %259 = vst [vmem:[%s2784_s30 + $0x7c] sm:$0xf] %v258_v31  ;;  %v260_v32 = vld [vmem:[%s2780_s29 + $0x100] sm:$0xf]  ;;  %v262_v33 = vld [vmem:[%s2780_s29 + $0x108] sm:$0xf] }
  0x27   : > { %v264_v34 = vld [vmem:[%s2780_s29 + $0x110] sm:$0xf]  ;;  %261 = vst [vmem:[%s2784_s30 + $0x80] sm:$0xf] %v260_v32  ;;  %263 = vst [vmem:[%s2784_s30 + $0x84] sm:$0xf] %v262_v33 }
  0x28   : > { %265 = vst [vmem:[%s2784_s30 + $0x88] sm:$0xf] %v264_v34  ;;  %v266_v35 = vld [vmem:[%s2780_s29 + $0x118] sm:$0xf]  ;;  %v268_v36 = vld [vmem:[%s2780_s29 + $0x120] sm:$0xf] }
  0x29   : > { %v270_v37 = vld [vmem:[%s2780_s29 + $0x128] sm:$0xf]  ;;  %267 = vst [vmem:[%s2784_s30 + $0x8c] sm:$0xf] %v266_v35  ;;  %269 = vst [vmem:[%s2784_s30 + $0x90] sm:$0xf] %v268_v36 }
  0x2a   : > { %271 = vst [vmem:[%s2784_s30 + $0x94] sm:$0xf] %v270_v37  ;;  %v272_v38 = vld [vmem:[%s2780_s29 + $0x130] sm:$0xf]  ;;  %v274_v39 = vld [vmem:[%s2780_s29 + $0x138] sm:$0xf] }
  0x2b   : > { %v276_v40 = vld [vmem:[%s2780_s29 + $0x140] sm:$0xf]  ;;  %273 = vst [vmem:[%s2784_s30 + $0x98] sm:$0xf] %v272_v38  ;;  %275 = vst [vmem:[%s2784_s30 + $0x9c] sm:$0xf] %v274_v39 }
  0x2c   : > { %277 = vst [vmem:[%s2784_s30 + $0xa0] sm:$0xf] %v276_v40  ;;  %v278_v41 = vld [vmem:[%s2780_s29 + $0x148] sm:$0xf]  ;;  %v280_v42 = vld [vmem:[%s2780_s29 + $0x150] sm:$0xf] }
  0x2d   : > { %v282_v43 = vld [vmem:[%s2780_s29 + $0x158] sm:$0xf]  ;;  %279 = vst [vmem:[%s2784_s30 + $0xa4] sm:$0xf] %v278_v41  ;;  %281 = vst [vmem:[%s2784_s30 + $0xa8] sm:$0xf] %v280_v42 }
  0x2e   : > { %283 = vst [vmem:[%s2784_s30 + $0xac] sm:$0xf] %v282_v43  ;;  %v284_v44 = vld [vmem:[%s2780_s29 + $0x160] sm:$0xf]  ;;  %v286_v45 = vld [vmem:[%s2780_s29 + $0x168] sm:$0xf] }
  0x2f   : > { %v288_v46 = vld [vmem:[%s2780_s29 + $0x170] sm:$0xf]  ;;  %285 = vst [vmem:[%s2784_s30 + $0xb0] sm:$0xf] %v284_v44  ;;  %287 = vst [vmem:[%s2784_s30 + $0xb4] sm:$0xf] %v286_v45 }
  0x30   : > { %289 = vst [vmem:[%s2784_s30 + $0xb8] sm:$0xf] %v288_v46  ;;  %v290_v47 = vld [vmem:[%s2780_s29 + $0x178] sm:$0xf]  ;;  %v292_v48 = vld [vmem:[%s2780_s29 + $0x180] sm:$0xf] }
  0x31   : > { %v294_v49 = vld [vmem:[%s2780_s29 + $0x188] sm:$0xf]  ;;  %291 = vst [vmem:[%s2784_s30 + $0xbc] sm:$0xf] %v290_v47  ;;  %293 = vst [vmem:[%s2784_s30 + $0xc0] sm:$0xf] %v292_v48 }
  0x32   : > { %295 = vst [vmem:[%s2784_s30 + $0xc4] sm:$0xf] %v294_v49  ;;  %v296_v50 = vld [vmem:[%s2780_s29 + $0x190] sm:$0xf]  ;;  %v298_v51 = vld [vmem:[%s2780_s29 + $0x198] sm:$0xf] }
  0x33   : > { %v300_v52 = vld [vmem:[%s2780_s29 + $0x1a0] sm:$0xf]  ;;  %297 = vst [vmem:[%s2784_s30 + $0xc8] sm:$0xf] %v296_v50  ;;  %299 = vst [vmem:[%s2784_s30 + $0xcc] sm:$0xf] %v298_v51 }
  0x34   : > { %301 = vst [vmem:[%s2784_s30 + $0xd0] sm:$0xf] %v300_v52  ;;  %v302_v53 = vld [vmem:[%s2780_s29 + $0x1a8] sm:$0xf]  ;;  %v304_v54 = vld [vmem:[%s2780_s29 + $0x1b0] sm:$0xf] }
  0x35   : > { %v306_v55 = vld [vmem:[%s2780_s29 + $0x1b8] sm:$0xf]  ;;  %303 = vst [vmem:[%s2784_s30 + $0xd4] sm:$0xf] %v302_v53  ;;  %305 = vst [vmem:[%s2784_s30 + $0xd8] sm:$0xf] %v304_v54 }
  0x36   : > { %307 = vst [vmem:[%s2784_s30 + $0xdc] sm:$0xf] %v306_v55  ;;  %v308_v56 = vld [vmem:[%s2780_s29 + $0x1c0] sm:$0xf]  ;;  %v310_v57 = vld [vmem:[%s2780_s29 + $0x1c8] sm:$0xf] }
  0x37   : > { %v312_v58 = vld [vmem:[%s2780_s29 + $0x1d0] sm:$0xf]  ;;  %309 = vst [vmem:[%s2784_s30 + $0xe0] sm:$0xf] %v308_v56  ;;  %311 = vst [vmem:[%s2784_s30 + $0xe4] sm:$0xf] %v310_v57 }
  0x38   : > { %313 = vst [vmem:[%s2784_s30 + $0xe8] sm:$0xf] %v312_v58  ;;  %v314_v59 = vld [vmem:[%s2780_s29 + $0x1d8] sm:$0xf]  ;;  %v316_v60 = vld [vmem:[%s2780_s29 + $0x1e0] sm:$0xf] }
  0x39   : > { %v318_v61 = vld [vmem:[%s2780_s29 + $0x1e8] sm:$0xf]  ;;  %315 = vst [vmem:[%s2784_s30 + $0xec] sm:$0xf] %v314_v59  ;;  %317 = vst [vmem:[%s2784_s30 + $0xf0] sm:$0xf] %v316_v60 }
  0x3a   : > { %319 = vst [vmem:[%s2784_s30 + $0xf4] sm:$0xf] %v318_v61  ;;  %v320_v62 = vld [vmem:[%s2780_s29 + $0x1f0] sm:$0xf]  ;;  %v322_v63 = vld [vmem:[%s2780_s29 + $0x1f8] sm:$0xf] }
  0x3b   : > { %321 = vst [vmem:[%s2784_s30 + $0xf8] sm:$0xf] %v320_v62  ;;  %323 = vst [vmem:[%s2784_s30 + $0xfc] sm:$0xf] %v322_v63 }
  0x3c PF: > { %p2083_p6 = scmp.ge.s32.totalorder %s2709_s19, 1  ;;  %p482_p7 = scmp.lt.s32.totalorder %s2709_s19, 3 }
  0x3e   : > { %p483_p8 = pnand %p2083_p6, %p482_p7 }
  0x3f   : > { %s489_s5 = sand.u32 (!%p483_p8), 1, %s2693_s15   ;;  %s2085_s6 = sshll.u32 (!%p483_p8), %s2701_s17, 4 }
  0x40   : > { %486 = sbr.rel (%p483_p8) target bundleno = 464 (0x1d0), region = 73  ;;  %s2084_s7 = sshll.u32 (!%p483_p8), %s489_s5, 8 }
  0x41   : > { %p521_p9 = scmp.lt.s32.totalorder (!%p483_p8), %s2085_s6, 31  ;;  %s2921_s12 = scalar_lea.vmem (!%p483_p8), [#allocation3], %s2084_s7 }
  0x42   : > { %p2087_p10 = scmp.ne.s32.totalorder (!%p483_p8), %s2701_s17, 0 }
  0x47   : > { %s3290_s6 = smov (!%p521_p9, %s2085_s6), 31  ;;  %536 = sbr.rel (%p2087_p10) target bundleno = 105 (0x69), region = 81 }
  0x48   : > { %s2086_s8 = sshll.u32 %s3290_s6, 2  ;;  %v2711_v0 = vmov (!%p2087_p10), 0.0  }
  0x49   : > { %s2919_s11 = scalar_lea.vmem %s3279_s1, %s2086_s8  ;;  %537 = vst [vmem:[#allocation2] sm:$0xff] (!%p2087_p10), %v2711_v0  ;;  %538 = vst [vmem:[#allocation2 + $0x8] sm:$0xff] (!%p2087_p10), %v2711_v0 }
  0x4a   : > { %539 = vst [vmem:[#allocation2 + $0x10] sm:$0xff] (!%p2087_p10), %v2711_v0  ;;  %540 = vst [vmem:[#allocation2 + $0x18] sm:$0xff] (!%p2087_p10), %v2711_v0 }
  0x4b   : > { %541 = vst [vmem:[#allocation2 + $0x20] sm:$0xff] (!%p2087_p10), %v2711_v0  ;;  %542 = vst [vmem:[#allocation2 + $0x28] sm:$0xff] (!%p2087_p10), %v2711_v0 }
  0x4c   : > { %543 = vst [vmem:[#allocation2 + $0x30] sm:$0xff] (!%p2087_p10), %v2711_v0  ;;  %544 = vst [vmem:[#allocation2 + $0x38] sm:$0xff] (!%p2087_p10), %v2711_v0 }
  0x4d   : > { %545 = vst [vmem:[#allocation2 + $0x40] sm:$0xff] (!%p2087_p10), %v2711_v0  ;;  %546 = vst [vmem:[#allocation2 + $0x48] sm:$0xff] (!%p2087_p10), %v2711_v0 }
  0x4e   : > { %547 = vst [vmem:[#allocation2 + $0x50] sm:$0xff] %v2711_v0  ;;  %548 = vst [vmem:[#allocation2 + $0x58] sm:$0xff] %v2711_v0 }
  0x4f   : > { %549 = vst [vmem:[#allocation2 + $0x60] sm:$0xff] %v2711_v0  ;;  %550 = vst [vmem:[#allocation2 + $0x68] sm:$0xff] %v2711_v0 }
  0x50   : > { %551 = vst [vmem:[#allocation2 + $0x70] sm:$0xff] %v2711_v0  ;;  %552 = vst [vmem:[#allocation2 + $0x78] sm:$0xff] %v2711_v0 }
  0x51   : > { %553 = vst [vmem:[#allocation2 + $0x80] sm:$0xff] %v2711_v0  ;;  %554 = vst [vmem:[#allocation2 + $0x88] sm:$0xff] %v2711_v0 }
  0x52   : > { %555 = vst [vmem:[#allocation2 + $0x90] sm:$0xff] %v2711_v0  ;;  %556 = vst [vmem:[#allocation2 + $0x98] sm:$0xff] %v2711_v0 }
  0x53   : > { %557 = vst [vmem:[#allocation2 + $0xa0] sm:$0xff] %v2711_v0  ;;  %558 = vst [vmem:[#allocation2 + $0xa8] sm:$0xff] %v2711_v0 }
  0x54   : > { %559 = vst [vmem:[#allocation2 + $0xb0] sm:$0xff] %v2711_v0  ;;  %560 = vst [vmem:[#allocation2 + $0xb8] sm:$0xff] %v2711_v0 }
  0x55   : > { %561 = vst [vmem:[#allocation2 + $0xc0] sm:$0xff] %v2711_v0  ;;  %562 = vst [vmem:[#allocation2 + $0xc8] sm:$0xff] %v2711_v0 }
  0x56   : > { %563 = vst [vmem:[#allocation2 + $0xd0] sm:$0xff] %v2711_v0  ;;  %564 = vst [vmem:[#allocation2 + $0xd8] sm:$0xff] %v2711_v0 }
  0x57   : > { %565 = vst [vmem:[#allocation2 + $0xe0] sm:$0xff] %v2711_v0  ;;  %566 = vst [vmem:[#allocation2 + $0xe8] sm:$0xff] %v2711_v0 }
  0x58   : > { %567 = vst [vmem:[#allocation2 + $0xf0] sm:$0xff] %v2711_v0  ;;  %568 = vst [vmem:[#allocation2 + $0xf8] sm:$0xff] %v2711_v0 }
  0x59   : > { %569 = vst [vmem:[#allocation2 + $0x100] sm:$0xff] %v2711_v0  ;;  %570 = vst [vmem:[#allocation2 + $0x108] sm:$0xff] %v2711_v0 }
  0x5a   : > { %571 = vst [vmem:[#allocation2 + $0x110] sm:$0xff] %v2711_v0  ;;  %572 = vst [vmem:[#allocation2 + $0x118] sm:$0xff] %v2711_v0 }
  0x5b   : > { %573 = vst [vmem:[#allocation2 + $0x120] sm:$0xff] %v2711_v0  ;;  %574 = vst [vmem:[#allocation2 + $0x128] sm:$0xff] %v2711_v0 }
  0x5c   : > { %575 = vst [vmem:[#allocation2 + $0x130] sm:$0xff] %v2711_v0  ;;  %576 = vst [vmem:[#allocation2 + $0x138] sm:$0xff] %v2711_v0 }
  0x5d   : > { %577 = vst [vmem:[#allocation2 + $0x140] sm:$0xff] %v2711_v0  ;;  %578 = vst [vmem:[#allocation2 + $0x148] sm:$0xff] %v2711_v0 }
  0x5e   : > { %579 = vst [vmem:[#allocation2 + $0x150] sm:$0xff] %v2711_v0  ;;  %580 = vst [vmem:[#allocation2 + $0x158] sm:$0xff] %v2711_v0 }
  0x5f   : > { %581 = vst [vmem:[#allocation2 + $0x160] sm:$0xff] %v2711_v0  ;;  %582 = vst [vmem:[#allocation2 + $0x168] sm:$0xff] %v2711_v0 }
  0x60   : > { %583 = vst [vmem:[#allocation2 + $0x170] sm:$0xff] %v2711_v0  ;;  %584 = vst [vmem:[#allocation2 + $0x178] sm:$0xff] %v2711_v0 }
  0x61   : > { %585 = vst [vmem:[#allocation2 + $0x180] sm:$0xff] %v2711_v0  ;;  %586 = vst [vmem:[#allocation2 + $0x188] sm:$0xff] %v2711_v0 }
  0x62   : > { %587 = vst [vmem:[#allocation2 + $0x190] sm:$0xff] %v2711_v0  ;;  %588 = vst [vmem:[#allocation2 + $0x198] sm:$0xff] %v2711_v0 }
  0x63   : > { %589 = vst [vmem:[#allocation2 + $0x1a0] sm:$0xff] %v2711_v0  ;;  %590 = vst [vmem:[#allocation2 + $0x1a8] sm:$0xff] %v2711_v0 }
  0x64   : > { %591 = vst [vmem:[#allocation2 + $0x1b0] sm:$0xff] %v2711_v0  ;;  %592 = vst [vmem:[#allocation2 + $0x1b8] sm:$0xff] %v2711_v0 }
  0x65   : > { %593 = vst [vmem:[#allocation2 + $0x1c0] sm:$0xff] %v2711_v0  ;;  %594 = vst [vmem:[#allocation2 + $0x1c8] sm:$0xff] %v2711_v0 }
  0x66   : > { %595 = vst [vmem:[#allocation2 + $0x1d0] sm:$0xff] %v2711_v0  ;;  %596 = vst [vmem:[#allocation2 + $0x1d8] sm:$0xff] %v2711_v0 }
  0x67   : > { %597 = vst [vmem:[#allocation2 + $0x1e0] sm:$0xff] %v2711_v0  ;;  %598 = vst [vmem:[#allocation2 + $0x1e8] sm:$0xff] %v2711_v0 }
  0x68   : > { %599 = vst [vmem:[#allocation2 + $0x1f0] sm:$0xff] %v2711_v0  ;;  %600 = vst [vmem:[#allocation2 + $0x1f8] sm:$0xff] %v2711_v0 }
  0x69 PF: > { %v2631_v1 = vld [vmem:[%s2919_s11] sm:$0xff]   ;;  %v2632_v2 = vld [vmem:[%s2919_s11 + $0x8] sm:$0xff]   ;;  %v2633_v3 = vld [vmem:[%s2919_s11 + $0x10] sm:$0xff]   ;;  %p2128_p11 = scmp.ne.s32.totalorder %s2701_s17, 1 }
  0x6a   : > { %2494 = vmatprep.subr.bf16.mxu0 %v2631_v1  ;;  %2574 = vmatprep.subr.bf16.mxu1 %v2631_v1  ;;  %v2634_v4 = vld [vmem:[%s2919_s11 + $0x18] sm:$0xff]   ;;  %v2639_v5 = vld [vmem:[%s2921_s12] sm:$0xff]   ;;  %v2636_v8 = vld [vmem:[%s2919_s11 + $0x28] sm:$0xff]  }
  0x6b   : > { %2495 = vmatpush3.bf16.msra.mxu0 %v2631_v1  ;;  %2582 = vmatpush3.bf16.msra.mxu1 %v2631_v1  ;;  %v2640_v6 = vld [vmem:[%s2921_s12 + $0x80] sm:$0xff]   ;;  %v2637_v9 = vld [vmem:[%s2919_s11 + $0x30] sm:$0xff]   ;;  %v2638_v10 = vld [vmem:[%s2919_s11 + $0x38] sm:$0xff]  }
  0x6c   : > { %2496 = vmatprep.subr.bf16.mxu0 %v2632_v2  ;;  %2575 = vmatprep.subr.bf16.mxu1 %v2632_v2  ;;  %v2635_v7 = vld [vmem:[%s2919_s11 + $0x20] sm:$0xff]   ;;  %v2641_v11 = vld [vmem:[%s2921_s12 + $0x8] sm:$0xff]   ;;  %v2643_v13 = vld [vmem:[%s2921_s12 + $0x10] sm:$0xff]  }
  0x6d   : > { %2510 = vmatprep.mubr.bf16.mxu0 %v2639_v5  ;;  %2542 = vmatprep.mubr.bf16.mxu1 %v2640_v6  ;;  %v2642_v12 = vld [vmem:[%s2921_s12 + $0x88] sm:$0xff]   ;;  %v2644_v14 = vld [vmem:[%s2921_s12 + $0x90] sm:$0xff]   ;;  %v2645_v15 = vld [vmem:[%s2921_s12 + $0x18] sm:$0xff]  }
  0x6e   : > { %v2646_v16 = vld [vmem:[%s2921_s12 + $0x98] sm:$0xff]   ;;  %v2647_v17 = vld [vmem:[%s2921_s12 + $0x20] sm:$0xff]   ;;  %v2649_v19 = vld [vmem:[%s2921_s12 + $0x28] sm:$0xff]  }
  0x6f   : > { %2497 = vmatpush3.bf16.msra.mxu0 %v2632_v2  ;;  %2583 = vmatpush3.bf16.msra.mxu1 %v2632_v2  ;;  %v2648_v18 = vld [vmem:[%s2921_s12 + $0xa0] sm:$0xff]   ;;  %v2650_v20 = vld [vmem:[%s2921_s12 + $0xa8] sm:$0xff]   ;;  %v2651_v21 = vld [vmem:[%s2921_s12 + $0x30] sm:$0xff]  }
  0x70   : > { %2498 = vmatprep.subr.bf16.mxu0 %v2633_v3  ;;  %2576 = vmatprep.subr.bf16.mxu1 %v2633_v3  ;;  %v2652_v22 = vld [vmem:[%s2921_s12 + $0xb0] sm:$0xff]   ;;  %v2653_v23 = vld [vmem:[%s2921_s12 + $0x38] sm:$0xff]   ;;  %v2655_v25 = vld [vmem:[%s2921_s12 + $0x40] sm:$0xff]  }
  0x71   : > { %v2654_v24 = vld [vmem:[%s2921_s12 + $0xb8] sm:$0xff]   ;;  %v2656_v26 = vld [vmem:[%s2921_s12 + $0xc0] sm:$0xff]   ;;  %v2657_v27 = vld [vmem:[%s2921_s12 + $0x48] sm:$0xff]  }
  0x72   : > { %v2658_v28 = vld [vmem:[%s2921_s12 + $0xc8] sm:$0xff]   ;;  %v2659_v29 = vld [vmem:[%s2921_s12 + $0x50] sm:$0xff]   ;;  %v2661_v31 = vld [vmem:[%s2921_s12 + $0x58] sm:$0xff]  }
  0x73   : > { %2499 = vmatpush3.bf16.msra.mxu0 %v2633_v3  ;;  %2584 = vmatpush3.bf16.msra.mxu1 %v2633_v3  ;;  %v2660_v30 = vld [vmem:[%s2921_s12 + $0xd0] sm:$0xff]   ;;  %v2662_v32 = vld [vmem:[%s2921_s12 + $0xd8] sm:$0xff]   ;;  %v2663_v33 = vld [vmem:[%s2921_s12 + $0x60] sm:$0xff]  }
  0x74   : > { %2500 = vmatprep.subr.bf16.mxu0 %v2634_v4  ;;  %2577 = vmatprep.subr.bf16.mxu1 %v2634_v4  ;;  %v2664_v34 = vld [vmem:[%s2921_s12 + $0xe0] sm:$0xff]   ;;  %v2665_v35 = vld [vmem:[%s2921_s12 + $0x68] sm:$0xff]   ;;  %v2667_v37 = vld [vmem:[%s2921_s12 + $0x70] sm:$0xff]  }
  0x75   : > { %v2666_v36 = vld [vmem:[%s2921_s12 + $0xe8] sm:$0xff]   ;;  %v2668_v38 = vld [vmem:[%s2921_s12 + $0xf0] sm:$0xff]   ;;  %v2669_v39 = vld [vmem:[%s2921_s12 + $0x78] sm:$0xff]  }
  0x76   : > { %v2670_v40 = vld [vmem:[%s2921_s12 + $0xf8] sm:$0xff]   ;;  %v667_v41 = vld [vmem:[#allocation2 + $0x10] sm:$0xff]  ;;  %v665_v43 = vld [vmem:[#allocation2] sm:$0xff] }
  0x77   : > { %2501 = vmatpush3.bf16.msra.mxu0 %v2634_v4  ;;  %2585 = vmatpush3.bf16.msra.mxu1 %v2634_v4  ;;  %v699_v42 = vld [vmem:[#allocation2 + $0x110] sm:$0xff]  ;;  %v697_v44 = vld [vmem:[#allocation2 + $0x100] sm:$0xff]  ;;  %v668_v47 = vld [vmem:[#allocation2 + $0x18] sm:$0xff] }
  0x78   : > { %2502 = vmatprep.subr.bf16.mxu0 %v2635_v7  ;;  %2578 = vmatprep.subr.bf16.mxu1 %v2635_v7  ;;  %v700_v48 = vld [vmem:[#allocation2 + $0x118] sm:$0xff]  ;;  %v666_v53 = vld [vmem:[#allocation2 + $0x8] sm:$0xff]  ;;  %v671_v1 = vld [vmem:[#allocation2 + $0x30] sm:$0xff] }
  0x79   : > { %v698_v54 = vld [vmem:[#allocation2 + $0x108] sm:$0xff]  ;;  %v703_v2 = vld [vmem:[#allocation2 + $0x130] sm:$0xff]  ;;  %v669_v3 = vld [vmem:[#allocation2 + $0x20] sm:$0xff] }
  0x7a   : > { %v701_v4 = vld [vmem:[#allocation2 + $0x120] sm:$0xff] }
  0x7b   : > { %2503 = vmatpush3.bf16.msra.mxu0 %v2635_v7  ;;  %2586 = vmatpush3.bf16.msra.mxu1 %v2635_v7  ;;  %v672_v7 = vld [vmem:[#allocation2 + $0x38] sm:$0xff] }
  0x7c   : > { %2504 = vmatprep.subr.bf16.mxu0 %v2636_v8  ;;  %2579 = vmatprep.subr.bf16.mxu1 %v2636_v8 }
  0x7f   : > { %2505 = vmatpush3.bf16.msra.mxu0 %v2636_v8  ;;  %2587 = vmatpush3.bf16.msra.mxu1 %v2636_v8  ;;  %v704_v8 = vld [vmem:[#allocation2 + $0x138] sm:$0xff] }
  0x80   : > { %2506 = vmatprep.subr.bf16.mxu0 %v2637_v9  ;;  %2580 = vmatprep.subr.bf16.mxu1 %v2637_v9 }
  0x83   : > { %2507 = vmatpush3.bf16.msra.mxu0 %v2637_v9  ;;  %2588 = vmatpush3.bf16.msra.mxu1 %v2637_v9 }
  0x84   : > { %2508 = vmatprep.subr.bf16.mxu0 %v2638_v10  ;;  %2581 = vmatprep.subr.bf16.mxu1 %v2638_v10 }
  0x87   : > { %2509 = vmatpush3.bf16.msra.mxu0 %v2638_v10  ;;  %2589 = vmatpush3.bf16.msra.mxu1 %v2638_v10 }
  0x8a   : > { %2511 = vmatmul.mubr.bf16.vlgmr.msra.gmra.mrb[0].mxu0 %v2641_v11  ;;  %2543 = vmatmul.mubr.bf16.vlgmr.msra.gmra.mrb[0].mxu1 %v2642_v12 }
  0x8b   : > { %2514 = vmatprep.mubr.bf16.mxu0 %v2643_v13  ;;  %2546 = vmatprep.mubr.bf16.mxu1 %v2644_v14  ;;  %v670_v13 = vld [vmem:[#allocation2 + $0x28] sm:$0xff] }
  0x8c   : > { %v702_v14 = vld [vmem:[#allocation2 + $0x128] sm:$0xff] }
  0x92   : > { %2515 = vmatmul.mubr.bf16.gmra.mrb[4].mxu0 %v2645_v15  ;;  %2547 = vmatmul.mubr.bf16.gmra.mrb[4].mxu1 %v2646_v16 }
  0x93   : > { %2518 = vmatprep.mubr.bf16.mxu0 %v2647_v17  ;;  %2550 = vmatprep.mubr.bf16.mxu1 %v2648_v18 }
  0x9a   : > { %2519 = vmatmul.mubr.bf16.gmra.mrb[8].mxu0 %v2649_v19  ;;  %2551 = vmatmul.mubr.bf16.gmra.mrb[8].mxu1 %v2650_v20 }
  0x9b   : > { %2522 = vmatprep.mubr.bf16.mxu0 %v2651_v21  ;;  %2554 = vmatprep.mubr.bf16.mxu1 %v2652_v22 }
  0xa2   : > { %2523 = vmatmul.mubr.bf16.gmra.mrb[12].mxu0 %v2653_v23  ;;  %2555 = vmatmul.mubr.bf16.gmra.mrb[12].mxu1 %v2654_v24 }
  0xa3   : > { %2526 = vmatprep.mubr.bf16.mxu0 %v2655_v25  ;;  %2558 = vmatprep.mubr.bf16.mxu1 %v2656_v26  ;;  %v675_v25 = vld [vmem:[#allocation2 + $0x50] sm:$0xff] }
  0xa4   : > { %v707_v26 = vld [vmem:[#allocation2 + $0x150] sm:$0xff] }
  0xaa   : > { %2527 = vmatmul.mubr.bf16.gmra.mrb[16].mxu0 %v2657_v27  ;;  %2559 = vmatmul.mubr.bf16.gmra.mrb[16].mxu1 %v2658_v28  ;;  %v673_v27 = vld [vmem:[#allocation2 + $0x40] sm:$0xff] }
  0xab   : > { %2530 = vmatprep.mubr.bf16.mxu0 %v2659_v29  ;;  %2562 = vmatprep.mubr.bf16.mxu1 %v2660_v30  ;;  %v705_v28 = vld [vmem:[#allocation2 + $0x140] sm:$0xff] }
  0xb2   : > { %2531 = vmatmul.mubr.bf16.gmra.mrb[20].mxu0 %v2661_v31  ;;  %2563 = vmatmul.mubr.bf16.gmra.mrb[20].mxu1 %v2662_v32  ;;  %v676_v31 = vld [vmem:[#allocation2 + $0x58] sm:$0xff] }
  0xb3   : > { %2534 = vmatprep.mubr.bf16.mxu0 %v2663_v33  ;;  %2566 = vmatprep.mubr.bf16.mxu1 %v2664_v34  ;;  %v708_v32 = vld [vmem:[#allocation2 + $0x158] sm:$0xff] }
  0xba   : > { %2535 = vmatmul.mubr.bf16.gmra.mrb[24].mxu0 %v2665_v35  ;;  %2567 = vmatmul.mubr.bf16.gmra.mrb[24].mxu1 %v2666_v36 }
  0xbb   : > { %2538 = vmatprep.mubr.bf16.mxu0 %v2667_v37  ;;  %2570 = vmatprep.mubr.bf16.mxu1 %v2668_v38  ;;  %v674_v37 = vld [vmem:[#allocation2 + $0x48] sm:$0xff] }
  0xbc   : > { %v706_v38 = vld [vmem:[#allocation2 + $0x148] sm:$0xff] }
  0xc2   : > { %2539 = vmatmul.mubr.bf16.gmra.mrb[28].mxu0 %v2669_v39  ;;  %2571 = vmatmul.mubr.bf16.gmra.mrb[28].mxu1 %v2670_v40 }
 0x15d   : > { %v2512_v45 = vpop.f32.mrb[0].mxu0  ;;  %v2544_v46 = vpop.f32.mrb[0].mxu1 }
 0x15e   : > { %v1276_v49 = vadd.f32 %v2512_v45, %v667_v41  ;;  %v1308_v50 = vadd.f32 %v2544_v46, %v699_v42  ;;  %v1019_v51 = vpop.f32.mrb[1].mxu0  ;;  %v1147_v52 = vpop.f32.mrb[1].mxu1 }
 0x15f   : > { %v1274_v55 = vadd.f32 %v1019_v51, %v665_v43  ;;  %v1306_v56 = vadd.f32 %v1147_v52, %v697_v44  ;;  %v2513_v57 = vpop.f32.mrb[2].mxu0  ;;  %v2545_v58 = vpop.f32.mrb[2].mxu1  ;;  %v677_v51 = vld [vmem:[#allocation2 + $0x60] sm:$0xff] }
 0x160   : > { %1340 = vst [vmem:[#allocation2 + $0x10] sm:$0xff] %v1276_v49  ;;  %1372 = vst [vmem:[#allocation2 + $0x110] sm:$0xff] %v1308_v50  ;;  %v1277_v59 = vadd.f32 %v2513_v57, %v668_v47  ;;  %v1309_v60 = vadd.f32 %v2545_v58, %v700_v48  ;;  %v1022_v61 = vpop.f32.mrb[3].mxu0  ;;  %v1150_v62 = vpop.f32.mrb[3].mxu1  ;;  %v679_v49 = vld [vmem:[#allocation2 + $0x70] sm:$0xff]  ;;  %v709_v52 = vld [vmem:[#allocation2 + $0x160] sm:$0xff] }
 0x161   : > { %1338 = vst [vmem:[#allocation2] sm:$0xff] %v1274_v55  ;;  %1370 = vst [vmem:[#allocation2 + $0x100] sm:$0xff] %v1306_v56  ;;  %v1275_v63 = vadd.f32 %v1022_v61, %v666_v53  ;;  %v1307_v0 = vadd.f32 %v1150_v62, %v698_v54  ;;  %v711_v50 = vld [vmem:[#allocation2 + $0x170] sm:$0xff]  ;;  %v680_v55 = vld [vmem:[#allocation2 + $0x78] sm:$0xff] }
 0x162   : > { %1341 = vst [vmem:[#allocation2 + $0x18] sm:$0xff] %v1277_v59  ;;  %1373 = vst [vmem:[#allocation2 + $0x118] sm:$0xff] %v1309_v60  ;;  %v712_v56 = vld [vmem:[#allocation2 + $0x178] sm:$0xff]  ;;  %v678_v61 = vld [vmem:[#allocation2 + $0x68] sm:$0xff] }
 0x163   : > { %1339 = vst [vmem:[#allocation2 + $0x8] sm:$0xff] %v1275_v63  ;;  %1371 = vst [vmem:[#allocation2 + $0x108] sm:$0xff] %v1307_v0  ;;  %v710_v62 = vld [vmem:[#allocation2 + $0x168] sm:$0xff] }
 0x165   : > { %v2516_v5 = vpop.f32.mrb[4].mxu0  ;;  %v2548_v6 = vpop.f32.mrb[4].mxu1 }
 0x166   : > { %v1280_v9 = vadd.f32 %v2516_v5, %v671_v1  ;;  %v1312_v10 = vadd.f32 %v2548_v6, %v703_v2  ;;  %v1035_v11 = vpop.f32.mrb[5].mxu0  ;;  %v1163_v12 = vpop.f32.mrb[5].mxu1 }
 0x167   : > { %v1278_v15 = vadd.f32 %v1035_v11, %v669_v3  ;;  %v1310_v16 = vadd.f32 %v1163_v12, %v701_v4  ;;  %v2517_v17 = vpop.f32.mrb[6].mxu0  ;;  %v2549_v18 = vpop.f32.mrb[6].mxu1  ;;  %v681_v11 = vld [vmem:[#allocation2 + $0x80] sm:$0xff] }
 0x168   : > { %1344 = vst [vmem:[#allocation2 + $0x30] sm:$0xff] %v1280_v9  ;;  %1376 = vst [vmem:[#allocation2 + $0x130] sm:$0xff] %v1312_v10  ;;  %v1281_v19 = vadd.f32 %v2517_v17, %v672_v7  ;;  %v1313_v20 = vadd.f32 %v2549_v18, %v704_v8  ;;  %v1038_v21 = vpop.f32.mrb[7].mxu0  ;;  %v1166_v22 = vpop.f32.mrb[7].mxu1  ;;  %v683_v9 = vld [vmem:[#allocation2 + $0x90] sm:$0xff]  ;;  %v713_v12 = vld [vmem:[#allocation2 + $0x180] sm:$0xff] }
 0x169   : > { %1342 = vst [vmem:[#allocation2 + $0x20] sm:$0xff] %v1278_v15  ;;  %1374 = vst [vmem:[#allocation2 + $0x120] sm:$0xff] %v1310_v16  ;;  %v1279_v23 = vadd.f32 %v1038_v21, %v670_v13  ;;  %v1311_v24 = vadd.f32 %v1166_v22, %v702_v14  ;;  %v715_v10 = vld [vmem:[#allocation2 + $0x190] sm:$0xff]  ;;  %v684_v15 = vld [vmem:[#allocation2 + $0x98] sm:$0xff] }
 0x16a   : > { %1345 = vst [vmem:[#allocation2 + $0x38] sm:$0xff] %v1281_v19  ;;  %1377 = vst [vmem:[#allocation2 + $0x138] sm:$0xff] %v1313_v20  ;;  %v716_v16 = vld [vmem:[#allocation2 + $0x198] sm:$0xff]  ;;  %v682_v21 = vld [vmem:[#allocation2 + $0x88] sm:$0xff] }
 0x16b   : > { %1343 = vst [vmem:[#allocation2 + $0x28] sm:$0xff] %v1279_v23  ;;  %1375 = vst [vmem:[#allocation2 + $0x128] sm:$0xff] %v1311_v24  ;;  %v714_v22 = vld [vmem:[#allocation2 + $0x188] sm:$0xff] }
 0x16d   : > { %v2520_v29 = vpop.f32.mrb[8].mxu0  ;;  %v2552_v30 = vpop.f32.mrb[8].mxu1 }
 0x16e   : > { %v1284_v33 = vadd.f32 %v2520_v29, %v675_v25  ;;  %v1316_v34 = vadd.f32 %v2552_v30, %v707_v26  ;;  %v1051_v35 = vpop.f32.mrb[9].mxu0  ;;  %v1179_v36 = vpop.f32.mrb[9].mxu1 }
 0x16f   : > { %v1282_v39 = vadd.f32 %v1051_v35, %v673_v27  ;;  %v1314_v40 = vadd.f32 %v1179_v36, %v705_v28  ;;  %v2521_v41 = vpop.f32.mrb[10].mxu0  ;;  %v2553_v42 = vpop.f32.mrb[10].mxu1  ;;  %v685_v35 = vld [vmem:[#allocation2 + $0xa0] sm:$0xff] }
 0x170   : > { %1348 = vst [vmem:[#allocation2 + $0x50] sm:$0xff] %v1284_v33  ;;  %1380 = vst [vmem:[#allocation2 + $0x150] sm:$0xff] %v1316_v34  ;;  %v1285_v43 = vadd.f32 %v2521_v41, %v676_v31  ;;  %v1317_v44 = vadd.f32 %v2553_v42, %v708_v32  ;;  %v1054_v45 = vpop.f32.mrb[11].mxu0  ;;  %v1182_v46 = vpop.f32.mrb[11].mxu1  ;;  %v687_v33 = vld [vmem:[#allocation2 + $0xb0] sm:$0xff]  ;;  %v717_v36 = vld [vmem:[#allocation2 + $0x1a0] sm:$0xff] }
 0x171   : > { %1346 = vst [vmem:[#allocation2 + $0x40] sm:$0xff] %v1282_v39  ;;  %1378 = vst [vmem:[#allocation2 + $0x140] sm:$0xff] %v1314_v40  ;;  %v1283_v47 = vadd.f32 %v1054_v45, %v674_v37  ;;  %v1315_v48 = vadd.f32 %v1182_v46, %v706_v38  ;;  %v719_v34 = vld [vmem:[#allocation2 + $0x1b0] sm:$0xff]  ;;  %v688_v39 = vld [vmem:[#allocation2 + $0xb8] sm:$0xff] }
 0x172   : > { %1349 = vst [vmem:[#allocation2 + $0x58] sm:$0xff] %v1285_v43  ;;  %1381 = vst [vmem:[#allocation2 + $0x158] sm:$0xff] %v1317_v44  ;;  %v720_v40 = vld [vmem:[#allocation2 + $0x1b8] sm:$0xff]  ;;  %v686_v45 = vld [vmem:[#allocation2 + $0xa8] sm:$0xff] }
 0x173   : > { %1347 = vst [vmem:[#allocation2 + $0x48] sm:$0xff] %v1283_v47  ;;  %1379 = vst [vmem:[#allocation2 + $0x148] sm:$0xff] %v1315_v48  ;;  %v718_v46 = vld [vmem:[#allocation2 + $0x1a8] sm:$0xff] }
 0x175   : > { %v2524_v53 = vpop.f32.mrb[12].mxu0  ;;  %v2556_v54 = vpop.f32.mrb[12].mxu1 }
 0x176   : > { %v1288_v57 = vadd.f32 %v2524_v53, %v679_v49  ;;  %v1320_v58 = vadd.f32 %v2556_v54, %v711_v50  ;;  %v1067_v59 = vpop.f32.mrb[13].mxu0  ;;  %v1195_v60 = vpop.f32.mrb[13].mxu1 }
 0x177   : > { %v1286_v63 = vadd.f32 %v1067_v59, %v677_v51  ;;  %v1318_v0 = vadd.f32 %v1195_v60, %v709_v52  ;;  %v2525_v1 = vpop.f32.mrb[14].mxu0  ;;  %v2557_v2 = vpop.f32.mrb[14].mxu1  ;;  %v689_v59 = vld [vmem:[#allocation2 + $0xc0] sm:$0xff] }
 0x178   : > { %1352 = vst [vmem:[#allocation2 + $0x70] sm:$0xff] %v1288_v57  ;;  %1384 = vst [vmem:[#allocation2 + $0x170] sm:$0xff] %v1320_v58  ;;  %v1289_v3 = vadd.f32 %v2525_v1, %v680_v55  ;;  %v1321_v4 = vadd.f32 %v2557_v2, %v712_v56  ;;  %v1070_v5 = vpop.f32.mrb[15].mxu0  ;;  %v1198_v6 = vpop.f32.mrb[15].mxu1  ;;  %v691_v57 = vld [vmem:[#allocation2 + $0xd0] sm:$0xff]  ;;  %v721_v60 = vld [vmem:[#allocation2 + $0x1c0] sm:$0xff] }
 0x179   : > { %1350 = vst [vmem:[#allocation2 + $0x60] sm:$0xff] %v1286_v63  ;;  %1382 = vst [vmem:[#allocation2 + $0x160] sm:$0xff] %v1318_v0  ;;  %v1287_v7 = vadd.f32 %v1070_v5, %v678_v61  ;;  %v1319_v8 = vadd.f32 %v1198_v6, %v710_v62  ;;  %v723_v58 = vld [vmem:[#allocation2 + $0x1d0] sm:$0xff]  ;;  %v692_v63 = vld [vmem:[#allocation2 + $0xd8] sm:$0xff] }
 0x17a   : > { %1353 = vst [vmem:[#allocation2 + $0x78] sm:$0xff] %v1289_v3  ;;  %1385 = vst [vmem:[#allocation2 + $0x178] sm:$0xff] %v1321_v4  ;;  %v724_v0 = vld [vmem:[#allocation2 + $0x1d8] sm:$0xff]  ;;  %v690_v5 = vld [vmem:[#allocation2 + $0xc8] sm:$0xff] }
 0x17b   : > { %1351 = vst [vmem:[#allocation2 + $0x68] sm:$0xff] %v1287_v7  ;;  %1383 = vst [vmem:[#allocation2 + $0x168] sm:$0xff] %v1319_v8  ;;  %v722_v6 = vld [vmem:[#allocation2 + $0x1c8] sm:$0xff] }
 0x17d   : > { %v2528_v13 = vpop.f32.mrb[16].mxu0  ;;  %v2560_v14 = vpop.f32.mrb[16].mxu1 }
 0x17e   : > { %v1292_v17 = vadd.f32 %v2528_v13, %v683_v9  ;;  %v1324_v18 = vadd.f32 %v2560_v14, %v715_v10  ;;  %v1083_v19 = vpop.f32.mrb[17].mxu0  ;;  %v1211_v20 = vpop.f32.mrb[17].mxu1 }
 0x17f   : > { %v1290_v23 = vadd.f32 %v1083_v19, %v681_v11  ;;  %v1322_v24 = vadd.f32 %v1211_v20, %v713_v12  ;;  %v2529_v25 = vpop.f32.mrb[18].mxu0  ;;  %v2561_v26 = vpop.f32.mrb[18].mxu1  ;;  %v693_v19 = vld [vmem:[#allocation2 + $0xe0] sm:$0xff] }
 0x180   : > { %1356 = vst [vmem:[#allocation2 + $0x90] sm:$0xff] %v1292_v17  ;;  %1388 = vst [vmem:[#allocation2 + $0x190] sm:$0xff] %v1324_v18  ;;  %v1293_v27 = vadd.f32 %v2529_v25, %v684_v15  ;;  %v1325_v28 = vadd.f32 %v2561_v26, %v716_v16  ;;  %v1086_v29 = vpop.f32.mrb[19].mxu0  ;;  %v1214_v30 = vpop.f32.mrb[19].mxu1  ;;  %v695_v17 = vld [vmem:[#allocation2 + $0xf0] sm:$0xff]  ;;  %v725_v20 = vld [vmem:[#allocation2 + $0x1e0] sm:$0xff] }
 0x181   : > { %1354 = vst [vmem:[#allocation2 + $0x80] sm:$0xff] %v1290_v23  ;;  %1386 = vst [vmem:[#allocation2 + $0x180] sm:$0xff] %v1322_v24  ;;  %v1291_v31 = vadd.f32 %v1086_v29, %v682_v21  ;;  %v1323_v32 = vadd.f32 %v1214_v30, %v714_v22  ;;  %v727_v18 = vld [vmem:[#allocation2 + $0x1f0] sm:$0xff]  ;;  %v696_v23 = vld [vmem:[#allocation2 + $0xf8] sm:$0xff] }
 0x182   : > { %1357 = vst [vmem:[#allocation2 + $0x98] sm:$0xff] %v1293_v27  ;;  %1389 = vst [vmem:[#allocation2 + $0x198] sm:$0xff] %v1325_v28  ;;  %v728_v24 = vld [vmem:[#allocation2 + $0x1f8] sm:$0xff]  ;;  %v694_v29 = vld [vmem:[#allocation2 + $0xe8] sm:$0xff] }
 0x183   : > { %1355 = vst [vmem:[#allocation2 + $0x88] sm:$0xff] %v1291_v31  ;;  %1387 = vst [vmem:[#allocation2 + $0x188] sm:$0xff] %v1323_v32  ;;  %v726_v30 = vld [vmem:[#allocation2 + $0x1e8] sm:$0xff] }
 0x185   : > { %v2532_v37 = vpop.f32.mrb[20].mxu0  ;;  %v2564_v38 = vpop.f32.mrb[20].mxu1 }
 0x186   : > { %v1296_v41 = vadd.f32 %v2532_v37, %v687_v33  ;;  %v1328_v42 = vadd.f32 %v2564_v38, %v719_v34  ;;  %v1099_v43 = vpop.f32.mrb[21].mxu0  ;;  %v1227_v44 = vpop.f32.mrb[21].mxu1 }
 0x187   : > { %v1294_v47 = vadd.f32 %v1099_v43, %v685_v35  ;;  %v1326_v48 = vadd.f32 %v1227_v44, %v717_v36  ;;  %v2533_v49 = vpop.f32.mrb[22].mxu0  ;;  %v2565_v50 = vpop.f32.mrb[22].mxu1  ;;  %v3032_v43 = vld [vmem:[%s3280_s2] ss:$0 sm:$0xff] (!%p2128_p11) }
 0x188   : > { %1360 = vst [vmem:[#allocation2 + $0xb0] sm:$0xff] %v1296_v41  ;;  %1392 = vst [vmem:[#allocation2 + $0x1b0] sm:$0xff] %v1328_v42  ;;  %v1297_v51 = vadd.f32 %v2533_v49, %v688_v39  ;;  %v1329_v52 = vadd.f32 %v2565_v50, %v720_v40  ;;  %v1102_v53 = vpop.f32.mrb[23].mxu0  ;;  %v1230_v54 = vpop.f32.mrb[23].mxu1  ;;  %v1406_v41 = vld [vmem:[#allocation2] sm:$0xff] (!%p2128_p11)  ;;  %v1407_v42 = vld [vmem:[#allocation2 + $0x8] sm:$0xff] (!%p2128_p11) }
 0x189   : > { %1358 = vst [vmem:[#allocation2 + $0xa0] sm:$0xff] %v1294_v47  ;;  %1390 = vst [vmem:[#allocation2 + $0x1a0] sm:$0xff] %v1326_v48  ;;  %v1295_v55 = vadd.f32 %v1102_v53, %v686_v45  ;;  %v1327_v56 = vadd.f32 %v1230_v54, %v718_v46  ;;  %v1477_v44 = vmul.f32 (!%p2128_p11), %v3032_v43, %v1406_v41  ;;  %v3039_v46 = vld [vmem:[%s3281_s3] ss:$0 sm:$0xff] (!%p2128_p11)  ;;  %v1408_v47 = vld [vmem:[#allocation2 + $0x10] sm:$0xff] (!%p2128_p11) }
 0x18a   : > { %1361 = vst [vmem:[#allocation2 + $0xb8] sm:$0xff] %v1297_v51  ;;  %1393 = vst [vmem:[#allocation2 + $0x1b8] sm:$0xff] %v1329_v52  ;;  %v1478_v45 = vmul.f32 (!%p2128_p11), %v3032_v43, %v1407_v42  ;;  %v1409_v48 = vld [vmem:[#allocation2 + $0x18] sm:$0xff] (!%p2128_p11)  ;;  %v1479_v49 = vmul.f32 (!%p2128_p11), %v3032_v43, %v1408_v47  ;;  %v1410_v51 = vld [vmem:[#allocation2 + $0x20] sm:$0xff] (!%p2128_p11) }
 0x18b   : > { %1359 = vst [vmem:[#allocation2 + $0xa8] sm:$0xff] %v1295_v55  ;;  %1391 = vst [vmem:[#allocation2 + $0x1a8] sm:$0xff] %v1327_v56  ;;  %v1480_v50 = vmul.f32 (!%p2128_p11), %v3032_v43, %v1409_v48  ;;  %v1411_v52 = vld [vmem:[#allocation2 + $0x28] sm:$0xff] (!%p2128_p11)  ;;  %v1412_v53 = vld [vmem:[#allocation2 + $0x30] sm:$0xff] (!%p2128_p11)  ;;  %v1548_v54 = vadd.f32 (!%p2128_p11), %v3039_v46, %v1477_v44  ;;  %v1481_v56 = vmul.f32 (!%p2128_p11), %v3032_v43, %v1410_v51 }
 0x18c   : > { %v1549_v55 = vadd.f32 (!%p2128_p11), %v3039_v46, %v1478_v45  ;;  %v1424_v47 = vld [vmem:[#allocation2 + $0x90] sm:$0xff] (!%p2128_p11)  ;;  %v1425_v48 = vld [vmem:[#allocation2 + $0x98] sm:$0xff] (!%p2128_p11) }
 0x18d   : > { %v2536_v61 = vpop.f32.mrb[24].mxu0  ;;  %v2568_v62 = vpop.f32.mrb[24].mxu1 }
 0x18e   : > { %v1300_v1 = vadd.f32 %v2536_v61, %v691_v57  ;;  %v1332_v2 = vadd.f32 %v2568_v62, %v723_v58  ;;  %v1115_v3 = vpop.f32.mrb[25].mxu0  ;;  %v1243_v4 = vpop.f32.mrb[25].mxu1  ;;  %v1482_v57 = vmul.f32 (!%p2128_p11), %v3032_v43, %v1411_v52  ;;  %v1413_v58 = vld [vmem:[#allocation2 + $0x38] sm:$0xff] (!%p2128_p11)  ;;  %v1483_v61 = vmul.f32 (!%p2128_p11), %v3032_v43, %v1412_v53 }
 0x18f   : > { %v1298_v7 = vadd.f32 %v1115_v3, %v689_v59  ;;  %v1330_v8 = vadd.f32 %v1243_v4, %v721_v60  ;;  %v2537_v9 = vpop.f32.mrb[26].mxu0  ;;  %v2569_v10 = vpop.f32.mrb[26].mxu1  ;;  %v1550_v59 = vadd.f32 (!%p2128_p11), %v3039_v46, %v1479_v49  ;;  %v1551_v60 = vadd.f32 (!%p2128_p11), %v3039_v46, %v1480_v50  ;;  %v1415_v4 = vld [vmem:[#allocation2 + $0x48] sm:$0xff] (!%p2128_p11) }
 0x190   : > { %1364 = vst [vmem:[#allocation2 + $0xd0] sm:$0xff] %v1300_v1  ;;  %1396 = vst [vmem:[#allocation2 + $0x1d0] sm:$0xff] %v1332_v2  ;;  %v1301_v11 = vadd.f32 %v2537_v9, %v692_v63  ;;  %v1333_v12 = vadd.f32 %v2569_v10, %v724_v0  ;;  %v1118_v13 = vpop.f32.mrb[27].mxu0  ;;  %v1246_v14 = vpop.f32.mrb[27].mxu1  ;;  %v1484_v62 = vmul.f32 (!%p2128_p11), %v3032_v43, %v1413_v58  ;;  %v1414_v63 = vld [vmem:[#allocation2 + $0x40] sm:$0xff] (!%p2128_p11)  ;;  %v1612_v0 = vmax.f32 (!%p2128_p11), %v1548_v54, 0.0 }
 0x191   : > { %1362 = vst [vmem:[#allocation2 + $0xc0] sm:$0xff] %v1298_v7  ;;  %1394 = vst [vmem:[#allocation2 + $0x1c0] sm:$0xff] %v1330_v8  ;;  %v1299_v15 = vadd.f32 %v1118_v13, %v690_v5  ;;  %v1331_v16 = vadd.f32 %v1246_v14, %v722_v6  ;;  %v1613_v1 = vmax.f32 (!%p2128_p11), %v1549_v55, 0.0  ;;  %v1552_v2 = vadd.f32 (!%p2128_p11), %v3039_v46, %v1481_v56  ;;  %v1416_v9 = vld [vmem:[#allocation2 + $0x50] sm:$0xff] (!%p2128_p11)  ;;  %v1417_v10 = vld [vmem:[#allocation2 + $0x58] sm:$0xff] (!%p2128_p11) }
 0x192   : > { %1365 = vst [vmem:[#allocation2 + $0xd8] sm:$0xff] %v1301_v11  ;;  %1397 = vst [vmem:[#allocation2 + $0x1d8] sm:$0xff] %v1333_v12  ;;  %v1553_v3 = vadd.f32 (!%p2128_p11), %v3039_v46, %v1482_v57  ;;  %v1614_v5 = vmax.f32 (!%p2128_p11), %v1550_v59, 0.0  ;;  %v1615_v6 = vmax.f32 (!%p2128_p11), %v1551_v60, 0.0  ;;  %v1554_v7 = vadd.f32 (!%p2128_p11), %v3039_v46, %v1483_v61  ;;  %v1426_v53 = vld [vmem:[#allocation2 + $0xa0] sm:$0xff] (!%p2128_p11)  ;;  %v1427_v54 = vld [vmem:[#allocation2 + $0xa8] sm:$0xff] (!%p2128_p11) }
 0x193   : > { %1363 = vst [vmem:[#allocation2 + $0xc8] sm:$0xff] %v1299_v15  ;;  %1395 = vst [vmem:[#allocation2 + $0x1c8] sm:$0xff] %v1331_v16  ;;  %v1555_v8 = vadd.f32 (!%p2128_p11), %v3039_v46, %v1484_v62  ;;  %v2266_v11 = vpack.c.bf16 (!%p2128_p11), %v1613_v1, %v1612_v0  ;;  %v1616_v12 = vmax.f32 (!%p2128_p11), %v1552_v2, 0.0  ;;  %v1485_v14 = vmul.f32 (!%p2128_p11), %v3032_v43, %v1414_v63  ;;  %v1418_v15 = vld [vmem:[#allocation2 + $0x60] sm:$0xff] (!%p2128_p11)  ;;  %v1419_v16 = vld [vmem:[#allocation2 + $0x68] sm:$0xff] (!%p2128_p11) }
 0x194   : > { %v1617_v13 = vmax.f32 (!%p2128_p11), %v1553_v3, 0.0  ;;  %v1428_v59 = vld [vmem:[#allocation2 + $0xb0] sm:$0xff] (!%p2128_p11)  ;;  %v1495_v62 = vmul.f32 (!%p2128_p11), %v3032_v43, %v1424_v47  ;;  %v1496_v63 = vmul.f32 (!%p2128_p11), %v3032_v43, %v1425_v48  ;;  %v1429_v0 = vld [vmem:[#allocation2 + $0xb8] sm:$0xff] (!%p2128_p11)  ;;  %v1497_v3 = vmul.f32 (!%p2128_p11), %v3032_v43, %v1426_v53 }
 0x195   : > { %v2540_v21 = vpop.f32.mrb[28].mxu0  ;;  %v2572_v22 = vpop.f32.mrb[28].mxu1  ;;  %1405 = sbr.rel (%p2128_p11) target bundleno = 464 (0x1d0), region = 85  ;;  %2267 = vst [vmem:[%s3282_s4] sm:$0xff] (!%p2128_p11), %v2266_v11  }
 0x196   : > { %v1304_v25 = vadd.f32 %v2540_v21, %v695_v17  ;;  %v1336_v26 = vadd.f32 %v2572_v22, %v727_v18  ;;  %v1131_v27 = vpop.f32.mrb[29].mxu0  ;;  %v1259_v28 = vpop.f32.mrb[29].mxu1  ;;  %v2271_v17 = vpack.c.bf16 (!%p2128_p11), %v1615_v6, %v1614_v5  ;;  %v1618_v18 = vmax.f32 (!%p2128_p11), %v1554_v7, 0.0  ;;  %v1420_v21 = vld [vmem:[#allocation2 + $0x70] sm:$0xff] (!%p2128_p11) }
 0x197   : > { %v1302_v31 = vadd.f32 %v1131_v27, %v693_v19  ;;  %v1334_v32 = vadd.f32 %v1259_v28, %v725_v20  ;;  %v2541_v33 = vpop.f32.mrb[30].mxu0  ;;  %v2573_v34 = vpop.f32.mrb[30].mxu1  ;;  %v1619_v19 = vmax.f32 (!%p2128_p11), %v1555_v8, 0.0  ;;  %v1486_v20 = vmul.f32 (!%p2128_p11), %v3032_v43, %v1415_v4 }
 0x198   : > { %1368 = vst [vmem:[#allocation2 + $0xf0] sm:$0xff] %v1304_v25  ;;  %1400 = vst [vmem:[#allocation2 + $0x1f0] sm:$0xff] %v1336_v26  ;;  %v1305_v35 = vadd.f32 %v2541_v33, %v696_v23  ;;  %v1337_v36 = vadd.f32 %v2573_v34, %v728_v24  ;;  %v1134_v37 = vpop.f32.mrb[31].mxu0  ;;  %v1262_v38 = vpop.f32.mrb[31].mxu1  ;;  %v2276_v22 = vpack.c.bf16 (!%p2128_p11), %v1617_v13, %v1616_v12  ;;  %v1421_v26 = vld [vmem:[#allocation2 + $0x78] sm:$0xff] (!%p2128_p11)  ;;  %v1430_v5 = vld [vmem:[#allocation2 + $0xc0] sm:$0xff] (!%p2128_p11) }
 0x199   : > { %1366 = vst [vmem:[#allocation2 + $0xe0] sm:$0xff] %v1302_v31  ;;  %1398 = vst [vmem:[#allocation2 + $0x1e0] sm:$0xff] %v1334_v32  ;;  %v1303_v39 = vadd.f32 %v1134_v37, %v694_v29  ;;  %v1335_v40 = vadd.f32 %v1262_v38, %v726_v30  ;;  %v1556_v23 = vadd.f32 (!%p2128_p11), %v3039_v46, %v1485_v14  ;;  %v1422_v31 = vld [vmem:[#allocation2 + $0x80] sm:$0xff] (!%p2128_p11) }
 0x19a   : > { %1369 = vst [vmem:[#allocation2 + $0xf8] sm:$0xff] %v1305_v35  ;;  %1401 = vst [vmem:[#allocation2 + $0x1f8] sm:$0xff] %v1337_v36  ;;  %v1487_v24 = vmul.f32 (!%p2128_p11), %v3032_v43, %v1416_v9  ;;  %v1488_v25 = vmul.f32 (!%p2128_p11), %v3032_v43, %v1417_v10  ;;  %v2281_v27 = vpack.c.bf16 (!%p2128_p11), %v1619_v19, %v1618_v18  ;;  %v1431_v14 = vld [vmem:[#allocation2 + $0xc8] sm:$0xff] (!%p2128_p11)  ;;  %v1432_v19 = vld [vmem:[#allocation2 + $0xd0] sm:$0xff] (!%p2128_p11) }
 0x19b   : > { %1367 = vst [vmem:[#allocation2 + $0xe8] sm:$0xff] %v1303_v39  ;;  %1399 = vst [vmem:[#allocation2 + $0x1e8] sm:$0xff] %v1335_v40  ;;  %v1557_v28 = vadd.f32 (!%p2128_p11), %v3039_v46, %v1486_v20  ;;  %v1489_v29 = vmul.f32 (!%p2128_p11), %v3032_v43, %v1418_v15  ;;  %v1490_v30 = vmul.f32 (!%p2128_p11), %v3032_v43, %v1419_v16  ;;  %v1620_v32 = vmax.f32 (!%p2128_p11), %v1556_v23, 0.0  ;;  %v1423_v40 = vld [vmem:[#allocation2 + $0x88] sm:$0xff] (!%p2128_p11)  ;;  %v1433_v20 = vld [vmem:[#allocation2 + $0xd8] sm:$0xff] (!%p2128_p11) }
 0x19c   : > { %2423 = vst [vmem:[%s3282_s4 + $0x8] sm:$0xff] %v2271_v17   ;;  %2424 = vst [vmem:[%s3282_s4 + $0x10] sm:$0xff] %v2276_v22   ;;  %v1558_v33 = vadd.f32 %v3039_v46, %v1487_v24  ;;  %v1559_v34 = vadd.f32 %v3039_v46, %v1488_v25  ;;  %v1491_v35 = vmul.f32 %v3032_v43, %v1420_v21 }
 0x19d   : > { %2425 = vst [vmem:[%s3282_s4 + $0x18] sm:$0xff] %v2281_v27   ;;  %v1621_v36 = vmax.f32 %v1557_v28, 0.0  ;;  %v1560_v37 = vadd.f32 %v3039_v46, %v1489_v29  ;;  %v1561_v38 = vadd.f32 %v3039_v46, %v1490_v30  ;;  %v1492_v39 = vmul.f32 %v3032_v43, %v1421_v26 }
 0x19e   : > { %v1622_v41 = vmax.f32 %v1558_v33, 0.0  ;;  %v1623_v42 = vmax.f32 %v1559_v34, 0.0  ;;  %v1562_v44 = vadd.f32 %v3039_v46, %v1491_v35  ;;  %v1493_v45 = vmul.f32 %v3032_v43, %v1422_v31 }
 0x19f   : > { %v2286_v49 = vpack.c.bf16 %v1621_v36, %v1620_v32  ;;  %v1624_v50 = vmax.f32 %v1560_v37, 0.0  ;;  %v1625_v51 = vmax.f32 %v1561_v38, 0.0  ;;  %v1563_v52 = vadd.f32 %v3039_v46, %v1492_v39  ;;  %v1436_v31 = vld [vmem:[#allocation2 + $0xf0] sm:$0xff] }
 0x1a0   : > { %v2291_v55 = vpack.c.bf16 %v1623_v42, %v1622_v41  ;;  %v1626_v56 = vmax.f32 %v1562_v44, 0.0  ;;  %v1494_v57 = vmul.f32 %v3032_v43, %v1423_v40  ;;  %v1564_v58 = vadd.f32 %v3039_v46, %v1493_v45  ;;  %v1434_v25 = vld [vmem:[#allocation2 + $0xe0] sm:$0xff] }
 0x1a1   : > { %2426 = vst [vmem:[%s3282_s4 + $0x20] sm:$0xff] %v2286_v49   ;;  %v2296_v60 = vpack.c.bf16 %v1625_v51, %v1624_v50  ;;  %v1627_v61 = vmax.f32 %v1563_v52, 0.0  ;;  %v1498_v4 = vmul.f32 %v3032_v43, %v1427_v54  ;;  %v1566_v7 = vadd.f32 %v3039_v46, %v1495_v62  ;;  %v1437_v36 = vld [vmem:[#allocation2 + $0xf8] sm:$0xff]  ;;  %v1438_v41 = vld [vmem:[#allocation2 + $0x100] sm:$0xff]  ;;  %v1439_v52 = vld [vmem:[#allocation2 + $0x108] sm:$0xff] }
 0x1a2   : > { %2427 = vst [vmem:[%s3282_s4 + $0x28] sm:$0xff] %v2291_v55   ;;  %v1565_v1 = vadd.f32 %v3039_v46, %v1494_v57  ;;  %v1628_v2 = vmax.f32 %v1564_v58, 0.0  ;;  %v1567_v8 = vadd.f32 %v3039_v46, %v1496_v63  ;;  %v1499_v9 = vmul.f32 %v3032_v43, %v1428_v59  ;;  %v1435_v26 = vld [vmem:[#allocation2 + $0xe8] sm:$0xff]  ;;  %v1440_v57 = vld [vmem:[#allocation2 + $0x110] sm:$0xff]  ;;  %v1441_v58 = vld [vmem:[#allocation2 + $0x118] sm:$0xff] }
 0x1a3   : > { %2428 = vst [vmem:[%s3282_s4 + $0x30] sm:$0xff] %v2296_v60   ;;  %v2301_v6 = vpack.c.bf16 %v1627_v61, %v1626_v56  ;;  %v1568_v11 = vadd.f32 %v3039_v46, %v1497_v3  ;;  %v1569_v12 = vadd.f32 %v3039_v46, %v1498_v4  ;;  %v1500_v13 = vmul.f32 %v3032_v43, %v1429_v0  ;;  %v1442_v63 = vld [vmem:[#allocation2 + $0x120] sm:$0xff]  ;;  %v1443_v0 = vld [vmem:[#allocation2 + $0x128] sm:$0xff] }
 0x1a4   : > { %v1629_v10 = vmax.f32 %v1565_v1, 0.0  ;;  %v1630_v15 = vmax.f32 %v1566_v7, 0.0  ;;  %v1631_v16 = vmax.f32 %v1567_v8, 0.0  ;;  %v1570_v17 = vadd.f32 %v3039_v46, %v1499_v9 }
 0x1a5   : > { %2429 = vst [vmem:[%s3282_s4 + $0x38] sm:$0xff] %v2301_v6   ;;  %v1501_v18 = vmul.f32 %v3032_v43, %v1430_v5  ;;  %v1632_v22 = vmax.f32 %v1568_v11, 0.0  ;;  %v1633_v23 = vmax.f32 %v1569_v12, 0.0  ;;  %v1571_v24 = vadd.f32 %v3039_v46, %v1500_v13  ;;  %v1444_v5 = vld [vmem:[#allocation2 + $0x130] sm:$0xff] }
 0x1a6   : > { %v2306_v21 = vpack.c.bf16 %v1629_v10, %v1628_v2  ;;  %v2311_v27 = vpack.c.bf16 %v1631_v16, %v1630_v15  ;;  %v1634_v28 = vmax.f32 %v1570_v17, 0.0  ;;  %v1502_v29 = vmul.f32 %v3032_v43, %v1431_v14  ;;  %v1445_v10 = vld [vmem:[#allocation2 + $0x138] sm:$0xff]  ;;  %v1446_v15 = vld [vmem:[#allocation2 + $0x140] sm:$0xff] }
 0x1a7   : > { %v1572_v30 = vadd.f32 %v3039_v46, %v1501_v18  ;;  %v2316_v32 = vpack.c.bf16 %v1633_v23, %v1632_v22  ;;  %v1635_v33 = vmax.f32 %v1571_v24, 0.0  ;;  %v1503_v34 = vmul.f32 %v3032_v43, %v1432_v19  ;;  %v1447_v24 = vld [vmem:[#allocation2 + $0x148] sm:$0xff] }
 0x1a8   : > { %2430 = vst [vmem:[%s3282_s4 + $0x40] sm:$0xff] %v2306_v21   ;;  %v1504_v35 = vmul.f32 %v3032_v43, %v1433_v20  ;;  %2431 = vst [vmem:[%s3282_s4 + $0x48] sm:$0xff] %v2311_v27   ;;  %v1573_v37 = vadd.f32 %v3039_v46, %v1502_v29  ;;  %v1505_v39 = vmul.f32 %v3032_v43, %v1434_v25  ;;  %v1448_v29 = vld [vmem:[#allocation2 + $0x150] sm:$0xff] }
 0x1a9   : > { %v1636_v38 = vmax.f32 %v1572_v30, 0.0  ;;  %v1506_v40 = vmul.f32 %v3032_v43, %v1435_v26  ;;  %2432 = vst [vmem:[%s3282_s4 + $0x50] sm:$0xff] %v2316_v32   ;;  %v2321_v42 = vpack.c.bf16 %v1635_v33, %v1634_v28  ;;  %v1574_v44 = vadd.f32 %v3039_v46, %v1503_v34  ;;  %v1449_v30 = vld [vmem:[#allocation2 + $0x158] sm:$0xff] }
 0x1aa   : > { %v1575_v45 = vadd.f32 %v3039_v46, %v1504_v35  ;;  %v1507_v47 = vmul.f32 %v3032_v43, %v1436_v31  ;;  %v1637_v48 = vmax.f32 %v1573_v37, 0.0  ;;  %v1576_v49 = vadd.f32 %v3039_v46, %v1505_v39  ;;  %v1450_v35 = vld [vmem:[#allocation2 + $0x160] sm:$0xff] }
 0x1ab   : > { %v1577_v50 = vadd.f32 %v3039_v46, %v1506_v40  ;;  %v1508_v51 = vmul.f32 %v3032_v43, %v1437_v36  ;;  %2433 = vst [vmem:[%s3282_s4 + $0x58] sm:$0xff] %v2321_v42   ;;  %v1638_v53 = vmax.f32 %v1574_v44, 0.0  ;;  %v1509_v56 = vmul.f32 %v3032_v43, %v1438_v41  ;;  %v1451_v36 = vld [vmem:[#allocation2 + $0x168] sm:$0xff]  ;;  %v1452_v41 = vld [vmem:[#allocation2 + $0x170] sm:$0xff] }
 0x1ac   : > { %v1639_v54 = vmax.f32 %v1575_v45, 0.0  ;;  %v1578_v55 = vadd.f32 %v3039_v46, %v1507_v47  ;;  %v2326_v59 = vpack.c.bf16 %v1637_v48, %v1636_v38  ;;  %v1640_v60 = vmax.f32 %v1576_v49, 0.0  ;;  %v1453_v48 = vld [vmem:[#allocation2 + $0x178] sm:$0xff] }
 0x1ad   : > { %v1641_v61 = vmax.f32 %v1577_v50, 0.0  ;;  %v1579_v62 = vadd.f32 %v3039_v46, %v1508_v51  ;;  %v1510_v3 = vmul.f32 %v3032_v43, %v1439_v52  ;;  %v1580_v4 = vadd.f32 %v3039_v46, %v1509_v56 }
 0x1ae   : > { %v2331_v1 = vpack.c.bf16 %v1639_v54, %v1638_v53  ;;  %v1642_v2 = vmax.f32 %v1578_v55, 0.0  ;;  %2434 = vst [vmem:[%s3282_s4 + $0x60] sm:$0xff] %v2326_v59   ;;  %v1511_v8 = vmul.f32 %v3032_v43, %v1440_v57  ;;  %v1512_v9 = vmul.f32 %v3032_v43, %v1441_v58  ;;  %v1454_v53 = vld [vmem:[#allocation2 + $0x180] sm:$0xff] }
 0x1af   : > { %v2336_v6 = vpack.c.bf16 %v1641_v61, %v1640_v60  ;;  %v1643_v7 = vmax.f32 %v1579_v62, 0.0  ;;  %v1581_v11 = vadd.f32 %v3039_v46, %v1510_v3  ;;  %v1644_v12 = vmax.f32 %v1580_v4, 0.0  ;;  %v1455_v62 = vld [vmem:[#allocation2 + $0x188] sm:$0xff]  ;;  %v1456_v3 = vld [vmem:[#allocation2 + $0x190] sm:$0xff]  ;;  %v1457_v4 = vld [vmem:[#allocation2 + $0x198] sm:$0xff] }
 0x1b0   : > { %2435 = vst [vmem:[%s3282_s4 + $0x68] sm:$0xff] %v2331_v1   ;;  %v1513_v13 = vmul.f32 %v3032_v43, %v1442_v63  ;;  %v1514_v14 = vmul.f32 %v3032_v43, %v1443_v0  ;;  %v1582_v17 = vadd.f32 %v3039_v46, %v1511_v8  ;;  %v1583_v18 = vadd.f32 %v3039_v46, %v1512_v9  ;;  %v1458_v9 = vld [vmem:[#allocation2 + $0x1a0] sm:$0xff] }
 0x1b1   : > { %2436 = vst [vmem:[%s3282_s4 + $0x70] sm:$0xff] %v2336_v6   ;;  %v2341_v16 = vpack.c.bf16 %v1643_v7, %v1642_v2  ;;  %v1515_v19 = vmul.f32 %v3032_v43, %v1444_v5  ;;  %v1645_v20 = vmax.f32 %v1581_v11, 0.0  ;;  %v1516_v23 = vmul.f32 %v3032_v43, %v1445_v10  ;;  %v1459_v10 = vld [vmem:[#allocation2 + $0x1a8] sm:$0xff] }
 0x1b2   : > { %v1584_v21 = vadd.f32 %v3039_v46, %v1513_v13  ;;  %v1585_v22 = vadd.f32 %v3039_v46, %v1514_v14  ;;  %v1646_v25 = vmax.f32 %v1582_v17, 0.0  ;;  %v1647_v26 = vmax.f32 %v1583_v18, 0.0 }
 0x1b3   : > { %2437 = vst [vmem:[%s3282_s4 + $0x78] sm:$0xff] %v2341_v16   ;;  %v1586_v27 = vadd.f32 %v3039_v46, %v1515_v19  ;;  %v1517_v28 = vmul.f32 %v3032_v43, %v1446_v15  ;;  %v2346_v31 = vpack.c.bf16 %v1645_v20, %v1644_v12  ;;  %v1587_v34 = vadd.f32 %v3039_v46, %v1516_v23  ;;  %v1460_v15 = vld [vmem:[#allocation2 + $0x1b0] sm:$0xff]  ;;  %v1461_v20 = vld [vmem:[#allocation2 + $0x1b8] sm:$0xff] }
 0x1b4   : > { %v1648_v32 = vmax.f32 %v1584_v21, 0.0  ;;  %v1649_v33 = vmax.f32 %v1585_v22, 0.0  ;;  %v2351_v37 = vpack.c.bf16 %v1647_v26, %v1646_v25  ;;  %v1518_v39 = vmul.f32 %v3032_v43, %v1447_v24  ;;  %v1462_v25 = vld [vmem:[#allocation2 + $0x1c0] sm:$0xff] }
 0x1b5   : > { %v1650_v38 = vmax.f32 %v1586_v27, 0.0  ;;  %v1588_v40 = vadd.f32 %v3039_v46, %v1517_v28  ;;  %2438 = vst [vmem:[%s3282_s4 + $0x80] sm:$0xff] %v2346_v31   ;;  %v1651_v44 = vmax.f32 %v1587_v34, 0.0  ;;  %v1519_v45 = vmul.f32 %v3032_v43, %v1448_v29  ;;  %v1463_v34 = vld [vmem:[#allocation2 + $0x1c8] sm:$0xff] }
 0x1b6   : > { %v2356_v42 = vpack.c.bf16 %v1649_v33, %v1648_v32  ;;  %v1520_v47 = vmul.f32 %v3032_v43, %v1449_v30  ;;  %2439 = vst [vmem:[%s3282_s4 + $0x88] sm:$0xff] %v2351_v37   ;;  %v1589_v49 = vadd.f32 %v3039_v46, %v1518_v39  ;;  %v1521_v51 = vmul.f32 %v3032_v43, %v1450_v35  ;;  %v1464_v39 = vld [vmem:[#allocation2 + $0x1d0] sm:$0xff] }
 0x1b7   : > { %v1652_v50 = vmax.f32 %v1588_v40, 0.0  ;;  %v1522_v52 = vmul.f32 %v3032_v43, %v1451_v36  ;;  %v2361_v54 = vpack.c.bf16 %v1651_v44, %v1650_v38  ;;  %v1590_v55 = vadd.f32 %v3039_v46, %v1519_v45  ;;  %v1465_v40 = vld [vmem:[#allocation2 + $0x1d8] sm:$0xff] }
 0x1b8   : > { %2440 = vst [vmem:[%s3282_s4 + $0x90] sm:$0xff] %v2356_v42   ;;  %v1591_v56 = vadd.f32 %v3039_v46, %v1520_v47  ;;  %v1523_v57 = vmul.f32 %v3032_v43, %v1452_v41  ;;  %v1653_v58 = vmax.f32 %v1589_v49, 0.0  ;;  %v1592_v59 = vadd.f32 %v3039_v46, %v1521_v51  ;;  %v1466_v47 = vld [vmem:[#allocation2 + $0x1e0] sm:$0xff] }
 0x1b9   : > { %v1593_v60 = vadd.f32 %v3039_v46, %v1522_v52  ;;  %v1524_v61 = vmul.f32 %v3032_v43, %v1453_v48  ;;  %2441 = vst [vmem:[%s3282_s4 + $0x98] sm:$0xff] %v2361_v54   ;;  %v1654_v63 = vmax.f32 %v1590_v55, 0.0  ;;  %v1525_v2 = vmul.f32 %v3032_v43, %v1454_v53  ;;  %v1467_v48 = vld [vmem:[#allocation2 + $0x1e8] sm:$0xff]  ;;  %v1468_v53 = vld [vmem:[#allocation2 + $0x1f0] sm:$0xff] }
 0x1ba   : > { %v1655_v0 = vmax.f32 %v1591_v56, 0.0  ;;  %v1594_v1 = vadd.f32 %v3039_v46, %v1523_v57  ;;  %v2366_v5 = vpack.c.bf16 %v1653_v58, %v1652_v50  ;;  %v1656_v6 = vmax.f32 %v1592_v59, 0.0  ;;  %v1469_v58 = vld [vmem:[#allocation2 + $0x1f8] sm:$0xff] }
 0x1bb   : > { %v1657_v7 = vmax.f32 %v1593_v60, 0.0  ;;  %v1595_v8 = vadd.f32 %v3039_v46, %v1524_v61  ;;  %v1526_v13 = vmul.f32 %v3032_v43, %v1455_v62  ;;  %v1596_v14 = vadd.f32 %v3039_v46, %v1525_v2 }
 0x1bc   : > { %v2371_v11 = vpack.c.bf16 %v1655_v0, %v1654_v63  ;;  %v1658_v12 = vmax.f32 %v1594_v1, 0.0  ;;  %2442 = vst [vmem:[%s3282_s4 + $0xa0] sm:$0xff] %v2366_v5   ;;  %v1527_v18 = vmul.f32 %v3032_v43, %v1456_v3  ;;  %v1528_v19 = vmul.f32 %v3032_v43, %v1457_v4 }
 0x1bd   : > { %v2376_v16 = vpack.c.bf16 %v1657_v7, %v1656_v6  ;;  %v1659_v17 = vmax.f32 %v1595_v8, 0.0  ;;  %v1597_v21 = vadd.f32 %v3039_v46, %v1526_v13  ;;  %v1660_v22 = vmax.f32 %v1596_v14, 0.0 }
 0x1be   : > { %2443 = vst [vmem:[%s3282_s4 + $0xa8] sm:$0xff] %v2371_v11   ;;  %v1529_v23 = vmul.f32 %v3032_v43, %v1458_v9  ;;  %v1530_v24 = vmul.f32 %v3032_v43, %v1459_v10  ;;  %v1598_v27 = vadd.f32 %v3039_v46, %v1527_v18  ;;  %v1599_v28 = vadd.f32 %v3039_v46, %v1528_v19 }
 0x1bf   : > { %2444 = vst [vmem:[%s3282_s4 + $0xb0] sm:$0xff] %v2376_v16   ;;  %v2381_v26 = vpack.c.bf16 %v1659_v17, %v1658_v12  ;;  %v1531_v29 = vmul.f32 %v3032_v43, %v1460_v15  ;;  %v1661_v30 = vmax.f32 %v1597_v21, 0.0  ;;  %v1532_v33 = vmul.f32 %v3032_v43, %v1461_v20 }
 0x1c0   : > { %v1600_v31 = vadd.f32 %v3039_v46, %v1529_v23  ;;  %v1601_v32 = vadd.f32 %v3039_v46, %v1530_v24  ;;  %v1662_v35 = vmax.f32 %v1598_v27, 0.0  ;;  %v1663_v36 = vmax.f32 %v1599_v28, 0.0 }
 0x1c1   : > { %2445 = vst [vmem:[%s3282_s4 + $0xb8] sm:$0xff] %v2381_v26   ;;  %v1602_v37 = vadd.f32 %v3039_v46, %v1531_v29  ;;  %v1533_v38 = vmul.f32 %v3032_v43, %v1462_v25  ;;  %v2386_v41 = vpack.c.bf16 %v1661_v30, %v1660_v22  ;;  %v1603_v45 = vadd.f32 %v3039_v46, %v1532_v33 }
 0x1c2   : > { %v1664_v42 = vmax.f32 %v1600_v31, 0.0  ;;  %v1665_v44 = vmax.f32 %v1601_v32, 0.0  ;;  %v2391_v49 = vpack.c.bf16 %v1663_v36, %v1662_v35  ;;  %v1534_v51 = vmul.f32 %v3032_v43, %v1463_v34 }
 0x1c3   : > { %v1666_v50 = vmax.f32 %v1602_v37, 0.0  ;;  %v1604_v52 = vadd.f32 %v3039_v46, %v1533_v38  ;;  %2446 = vst [vmem:[%s3282_s4 + $0xc0] sm:$0xff] %v2386_v41   ;;  %v1667_v55 = vmax.f32 %v1603_v45, 0.0  ;;  %v1535_v56 = vmul.f32 %v3032_v43, %v1464_v39 }
 0x1c4   : > { %v2396_v54 = vpack.c.bf16 %v1665_v44, %v1664_v42  ;;  %v1536_v57 = vmul.f32 %v3032_v43, %v1465_v40  ;;  %2447 = vst [vmem:[%s3282_s4 + $0xc8] sm:$0xff] %v2391_v49   ;;  %v1605_v59 = vadd.f32 %v3039_v46, %v1534_v51  ;;  %v1537_v61 = vmul.f32 %v3032_v43, %v1466_v47 }
 0x1c5   : > { %v1668_v60 = vmax.f32 %v1604_v52, 0.0  ;;  %v1538_v62 = vmul.f32 %v3032_v43, %v1467_v48  ;;  %v2401_v63 = vpack.c.bf16 %v1667_v55, %v1666_v50  ;;  %v1606_v0 = vadd.f32 %v3039_v46, %v1535_v56 }
 0x1c6   : > { %2448 = vst [vmem:[%s3282_s4 + $0xd0] sm:$0xff] %v2396_v54   ;;  %v1607_v1 = vadd.f32 %v3039_v46, %v1536_v57  ;;  %v1539_v2 = vmul.f32 %v3032_v43, %v1468_v53  ;;  %v1669_v3 = vmax.f32 %v1605_v59, 0.0  ;;  %v1608_v4 = vadd.f32 %v3039_v46, %v1537_v61 }
 0x1c7   : > { %v1609_v5 = vadd.f32 %v3039_v46, %v1538_v62  ;;  %v1540_v6 = vmul.f32 %v3032_v43, %v1469_v58  ;;  %2449 = vst [vmem:[%s3282_s4 + $0xd8] sm:$0xff] %v2401_v63   ;;  %v1670_v7 = vmax.f32 %v1606_v0, 0.0 }
 0x1c8   : > { %v1671_v8 = vmax.f32 %v1607_v1, 0.0  ;;  %v1610_v9 = vadd.f32 %v3039_v46, %v1539_v2  ;;  %v2406_v10 = vpack.c.bf16 %v1669_v3, %v1668_v60  ;;  %v1672_v11 = vmax.f32 %v1608_v4, 0.0 }
 0x1c9   : > { %v1673_v12 = vmax.f32 %v1609_v5, 0.0  ;;  %v1611_v13 = vadd.f32 %v3039_v46, %v1540_v6 }
 0x1ca   : > { %v2411_v14 = vpack.c.bf16 %v1671_v8, %v1670_v7  ;;  %v1674_v15 = vmax.f32 %v1610_v9, 0.0  ;;  %2450 = vst [vmem:[%s3282_s4 + $0xe0] sm:$0xff] %v2406_v10  }
 0x1cb   : > { %v2416_v43 = vpack.c.bf16 %v1673_v12, %v1672_v11  ;;  %v1675_v16 = vmax.f32 %v1611_v13, 0.0 }
 0x1cc   : > { %2451 = vst [vmem:[%s3282_s4 + $0xe8] sm:$0xff] %v2411_v14  }
 0x1cd   : > { %2452 = vst [vmem:[%s3282_s4 + $0xf0] sm:$0xff] %v2416_v43   ;;  %v2421_v17 = vpack.c.bf16 %v1675_v16, %v1674_v15 }
 0x1cf   : > { %2453 = vst [vmem:[%s3282_s4 + $0xf8] sm:$0xff] %v2421_v17  }
 0x1d0 PF: > { %s14_s19 = sadd.s32 1, %s2709_s19   ;;  %s3283_s15 = smov %s2697_s16 }
 0x1d1   : > { %p11_p12 = scmp.ge.s32.totalorder %s14_s19, 4   ;;  %s3284_s16 = smov %s2772_s23 }
 0x1d2   : > { %s3285_s17 = smov %s2705_s18  ;;  %s3286_s18 = smov %s3288_s20 }
 0x1d3   :  { %13 = sbr.rel (!%p11_p12) target bundleno = 3 (0x3), region = 123 }

// kernel: densenet121_forward.124
= control target key start
LH: loop header
LB: loop body
LE: loop exit
PB: predicated region body
PF: predicated region fallthrough
CT: control target
= control target key end

     0   :  { %s1049_s9 = smov 0   ;;  %s1051_s10 = smov 0   ;;  %s1178_s0 = inlined_call_operand.vmem [shape: bf16[128,1152], index: 0, kind: input, shape index: {}]   ;;  %s1179_s1 = inlined_call_operand.vmem [shape: bf16[1152,128], index: 1, kind: input, shape index: {}]   ;;  %s1180_s2 = inlined_call_operand.vmem [shape: bf16[128,128], index: 2, kind: output, shape index: {}]  }
   0x1   :  { %s1053_s11 = smov 0   ;;  %s1055_s12 = smov 0  }
   0x2   :  { %s1057_s13 = smov 0  }
   0x3 LB: > { %s21_s14 = sadd.s32 1, %s1027_s12  ;;  %p40_p1 = scmp.ne.s32.totalorder %s1019_s10, %s1015_s9  ;;  %s1031_s13 = sphi %s1057_s13, %s12_s13   ;;  %s1027_s12 = sphi %s1055_s12, %s1184_s12   ;;  %s1023_s11 = sphi %s1053_s11, %s1183_s11   ;;  %s1019_s10 = sphi %s1051_s10, %s1182_s10   ;;  %s1015_s9 = sphi %s1049_s9, %s1181_s9  }
   0x4   : > { %p22_p0 = scmp.ge.s32.totalorder %s21_s14, 9  ;;  %p41_p2 = scmp.eq.s32.totalorder %s1031_s13, 0 }
   0x5   : > { %s33_s16 = sadd.s32 1, %s1019_s10  ;;  %p764_p5 = scmp.ge.s32.totalorder %s1031_s13, 9 }
   0x6   : > { %s1186_s14 = smov (%p22_p0, %s21_s14), 0  ;;  %p42_p3 = por %p41_p2, %p40_p1 }
   0x7   : > { %s29_s15 = ssub.s32 %s1027_s12, %s1186_s14  ;;  %118 = sbr.rel (%p764_p5) target bundleno = 28 (0x1c), region = 16 }
   0x8   : > { %p31_p4 = scmp.eq.s32.totalorder %s29_s15, 0 }
   0xa   : > { %s1084_s17 = scalar_select %p31_p4, %s1019_s10, %s33_s16  }
   0xe   : > { %121 = sbr.rel (!%p42_p3) target bundleno = 28 (0x1c), region = 20  ;;  %s123_s18 = sand.u32 (%p42_p3), 1, %s1019_s10  }
   0xf   : > { %s766_s19 = sshll.u32 (%p42_p3), %s1027_s12, 2  ;;  %s765_s20 = sshll.u32 (%p42_p3), %s123_s18, 6 }
  0x10   : > { %s1092_s23 = scalar_lea.vmem (%p42_p3), %s1178_s0, %s766_s19  ;;  %s125_s24 = scalar_lea.vmem (%p42_p3), [#allocation3], %s765_s20 }
  0x11   : > { %v146_v0 = vld [vmem:[%s1092_s23] sm:$0xf] (%p42_p3)  ;;  %v148_v1 = vld [vmem:[%s1092_s23 + $0x24] sm:$0xf] (%p42_p3)  ;;  %v150_v2 = vld [vmem:[%s1092_s23 + $0x48] sm:$0xf] (%p42_p3) }
  0x12   : > { %147 = vst [vmem:[%s125_s24] sm:$0xf] (%p42_p3), %v146_v0  ;;  %149 = vst [vmem:[%s125_s24 + $0x4] sm:$0xf] (%p42_p3), %v148_v1  ;;  %v152_v3 = vld [vmem:[%s1092_s23 + $0x6c] sm:$0xf] (%p42_p3) }
  0x13   : > { %v154_v4 = vld [vmem:[%s1092_s23 + $0x90] sm:$0xf] (%p42_p3)  ;;  %151 = vst [vmem:[%s125_s24 + $0x8] sm:$0xf] (%p42_p3), %v150_v2  ;;  %153 = vst [vmem:[%s125_s24 + $0xc] sm:$0xf] (%p42_p3), %v152_v3 }
  0x14   : > { %155 = vst [vmem:[%s125_s24 + $0x10] sm:$0xf] (%p42_p3), %v154_v4  ;;  %v156_v5 = vld [vmem:[%s1092_s23 + $0xb4] sm:$0xf] (%p42_p3)  ;;  %v158_v6 = vld [vmem:[%s1092_s23 + $0xd8] sm:$0xf] (%p42_p3) }
  0x15   : > { %v160_v7 = vld [vmem:[%s1092_s23 + $0xfc] sm:$0xf]  ;;  %157 = vst [vmem:[%s125_s24 + $0x14] sm:$0xf] %v156_v5  ;;  %159 = vst [vmem:[%s125_s24 + $0x18] sm:$0xf] %v158_v6 }
  0x16   : > { %161 = vst [vmem:[%s125_s24 + $0x1c] sm:$0xf] %v160_v7  ;;  %v162_v8 = vld [vmem:[%s1092_s23 + $0x120] sm:$0xf]  ;;  %v164_v9 = vld [vmem:[%s1092_s23 + $0x144] sm:$0xf] }
  0x17   : > { %v166_v10 = vld [vmem:[%s1092_s23 + $0x168] sm:$0xf]  ;;  %163 = vst [vmem:[%s125_s24 + $0x20] sm:$0xf] %v162_v8  ;;  %165 = vst [vmem:[%s125_s24 + $0x24] sm:$0xf] %v164_v9 }
  0x18   : > { %167 = vst [vmem:[%s125_s24 + $0x28] sm:$0xf] %v166_v10  ;;  %v168_v11 = vld [vmem:[%s1092_s23 + $0x18c] sm:$0xf]  ;;  %v170_v12 = vld [vmem:[%s1092_s23 + $0x1b0] sm:$0xf] }
  0x19   : > { %v172_v13 = vld [vmem:[%s1092_s23 + $0x1d4] sm:$0xf]  ;;  %169 = vst [vmem:[%s125_s24 + $0x2c] sm:$0xf] %v168_v11  ;;  %171 = vst [vmem:[%s125_s24 + $0x30] sm:$0xf] %v170_v12 }
  0x1a   : > { %173 = vst [vmem:[%s125_s24 + $0x34] sm:$0xf] %v172_v13  ;;  %v174_v14 = vld [vmem:[%s1092_s23 + $0x1f8] sm:$0xf]  ;;  %v176_v15 = vld [vmem:[%s1092_s23 + $0x21c] sm:$0xf] }
  0x1b   : > { %175 = vst [vmem:[%s125_s24 + $0x38] sm:$0xf] %v174_v14  ;;  %177 = vst [vmem:[%s125_s24 + $0x3c] sm:$0xf] %v176_v15 }
  0x1c PF: > { %p767_p6 = scmp.ge.s32.totalorder %s1031_s13, 1  ;;  %p240_p7 = scmp.lt.s32.totalorder %s1031_s13, 10 }
  0x1e   : > { %p241_p8 = pnand %p767_p6, %p240_p7 }
  0x1f   : > { %s247_s25 = sand.u32 (!%p241_p8), 1, %s1015_s9   ;;  %s769_s26 = sshll.u32 (!%p241_p8), %s1023_s11, 4 }
  0x20   : > { %244 = sbr.rel (%p241_p8) target bundleno = 319 (0x13f), region = 65  ;;  %s768_s27 = sshll.u32 (!%p241_p8), %s247_s25, 6 }
  0x21   : > { %p275_p9 = scmp.lt.s32.totalorder (!%p241_p8), %s769_s26, 143  ;;  %s1119_s4 = scalar_lea.vmem (!%p241_p8), [#allocation3], %s768_s27 }
  0x22   : > { %p771_p10 = scmp.ne.s32.totalorder (!%p241_p8), %s1023_s11, 0 }
  0x27   : > { %s1188_s26 = smov (!%p275_p9, %s769_s26), 143  ;;  %290 = sbr.rel (%p771_p10) target bundleno = 49 (0x31), region = 73 }
  0x28   : > { %s770_s28 = sshll.u32 %s1188_s26, 2  ;;  %v1033_v16 = vmov (!%p771_p10), 0.0  }
  0x29   : > { %s1117_s3 = scalar_lea.vmem %s1179_s1, %s770_s28  ;;  %291 = vst [vmem:[#allocation2] sm:$0xff] (!%p771_p10), %v1033_v16  ;;  %292 = vst [vmem:[#allocation2 + $0x8] sm:$0xff] (!%p771_p10), %v1033_v16 }
  0x2a   : > { %293 = vst [vmem:[#allocation2 + $0x10] sm:$0xff] (!%p771_p10), %v1033_v16  ;;  %294 = vst [vmem:[#allocation2 + $0x18] sm:$0xff] (!%p771_p10), %v1033_v16 }
  0x2b   : > { %295 = vst [vmem:[#allocation2 + $0x20] sm:$0xff] (!%p771_p10), %v1033_v16  ;;  %296 = vst [vmem:[#allocation2 + $0x28] sm:$0xff] (!%p771_p10), %v1033_v16 }
  0x2c   : > { %297 = vst [vmem:[#allocation2 + $0x30] sm:$0xff] (!%p771_p10), %v1033_v16  ;;  %298 = vst [vmem:[#allocation2 + $0x38] sm:$0xff] (!%p771_p10), %v1033_v16 }
  0x2d   : > { %299 = vst [vmem:[#allocation2 + $0x40] sm:$0xff] (!%p771_p10), %v1033_v16  ;;  %300 = vst [vmem:[#allocation2 + $0x48] sm:$0xff] (!%p771_p10), %v1033_v16 }
  0x2e   : > { %301 = vst [vmem:[#allocation2 + $0x50] sm:$0xff] %v1033_v16  ;;  %302 = vst [vmem:[#allocation2 + $0x58] sm:$0xff] %v1033_v16 }
  0x2f   : > { %303 = vst [vmem:[#allocation2 + $0x60] sm:$0xff] %v1033_v16  ;;  %304 = vst [vmem:[#allocation2 + $0x68] sm:$0xff] %v1033_v16 }
  0x30   : > { %305 = vst [vmem:[#allocation2 + $0x70] sm:$0xff] %v1033_v16  ;;  %306 = vst [vmem:[#allocation2 + $0x78] sm:$0xff] %v1033_v16 }
  0x31 PF: > { %v977_v17 = vld [vmem:[%s1117_s3] sm:$0xff]   ;;  %v978_v18 = vld [vmem:[%s1117_s3 + $0x8] sm:$0xff]   ;;  %v979_v19 = vld [vmem:[%s1117_s3 + $0x10] sm:$0xff]   ;;  %p788_p11 = scmp.ne.s32.totalorder %s1023_s11, 8 }
  0x32   : > { %888 = vmatprep.subr.bf16.mxu0 %v977_v17  ;;  %920 = vmatprep.subr.bf16.mxu1 %v977_v17  ;;  %v980_v20 = vld [vmem:[%s1117_s3 + $0x18] sm:$0xff]   ;;  %v985_v21 = vld [vmem:[%s1119_s4] sm:$0xff]   ;;  %v982_v24 = vld [vmem:[%s1117_s3 + $0x28] sm:$0xff]  }
  0x33   : > { %889 = vmatpush3.bf16.msra.mxu0 %v977_v17  ;;  %928 = vmatpush3.bf16.msra.mxu1 %v977_v17  ;;  %v986_v22 = vld [vmem:[%s1119_s4 + $0x20] sm:$0xff]   ;;  %v983_v25 = vld [vmem:[%s1117_s3 + $0x30] sm:$0xff]   ;;  %v984_v26 = vld [vmem:[%s1117_s3 + $0x38] sm:$0xff]  }
  0x34   : > { %890 = vmatprep.subr.bf16.mxu0 %v978_v18  ;;  %921 = vmatprep.subr.bf16.mxu1 %v978_v18  ;;  %v981_v23 = vld [vmem:[%s1117_s3 + $0x20] sm:$0xff]   ;;  %v987_v27 = vld [vmem:[%s1119_s4 + $0x8] sm:$0xff]   ;;  %v989_v29 = vld [vmem:[%s1119_s4 + $0x10] sm:$0xff]  }
  0x35   : > { %904 = vmatprep.mubr.bf16.mxu0 %v985_v21  ;;  %912 = vmatprep.mubr.bf16.mxu1 %v986_v22  ;;  %v988_v28 = vld [vmem:[%s1119_s4 + $0x28] sm:$0xff]   ;;  %v990_v30 = vld [vmem:[%s1119_s4 + $0x30] sm:$0xff]   ;;  %v991_v31 = vld [vmem:[%s1119_s4 + $0x18] sm:$0xff]  }
  0x36   : > { %v992_v32 = vld [vmem:[%s1119_s4 + $0x38] sm:$0xff]   ;;  %v325_v33 = vld [vmem:[#allocation2 + $0x10] sm:$0xff]  ;;  %v323_v35 = vld [vmem:[#allocation2] sm:$0xff] }
  0x37   : > { %891 = vmatpush3.bf16.msra.mxu0 %v978_v18  ;;  %929 = vmatpush3.bf16.msra.mxu1 %v978_v18  ;;  %v333_v34 = vld [vmem:[#allocation2 + $0x50] sm:$0xff]  ;;  %v331_v36 = vld [vmem:[#allocation2 + $0x40] sm:$0xff]  ;;  %v326_v39 = vld [vmem:[#allocation2 + $0x18] sm:$0xff] }
  0x38   : > { %892 = vmatprep.subr.bf16.mxu0 %v979_v19  ;;  %922 = vmatprep.subr.bf16.mxu1 %v979_v19  ;;  %v334_v40 = vld [vmem:[#allocation2 + $0x58] sm:$0xff]  ;;  %v324_v45 = vld [vmem:[#allocation2 + $0x8] sm:$0xff]  ;;  %v329_v57 = vld [vmem:[#allocation2 + $0x30] sm:$0xff] }
  0x39   : > { %v332_v46 = vld [vmem:[#allocation2 + $0x48] sm:$0xff]  ;;  %v337_v58 = vld [vmem:[#allocation2 + $0x70] sm:$0xff]  ;;  %v327_v59 = vld [vmem:[#allocation2 + $0x20] sm:$0xff] }
  0x3a   : > { %v335_v60 = vld [vmem:[#allocation2 + $0x60] sm:$0xff]  ;;  %v330_v63 = vld [vmem:[#allocation2 + $0x38] sm:$0xff]  ;;  %v328_v5 = vld [vmem:[#allocation2 + $0x28] sm:$0xff] }
  0x3b   : > { %893 = vmatpush3.bf16.msra.mxu0 %v979_v19  ;;  %930 = vmatpush3.bf16.msra.mxu1 %v979_v19  ;;  %v338_v0 = vld [vmem:[#allocation2 + $0x78] sm:$0xff]  ;;  %v336_v6 = vld [vmem:[#allocation2 + $0x68] sm:$0xff] }
  0x3c   : > { %894 = vmatprep.subr.bf16.mxu0 %v980_v20  ;;  %923 = vmatprep.subr.bf16.mxu1 %v980_v20 }
  0x3f   : > { %895 = vmatpush3.bf16.msra.mxu0 %v980_v20  ;;  %931 = vmatpush3.bf16.msra.mxu1 %v980_v20 }
  0x40   : > { %896 = vmatprep.subr.bf16.mxu0 %v981_v23  ;;  %924 = vmatprep.subr.bf16.mxu1 %v981_v23 }
  0x43   : > { %897 = vmatpush3.bf16.msra.mxu0 %v981_v23  ;;  %932 = vmatpush3.bf16.msra.mxu1 %v981_v23 }
  0x44   : > { %898 = vmatprep.subr.bf16.mxu0 %v982_v24  ;;  %925 = vmatprep.subr.bf16.mxu1 %v982_v24 }
  0x47   : > { %899 = vmatpush3.bf16.msra.mxu0 %v982_v24  ;;  %933 = vmatpush3.bf16.msra.mxu1 %v982_v24 }
  0x48   : > { %900 = vmatprep.subr.bf16.mxu0 %v983_v25  ;;  %926 = vmatprep.subr.bf16.mxu1 %v983_v25 }
  0x4b   : > { %901 = vmatpush3.bf16.msra.mxu0 %v983_v25  ;;  %934 = vmatpush3.bf16.msra.mxu1 %v983_v25 }
  0x4c   : > { %902 = vmatprep.subr.bf16.mxu0 %v984_v26  ;;  %927 = vmatprep.subr.bf16.mxu1 %v984_v26 }
  0x4f   : > { %903 = vmatpush3.bf16.msra.mxu0 %v984_v26  ;;  %935 = vmatpush3.bf16.msra.mxu1 %v984_v26 }
  0x52   : > { %905 = vmatmul.mubr.bf16.vlgmr.msra.gmra.mrb[0].mxu0 %v987_v27  ;;  %913 = vmatmul.mubr.bf16.vlgmr.msra.gmra.mrb[0].mxu1 %v988_v28 }
  0x53   : > { %908 = vmatprep.mubr.bf16.mxu0 %v989_v29  ;;  %916 = vmatprep.mubr.bf16.mxu1 %v990_v30 }
  0x5a   : > { %909 = vmatmul.mubr.bf16.gmra.mrb[4].mxu0 %v991_v31  ;;  %917 = vmatmul.mubr.bf16.gmra.mrb[4].mxu1 %v992_v32 }
 0x125   : > { %v906_v37 = vpop.f32.mrb[0].mxu0  ;;  %v914_v38 = vpop.f32.mrb[0].mxu1 }
 0x126   : > { %v550_v41 = vadd.f32 %v906_v37, %v325_v33  ;;  %v558_v42 = vadd.f32 %v914_v38, %v333_v34  ;;  %v485_v43 = vpop.f32.mrb[1].mxu0  ;;  %v517_v44 = vpop.f32.mrb[1].mxu1 }
 0x127   : > { %v548_v47 = vadd.f32 %v485_v43, %v323_v35  ;;  %v556_v48 = vadd.f32 %v517_v44, %v331_v36  ;;  %v907_v49 = vpop.f32.mrb[2].mxu0  ;;  %v915_v50 = vpop.f32.mrb[2].mxu1 }
 0x128   : > { %566 = vst [vmem:[#allocation2 + $0x10] sm:$0xff] %v550_v41  ;;  %574 = vst [vmem:[#allocation2 + $0x50] sm:$0xff] %v558_v42  ;;  %v551_v51 = vadd.f32 %v907_v49, %v326_v39  ;;  %v559_v52 = vadd.f32 %v915_v50, %v334_v40  ;;  %v488_v53 = vpop.f32.mrb[3].mxu0  ;;  %v520_v54 = vpop.f32.mrb[3].mxu1 }
 0x129   : > { %564 = vst [vmem:[#allocation2] sm:$0xff] %v548_v47  ;;  %572 = vst [vmem:[#allocation2 + $0x40] sm:$0xff] %v556_v48  ;;  %v549_v55 = vadd.f32 %v488_v53, %v324_v45  ;;  %v557_v56 = vadd.f32 %v520_v54, %v332_v46 }
 0x12a   : > { %567 = vst [vmem:[#allocation2 + $0x18] sm:$0xff] %v551_v51  ;;  %575 = vst [vmem:[#allocation2 + $0x58] sm:$0xff] %v559_v52 }
 0x12b   : > { %565 = vst [vmem:[#allocation2 + $0x8] sm:$0xff] %v549_v55  ;;  %573 = vst [vmem:[#allocation2 + $0x48] sm:$0xff] %v557_v56 }
 0x12d   : > { %v910_v61 = vpop.f32.mrb[4].mxu0  ;;  %v918_v62 = vpop.f32.mrb[4].mxu1  ;;  %583 = sbr.rel (%p788_p11) target bundleno = 319 (0x13f), region = 77 }
 0x12e   : > { %v554_v1 = vadd.f32 %v910_v61, %v329_v57  ;;  %v562_v2 = vadd.f32 %v918_v62, %v337_v58  ;;  %v501_v3 = vpop.f32.mrb[5].mxu0  ;;  %v533_v4 = vpop.f32.mrb[5].mxu1 }
 0x12f   : > { %v552_v7 = vadd.f32 %v501_v3, %v327_v59  ;;  %v560_v8 = vadd.f32 %v533_v4, %v335_v60  ;;  %v911_v9 = vpop.f32.mrb[6].mxu0  ;;  %v919_v10 = vpop.f32.mrb[6].mxu1  ;;  %v586_v19 = vld [vmem:[#allocation2 + $0x10] sm:$0xff] (!%p788_p11) }
 0x130   : > { %570 = vst [vmem:[#allocation2 + $0x30] sm:$0xff] %v554_v1  ;;  %578 = vst [vmem:[#allocation2 + $0x70] sm:$0xff] %v562_v2  ;;  %v555_v11 = vadd.f32 %v911_v9, %v330_v63  ;;  %v563_v12 = vadd.f32 %v919_v10, %v338_v0  ;;  %v504_v13 = vpop.f32.mrb[7].mxu0  ;;  %v536_v14 = vpop.f32.mrb[7].mxu1  ;;  %v584_v17 = vld [vmem:[#allocation2] sm:$0xff] (!%p788_p11)  ;;  %v594_v31 = vld [vmem:[#allocation2 + $0x50] sm:$0xff] (!%p788_p11) }
 0x131   : > { %568 = vst [vmem:[#allocation2 + $0x20] sm:$0xff] %v552_v7  ;;  %576 = vst [vmem:[#allocation2 + $0x60] sm:$0xff] %v560_v8  ;;  %v553_v15 = vadd.f32 %v504_v13, %v328_v5  ;;  %v561_v16 = vadd.f32 %v536_v14, %v336_v6  ;;  %v587_v21 = vld [vmem:[#allocation2 + $0x18] sm:$0xff] (!%p788_p11)  ;;  %v592_v28 = vld [vmem:[#allocation2 + $0x40] sm:$0xff] (!%p788_p11) }
 0x132   : > { %571 = vst [vmem:[#allocation2 + $0x38] sm:$0xff] %v555_v11  ;;  %579 = vst [vmem:[#allocation2 + $0x78] sm:$0xff] %v563_v12  ;;  %v585_v18 = vld [vmem:[#allocation2 + $0x8] sm:$0xff] (!%p788_p11)  ;;  %v833_v24 = vpack.c.bf16 (!%p788_p11), %v587_v21, %v586_v19  ;;  %v595_v32 = vld [vmem:[#allocation2 + $0x58] sm:$0xff] (!%p788_p11) }
 0x133   : > { %569 = vst [vmem:[#allocation2 + $0x28] sm:$0xff] %v553_v15  ;;  %577 = vst [vmem:[#allocation2 + $0x68] sm:$0xff] %v561_v16  ;;  %v828_v20 = vpack.c.bf16 (!%p788_p11), %v585_v18, %v584_v17  ;;  %v593_v30 = vld [vmem:[#allocation2 + $0x48] sm:$0xff] (!%p788_p11)  ;;  %v853_v34 = vpack.c.bf16 (!%p788_p11), %v595_v32, %v594_v31 }
 0x134   : > { %865 = vst [vmem:[%s1180_s2 + $0x8] sm:$0xff] %v833_v24   ;;  %v848_v33 = vpack.c.bf16 %v593_v30, %v592_v28 }
 0x135   : > { %829 = vst [vmem:[%s1180_s2] sm:$0xff] %v828_v20   ;;  %869 = vst [vmem:[%s1180_s2 + $0x28] sm:$0xff] %v853_v34  }
 0x136   : > { %868 = vst [vmem:[%s1180_s2 + $0x20] sm:$0xff] %v848_v33  }
 0x137   : > { %v590_v26 = vld [vmem:[#allocation2 + $0x30] sm:$0xff] }
 0x138   : > { %v588_v22 = vld [vmem:[#allocation2 + $0x20] sm:$0xff]  ;;  %v598_v37 = vld [vmem:[#allocation2 + $0x70] sm:$0xff] }
 0x139   : > { %v591_v27 = vld [vmem:[#allocation2 + $0x38] sm:$0xff]  ;;  %v596_v35 = vld [vmem:[#allocation2 + $0x60] sm:$0xff] }
 0x13a   : > { %v589_v23 = vld [vmem:[#allocation2 + $0x28] sm:$0xff]  ;;  %v843_v29 = vpack.c.bf16 %v591_v27, %v590_v26  ;;  %v599_v39 = vld [vmem:[#allocation2 + $0x78] sm:$0xff] }
 0x13b   : > { %v838_v25 = vpack.c.bf16 %v589_v23, %v588_v22  ;;  %v597_v36 = vld [vmem:[#allocation2 + $0x68] sm:$0xff]  ;;  %v863_v40 = vpack.c.bf16 %v599_v39, %v598_v37 }
 0x13c   : > { %867 = vst [vmem:[%s1180_s2 + $0x18] sm:$0xff] %v843_v29   ;;  %v858_v38 = vpack.c.bf16 %v597_v36, %v596_v35 }
 0x13d   : > { %866 = vst [vmem:[%s1180_s2 + $0x10] sm:$0xff] %v838_v25   ;;  %871 = vst [vmem:[%s1180_s2 + $0x38] sm:$0xff] %v863_v40  }
 0x13e   : > { %870 = vst [vmem:[%s1180_s2 + $0x30] sm:$0xff] %v858_v38  }
 0x13f PF: > { %s12_s13 = sadd.s32 1, %s1031_s13   ;;  %s1181_s9 = smov %s1019_s10 }
 0x140   : > { %p9_p12 = scmp.ge.s32.totalorder %s12_s13, 11   ;;  %s1182_s10 = smov %s1084_s17 }
 0x141   : > { %s1183_s11 = smov %s1027_s12  ;;  %s1184_s12 = smov %s1186_s14 }
 0x142   :  { %11 = sbr.rel (!%p9_p12) target bundleno = 3 (0x3), region = 115 }

// kernel: densenet121_forward.129
= control target key start
LH: loop header
LB: loop body
LE: loop exit
PB: predicated region body
PF: predicated region fallthrough
CT: control target
= control target key end

     0   :  { %s1350_s21 = smov 0   ;;  %s1352_s22 = smov 0   ;;  %s1579_s0 = inlined_call_operand.vmem [shape: bf16[128,256], index: 0, kind: input, shape index: {}]   ;;  %s1580_s1 = inlined_call_operand.vmem [shape: bf16[256,128], index: 1, kind: input, shape index: {}]   ;;  %s1581_s2 = inlined_call_operand.vmem [shape: f32[1,256], index: 2, kind: input, shape index: {}]   ;;  %s1582_s3 = inlined_call_operand.vmem [shape: f32[1,256], index: 3, kind: input, shape index: {}]   ;;  %s1583_s4 = inlined_call_operand.vmem [shape: f32[1,128], index: 4, kind: input, shape index: {}]   ;;  %s1584_s5 = inlined_call_operand.vmem [shape: f32[1,128], index: 5, kind: input, shape index: {}]   ;;  %s1585_s6 = inlined_call_operand.vmem [shape: bf16[128,128], index: 6, kind: output, shape index: {}]  }
   0x1   :  { %s1354_s23 = smov 0   ;;  %s1356_s24 = smov 0  }
   0x2   :  { %s1358_s25 = smov 0  }
   0x3 LB: > { %s25_s26 = sadd.s32 1, %s1308_s24  ;;  %p44_p1 = scmp.ne.s32.totalorder %s1300_s22, %s1296_s21  ;;  %s1312_s25 = sphi %s1358_s25, %s16_s25   ;;  %s1308_s24 = sphi %s1356_s24, %s1589_s24   ;;  %s1304_s23 = sphi %s1354_s23, %s1588_s23   ;;  %s1300_s22 = sphi %s1352_s22, %s1587_s22   ;;  %s1296_s21 = sphi %s1350_s21, %s1586_s21  }
   0x4   : > { %p26_p0 = scmp.ge.s32.totalorder %s25_s26, 2  ;;  %p45_p2 = scmp.eq.s32.totalorder %s1312_s25, 0 }
   0x5   : > { %s37_s28 = sadd.s32 1, %s1300_s22  ;;  %p1018_p5 = scmp.ge.s32.totalorder %s1312_s25, 2 }
   0x6   : > { %s1591_s26 = smov (%p26_p0, %s25_s26), 0  ;;  %p46_p3 = por %p45_p2, %p44_p1 }
   0x7   : > { %s33_s27 = ssub.s32 %s1308_s24, %s1591_s26  ;;  %222 = sbr.rel (%p1018_p5) target bundleno = 28 (0x1c), region = 24 }
   0x8   : > { %p35_p4 = scmp.eq.s32.totalorder %s33_s27, 0 }
   0xa   : > { %s1385_s29 = scalar_select %p35_p4, %s1300_s22, %s37_s28  }
   0xe   : > { %225 = sbr.rel (!%p46_p3) target bundleno = 28 (0x1c), region = 28  ;;  %s227_s30 = sand.u32 (%p46_p3), 1, %s1300_s22  }
   0xf   : > { %s1020_s7 = sshll.u32 (%p46_p3), %s1308_s24, 2  ;;  %s1019_s8 = sshll.u32 (%p46_p3), %s227_s30, 6 }
  0x10   : > { %s1393_s11 = scalar_lea.vmem (%p46_p3), %s1579_s0, %s1020_s7  ;;  %s229_s12 = scalar_lea.vmem (%p46_p3), [#allocation3], %s1019_s8 }
  0x11   : > { %v250_v0 = vld [vmem:[%s1393_s11] sm:$0xf] (%p46_p3)  ;;  %v252_v1 = vld [vmem:[%s1393_s11 + $0x8] sm:$0xf] (%p46_p3)  ;;  %v254_v2 = vld [vmem:[%s1393_s11 + $0x10] sm:$0xf] (%p46_p3) }
  0x12   : > { %251 = vst [vmem:[%s229_s12] sm:$0xf] (%p46_p3), %v250_v0  ;;  %253 = vst [vmem:[%s229_s12 + $0x4] sm:$0xf] (%p46_p3), %v252_v1  ;;  %v256_v3 = vld [vmem:[%s1393_s11 + $0x18] sm:$0xf] (%p46_p3) }
  0x13   : > { %v258_v4 = vld [vmem:[%s1393_s11 + $0x20] sm:$0xf] (%p46_p3)  ;;  %255 = vst [vmem:[%s229_s12 + $0x8] sm:$0xf] (%p46_p3), %v254_v2  ;;  %257 = vst [vmem:[%s229_s12 + $0xc] sm:$0xf] (%p46_p3), %v256_v3 }
  0x14   : > { %259 = vst [vmem:[%s229_s12 + $0x10] sm:$0xf] (%p46_p3), %v258_v4  ;;  %v260_v5 = vld [vmem:[%s1393_s11 + $0x28] sm:$0xf] (%p46_p3)  ;;  %v262_v6 = vld [vmem:[%s1393_s11 + $0x30] sm:$0xf] (%p46_p3) }
  0x15   : > { %v264_v7 = vld [vmem:[%s1393_s11 + $0x38] sm:$0xf]  ;;  %261 = vst [vmem:[%s229_s12 + $0x14] sm:$0xf] %v260_v5  ;;  %263 = vst [vmem:[%s229_s12 + $0x18] sm:$0xf] %v262_v6 }
  0x16   : > { %265 = vst [vmem:[%s229_s12 + $0x1c] sm:$0xf] %v264_v7  ;;  %v266_v8 = vld [vmem:[%s1393_s11 + $0x40] sm:$0xf]  ;;  %v268_v9 = vld [vmem:[%s1393_s11 + $0x48] sm:$0xf] }
  0x17   : > { %v270_v10 = vld [vmem:[%s1393_s11 + $0x50] sm:$0xf]  ;;  %267 = vst [vmem:[%s229_s12 + $0x20] sm:$0xf] %v266_v8  ;;  %269 = vst [vmem:[%s229_s12 + $0x24] sm:$0xf] %v268_v9 }
  0x18   : > { %271 = vst [vmem:[%s229_s12 + $0x28] sm:$0xf] %v270_v10  ;;  %v272_v11 = vld [vmem:[%s1393_s11 + $0x58] sm:$0xf]  ;;  %v274_v12 = vld [vmem:[%s1393_s11 + $0x60] sm:$0xf] }
  0x19   : > { %v276_v13 = vld [vmem:[%s1393_s11 + $0x68] sm:$0xf]  ;;  %273 = vst [vmem:[%s229_s12 + $0x2c] sm:$0xf] %v272_v11  ;;  %275 = vst [vmem:[%s229_s12 + $0x30] sm:$0xf] %v274_v12 }
  0x1a   : > { %277 = vst [vmem:[%s229_s12 + $0x34] sm:$0xf] %v276_v13  ;;  %v278_v14 = vld [vmem:[%s1393_s11 + $0x70] sm:$0xf]  ;;  %v280_v15 = vld [vmem:[%s1393_s11 + $0x78] sm:$0xf] }
  0x1b   : > { %279 = vst [vmem:[%s229_s12 + $0x38] sm:$0xf] %v278_v14  ;;  %281 = vst [vmem:[%s229_s12 + $0x3c] sm:$0xf] %v280_v15 }
  0x1c PF: > { %p1021_p6 = scmp.ge.s32.totalorder %s1312_s25, 1  ;;  %p356_p7 = scmp.lt.s32.totalorder %s1312_s25, 3 }
  0x1e   : > { %p357_p8 = pnand %p1021_p6, %p356_p7 }
  0x1f   : > { %s363_s13 = sand.u32 (!%p357_p8), 1, %s1296_s21   ;;  %s1023_s14 = sshll.u32 (!%p357_p8), %s1304_s23, 4 }
  0x20   : > { %360 = sbr.rel (%p357_p8) target bundleno = 326 (0x146), region = 81  ;;  %s1022_s15 = sshll.u32 (!%p357_p8), %s363_s13, 6 }
  0x21   : > { %p405_p9 = scmp.lt.s32.totalorder (!%p357_p8), %s1023_s14, 31  ;;  %p410_p10 = scmp.lt.s32.totalorder (!%p357_p8), %s1304_s23, 1 }
  0x22   : > { %s1432_s9 = scalar_lea.vmem (!%p357_p8), [#allocation3], %s1022_s15  ;;  %p1025_p11 = scmp.ne.s32.totalorder (!%p357_p8), %s1304_s23, 0 }
  0x27   : > { %s1593_s14 = smov (!%p405_p9, %s1023_s14), 31  ;;  %426 = sbr.rel (%p1025_p11) target bundleno = 50 (0x32), region = 89 }
  0x28   : > { %s1417_s16 = scalar_select %p410_p10, %s1304_s23, 1 }
  0x29   : > { %s1024_s17 = sshll.u32 %s1593_s14, 2  ;;  %v1314_v16 = vmov (!%p1025_p11), 0.0  }
  0x2a   : > { %s1422_s20 = scalar_lea.vmem %s1580_s1, %s1024_s17  ;;  %s412_s30 = scalar_lea.vmem %s1581_s2, %s1417_s16  ;;  %427 = vst [vmem:[#allocation2] sm:$0xff] (!%p1025_p11), %v1314_v16  ;;  %428 = vst [vmem:[#allocation2 + $0x8] sm:$0xff] (!%p1025_p11), %v1314_v16 }
  0x2b   : > { %s415_s8 = scalar_lea.vmem %s1582_s3, %s1417_s16  ;;  %429 = vst [vmem:[#allocation2 + $0x10] sm:$0xff] (!%p1025_p11), %v1314_v16  ;;  %430 = vst [vmem:[#allocation2 + $0x18] sm:$0xff] (!%p1025_p11), %v1314_v16 }
  0x2c   : > { %431 = vst [vmem:[#allocation2 + $0x20] sm:$0xff] (!%p1025_p11), %v1314_v16  ;;  %432 = vst [vmem:[#allocation2 + $0x28] sm:$0xff] (!%p1025_p11), %v1314_v16 }
  0x2d   : > { %433 = vst [vmem:[#allocation2 + $0x30] sm:$0xff] (!%p1025_p11), %v1314_v16  ;;  %434 = vst [vmem:[#allocation2 + $0x38] sm:$0xff] (!%p1025_p11), %v1314_v16 }
  0x2e   : > { %435 = vst [vmem:[#allocation2 + $0x40] sm:$0xff] %v1314_v16  ;;  %436 = vst [vmem:[#allocation2 + $0x48] sm:$0xff] %v1314_v16 }
  0x2f   : > { %437 = vst [vmem:[#allocation2 + $0x50] sm:$0xff] %v1314_v16  ;;  %438 = vst [vmem:[#allocation2 + $0x58] sm:$0xff] %v1314_v16 }
  0x30   : > { %439 = vst [vmem:[#allocation2 + $0x60] sm:$0xff] %v1314_v16  ;;  %440 = vst [vmem:[#allocation2 + $0x68] sm:$0xff] %v1314_v16 }
  0x31   : > { %441 = vst [vmem:[#allocation2 + $0x70] sm:$0xff] %v1314_v16  ;;  %442 = vst [vmem:[#allocation2 + $0x78] sm:$0xff] %v1314_v16 }
  0x32 PF: > { %v1266_v17 = vld [vmem:[%s1422_s20] sm:$0xff]   ;;  %v1267_v18 = vld [vmem:[%s1422_s20 + $0x8] sm:$0xff]   ;;  %v1268_v19 = vld [vmem:[%s1422_s20 + $0x10] sm:$0xff]   ;;  %p1036_p12 = scmp.ne.s32.totalorder %s1304_s23, 1 }
  0x33   : > { %1177 = vmatprep.subr.bf16.mxu0 %v1266_v17  ;;  %1209 = vmatprep.subr.bf16.mxu1 %v1266_v17  ;;  %v1269_v20 = vld [vmem:[%s1422_s20 + $0x18] sm:$0xff]   ;;  %v1076_v21 = vld [vmem:[%s1432_s9] sm:$0xff]   ;;  %v1147_v26 = vld [vmem:[%s1432_s9 + $0x8] sm:$0xff]  }
  0x34   : > { %1178 = vmatpush3.bf16.msra.mxu0 %v1266_v17  ;;  %1217 = vmatpush3.bf16.msra.mxu1 %v1266_v17  ;;  %v1445_v22 = vld [vmem:[%s412_s30] ss:$0 sm:$0xff]  ;;  %v1077_v23 = vunpack.c.l.bf16 %v1076_v21  ;;  %v1078_v24 = vunpack.c.h.bf16 %v1076_v21  ;;  %v1151_v30 = vld [vmem:[%s1432_s9 + $0x28] sm:$0xff]   ;;  %v1148_v33 = vld [vmem:[%s1432_s9 + $0x10] sm:$0xff]   ;;  %v1081_v37 = vunpack.c.l.bf16 %v1147_v26  ;;  %v1082_v38 = vunpack.c.h.bf16 %v1147_v26 }
  0x35   : > { %1179 = vmatprep.subr.bf16.mxu0 %v1267_v18  ;;  %1210 = vmatprep.subr.bf16.mxu1 %v1267_v18  ;;  %v1150_v25 = vld [vmem:[%s1432_s9 + $0x20] sm:$0xff]   ;;  %v1097_v41 = vunpack.c.l.bf16 %v1151_v30  ;;  %v1098_v42 = vunpack.c.h.bf16 %v1151_v30  ;;  %v1085_v45 = vunpack.c.l.bf16 %v1148_v33  ;;  %v1152_v48 = vld [vmem:[%s1432_s9 + $0x30] sm:$0xff]   ;;  %v1271_v49 = vld [vmem:[%s1422_s20 + $0x28] sm:$0xff]   ;;  %v1086_v57 = vunpack.c.h.bf16 %v1148_v33 }
  0x36   : > { %v1454_v27 = vld [vmem:[%s415_s8] ss:$0 sm:$0xff]  ;;  %v1093_v28 = vunpack.c.l.bf16 %v1150_v25  ;;  %v1094_v29 = vunpack.c.h.bf16 %v1150_v25  ;;  %v482_v31 = vmul.f32 %v1077_v23, %v1445_v22  ;;  %v483_v32 = vmul.f32 %v1078_v24, %v1445_v22  ;;  %v1149_v61 = vld [vmem:[%s1432_s9 + $0x18] sm:$0xff]   ;;  %v1272_v1 = vld [vmem:[%s1422_s20 + $0x30] sm:$0xff]  }
  0x37   : > { %v1270_v34 = vld [vmem:[%s1422_s20 + $0x20] sm:$0xff]   ;;  %v484_v52 = vmul.f32 %v1081_v37, %v1445_v22  ;;  %v485_v53 = vmul.f32 %v1082_v38, %v1445_v22  ;;  %v492_v55 = vmul.f32 %v1097_v41, %v1445_v22  ;;  %v493_v56 = vmul.f32 %v1098_v42, %v1445_v22  ;;  %v1153_v0 = vld [vmem:[%s1432_s9 + $0x38] sm:$0xff]  }
  0x38   : > { %1180 = vmatpush3.bf16.msra.mxu0 %v1267_v18  ;;  %1218 = vmatpush3.bf16.msra.mxu1 %v1267_v18  ;;  %v490_v35 = vmul.f32 %v1093_v28, %v1445_v22  ;;  %v491_v36 = vmul.f32 %v1094_v29, %v1445_v22  ;;  %v505_v39 = vadd.f32 %v1454_v27, %v482_v31  ;;  %v1101_v60 = vunpack.c.l.bf16 %v1152_v48  ;;  %v1273_v16 = vld [vmem:[%s1422_s20 + $0x38] sm:$0xff]  }
  0x39   : > { %1181 = vmatprep.subr.bf16.mxu0 %v1268_v19  ;;  %1211 = vmatprep.subr.bf16.mxu1 %v1268_v19  ;;  %v506_v40 = vadd.f32 %v1454_v27, %v483_v32  ;;  %v486_v59 = vmul.f32 %v1085_v45, %v1445_v22  ;;  %v487_v62 = vmul.f32 %v1086_v57, %v1445_v22  ;;  %v1102_v63 = vunpack.c.h.bf16 %v1152_v48  ;;  %v555_v45 = vld [vmem:[#allocation2 + $0x50] sm:$0xff] }
  0x3a   : > { %v513_v43 = vadd.f32 %v1454_v27, %v490_v35  ;;  %v514_v44 = vadd.f32 %v1454_v27, %v491_v36  ;;  %v521_v46 = vmax.f32 %v505_v39, 0.0  ;;  %v507_v2 = vadd.f32 %v1454_v27, %v484_v52 }
  0x3b   : > { %v522_v47 = vmax.f32 %v506_v40, 0.0  ;;  %v508_v3 = vadd.f32 %v1454_v27, %v485_v53  ;;  %v494_v4 = vmul.f32 %v1101_v60, %v1445_v22  ;;  %v515_v5 = vadd.f32 %v1454_v27, %v492_v55  ;;  %v546_v55 = vld [vmem:[#allocation2 + $0x8] sm:$0xff] }
  0x3c   : > { %1182 = vmatpush3.bf16.msra.mxu0 %v1268_v19  ;;  %1219 = vmatpush3.bf16.msra.mxu1 %v1268_v19  ;;  %v529_v50 = vmax.f32 %v513_v43, 0.0  ;;  %v530_v51 = vmax.f32 %v514_v44, 0.0  ;;  %v516_v6 = vadd.f32 %v1454_v27, %v493_v56  ;;  %v495_v7 = vmul.f32 %v1102_v63, %v1445_v22  ;;  %v547_v44 = vld [vmem:[#allocation2 + $0x10] sm:$0xff]  ;;  %v554_v56 = vld [vmem:[#allocation2 + $0x48] sm:$0xff] }
  0x3d   : > { %1183 = vmatprep.subr.bf16.mxu0 %v1269_v20  ;;  %1212 = vmatprep.subr.bf16.mxu1 %v1269_v20  ;;  %v537_v54 = vpack.c.bf16 %v522_v47, %v521_v46  ;;  %v1089_v8 = vunpack.c.l.bf16 %v1149_v61  ;;  %v509_v9 = vadd.f32 %v1454_v27, %v486_v59  ;;  %v1090_v10 = vunpack.c.h.bf16 %v1149_v61  ;;  %v545_v46 = vld [vmem:[#allocation2] sm:$0xff] }
  0x3e   : > { %v541_v58 = vpack.c.bf16 %v530_v51, %v529_v50  ;;  %v1105_v11 = vunpack.c.l.bf16 %v1153_v0  ;;  %v1106_v12 = vunpack.c.h.bf16 %v1153_v0  ;;  %v510_v13 = vadd.f32 %v1454_v27, %v487_v62  ;;  %v556_v50 = vld [vmem:[#allocation2 + $0x58] sm:$0xff] }
  0x3f   : > { %1193 = vmatprep.mubr.bf16.mxu0 %v537_v54  ;;  %v517_v14 = vadd.f32 %v1454_v27, %v494_v4  ;;  %v518_v15 = vadd.f32 %v1454_v27, %v495_v7  ;;  %v523_v17 = vmax.f32 %v507_v2, 0.0  ;;  %v524_v18 = vmax.f32 %v508_v3, 0.0  ;;  %v551_v3 = vld [vmem:[#allocation2 + $0x30] sm:$0xff] }
  0x40   : > { %1184 = vmatpush3.bf16.msra.mxu0 %v1269_v20  ;;  %1220 = vmatpush3.bf16.msra.mxu1 %v1269_v20  ;;  %v531_v19 = vmax.f32 %v515_v5, 0.0  ;;  %v532_v20 = vmax.f32 %v516_v6, 0.0  ;;  %v488_v21 = vmul.f32 %v1089_v8, %v1445_v22  ;;  %v489_v23 = vmul.f32 %v1090_v10, %v1445_v22  ;;  %v559_v4 = vld [vmem:[#allocation2 + $0x70] sm:$0xff]  ;;  %v549_v5 = vld [vmem:[#allocation2 + $0x20] sm:$0xff]  ;;  %v560_v10 = vld [vmem:[#allocation2 + $0x78] sm:$0xff] }
  0x41   : > { %1185 = vmatprep.subr.bf16.mxu0 %v1270_v34  ;;  %1213 = vmatprep.subr.bf16.mxu1 %v1270_v34  ;;  %v496_v24 = vmul.f32 %v1105_v11, %v1445_v22  ;;  %v497_v25 = vmul.f32 %v1106_v12, %v1445_v22  ;;  %v525_v26 = vmax.f32 %v509_v9, 0.0  ;;  %v526_v28 = vmax.f32 %v510_v13, 0.0  ;;  %v557_v6 = vld [vmem:[#allocation2 + $0x60] sm:$0xff]  ;;  %v552_v9 = vld [vmem:[#allocation2 + $0x38] sm:$0xff] }
  0x42   : > { %1201 = vmatprep.mubr.bf16.mxu1 %v541_v58  ;;  %v533_v29 = vmax.f32 %v517_v14, 0.0  ;;  %v534_v30 = vmax.f32 %v518_v15, 0.0  ;;  %v538_v31 = vpack.c.bf16 %v524_v18, %v523_v17  ;;  %v542_v32 = vpack.c.bf16 %v532_v20, %v531_v19  ;;  %v550_v15 = vld [vmem:[#allocation2 + $0x28] sm:$0xff] }
  0x43   : > { %v511_v33 = vadd.f32 %v1454_v27, %v488_v21  ;;  %v519_v35 = vadd.f32 %v1454_v27, %v496_v24  ;;  %v520_v36 = vadd.f32 %v1454_v27, %v497_v25  ;;  %v539_v22 = vpack.c.bf16 %v526_v28, %v525_v26 }
  0x44   : > { %1186 = vmatpush3.bf16.msra.mxu0 %v1270_v34  ;;  %1221 = vmatpush3.bf16.msra.mxu1 %v1270_v34  ;;  %v512_v34 = vadd.f32 %v1454_v27, %v489_v23  ;;  %v543_v37 = vpack.c.bf16 %v534_v30, %v533_v29  ;;  %v553_v27 = vld [vmem:[#allocation2 + $0x40] sm:$0xff] }
  0x45   : > { %1187 = vmatprep.subr.bf16.mxu0 %v1271_v49  ;;  %1214 = vmatprep.subr.bf16.mxu1 %v1271_v49  ;;  %v527_v38 = vmax.f32 %v511_v33, 0.0  ;;  %v535_v40 = vmax.f32 %v519_v35, 0.0  ;;  %v536_v41 = vmax.f32 %v520_v36, 0.0 }
  0x46   : > { %v528_v39 = vmax.f32 %v512_v34, 0.0  ;;  %v1508_v34 = vld [vmem:[%s1584_s5] ss:$0 sm:$0xff] (!%p1036_p12) }
  0x47   : > { %v544_v43 = vpack.c.bf16 %v536_v41, %v535_v40 }
  0x48   : > { %1188 = vmatpush3.bf16.msra.mxu0 %v1271_v49  ;;  %1222 = vmatpush3.bf16.msra.mxu1 %v1271_v49  ;;  %v540_v42 = vpack.c.bf16 %v528_v39, %v527_v38  ;;  %v548_v49 = vld [vmem:[#allocation2 + $0x18] sm:$0xff] }
  0x49   : > { %1189 = vmatprep.subr.bf16.mxu0 %v1272_v1  ;;  %1215 = vmatprep.subr.bf16.mxu1 %v1272_v1 }
  0x4c   : > { %1190 = vmatpush3.bf16.msra.mxu0 %v1272_v1  ;;  %1223 = vmatpush3.bf16.msra.mxu1 %v1272_v1 }
  0x4d   : > { %1191 = vmatprep.subr.bf16.mxu0 %v1273_v16  ;;  %1216 = vmatprep.subr.bf16.mxu1 %v1273_v16 }
  0x50   : > { %1192 = vmatpush3.bf16.msra.mxu0 %v1273_v16  ;;  %1224 = vmatpush3.bf16.msra.mxu1 %v1273_v16  ;;  %v558_v16 = vld [vmem:[#allocation2 + $0x68] sm:$0xff] }
  0x53   : > { %1194 = vmatmul.mubr.bf16.vlgmr.msra.gmra.mrb[0].mxu0 %v538_v31  ;;  %1202 = vmatmul.mubr.bf16.vlgmr.msra.gmra.mrb[0].mxu1 %v542_v32  ;;  %v1501_v31 = vld [vmem:[%s1583_s4] ss:$0 sm:$0xff] (!%p1036_p12) }
  0x54   : > { %1197 = vmatprep.mubr.bf16.mxu0 %v539_v22  ;;  %1205 = vmatprep.mubr.bf16.mxu1 %v543_v37 }
  0x5b   : > { %1198 = vmatmul.mubr.bf16.gmra.mrb[4].mxu0 %v540_v42  ;;  %1206 = vmatmul.mubr.bf16.gmra.mrb[4].mxu1 %v544_v43 }
 0x126   : > { %v1195_v47 = vpop.f32.mrb[0].mxu0  ;;  %v1203_v48 = vpop.f32.mrb[0].mxu1 }
 0x127   : > { %v724_v51 = vadd.f32 %v1195_v47, %v547_v44  ;;  %v732_v52 = vadd.f32 %v1203_v48, %v555_v45  ;;  %v659_v53 = vpop.f32.mrb[1].mxu0  ;;  %v691_v54 = vpop.f32.mrb[1].mxu1 }
 0x128   : > { %v722_v57 = vadd.f32 %v659_v53, %v545_v46  ;;  %v730_v58 = vadd.f32 %v691_v54, %v553_v27  ;;  %v1196_v59 = vpop.f32.mrb[2].mxu0  ;;  %v1204_v60 = vpop.f32.mrb[2].mxu1 }
 0x129   : > { %740 = vst [vmem:[#allocation2 + $0x10] sm:$0xff] %v724_v51  ;;  %748 = vst [vmem:[#allocation2 + $0x50] sm:$0xff] %v732_v52  ;;  %v725_v61 = vadd.f32 %v1196_v59, %v548_v49  ;;  %v733_v62 = vadd.f32 %v1204_v60, %v556_v50  ;;  %v662_v63 = vpop.f32.mrb[3].mxu0  ;;  %v694_v0 = vpop.f32.mrb[3].mxu1 }
 0x12a   : > { %738 = vst [vmem:[#allocation2] sm:$0xff] %v722_v57  ;;  %746 = vst [vmem:[#allocation2 + $0x40] sm:$0xff] %v730_v58  ;;  %v723_v1 = vadd.f32 %v662_v63, %v546_v55  ;;  %v731_v2 = vadd.f32 %v694_v0, %v554_v56 }
 0x12b   : > { %741 = vst [vmem:[#allocation2 + $0x18] sm:$0xff] %v725_v61  ;;  %749 = vst [vmem:[#allocation2 + $0x58] sm:$0xff] %v733_v62 }
 0x12c   : > { %739 = vst [vmem:[#allocation2 + $0x8] sm:$0xff] %v723_v1  ;;  %747 = vst [vmem:[#allocation2 + $0x48] sm:$0xff] %v731_v2 }
 0x12e   : > { %v1199_v7 = vpop.f32.mrb[4].mxu0  ;;  %v1207_v8 = vpop.f32.mrb[4].mxu1  ;;  %757 = sbr.rel (%p1036_p12) target bundleno = 326 (0x146), region = 93 }
 0x12f   : > { %v728_v11 = vadd.f32 %v1199_v7, %v551_v3  ;;  %v736_v12 = vadd.f32 %v1207_v8, %v559_v4  ;;  %v675_v13 = vpop.f32.mrb[5].mxu0  ;;  %v707_v14 = vpop.f32.mrb[5].mxu1 }
 0x130   : > { %v726_v17 = vadd.f32 %v675_v13, %v549_v5  ;;  %v734_v18 = vadd.f32 %v707_v14, %v557_v6  ;;  %v1200_v19 = vpop.f32.mrb[6].mxu0  ;;  %v1208_v20 = vpop.f32.mrb[6].mxu1  ;;  %v760_v35 = vld [vmem:[#allocation2 + $0x10] sm:$0xff] (!%p1036_p12) }
 0x131   : > { %744 = vst [vmem:[#allocation2 + $0x30] sm:$0xff] %v728_v11  ;;  %752 = vst [vmem:[#allocation2 + $0x70] sm:$0xff] %v736_v12  ;;  %v729_v21 = vadd.f32 %v1200_v19, %v552_v9  ;;  %v737_v23 = vadd.f32 %v1208_v20, %v560_v10  ;;  %v678_v24 = vpop.f32.mrb[7].mxu0  ;;  %v710_v25 = vpop.f32.mrb[7].mxu1  ;;  %v758_v29 = vld [vmem:[#allocation2] sm:$0xff] (!%p1036_p12)  ;;  %v783_v22 = vmul.f32 (!%p1036_p12), %v1501_v31, %v760_v35  ;;  %v768_v59 = vld [vmem:[#allocation2 + $0x50] sm:$0xff] (!%p1036_p12) }
 0x132   : > { %742 = vst [vmem:[#allocation2 + $0x20] sm:$0xff] %v726_v17  ;;  %750 = vst [vmem:[#allocation2 + $0x60] sm:$0xff] %v734_v18  ;;  %v727_v26 = vadd.f32 %v678_v24, %v550_v15  ;;  %v735_v28 = vadd.f32 %v710_v25, %v558_v16  ;;  %v781_v32 = vmul.f32 (!%p1036_p12), %v1501_v31, %v758_v29  ;;  %v761_v36 = vld [vmem:[#allocation2 + $0x18] sm:$0xff] (!%p1036_p12)  ;;  %v766_v49 = vld [vmem:[#allocation2 + $0x40] sm:$0xff] (!%p1036_p12) }
 0x133   : > { %745 = vst [vmem:[#allocation2 + $0x38] sm:$0xff] %v729_v21  ;;  %753 = vst [vmem:[#allocation2 + $0x78] sm:$0xff] %v737_v23  ;;  %v759_v30 = vld [vmem:[#allocation2 + $0x8] sm:$0xff] (!%p1036_p12)  ;;  %v784_v37 = vmul.f32 (!%p1036_p12), %v1501_v31, %v761_v36  ;;  %v806_v46 = vadd.f32 (!%p1036_p12), %v1508_v34, %v783_v22  ;;  %v769_v60 = vld [vmem:[#allocation2 + $0x58] sm:$0xff] (!%p1036_p12)  ;;  %v789_v0 = vmul.f32 (!%p1036_p12), %v1501_v31, %v766_v49 }
 0x134   : > { %743 = vst [vmem:[#allocation2 + $0x28] sm:$0xff] %v727_v26  ;;  %751 = vst [vmem:[#allocation2 + $0x68] sm:$0xff] %v735_v28  ;;  %v782_v33 = vmul.f32 (!%p1036_p12), %v1501_v31, %v759_v30  ;;  %v804_v41 = vadd.f32 (!%p1036_p12), %v1508_v34, %v781_v32  ;;  %v767_v54 = vld [vmem:[#allocation2 + $0x48] sm:$0xff] (!%p1036_p12)  ;;  %v791_v10 = vmul.f32 (!%p1036_p12), %v1501_v31, %v768_v59 }
 0x135   : > { %v807_v27 = vadd.f32 %v1508_v34, %v784_v37  ;;  %v822_v55 = vmax.f32 %v806_v46, 0.0  ;;  %v790_v6 = vmul.f32 %v1501_v31, %v767_v54  ;;  %v812_v9 = vadd.f32 %v1508_v34, %v789_v0 }
 0x136   : > { %v805_v42 = vadd.f32 %v1508_v34, %v782_v33  ;;  %v820_v50 = vmax.f32 %v804_v41, 0.0  ;;  %v792_v11 = vmul.f32 %v1501_v31, %v769_v60  ;;  %v814_v18 = vadd.f32 %v1508_v34, %v791_v10 }
 0x137   : > { %v823_v56 = vmax.f32 %v807_v27, 0.0  ;;  %v813_v14 = vadd.f32 %v1508_v34, %v790_v6  ;;  %v828_v17 = vmax.f32 %v812_v9, 0.0 }
 0x138   : > { %v764_v40 = vld [vmem:[#allocation2 + $0x30] sm:$0xff]  ;;  %v821_v51 = vmax.f32 %v805_v42, 0.0  ;;  %v815_v19 = vadd.f32 %v1508_v34, %v792_v11  ;;  %v830_v26 = vmax.f32 %v814_v18, 0.0 }
 0x139   : > { %v762_v38 = vld [vmem:[#allocation2 + $0x20] sm:$0xff]  ;;  %v787_v47 = vmul.f32 %v1501_v31, %v764_v40  ;;  %v1115_v3 = vpack.c.bf16 %v823_v56, %v822_v55  ;;  %v772_v7 = vld [vmem:[#allocation2 + $0x70] sm:$0xff]  ;;  %v829_v21 = vmax.f32 %v813_v14, 0.0 }
 0x13a   : > { %v785_v43 = vmul.f32 %v1501_v31, %v762_v38  ;;  %v765_v45 = vld [vmem:[#allocation2 + $0x38] sm:$0xff]  ;;  %v1110_v61 = vpack.c.bf16 %v821_v51, %v820_v50  ;;  %v770_v1 = vld [vmem:[#allocation2 + $0x60] sm:$0xff]  ;;  %v795_v20 = vmul.f32 %v1501_v31, %v772_v7  ;;  %v831_v28 = vmax.f32 %v815_v19, 0.0 }
 0x13b   : > { %v763_v39 = vld [vmem:[#allocation2 + $0x28] sm:$0xff]  ;;  %v788_v48 = vmul.f32 %v1501_v31, %v765_v45  ;;  %v810_v57 = vadd.f32 %v1508_v34, %v787_v47  ;;  %v773_v12 = vld [vmem:[#allocation2 + $0x78] sm:$0xff]  ;;  %1154 = vst [vmem:[%s1585_s6 + $0x8] sm:$0xff] %v1115_v3   ;;  %v793_v15 = vmul.f32 %v1501_v31, %v770_v1  ;;  %v1130_v30 = vpack.c.bf16 %v829_v21, %v828_v17 }
 0x13c   : > { %v786_v44 = vmul.f32 %v1501_v31, %v763_v39  ;;  %v808_v52 = vadd.f32 %v1508_v34, %v785_v43  ;;  %v771_v2 = vld [vmem:[#allocation2 + $0x68] sm:$0xff]  ;;  %1111 = vst [vmem:[%s1585_s6] sm:$0xff] %v1110_v61   ;;  %v796_v25 = vmul.f32 %v1501_v31, %v773_v12  ;;  %v818_v29 = vadd.f32 %v1508_v34, %v795_v20 }
 0x13d   : > { %v811_v58 = vadd.f32 %v1508_v34, %v788_v48  ;;  %v826_v4 = vmax.f32 %v810_v57, 0.0  ;;  %v794_v16 = vmul.f32 %v1501_v31, %v771_v2  ;;  %v816_v23 = vadd.f32 %v1508_v34, %v793_v15  ;;  %1157 = vst [vmem:[%s1585_s6 + $0x20] sm:$0xff] %v1130_v30  }
 0x13e   : > { %v809_v53 = vadd.f32 %v1508_v34, %v786_v44  ;;  %v824_v62 = vmax.f32 %v808_v52, 0.0  ;;  %v819_v35 = vadd.f32 %v1508_v34, %v796_v25  ;;  %v1135_v36 = vpack.c.bf16 %v831_v28, %v830_v26 }
 0x13f   : > { %v827_v5 = vmax.f32 %v811_v58, 0.0  ;;  %v817_v24 = vadd.f32 %v1508_v34, %v794_v16  ;;  %v832_v32 = vmax.f32 %v816_v23, 0.0  ;;  %v834_v22 = vmax.f32 %v818_v29, 0.0 }
 0x140   : > { %v825_v63 = vmax.f32 %v809_v53, 0.0  ;;  %v835_v38 = vmax.f32 %v819_v35, 0.0  ;;  %1158 = vst [vmem:[%s1585_s6 + $0x28] sm:$0xff] %v1135_v36  }
 0x141   : > { %v1125_v13 = vpack.c.bf16 %v827_v5, %v826_v4  ;;  %v833_v33 = vmax.f32 %v817_v24, 0.0 }
 0x142   : > { %v1120_v8 = vpack.c.bf16 %v825_v63, %v824_v62  ;;  %v1145_v31 = vpack.c.bf16 %v835_v38, %v834_v22 }
 0x143   : > { %1156 = vst [vmem:[%s1585_s6 + $0x18] sm:$0xff] %v1125_v13   ;;  %v1140_v37 = vpack.c.bf16 %v833_v33, %v832_v32 }
 0x144   : > { %1155 = vst [vmem:[%s1585_s6 + $0x10] sm:$0xff] %v1120_v8   ;;  %1160 = vst [vmem:[%s1585_s6 + $0x38] sm:$0xff] %v1145_v31  }
 0x145   : > { %1159 = vst [vmem:[%s1585_s6 + $0x30] sm:$0xff] %v1140_v37  }
 0x146 PF: > { %s16_s25 = sadd.s32 1, %s1312_s25   ;;  %s1586_s21 = smov %s1300_s22 }
 0x147   : > { %p13_p13 = scmp.ge.s32.totalorder %s16_s25, 4   ;;  %s1587_s22 = smov %s1385_s29 }
 0x148   : > { %s1588_s23 = smov %s1308_s24  ;;  %s1589_s24 = smov %s1591_s26 }
 0x149   :  { %15 = sbr.rel (!%p13_p13) target bundleno = 3 (0x3), region = 137 }

// kernel: densenet121_forward.135
= control target key start
LH: loop header
LB: loop body
LE: loop exit
PB: predicated region body
PF: predicated region fallthrough
CT: control target
= control target key end

     0   :  { %s1222_s15 = smov 0   ;;  %s1224_s16 = smov 0   ;;  %s1409_s0 = inlined_call_operand.vmem [shape: bf16[128,256], index: 0, kind: input, shape index: {}]   ;;  %s1410_s1 = inlined_call_operand.vmem [shape: bf16[256,128], index: 1, kind: input, shape index: {}]   ;;  %s1411_s2 = inlined_call_operand.vmem [shape: f32[1,256], index: 2, kind: input, shape index: {}]   ;;  %s1412_s3 = inlined_call_operand.vmem [shape: f32[1,256], index: 3, kind: input, shape index: {}]   ;;  %s1413_s4 = inlined_call_operand.vmem [shape: bf16[128,128], index: 4, kind: output, shape index: {}]  }
   0x1   :  { %s1226_s17 = smov 0   ;;  %s1228_s18 = smov 0  }
   0x2   :  { %s1230_s19 = smov 0  }
   0x3 LB: > { %s23_s20 = sadd.s32 1, %s1190_s18  ;;  %p42_p1 = scmp.ne.s32.totalorder %s1182_s16, %s1178_s15  ;;  %s1194_s19 = sphi %s1230_s19, %s14_s19   ;;  %s1190_s18 = sphi %s1228_s18, %s1417_s18   ;;  %s1186_s17 = sphi %s1226_s17, %s1416_s17   ;;  %s1182_s16 = sphi %s1224_s16, %s1415_s16   ;;  %s1178_s15 = sphi %s1222_s15, %s1414_s15  }
   0x4   : > { %p24_p0 = scmp.ge.s32.totalorder %s23_s20, 2  ;;  %p43_p2 = scmp.eq.s32.totalorder %s1194_s19, 0 }
   0x5   : > { %s35_s22 = sadd.s32 1, %s1182_s16  ;;  %p902_p5 = scmp.ge.s32.totalorder %s1194_s19, 2 }
   0x6   : > { %s1419_s20 = smov (%p24_p0, %s23_s20), 0  ;;  %p44_p3 = por %p43_p2, %p42_p1 }
   0x7   : > { %s31_s21 = ssub.s32 %s1190_s18, %s1419_s20  ;;  %172 = sbr.rel (%p902_p5) target bundleno = 28 (0x1c), region = 16 }
   0x8   : > { %p33_p4 = scmp.eq.s32.totalorder %s31_s21, 0 }
   0xa   : > { %s1257_s23 = scalar_select %p33_p4, %s1182_s16, %s35_s22  }
   0xe   : > { %175 = sbr.rel (!%p44_p3) target bundleno = 28 (0x1c), region = 20  ;;  %s177_s24 = sand.u32 (%p44_p3), 1, %s1182_s16  }
   0xf   : > { %s904_s25 = sshll.u32 (%p44_p3), %s1190_s18, 2  ;;  %s903_s26 = sshll.u32 (%p44_p3), %s177_s24, 6 }
  0x10   : > { %s1265_s29 = scalar_lea.vmem (%p44_p3), %s1409_s0, %s904_s25  ;;  %s179_s30 = scalar_lea.vmem (%p44_p3), [#allocation3], %s903_s26 }
  0x11   : > { %v200_v0 = vld [vmem:[%s1265_s29] sm:$0xf] (%p44_p3)  ;;  %v202_v1 = vld [vmem:[%s1265_s29 + $0x8] sm:$0xf] (%p44_p3)  ;;  %v204_v2 = vld [vmem:[%s1265_s29 + $0x10] sm:$0xf] (%p44_p3) }
  0x12   : > { %201 = vst [vmem:[%s179_s30] sm:$0xf] (%p44_p3), %v200_v0  ;;  %203 = vst [vmem:[%s179_s30 + $0x4] sm:$0xf] (%p44_p3), %v202_v1  ;;  %v206_v3 = vld [vmem:[%s1265_s29 + $0x18] sm:$0xf] (%p44_p3) }
  0x13   : > { %v208_v4 = vld [vmem:[%s1265_s29 + $0x20] sm:$0xf] (%p44_p3)  ;;  %205 = vst [vmem:[%s179_s30 + $0x8] sm:$0xf] (%p44_p3), %v204_v2  ;;  %207 = vst [vmem:[%s179_s30 + $0xc] sm:$0xf] (%p44_p3), %v206_v3 }
  0x14   : > { %209 = vst [vmem:[%s179_s30 + $0x10] sm:$0xf] (%p44_p3), %v208_v4  ;;  %v210_v5 = vld [vmem:[%s1265_s29 + $0x28] sm:$0xf] (%p44_p3)  ;;  %v212_v6 = vld [vmem:[%s1265_s29 + $0x30] sm:$0xf] (%p44_p3) }
  0x15   : > { %v214_v7 = vld [vmem:[%s1265_s29 + $0x38] sm:$0xf]  ;;  %211 = vst [vmem:[%s179_s30 + $0x14] sm:$0xf] %v210_v5  ;;  %213 = vst [vmem:[%s179_s30 + $0x18] sm:$0xf] %v212_v6 }
  0x16   : > { %215 = vst [vmem:[%s179_s30 + $0x1c] sm:$0xf] %v214_v7  ;;  %v216_v8 = vld [vmem:[%s1265_s29 + $0x40] sm:$0xf]  ;;  %v218_v9 = vld [vmem:[%s1265_s29 + $0x48] sm:$0xf] }
  0x17   : > { %v220_v10 = vld [vmem:[%s1265_s29 + $0x50] sm:$0xf]  ;;  %217 = vst [vmem:[%s179_s30 + $0x20] sm:$0xf] %v216_v8  ;;  %219 = vst [vmem:[%s179_s30 + $0x24] sm:$0xf] %v218_v9 }
  0x18   : > { %221 = vst [vmem:[%s179_s30 + $0x28] sm:$0xf] %v220_v10  ;;  %v222_v11 = vld [vmem:[%s1265_s29 + $0x58] sm:$0xf]  ;;  %v224_v12 = vld [vmem:[%s1265_s29 + $0x60] sm:$0xf] }
  0x19   : > { %v226_v13 = vld [vmem:[%s1265_s29 + $0x68] sm:$0xf]  ;;  %223 = vst [vmem:[%s179_s30 + $0x2c] sm:$0xf] %v222_v11  ;;  %225 = vst [vmem:[%s179_s30 + $0x30] sm:$0xf] %v224_v12 }
  0x1a   : > { %227 = vst [vmem:[%s179_s30 + $0x34] sm:$0xf] %v226_v13  ;;  %v228_v14 = vld [vmem:[%s1265_s29 + $0x70] sm:$0xf]  ;;  %v230_v15 = vld [vmem:[%s1265_s29 + $0x78] sm:$0xf] }
  0x1b   : > { %229 = vst [vmem:[%s179_s30 + $0x38] sm:$0xf] %v228_v14  ;;  %231 = vst [vmem:[%s179_s30 + $0x3c] sm:$0xf] %v230_v15 }
  0x1c PF: > { %p905_p6 = scmp.ge.s32.totalorder %s1194_s19, 1  ;;  %p306_p7 = scmp.lt.s32.totalorder %s1194_s19, 3 }
  0x1e   : > { %p307_p8 = pnand %p905_p6, %p306_p7 }
  0x1f   : > { %s313_s5 = sand.u32 (!%p307_p8), 1, %s1178_s15   ;;  %s907_s6 = sshll.u32 (!%p307_p8), %s1186_s17, 4 }
  0x20   : > { %310 = sbr.rel (%p307_p8) target bundleno = 320 (0x140), region = 73  ;;  %s906_s7 = sshll.u32 (!%p307_p8), %s313_s5, 6 }
  0x21   : > { %p351_p9 = scmp.lt.s32.totalorder (!%p307_p8), %s907_s6, 31  ;;  %p356_p10 = scmp.lt.s32.totalorder (!%p307_p8), %s1186_s17, 1 }
  0x22   : > { %s1304_s25 = scalar_lea.vmem (!%p307_p8), [#allocation3], %s906_s7  ;;  %p909_p11 = scmp.ne.s32.totalorder (!%p307_p8), %s1186_s17, 0 }
  0x27   : > { %s1421_s6 = smov (!%p351_p9, %s907_s6), 31  ;;  %372 = sbr.rel (%p909_p11) target bundleno = 50 (0x32), region = 81 }
  0x28   : > { %s1289_s8 = scalar_select %p356_p10, %s1186_s17, 1 }
  0x29   : > { %s908_s9 = sshll.u32 %s1421_s6, 2  ;;  %v1196_v16 = vmov (!%p909_p11), 0.0  }
  0x2a   : > { %s1294_s12 = scalar_lea.vmem %s1410_s1, %s908_s9  ;;  %s358_s21 = scalar_lea.vmem %s1411_s2, %s1289_s8  ;;  %373 = vst [vmem:[#allocation2] sm:$0xff] (!%p909_p11), %v1196_v16  ;;  %374 = vst [vmem:[#allocation2 + $0x8] sm:$0xff] (!%p909_p11), %v1196_v16 }
  0x2b   : > { %s361_s24 = scalar_lea.vmem %s1412_s3, %s1289_s8  ;;  %375 = vst [vmem:[#allocation2 + $0x10] sm:$0xff] (!%p909_p11), %v1196_v16  ;;  %376 = vst [vmem:[#allocation2 + $0x18] sm:$0xff] (!%p909_p11), %v1196_v16 }
  0x2c   : > { %377 = vst [vmem:[#allocation2 + $0x20] sm:$0xff] (!%p909_p11), %v1196_v16  ;;  %378 = vst [vmem:[#allocation2 + $0x28] sm:$0xff] (!%p909_p11), %v1196_v16 }
  0x2d   : > { %379 = vst [vmem:[#allocation2 + $0x30] sm:$0xff] (!%p909_p11), %v1196_v16  ;;  %380 = vst [vmem:[#allocation2 + $0x38] sm:$0xff] (!%p909_p11), %v1196_v16 }
  0x2e   : > { %381 = vst [vmem:[#allocation2 + $0x40] sm:$0xff] %v1196_v16  ;;  %382 = vst [vmem:[#allocation2 + $0x48] sm:$0xff] %v1196_v16 }
  0x2f   : > { %383 = vst [vmem:[#allocation2 + $0x50] sm:$0xff] %v1196_v16  ;;  %384 = vst [vmem:[#allocation2 + $0x58] sm:$0xff] %v1196_v16 }
  0x30   : > { %385 = vst [vmem:[#allocation2 + $0x60] sm:$0xff] %v1196_v16  ;;  %386 = vst [vmem:[#allocation2 + $0x68] sm:$0xff] %v1196_v16 }
  0x31   : > { %387 = vst [vmem:[#allocation2 + $0x70] sm:$0xff] %v1196_v16  ;;  %388 = vst [vmem:[#allocation2 + $0x78] sm:$0xff] %v1196_v16 }
  0x32 PF: > { %v1148_v17 = vld [vmem:[%s1294_s12] sm:$0xff]   ;;  %v1149_v18 = vld [vmem:[%s1294_s12 + $0x8] sm:$0xff]   ;;  %v1150_v19 = vld [vmem:[%s1294_s12 + $0x10] sm:$0xff]   ;;  %p920_p12 = scmp.ne.s32.totalorder %s1186_s17, 1 }
  0x33   : > { %1059 = vmatprep.subr.bf16.mxu0 %v1148_v17  ;;  %1091 = vmatprep.subr.bf16.mxu1 %v1148_v17  ;;  %v1151_v20 = vld [vmem:[%s1294_s12 + $0x18] sm:$0xff]   ;;  %v958_v21 = vld [vmem:[%s1304_s25] sm:$0xff]   ;;  %v1029_v26 = vld [vmem:[%s1304_s25 + $0x8] sm:$0xff]  }
  0x34   : > { %1060 = vmatpush3.bf16.msra.mxu0 %v1148_v17  ;;  %1099 = vmatpush3.bf16.msra.mxu1 %v1148_v17  ;;  %v1317_v22 = vld [vmem:[%s358_s21] ss:$0 sm:$0xff]  ;;  %v959_v23 = vunpack.c.l.bf16 %v958_v21  ;;  %v960_v24 = vunpack.c.h.bf16 %v958_v21  ;;  %v1033_v30 = vld [vmem:[%s1304_s25 + $0x28] sm:$0xff]   ;;  %v1030_v33 = vld [vmem:[%s1304_s25 + $0x10] sm:$0xff]   ;;  %v963_v37 = vunpack.c.l.bf16 %v1029_v26  ;;  %v964_v38 = vunpack.c.h.bf16 %v1029_v26 }
  0x35   : > { %1061 = vmatprep.subr.bf16.mxu0 %v1149_v18  ;;  %1092 = vmatprep.subr.bf16.mxu1 %v1149_v18  ;;  %v1032_v25 = vld [vmem:[%s1304_s25 + $0x20] sm:$0xff]   ;;  %v979_v41 = vunpack.c.l.bf16 %v1033_v30  ;;  %v980_v42 = vunpack.c.h.bf16 %v1033_v30  ;;  %v967_v45 = vunpack.c.l.bf16 %v1030_v33  ;;  %v1034_v48 = vld [vmem:[%s1304_s25 + $0x30] sm:$0xff]   ;;  %v1153_v49 = vld [vmem:[%s1294_s12 + $0x28] sm:$0xff]   ;;  %v968_v57 = vunpack.c.h.bf16 %v1030_v33 }
  0x36   : > { %v1326_v27 = vld [vmem:[%s361_s24] ss:$0 sm:$0xff]  ;;  %v975_v28 = vunpack.c.l.bf16 %v1032_v25  ;;  %v976_v29 = vunpack.c.h.bf16 %v1032_v25  ;;  %v428_v31 = vmul.f32 %v959_v23, %v1317_v22  ;;  %v429_v32 = vmul.f32 %v960_v24, %v1317_v22  ;;  %v1031_v61 = vld [vmem:[%s1304_s25 + $0x18] sm:$0xff]   ;;  %v1154_v1 = vld [vmem:[%s1294_s12 + $0x30] sm:$0xff]  }
  0x37   : > { %v1152_v34 = vld [vmem:[%s1294_s12 + $0x20] sm:$0xff]   ;;  %v430_v52 = vmul.f32 %v963_v37, %v1317_v22  ;;  %v431_v53 = vmul.f32 %v964_v38, %v1317_v22  ;;  %v438_v55 = vmul.f32 %v979_v41, %v1317_v22  ;;  %v439_v56 = vmul.f32 %v980_v42, %v1317_v22  ;;  %v1035_v0 = vld [vmem:[%s1304_s25 + $0x38] sm:$0xff]  }
  0x38   : > { %1062 = vmatpush3.bf16.msra.mxu0 %v1149_v18  ;;  %1100 = vmatpush3.bf16.msra.mxu1 %v1149_v18  ;;  %v436_v35 = vmul.f32 %v975_v28, %v1317_v22  ;;  %v437_v36 = vmul.f32 %v976_v29, %v1317_v22  ;;  %v451_v39 = vadd.f32 %v1326_v27, %v428_v31  ;;  %v983_v60 = vunpack.c.l.bf16 %v1034_v48  ;;  %v1155_v16 = vld [vmem:[%s1294_s12 + $0x38] sm:$0xff]  }
  0x39   : > { %1063 = vmatprep.subr.bf16.mxu0 %v1150_v19  ;;  %1093 = vmatprep.subr.bf16.mxu1 %v1150_v19  ;;  %v452_v40 = vadd.f32 %v1326_v27, %v429_v32  ;;  %v432_v59 = vmul.f32 %v967_v45, %v1317_v22  ;;  %v433_v62 = vmul.f32 %v968_v57, %v1317_v22  ;;  %v984_v63 = vunpack.c.h.bf16 %v1034_v48  ;;  %v501_v45 = vld [vmem:[#allocation2 + $0x50] sm:$0xff] }
  0x3a   : > { %v459_v43 = vadd.f32 %v1326_v27, %v436_v35  ;;  %v460_v44 = vadd.f32 %v1326_v27, %v437_v36  ;;  %v467_v46 = vmax.f32 %v451_v39, 0.0  ;;  %v453_v2 = vadd.f32 %v1326_v27, %v430_v52 }
  0x3b   : > { %v468_v47 = vmax.f32 %v452_v40, 0.0  ;;  %v454_v3 = vadd.f32 %v1326_v27, %v431_v53  ;;  %v440_v4 = vmul.f32 %v983_v60, %v1317_v22  ;;  %v461_v5 = vadd.f32 %v1326_v27, %v438_v55  ;;  %v492_v55 = vld [vmem:[#allocation2 + $0x8] sm:$0xff] }
  0x3c   : > { %1064 = vmatpush3.bf16.msra.mxu0 %v1150_v19  ;;  %1101 = vmatpush3.bf16.msra.mxu1 %v1150_v19  ;;  %v475_v50 = vmax.f32 %v459_v43, 0.0  ;;  %v476_v51 = vmax.f32 %v460_v44, 0.0  ;;  %v462_v6 = vadd.f32 %v1326_v27, %v439_v56  ;;  %v441_v7 = vmul.f32 %v984_v63, %v1317_v22  ;;  %v493_v44 = vld [vmem:[#allocation2 + $0x10] sm:$0xff]  ;;  %v500_v56 = vld [vmem:[#allocation2 + $0x48] sm:$0xff] }
  0x3d   : > { %1065 = vmatprep.subr.bf16.mxu0 %v1151_v20  ;;  %1094 = vmatprep.subr.bf16.mxu1 %v1151_v20  ;;  %v483_v54 = vpack.c.bf16 %v468_v47, %v467_v46  ;;  %v971_v8 = vunpack.c.l.bf16 %v1031_v61  ;;  %v455_v9 = vadd.f32 %v1326_v27, %v432_v59  ;;  %v972_v10 = vunpack.c.h.bf16 %v1031_v61  ;;  %v491_v46 = vld [vmem:[#allocation2] sm:$0xff] }
  0x3e   : > { %v487_v58 = vpack.c.bf16 %v476_v51, %v475_v50  ;;  %v987_v11 = vunpack.c.l.bf16 %v1035_v0  ;;  %v988_v12 = vunpack.c.h.bf16 %v1035_v0  ;;  %v456_v13 = vadd.f32 %v1326_v27, %v433_v62  ;;  %v502_v50 = vld [vmem:[#allocation2 + $0x58] sm:$0xff] }
  0x3f   : > { %1075 = vmatprep.mubr.bf16.mxu0 %v483_v54  ;;  %v463_v14 = vadd.f32 %v1326_v27, %v440_v4  ;;  %v464_v15 = vadd.f32 %v1326_v27, %v441_v7  ;;  %v469_v17 = vmax.f32 %v453_v2, 0.0  ;;  %v470_v18 = vmax.f32 %v454_v3, 0.0  ;;  %v497_v3 = vld [vmem:[#allocation2 + $0x30] sm:$0xff] }
  0x40   : > { %1066 = vmatpush3.bf16.msra.mxu0 %v1151_v20  ;;  %1102 = vmatpush3.bf16.msra.mxu1 %v1151_v20  ;;  %v477_v19 = vmax.f32 %v461_v5, 0.0  ;;  %v478_v20 = vmax.f32 %v462_v6, 0.0  ;;  %v434_v21 = vmul.f32 %v971_v8, %v1317_v22  ;;  %v435_v23 = vmul.f32 %v972_v10, %v1317_v22  ;;  %v505_v4 = vld [vmem:[#allocation2 + $0x70] sm:$0xff]  ;;  %v495_v5 = vld [vmem:[#allocation2 + $0x20] sm:$0xff]  ;;  %v506_v10 = vld [vmem:[#allocation2 + $0x78] sm:$0xff] }
  0x41   : > { %1067 = vmatprep.subr.bf16.mxu0 %v1152_v34  ;;  %1095 = vmatprep.subr.bf16.mxu1 %v1152_v34  ;;  %v442_v24 = vmul.f32 %v987_v11, %v1317_v22  ;;  %v443_v25 = vmul.f32 %v988_v12, %v1317_v22  ;;  %v471_v26 = vmax.f32 %v455_v9, 0.0  ;;  %v472_v28 = vmax.f32 %v456_v13, 0.0  ;;  %v503_v6 = vld [vmem:[#allocation2 + $0x60] sm:$0xff]  ;;  %v498_v9 = vld [vmem:[#allocation2 + $0x38] sm:$0xff] }
  0x42   : > { %1083 = vmatprep.mubr.bf16.mxu1 %v487_v58  ;;  %v479_v29 = vmax.f32 %v463_v14, 0.0  ;;  %v480_v30 = vmax.f32 %v464_v15, 0.0  ;;  %v484_v31 = vpack.c.bf16 %v470_v18, %v469_v17  ;;  %v488_v32 = vpack.c.bf16 %v478_v20, %v477_v19  ;;  %v496_v15 = vld [vmem:[#allocation2 + $0x28] sm:$0xff] }
  0x43   : > { %v457_v33 = vadd.f32 %v1326_v27, %v434_v21  ;;  %v465_v35 = vadd.f32 %v1326_v27, %v442_v24  ;;  %v466_v36 = vadd.f32 %v1326_v27, %v443_v25  ;;  %v485_v22 = vpack.c.bf16 %v472_v28, %v471_v26 }
  0x44   : > { %1068 = vmatpush3.bf16.msra.mxu0 %v1152_v34  ;;  %1103 = vmatpush3.bf16.msra.mxu1 %v1152_v34  ;;  %v458_v34 = vadd.f32 %v1326_v27, %v435_v23  ;;  %v489_v37 = vpack.c.bf16 %v480_v30, %v479_v29  ;;  %v499_v27 = vld [vmem:[#allocation2 + $0x40] sm:$0xff] }
  0x45   : > { %1069 = vmatprep.subr.bf16.mxu0 %v1153_v49  ;;  %1096 = vmatprep.subr.bf16.mxu1 %v1153_v49  ;;  %v473_v38 = vmax.f32 %v457_v33, 0.0  ;;  %v481_v40 = vmax.f32 %v465_v35, 0.0  ;;  %v482_v41 = vmax.f32 %v466_v36, 0.0 }
  0x46   : > { %v474_v39 = vmax.f32 %v458_v34, 0.0 }
  0x47   : > { %v490_v43 = vpack.c.bf16 %v482_v41, %v481_v40 }
  0x48   : > { %1070 = vmatpush3.bf16.msra.mxu0 %v1153_v49  ;;  %1104 = vmatpush3.bf16.msra.mxu1 %v1153_v49  ;;  %v486_v42 = vpack.c.bf16 %v474_v39, %v473_v38  ;;  %v494_v49 = vld [vmem:[#allocation2 + $0x18] sm:$0xff] }
  0x49   : > { %1071 = vmatprep.subr.bf16.mxu0 %v1154_v1  ;;  %1097 = vmatprep.subr.bf16.mxu1 %v1154_v1 }
  0x4c   : > { %1072 = vmatpush3.bf16.msra.mxu0 %v1154_v1  ;;  %1105 = vmatpush3.bf16.msra.mxu1 %v1154_v1 }
  0x4d   : > { %1073 = vmatprep.subr.bf16.mxu0 %v1155_v16  ;;  %1098 = vmatprep.subr.bf16.mxu1 %v1155_v16 }
  0x50   : > { %1074 = vmatpush3.bf16.msra.mxu0 %v1155_v16  ;;  %1106 = vmatpush3.bf16.msra.mxu1 %v1155_v16  ;;  %v504_v16 = vld [vmem:[#allocation2 + $0x68] sm:$0xff] }
  0x53   : > { %1076 = vmatmul.mubr.bf16.vlgmr.msra.gmra.mrb[0].mxu0 %v484_v31  ;;  %1084 = vmatmul.mubr.bf16.vlgmr.msra.gmra.mrb[0].mxu1 %v488_v32 }
  0x54   : > { %1079 = vmatprep.mubr.bf16.mxu0 %v485_v22  ;;  %1087 = vmatprep.mubr.bf16.mxu1 %v489_v37 }
  0x5b   : > { %1080 = vmatmul.mubr.bf16.gmra.mrb[4].mxu0 %v486_v42  ;;  %1088 = vmatmul.mubr.bf16.gmra.mrb[4].mxu1 %v490_v43 }
 0x126   : > { %v1077_v47 = vpop.f32.mrb[0].mxu0  ;;  %v1085_v48 = vpop.f32.mrb[0].mxu1 }
 0x127   : > { %v670_v51 = vadd.f32 %v1077_v47, %v493_v44  ;;  %v678_v52 = vadd.f32 %v1085_v48, %v501_v45  ;;  %v605_v53 = vpop.f32.mrb[1].mxu0  ;;  %v637_v54 = vpop.f32.mrb[1].mxu1 }
 0x128   : > { %v668_v57 = vadd.f32 %v605_v53, %v491_v46  ;;  %v676_v58 = vadd.f32 %v637_v54, %v499_v27  ;;  %v1078_v59 = vpop.f32.mrb[2].mxu0  ;;  %v1086_v60 = vpop.f32.mrb[2].mxu1 }
 0x129   : > { %686 = vst [vmem:[#allocation2 + $0x10] sm:$0xff] %v670_v51  ;;  %694 = vst [vmem:[#allocation2 + $0x50] sm:$0xff] %v678_v52  ;;  %v671_v61 = vadd.f32 %v1078_v59, %v494_v49  ;;  %v679_v62 = vadd.f32 %v1086_v60, %v502_v50  ;;  %v608_v63 = vpop.f32.mrb[3].mxu0  ;;  %v640_v0 = vpop.f32.mrb[3].mxu1 }
 0x12a   : > { %684 = vst [vmem:[#allocation2] sm:$0xff] %v668_v57  ;;  %692 = vst [vmem:[#allocation2 + $0x40] sm:$0xff] %v676_v58  ;;  %v669_v1 = vadd.f32 %v608_v63, %v492_v55  ;;  %v677_v2 = vadd.f32 %v640_v0, %v500_v56 }
 0x12b   : > { %687 = vst [vmem:[#allocation2 + $0x18] sm:$0xff] %v671_v61  ;;  %695 = vst [vmem:[#allocation2 + $0x58] sm:$0xff] %v679_v62 }
 0x12c   : > { %685 = vst [vmem:[#allocation2 + $0x8] sm:$0xff] %v669_v1  ;;  %693 = vst [vmem:[#allocation2 + $0x48] sm:$0xff] %v677_v2 }
 0x12e   : > { %v1081_v7 = vpop.f32.mrb[4].mxu0  ;;  %v1089_v8 = vpop.f32.mrb[4].mxu1  ;;  %703 = sbr.rel (%p920_p12) target bundleno = 320 (0x140), region = 85 }
 0x12f   : > { %v674_v11 = vadd.f32 %v1081_v7, %v497_v3  ;;  %v682_v12 = vadd.f32 %v1089_v8, %v505_v4  ;;  %v621_v13 = vpop.f32.mrb[5].mxu0  ;;  %v653_v14 = vpop.f32.mrb[5].mxu1 }
 0x130   : > { %v672_v17 = vadd.f32 %v621_v13, %v495_v5  ;;  %v680_v18 = vadd.f32 %v653_v14, %v503_v6  ;;  %v1082_v19 = vpop.f32.mrb[6].mxu0  ;;  %v1090_v20 = vpop.f32.mrb[6].mxu1  ;;  %v706_v31 = vld [vmem:[#allocation2 + $0x10] sm:$0xff] (!%p920_p12) }
 0x131   : > { %690 = vst [vmem:[#allocation2 + $0x30] sm:$0xff] %v674_v11  ;;  %698 = vst [vmem:[#allocation2 + $0x70] sm:$0xff] %v682_v12  ;;  %v675_v21 = vadd.f32 %v1082_v19, %v498_v9  ;;  %v683_v23 = vadd.f32 %v1090_v20, %v506_v10  ;;  %v624_v24 = vpop.f32.mrb[7].mxu0  ;;  %v656_v25 = vpop.f32.mrb[7].mxu1  ;;  %v704_v29 = vld [vmem:[#allocation2] sm:$0xff] (!%p920_p12)  ;;  %v714_v42 = vld [vmem:[#allocation2 + $0x50] sm:$0xff] (!%p920_p12) }
 0x132   : > { %688 = vst [vmem:[#allocation2 + $0x20] sm:$0xff] %v672_v17  ;;  %696 = vst [vmem:[#allocation2 + $0x60] sm:$0xff] %v680_v18  ;;  %v673_v26 = vadd.f32 %v624_v24, %v496_v15  ;;  %v681_v28 = vadd.f32 %v656_v25, %v504_v16  ;;  %v707_v33 = vld [vmem:[#allocation2 + $0x18] sm:$0xff] (!%p920_p12)  ;;  %v712_v39 = vld [vmem:[#allocation2 + $0x40] sm:$0xff] (!%p920_p12) }
 0x133   : > { %691 = vst [vmem:[#allocation2 + $0x38] sm:$0xff] %v675_v21  ;;  %699 = vst [vmem:[#allocation2 + $0x78] sm:$0xff] %v683_v23  ;;  %v705_v30 = vld [vmem:[#allocation2 + $0x8] sm:$0xff] (!%p920_p12)  ;;  %v997_v36 = vpack.c.bf16 (!%p920_p12), %v707_v33, %v706_v31  ;;  %v715_v43 = vld [vmem:[#allocation2 + $0x58] sm:$0xff] (!%p920_p12) }
 0x134   : > { %689 = vst [vmem:[#allocation2 + $0x28] sm:$0xff] %v673_v26  ;;  %697 = vst [vmem:[#allocation2 + $0x68] sm:$0xff] %v681_v28  ;;  %v992_v32 = vpack.c.bf16 (!%p920_p12), %v705_v30, %v704_v29  ;;  %v713_v41 = vld [vmem:[#allocation2 + $0x48] sm:$0xff] (!%p920_p12)  ;;  %v1017_v45 = vpack.c.bf16 (!%p920_p12), %v715_v43, %v714_v42 }
 0x135   : > { %1036 = vst [vmem:[%s1413_s4 + $0x8] sm:$0xff] %v997_v36   ;;  %v1012_v44 = vpack.c.bf16 %v713_v41, %v712_v39 }
 0x136   : > { %993 = vst [vmem:[%s1413_s4] sm:$0xff] %v992_v32   ;;  %1040 = vst [vmem:[%s1413_s4 + $0x28] sm:$0xff] %v1017_v45  }
 0x137   : > { %1039 = vst [vmem:[%s1413_s4 + $0x20] sm:$0xff] %v1012_v44  }
 0x138   : > { %v710_v37 = vld [vmem:[#allocation2 + $0x30] sm:$0xff] }
 0x139   : > { %v708_v34 = vld [vmem:[#allocation2 + $0x20] sm:$0xff]  ;;  %v718_v47 = vld [vmem:[#allocation2 + $0x70] sm:$0xff] }
 0x13a   : > { %v711_v38 = vld [vmem:[#allocation2 + $0x38] sm:$0xff]  ;;  %v716_v46 = vld [vmem:[#allocation2 + $0x60] sm:$0xff] }
 0x13b   : > { %v709_v35 = vld [vmem:[#allocation2 + $0x28] sm:$0xff]  ;;  %v1007_v40 = vpack.c.bf16 %v711_v38, %v710_v37  ;;  %v719_v49 = vld [vmem:[#allocation2 + $0x78] sm:$0xff] }
 0x13c   : > { %v1002_v22 = vpack.c.bf16 %v709_v35, %v708_v34  ;;  %v717_v27 = vld [vmem:[#allocation2 + $0x68] sm:$0xff]  ;;  %v1027_v50 = vpack.c.bf16 %v719_v49, %v718_v47 }
 0x13d   : > { %1038 = vst [vmem:[%s1413_s4 + $0x18] sm:$0xff] %v1007_v40   ;;  %v1022_v48 = vpack.c.bf16 %v717_v27, %v716_v46 }
 0x13e   : > { %1037 = vst [vmem:[%s1413_s4 + $0x10] sm:$0xff] %v1002_v22   ;;  %1042 = vst [vmem:[%s1413_s4 + $0x38] sm:$0xff] %v1027_v50  }
 0x13f   : > { %1041 = vst [vmem:[%s1413_s4 + $0x30] sm:$0xff] %v1022_v48  }
 0x140 PF: > { %s14_s19 = sadd.s32 1, %s1194_s19   ;;  %s1414_s15 = smov %s1182_s16 }
 0x141   : > { %p11_p13 = scmp.ge.s32.totalorder %s14_s19, 4   ;;  %s1415_s16 = smov %s1257_s23 }
 0x142   : > { %s1416_s17 = smov %s1190_s18  ;;  %s1417_s18 = smov %s1419_s20 }
 0x143   :  { %13 = sbr.rel (!%p11_p13) target bundleno = 3 (0x3), region = 129 }

// kernel: densenet121_forward.136
= control target key start
LH: loop header
LB: loop body
LE: loop exit
PB: predicated region body
PF: predicated region fallthrough
CT: control target
= control target key end

     0   :  { %s411_s1 = inlined_call_operand.vmem [shape: bf16[128,128], index: 1, kind: input, shape index: {}]   ;;  %s412_s0 = inlined_call_operand.vmem [shape: bf16[32,128], index: 0, kind: input, shape index: {}]   ;;  %s413_s2 = inlined_call_operand.vmem [shape: f32[1,128], index: 2, kind: input, shape index: {}]   ;;  %s414_s3 = inlined_call_operand.vmem [shape: f32[1,128], index: 3, kind: input, shape index: {}]   ;;  %s415_s4 = inlined_call_operand.vmem [shape: f32[1,128], index: 4, kind: input, shape index: {}]   ;;  %s416_s5 = inlined_call_operand.vmem [shape: f32[1,128], index: 5, kind: input, shape index: {}]   ;;  %s417_s6 = inlined_call_operand.vmem [shape: bf16[32,128], index: 6, kind: output, shape index: {}]  }
   0x1   :  { %v320_v0 = vld [vmem:[%s411_s1] sm:$0xff]   ;;  %v321_v1 = vld [vmem:[%s411_s1 + $0x8] sm:$0xff]   ;;  %v322_v2 = vld [vmem:[%s411_s1 + $0x10] sm:$0xff]  }
   0x2   :  { %300 = vmatprep.subr.bf16.mxu0 %v320_v0  ;;  %v323_v3 = vld [vmem:[%s411_s1 + $0x18] sm:$0xff]   ;;  %v271_v4 = vld [vmem:[%s412_s0] sm:$0xff]   ;;  %v288_v9 = vld [vmem:[%s412_s0 + $0x8] sm:$0xff]  }
   0x3   :  { %301 = vmatpush3.bf16.msra.mxu0 %v320_v0  ;;  %v250_v5 = vld [vmem:[%s413_s2] ss:$0 sm:$0xff]  ;;  %v272_v6 = vunpack.c.l.bf16 %v271_v4  ;;  %v273_v7 = vunpack.c.h.bf16 %v271_v4  ;;  %v276_v15 = vunpack.c.l.bf16 %v288_v9  ;;  %v277_v16 = vunpack.c.h.bf16 %v288_v9  ;;  %v325_v19 = vld [vmem:[%s411_s1 + $0x28] sm:$0xff]   ;;  %v326_v23 = vld [vmem:[%s411_s1 + $0x30] sm:$0xff]  }
   0x4   :  { %302 = vmatprep.subr.bf16.mxu0 %v321_v1  ;;  %v251_v8 = vld [vmem:[%s414_s3] ss:$0 sm:$0xff]  ;;  %v327_v26 = vld [vmem:[%s411_s1 + $0x38] sm:$0xff]  }
   0x5   :  { %v47_v10 = vmul.f32 %v272_v6, %v250_v5  ;;  %v48_v11 = vmul.f32 %v273_v7, %v250_v5  ;;  %v324_v12 = vld [vmem:[%s411_s1 + $0x20] sm:$0xff]   ;;  %v49_v21 = vmul.f32 %v276_v15, %v250_v5  ;;  %v50_v22 = vmul.f32 %v277_v16, %v250_v5 }
   0x6   :  { %v260_v30 = vld [vmem:[%s415_s4] ss:$0 sm:$0xff] }
   0x7   :  { %303 = vmatpush3.bf16.msra.mxu0 %v321_v1  ;;  %v58_v13 = vadd.f32 %v251_v8, %v47_v10  ;;  %v59_v14 = vadd.f32 %v251_v8, %v48_v11  ;;  %v60_v24 = vadd.f32 %v251_v8, %v49_v21  ;;  %v61_v25 = vadd.f32 %v251_v8, %v50_v22  ;;  %v261_v32 = vld [vmem:[%s416_s5] ss:$0 sm:$0xff] }
   0x8   :  { %304 = vmatprep.subr.bf16.mxu0 %v322_v2 }
   0x9   :  { %v62_v17 = vmax.f32 %v58_v13, 0.0  ;;  %v63_v18 = vmax.f32 %v59_v14, 0.0  ;;  %v64_v27 = vmax.f32 %v60_v24, 0.0  ;;  %v65_v28 = vmax.f32 %v61_v25, 0.0 }
   0xb   :  { %305 = vmatpush3.bf16.msra.mxu0 %v322_v2  ;;  %v66_v20 = vpack.c.bf16 %v63_v18, %v62_v17  ;;  %v67_v29 = vpack.c.bf16 %v65_v28, %v64_v27 }
   0xc   :  { %306 = vmatprep.subr.bf16.mxu0 %v323_v3 }
   0xd   :  { %316 = vmatprep.mubr.bf16.mxu0 %v66_v20 }
   0xf   :  { %307 = vmatpush3.bf16.msra.mxu0 %v323_v3 }
  0x10   :  { %308 = vmatprep.subr.bf16.mxu0 %v324_v12 }
  0x13   :  { %309 = vmatpush3.bf16.msra.mxu0 %v324_v12 }
  0x14   :  { %310 = vmatprep.subr.bf16.mxu0 %v325_v19 }
  0x17   :  { %311 = vmatpush3.bf16.msra.mxu0 %v325_v19 }
  0x18   :  { %312 = vmatprep.subr.bf16.mxu0 %v326_v23 }
  0x1b   :  { %313 = vmatpush3.bf16.msra.mxu0 %v326_v23 }
  0x1c   :  { %314 = vmatprep.subr.bf16.mxu0 %v327_v26 }
  0x1f   :  { %315 = vmatpush3.bf16.msra.mxu0 %v327_v26 }
  0x22   :  { %317 = vmatmul.mubr.bf16.vlgmr.msra.gmra.mrb[0].mxu0 %v67_v29 }
  0xf5   :  { %v318_v31 = vpop.f32.mrb[0].mxu0 }
  0xf6   :  { %v209_v33 = vmul.f32 %v318_v31, %v260_v30  ;;  %v170_v34 = vpop.f32.mrb[1].mxu0 }
  0xf7   :  { %v207_v35 = vmul.f32 %v260_v30, %v170_v34  ;;  %v319_v36 = vpop.f32.mrb[2].mxu0 }
  0xf8   :  { %v220_v37 = vadd.f32 %v261_v32, %v209_v33  ;;  %v210_v38 = vmul.f32 %v319_v36, %v260_v30  ;;  %v173_v39 = vpop.f32.mrb[3].mxu0 }
  0xf9   :  { %v218_v40 = vadd.f32 %v261_v32, %v207_v35  ;;  %v208_v41 = vmul.f32 %v260_v30, %v173_v39 }
  0xfa   :  { %v221_v42 = vadd.f32 %v261_v32, %v210_v38  ;;  %v224_v44 = vmax.f32 %v220_v37, 0.0 }
  0xfb   :  { %v219_v43 = vadd.f32 %v261_v32, %v208_v41  ;;  %v222_v46 = vmax.f32 %v218_v40, 0.0 }
  0xfc   :  { %v225_v45 = vmax.f32 %v221_v42, 0.0 }
  0xfd   :  { %v223_v47 = vmax.f32 %v219_v43, 0.0 }
  0xfe   :  { %v286_v48 = vpack.c.bf16 %v225_v45, %v224_v44 }
  0xff   :  { %v281_v49 = vpack.c.bf16 %v223_v47, %v222_v46 }
 0x100   :  { %289 = vst [vmem:[%s417_s6 + $0x8] sm:$0xff] %v286_v48  }
 0x101   :  { %282 = vst [vmem:[%s417_s6] sm:$0xff] %v281_v49  }

// kernel: densenet121_forward.137
= control target key start
LH: loop header
LB: loop body
LE: loop exit
PB: predicated region body
PF: predicated region fallthrough
CT: control target
= control target key end

     0   :  { %s679_s9 = smov 0   ;;  %s681_s10 = smov 0   ;;  %s769_s0 = inlined_call_operand.vmem [shape: bf16[32,1152], index: 0, kind: input, shape index: {}]   ;;  %s770_s1 = inlined_call_operand.vmem [shape: bf16[1152,128], index: 1, kind: input, shape index: {}]   ;;  %s771_s2 = inlined_call_operand.vmem [shape: bf16[32,128], index: 2, kind: output, shape index: {}]  }
   0x1   :  { %s683_s11 = smov 0   ;;  %s685_s12 = smov 0  }
   0x2   :  { %s687_s13 = smov 0  }
   0x3 LB: > { %s21_s14 = sadd.s32 1, %s657_s12  ;;  %p40_p1 = scmp.ne.s32.totalorder %s649_s10, %s645_s9  ;;  %s661_s13 = sphi %s687_s13, %s12_s13   ;;  %s657_s12 = sphi %s685_s12, %s775_s12   ;;  %s653_s11 = sphi %s683_s11, %s774_s11   ;;  %s649_s10 = sphi %s681_s10, %s773_s10   ;;  %s645_s9 = sphi %s679_s9, %s772_s9  }
   0x4   : > { %p22_p0 = scmp.ge.s32.totalorder %s21_s14, 9  ;;  %p41_p2 = scmp.eq.s32.totalorder %s661_s13, 0 }
   0x5   : > { %s33_s16 = sadd.s32 1, %s649_s10  ;;  %p500_p5 = scmp.ge.s32.totalorder %s661_s13, 9 }
   0x6   : > { %s777_s14 = smov (%p22_p0, %s21_s14), 0  ;;  %p42_p3 = por %p41_p2, %p40_p1 }
   0x7   : > { %s29_s15 = ssub.s32 %s657_s12, %s777_s14  ;;  %118 = sbr.rel (%p500_p5) target bundleno = 21 (0x15), region = 16 }
   0x8   : > { %p31_p4 = scmp.eq.s32.totalorder %s29_s15, 0 }
   0xa   : > { %s714_s17 = scalar_select %p31_p4, %s649_s10, %s33_s16  }
   0xe   : > { %121 = sbr.rel (!%p42_p3) target bundleno = 21 (0x15), region = 20  ;;  %s123_s18 = sand.u32 (%p42_p3), 1, %s649_s10  }
   0xf   : > { %s502_s19 = sshll.u32 (%p42_p3), %s657_s12, 2  ;;  %s501_s20 = sshll.u32 (%p42_p3), %s123_s18, 4 }
  0x10   : > { %s130_s23 = scalar_lea.vmem (%p42_p3), %s769_s0, %s502_s19  ;;  %s125_s24 = scalar_lea.vmem (%p42_p3), [#allocation3], %s501_s20 }
  0x11   : > { %v146_v0 = vld [vmem:[%s130_s23] sm:$0xf] (%p42_p3)  ;;  %v148_v1 = vld [vmem:[%s130_s23 + $0x24] sm:$0xf] (%p42_p3)  ;;  %v150_v2 = vld [vmem:[%s130_s23 + $0x48] sm:$0xf] (%p42_p3) }
  0x12   : > { %147 = vst [vmem:[%s125_s24] sm:$0xf] (%p42_p3), %v146_v0  ;;  %149 = vst [vmem:[%s125_s24 + $0x4] sm:$0xf] (%p42_p3), %v148_v1  ;;  %v152_v3 = vld [vmem:[%s130_s23 + $0x6c] sm:$0xf] (%p42_p3) }
  0x13   : > { %151 = vst [vmem:[%s125_s24 + $0x8] sm:$0xf] (%p42_p3), %v150_v2  ;;  %153 = vst [vmem:[%s125_s24 + $0xc] sm:$0xf] (%p42_p3), %v152_v3 }
  0x15 PF: > { %p503_p6 = scmp.ge.s32.totalorder %s661_s13, 1  ;;  %p192_p7 = scmp.lt.s32.totalorder %s661_s13, 10 }
  0x17   : > { %p193_p8 = pnand %p503_p6, %p192_p7 }
  0x18   : > { %s199_s25 = sand.u32 (!%p193_p8), 1, %s645_s9   ;;  %s505_s26 = sshll.u32 (!%p193_p8), %s653_s11, 4 }
  0x19   : > { %196 = sbr.rel (%p193_p8) target bundleno = 300 (0x12c), region = 65  ;;  %s726_s27 = sshll.u32 (!%p193_p8), %s199_s25, 4 }
  0x1a   : > { %p227_p9 = scmp.lt.s32.totalorder (!%p193_p8), %s505_s26, 143  ;;  %s201_s4 = scalar_lea.vmem (!%p193_p8), [#allocation3], %s726_s27 }
  0x1b   : > { %p507_p10 = scmp.ne.s32.totalorder (!%p193_p8), %s653_s11, 0 }
  0x20   : > { %s779_s26 = smov (!%p227_p9, %s505_s26), 143  ;;  %242 = sbr.rel (%p507_p10) target bundleno = 39 (0x27), region = 73 }
  0x21   : > { %s506_s28 = sshll.u32 %s779_s26, 2  ;;  %v663_v4 = vmov (!%p507_p10), 0.0  }
  0x22   : > { %s731_s3 = scalar_lea.vmem %s770_s1, %s506_s28  ;;  %243 = vst [vmem:[#allocation2] sm:$0xff] (!%p507_p10), %v663_v4  ;;  %244 = vst [vmem:[#allocation2 + $0x8] sm:$0xff] (!%p507_p10), %v663_v4 }
  0x23   : > { %245 = vst [vmem:[#allocation2 + $0x10] sm:$0xff] (!%p507_p10), %v663_v4  ;;  %246 = vst [vmem:[#allocation2 + $0x18] sm:$0xff] (!%p507_p10), %v663_v4 }
  0x27 PF: > { %v613_v5 = vld [vmem:[%s731_s3] sm:$0xff]   ;;  %v614_v6 = vld [vmem:[%s731_s3 + $0x8] sm:$0xff]   ;;  %v615_v7 = vld [vmem:[%s731_s3 + $0x10] sm:$0xff]   ;;  %p518_p11 = scmp.ne.s32.totalorder %s653_s11, 8 }
  0x28   : > { %552 = vmatprep.subr.bf16.mxu0 %v613_v5  ;;  %v616_v8 = vld [vmem:[%s731_s3 + $0x18] sm:$0xff]   ;;  %v621_v9 = vld [vmem:[%s201_s4] sm:$0xff]   ;;  %v618_v11 = vld [vmem:[%s731_s3 + $0x28] sm:$0xff]  }
  0x29   : > { %553 = vmatpush3.bf16.msra.mxu0 %v613_v5  ;;  %568 = vmatprep.mubr.bf16.mxu0 %v621_v9  ;;  %v617_v10 = vld [vmem:[%s731_s3 + $0x20] sm:$0xff]   ;;  %v619_v12 = vld [vmem:[%s731_s3 + $0x30] sm:$0xff]   ;;  %v620_v13 = vld [vmem:[%s731_s3 + $0x38] sm:$0xff]  }
  0x2a   : > { %554 = vmatprep.subr.bf16.mxu0 %v614_v6  ;;  %v622_v14 = vld [vmem:[%s201_s4 + $0x8] sm:$0xff]   ;;  %v253_v15 = vld [vmem:[#allocation2 + $0x10] sm:$0xff]  ;;  %v251_v16 = vld [vmem:[#allocation2] sm:$0xff] }
  0x2b   : > { %v254_v18 = vld [vmem:[#allocation2 + $0x18] sm:$0xff]  ;;  %v252_v21 = vld [vmem:[#allocation2 + $0x8] sm:$0xff] }
  0x2d   : > { %555 = vmatpush3.bf16.msra.mxu0 %v614_v6 }
  0x2e   : > { %556 = vmatprep.subr.bf16.mxu0 %v615_v7 }
  0x31   : > { %557 = vmatpush3.bf16.msra.mxu0 %v615_v7 }
  0x32   : > { %558 = vmatprep.subr.bf16.mxu0 %v616_v8 }
  0x35   : > { %559 = vmatpush3.bf16.msra.mxu0 %v616_v8 }
  0x36   : > { %560 = vmatprep.subr.bf16.mxu0 %v617_v10 }
  0x39   : > { %561 = vmatpush3.bf16.msra.mxu0 %v617_v10 }
  0x3a   : > { %562 = vmatprep.subr.bf16.mxu0 %v618_v11 }
  0x3d   : > { %563 = vmatpush3.bf16.msra.mxu0 %v618_v11 }
  0x3e   : > { %564 = vmatprep.subr.bf16.mxu0 %v619_v12 }
  0x41   : > { %565 = vmatpush3.bf16.msra.mxu0 %v619_v12 }
  0x42   : > { %566 = vmatprep.subr.bf16.mxu0 %v620_v13 }
  0x45   : > { %567 = vmatpush3.bf16.msra.mxu0 %v620_v13 }
  0x48   : > { %569 = vmatmul.mubr.bf16.vlgmr.msra.gmra.mrb[0].mxu0 %v622_v14 }
 0x11b   : > { %v570_v17 = vpop.f32.mrb[0].mxu0  ;;  %391 = sbr.rel (%p518_p11) target bundleno = 300 (0x12c), region = 77 }
 0x11c   : > { %v382_v19 = vadd.f32 %v570_v17, %v253_v15  ;;  %v365_v20 = vpop.f32.mrb[1].mxu0 }
 0x11d   : > { %v380_v22 = vadd.f32 %v365_v20, %v251_v16  ;;  %v571_v23 = vpop.f32.mrb[2].mxu0 }
 0x11e   : > { %386 = vst [vmem:[#allocation2 + $0x10] sm:$0xff] %v382_v19  ;;  %v383_v24 = vadd.f32 %v571_v23, %v254_v18  ;;  %v368_v25 = vpop.f32.mrb[3].mxu0 }
 0x11f   : > { %384 = vst [vmem:[#allocation2] sm:$0xff] %v380_v22  ;;  %v381_v26 = vadd.f32 %v368_v25, %v252_v21 }
 0x120   : > { %387 = vst [vmem:[#allocation2 + $0x18] sm:$0xff] %v383_v24 }
 0x121   : > { %385 = vst [vmem:[#allocation2 + $0x8] sm:$0xff] %v381_v26 }
 0x125   : > { %v394_v29 = vld [vmem:[#allocation2 + $0x10] sm:$0xff] }
 0x126   : > { %v392_v27 = vld [vmem:[#allocation2] sm:$0xff] }
 0x127   : > { %v395_v31 = vld [vmem:[#allocation2 + $0x18] sm:$0xff] }
 0x128   : > { %v393_v28 = vld [vmem:[#allocation2 + $0x8] sm:$0xff]  ;;  %v539_v32 = vpack.c.bf16 %v395_v31, %v394_v29 }
 0x129   : > { %v534_v30 = vpack.c.bf16 %v393_v28, %v392_v27 }
 0x12a   : > { %541 = vst [vmem:[%s771_s2 + $0x8] sm:$0xff] %v539_v32  }
 0x12b   : > { %535 = vst [vmem:[%s771_s2] sm:$0xff] %v534_v30  }
 0x12c PF: > { %s12_s13 = sadd.s32 1, %s661_s13   ;;  %s772_s9 = smov %s649_s10 }
 0x12d   : > { %p9_p12 = scmp.ge.s32.totalorder %s12_s13, 11   ;;  %s773_s10 = smov %s714_s17 }
 0x12e   : > { %s774_s11 = smov %s657_s12  ;;  %s775_s12 = smov %s777_s14 }
 0x12f   :  { %11 = sbr.rel (!%p9_p12) target bundleno = 3 (0x3), region = 115 }

// kernel: densenet121_forward.138
= control target key start
LH: loop header
LB: loop body
LE: loop exit
PB: predicated region body
PF: predicated region fallthrough
CT: control target
= control target key end

     0   :  { %s908_s21 = smov 0   ;;  %s910_s22 = smov 0   ;;  %s1008_s0 = inlined_call_operand.vmem [shape: bf16[32,256], index: 0, kind: input, shape index: {}]   ;;  %s1009_s1 = inlined_call_operand.vmem [shape: bf16[256,128], index: 1, kind: input, shape index: {}]   ;;  %s1010_s2 = inlined_call_operand.vmem [shape: f32[1,256], index: 2, kind: input, shape index: {}]   ;;  %s1011_s3 = inlined_call_operand.vmem [shape: f32[1,256], index: 3, kind: input, shape index: {}]   ;;  %s1012_s4 = inlined_call_operand.vmem [shape: f32[1,128], index: 4, kind: input, shape index: {}]   ;;  %s1013_s5 = inlined_call_operand.vmem [shape: f32[1,128], index: 5, kind: input, shape index: {}]   ;;  %s1014_s6 = inlined_call_operand.vmem [shape: bf16[32,128], index: 6, kind: output, shape index: {}]  }
   0x1   :  { %s912_s23 = smov 0   ;;  %s914_s24 = smov 0  }
   0x2   :  { %s916_s25 = smov 0  }
   0x3 LB: > { %s25_s26 = sadd.s32 1, %s866_s24  ;;  %p44_p1 = scmp.ne.s32.totalorder %s858_s22, %s854_s21  ;;  %s870_s25 = sphi %s916_s25, %s16_s25   ;;  %s866_s24 = sphi %s914_s24, %s1018_s24   ;;  %s862_s23 = sphi %s912_s23, %s1017_s23   ;;  %s858_s22 = sphi %s910_s22, %s1016_s22   ;;  %s854_s21 = sphi %s908_s21, %s1015_s21  }
   0x4   : > { %p26_p0 = scmp.ge.s32.totalorder %s25_s26, 2  ;;  %p45_p2 = scmp.eq.s32.totalorder %s870_s25, 0 }
   0x5   : > { %s37_s28 = sadd.s32 1, %s858_s22  ;;  %p700_p5 = scmp.ge.s32.totalorder %s870_s25, 2 }
   0x6   : > { %s1020_s26 = smov (%p26_p0, %s25_s26), 0  ;;  %p46_p3 = por %p45_p2, %p44_p1 }
   0x7   : > { %s33_s27 = ssub.s32 %s866_s24, %s1020_s26  ;;  %222 = sbr.rel (%p700_p5) target bundleno = 21 (0x15), region = 24 }
   0x8   : > { %p35_p4 = scmp.eq.s32.totalorder %s33_s27, 0 }
   0xa   : > { %s943_s29 = scalar_select %p35_p4, %s858_s22, %s37_s28  }
   0xe   : > { %225 = sbr.rel (!%p46_p3) target bundleno = 21 (0x15), region = 28  ;;  %s227_s30 = sand.u32 (%p46_p3), 1, %s858_s22  }
   0xf   : > { %s702_s7 = sshll.u32 (%p46_p3), %s866_s24, 2  ;;  %s701_s8 = sshll.u32 (%p46_p3), %s227_s30, 4 }
  0x10   : > { %s234_s11 = scalar_lea.vmem (%p46_p3), %s1008_s0, %s702_s7  ;;  %s229_s12 = scalar_lea.vmem (%p46_p3), [#allocation3], %s701_s8 }
  0x11   : > { %v250_v0 = vld [vmem:[%s234_s11] sm:$0xf] (%p46_p3)  ;;  %v252_v1 = vld [vmem:[%s234_s11 + $0x8] sm:$0xf] (%p46_p3)  ;;  %v254_v2 = vld [vmem:[%s234_s11 + $0x10] sm:$0xf] (%p46_p3) }
  0x12   : > { %251 = vst [vmem:[%s229_s12] sm:$0xf] (%p46_p3), %v250_v0  ;;  %253 = vst [vmem:[%s229_s12 + $0x4] sm:$0xf] (%p46_p3), %v252_v1  ;;  %v256_v3 = vld [vmem:[%s234_s11 + $0x18] sm:$0xf] (%p46_p3) }
  0x13   : > { %255 = vst [vmem:[%s229_s12 + $0x8] sm:$0xf] (%p46_p3), %v254_v2  ;;  %257 = vst [vmem:[%s229_s12 + $0xc] sm:$0xf] (%p46_p3), %v256_v3 }
  0x15 PF: > { %p703_p6 = scmp.ge.s32.totalorder %s870_s25, 1  ;;  %p308_p7 = scmp.lt.s32.totalorder %s870_s25, 3 }
  0x17   : > { %p309_p8 = pnand %p703_p6, %p308_p7 }
  0x18   : > { %s315_s13 = sand.u32 (!%p309_p8), 1, %s854_s21   ;;  %s705_s14 = sshll.u32 (!%p309_p8), %s862_s23, 4 }
  0x19   : > { %312 = sbr.rel (%p309_p8) target bundleno = 306 (0x132), region = 81  ;;  %s955_s15 = sshll.u32 (!%p309_p8), %s315_s13, 4 }
  0x1a   : > { %p357_p9 = scmp.lt.s32.totalorder (!%p309_p8), %s705_s14, 31  ;;  %p362_p10 = scmp.lt.s32.totalorder (!%p309_p8), %s862_s23, 1 }
  0x1b   : > { %s317_s9 = scalar_lea.vmem (!%p309_p8), [#allocation3], %s955_s15  ;;  %p707_p11 = scmp.ne.s32.totalorder (!%p309_p8), %s862_s23, 0 }
  0x20   : > { %s1022_s14 = smov (!%p357_p9, %s705_s14), 31  ;;  %378 = sbr.rel (%p707_p11) target bundleno = 39 (0x27), region = 89 }
  0x21   : > { %s363_s16 = scalar_select %p362_p10, %s862_s23, 1 }
  0x22   : > { %s706_s17 = sshll.u32 %s1022_s14, 2  ;;  %v872_v4 = vmov (!%p707_p11), 0.0  }
  0x23   : > { %s962_s20 = scalar_lea.vmem %s1009_s1, %s706_s17  ;;  %s364_s30 = scalar_lea.vmem %s1010_s2, %s363_s16  ;;  %379 = vst [vmem:[#allocation2] sm:$0xff] (!%p707_p11), %v872_v4  ;;  %380 = vst [vmem:[#allocation2 + $0x8] sm:$0xff] (!%p707_p11), %v872_v4 }
  0x24   : > { %s367_s8 = scalar_lea.vmem %s1011_s3, %s363_s16  ;;  %381 = vst [vmem:[#allocation2 + $0x10] sm:$0xff] (!%p707_p11), %v872_v4  ;;  %382 = vst [vmem:[#allocation2 + $0x18] sm:$0xff] (!%p707_p11), %v872_v4 }
  0x27 PF: > { %v824_v5 = vld [vmem:[%s962_s20] sm:$0xff]   ;;  %v825_v6 = vld [vmem:[%s962_s20 + $0x8] sm:$0xff]   ;;  %v826_v7 = vld [vmem:[%s962_s20 + $0x10] sm:$0xff]   ;;  %p718_p12 = scmp.ne.s32.totalorder %s862_s23, 1 }
  0x28   : > { %763 = vmatprep.subr.bf16.mxu0 %v824_v5  ;;  %v827_v8 = vld [vmem:[%s962_s20 + $0x18] sm:$0xff]   ;;  %v734_v9 = vld [vmem:[%s317_s9] sm:$0xff]   ;;  %v829_v24 = vld [vmem:[%s962_s20 + $0x28] sm:$0xff]  }
  0x29   : > { %764 = vmatpush3.bf16.msra.mxu0 %v824_v5  ;;  %v708_v10 = vld [vmem:[%s364_s30] ss:$0 sm:$0xff]  ;;  %v735_v11 = vunpack.c.l.bf16 %v734_v9  ;;  %v736_v12 = vunpack.c.h.bf16 %v734_v9  ;;  %v751_v16 = vld [vmem:[%s317_s9 + $0x8] sm:$0xff]   ;;  %v830_v28 = vld [vmem:[%s962_s20 + $0x30] sm:$0xff]  }
  0x2a   : > { %765 = vmatprep.subr.bf16.mxu0 %v825_v6  ;;  %v709_v13 = vld [vmem:[%s367_s8] ss:$0 sm:$0xff]  ;;  %v739_v20 = vunpack.c.l.bf16 %v751_v16  ;;  %v740_v21 = vunpack.c.h.bf16 %v751_v16  ;;  %v831_v31 = vld [vmem:[%s962_s20 + $0x38] sm:$0xff]   ;;  %v420_v41 = vld [vmem:[#allocation2 + $0x8] sm:$0xff] }
  0x2b   : > { %v398_v14 = vmul.f32 %v735_v11, %v708_v10  ;;  %v399_v15 = vmul.f32 %v736_v12, %v708_v10  ;;  %v828_v17 = vld [vmem:[%s962_s20 + $0x20] sm:$0xff]   ;;  %v421_v35 = vld [vmem:[#allocation2 + $0x10] sm:$0xff]  ;;  %v422_v38 = vld [vmem:[#allocation2 + $0x18] sm:$0xff] }
  0x2c   : > { %v400_v26 = vmul.f32 %v739_v20, %v708_v10  ;;  %v401_v27 = vmul.f32 %v740_v21, %v708_v10  ;;  %v419_v36 = vld [vmem:[#allocation2] sm:$0xff] }
  0x2d   : > { %766 = vmatpush3.bf16.msra.mxu0 %v825_v6  ;;  %v409_v18 = vadd.f32 %v709_v13, %v398_v14  ;;  %v410_v19 = vadd.f32 %v709_v13, %v399_v15  ;;  %v719_v49 = vld [vmem:[%s1012_s4] ss:$0 sm:$0xff] (!%p718_p12) }
  0x2e   : > { %767 = vmatprep.subr.bf16.mxu0 %v826_v7  ;;  %v411_v29 = vadd.f32 %v709_v13, %v400_v26  ;;  %v412_v30 = vadd.f32 %v709_v13, %v401_v27  ;;  %v720_v52 = vld [vmem:[%s1013_s5] ss:$0 sm:$0xff] (!%p718_p12) }
  0x2f   : > { %v413_v22 = vmax.f32 %v409_v18, 0.0  ;;  %v414_v23 = vmax.f32 %v410_v19, 0.0 }
  0x30   : > { %v415_v32 = vmax.f32 %v411_v29, 0.0  ;;  %v416_v33 = vmax.f32 %v412_v30, 0.0 }
  0x31   : > { %768 = vmatpush3.bf16.msra.mxu0 %v826_v7  ;;  %v417_v25 = vpack.c.bf16 %v414_v23, %v413_v22 }
  0x32   : > { %769 = vmatprep.subr.bf16.mxu0 %v827_v8  ;;  %v418_v34 = vpack.c.bf16 %v416_v33, %v415_v32 }
  0x33   : > { %779 = vmatprep.mubr.bf16.mxu0 %v417_v25 }
  0x35   : > { %770 = vmatpush3.bf16.msra.mxu0 %v827_v8 }
  0x36   : > { %771 = vmatprep.subr.bf16.mxu0 %v828_v17 }
  0x39   : > { %772 = vmatpush3.bf16.msra.mxu0 %v828_v17 }
  0x3a   : > { %773 = vmatprep.subr.bf16.mxu0 %v829_v24 }
  0x3d   : > { %774 = vmatpush3.bf16.msra.mxu0 %v829_v24 }
  0x3e   : > { %775 = vmatprep.subr.bf16.mxu0 %v830_v28 }
  0x41   : > { %776 = vmatpush3.bf16.msra.mxu0 %v830_v28 }
  0x42   : > { %777 = vmatprep.subr.bf16.mxu0 %v831_v31 }
  0x45   : > { %778 = vmatpush3.bf16.msra.mxu0 %v831_v31 }
  0x48   : > { %780 = vmatmul.mubr.bf16.vlgmr.msra.gmra.mrb[0].mxu0 %v418_v34 }
 0x11b   : > { %v781_v37 = vpop.f32.mrb[0].mxu0  ;;  %547 = sbr.rel (%p718_p12) target bundleno = 306 (0x132), region = 93 }
 0x11c   : > { %v538_v39 = vadd.f32 %v781_v37, %v421_v35  ;;  %v521_v40 = vpop.f32.mrb[1].mxu0 }
 0x11d   : > { %v536_v42 = vadd.f32 %v521_v40, %v419_v36  ;;  %v782_v43 = vpop.f32.mrb[2].mxu0 }
 0x11e   : > { %542 = vst [vmem:[#allocation2 + $0x10] sm:$0xff] %v538_v39  ;;  %v539_v44 = vadd.f32 %v782_v43, %v422_v38  ;;  %v524_v45 = vpop.f32.mrb[3].mxu0 }
 0x11f   : > { %540 = vst [vmem:[#allocation2] sm:$0xff] %v536_v42  ;;  %v537_v46 = vadd.f32 %v524_v45, %v420_v41 }
 0x120   : > { %543 = vst [vmem:[#allocation2 + $0x18] sm:$0xff] %v539_v44 }
 0x121   : > { %541 = vst [vmem:[#allocation2 + $0x8] sm:$0xff] %v537_v46 }
 0x125   : > { %v550_v53 = vld [vmem:[#allocation2 + $0x10] sm:$0xff] }
 0x126   : > { %v548_v47 = vld [vmem:[#allocation2] sm:$0xff]  ;;  %v561_v55 = vmul.f32 %v719_v49, %v550_v53 }
 0x127   : > { %v559_v50 = vmul.f32 %v719_v49, %v548_v47  ;;  %v551_v54 = vld [vmem:[#allocation2 + $0x18] sm:$0xff] }
 0x128   : > { %v549_v48 = vld [vmem:[#allocation2 + $0x8] sm:$0xff]  ;;  %v562_v56 = vmul.f32 %v719_v49, %v551_v54  ;;  %v572_v59 = vadd.f32 %v720_v52, %v561_v55 }
 0x129   : > { %v560_v51 = vmul.f32 %v719_v49, %v549_v48  ;;  %v570_v57 = vadd.f32 %v720_v52, %v559_v50 }
 0x12a   : > { %v573_v60 = vadd.f32 %v720_v52, %v562_v56  ;;  %v576_v63 = vmax.f32 %v572_v59, 0.0 }
 0x12b   : > { %v571_v58 = vadd.f32 %v720_v52, %v560_v51  ;;  %v574_v61 = vmax.f32 %v570_v57, 0.0 }
 0x12c   : > { %v577_v0 = vmax.f32 %v573_v60, 0.0 }
 0x12d   : > { %v575_v62 = vmax.f32 %v571_v58, 0.0 }
 0x12e   : > { %v749_v2 = vpack.c.bf16 %v577_v0, %v576_v63 }
 0x12f   : > { %v744_v1 = vpack.c.bf16 %v575_v62, %v574_v61 }
 0x130   : > { %752 = vst [vmem:[%s1014_s6 + $0x8] sm:$0xff] %v749_v2  }
 0x131   : > { %745 = vst [vmem:[%s1014_s6] sm:$0xff] %v744_v1  }
 0x132 PF: > { %s16_s25 = sadd.s32 1, %s870_s25   ;;  %s1015_s21 = smov %s858_s22 }
 0x133   : > { %p13_p13 = scmp.ge.s32.totalorder %s16_s25, 4   ;;  %s1016_s22 = smov %s943_s29 }
 0x134   : > { %s1017_s23 = smov %s866_s24  ;;  %s1018_s24 = smov %s1020_s26 }
 0x135   :  { %15 = sbr.rel (!%p13_p13) target bundleno = 3 (0x3), region = 137 }

// kernel: densenet121_forward.146
= control target key start
LH: loop header
LB: loop body
LE: loop exit
PB: predicated region body
PF: predicated region fallthrough
CT: control target
= control target key end

     0   :  { %s908_s21 = smov 0   ;;  %s910_s22 = smov 0   ;;  %s1008_s0 = inlined_call_operand.vmem [shape: bf16[32,384], index: 0, kind: input, shape index: {}]   ;;  %s1009_s1 = inlined_call_operand.vmem [shape: bf16[384,128], index: 1, kind: input, shape index: {}]   ;;  %s1010_s2 = inlined_call_operand.vmem [shape: f32[1,384], index: 2, kind: input, shape index: {}]   ;;  %s1011_s3 = inlined_call_operand.vmem [shape: f32[1,384], index: 3, kind: input, shape index: {}]   ;;  %s1012_s4 = inlined_call_operand.vmem [shape: f32[1,128], index: 4, kind: input, shape index: {}]   ;;  %s1013_s5 = inlined_call_operand.vmem [shape: f32[1,128], index: 5, kind: input, shape index: {}]   ;;  %s1014_s6 = inlined_call_operand.vmem [shape: bf16[32,128], index: 6, kind: output, shape index: {}]  }
   0x1   :  { %s912_s23 = smov 0   ;;  %s914_s24 = smov 0  }
   0x2   :  { %s916_s25 = smov 0  }
   0x3 LB: > { %s25_s26 = sadd.s32 1, %s866_s24  ;;  %p44_p1 = scmp.ne.s32.totalorder %s858_s22, %s854_s21  ;;  %s870_s25 = sphi %s916_s25, %s16_s25   ;;  %s866_s24 = sphi %s914_s24, %s1018_s24   ;;  %s862_s23 = sphi %s912_s23, %s1017_s23   ;;  %s858_s22 = sphi %s910_s22, %s1016_s22   ;;  %s854_s21 = sphi %s908_s21, %s1015_s21  }
   0x4   : > { %p26_p0 = scmp.ge.s32.totalorder %s25_s26, 3  ;;  %p45_p2 = scmp.eq.s32.totalorder %s870_s25, 0 }
   0x5   : > { %s37_s28 = sadd.s32 1, %s858_s22  ;;  %p700_p5 = scmp.ge.s32.totalorder %s870_s25, 3 }
   0x6   : > { %s1020_s26 = smov (%p26_p0, %s25_s26), 0  ;;  %p46_p3 = por %p45_p2, %p44_p1 }
   0x7   : > { %s33_s27 = ssub.s32 %s866_s24, %s1020_s26  ;;  %222 = sbr.rel (%p700_p5) target bundleno = 21 (0x15), region = 24 }
   0x8   : > { %p35_p4 = scmp.eq.s32.totalorder %s33_s27, 0 }
   0xa   : > { %s943_s29 = scalar_select %p35_p4, %s858_s22, %s37_s28  }
   0xe   : > { %225 = sbr.rel (!%p46_p3) target bundleno = 21 (0x15), region = 28  ;;  %s227_s30 = sand.u32 (%p46_p3), 1, %s858_s22  }
   0xf   : > { %s702_s7 = sshll.u32 (%p46_p3), %s866_s24, 2  ;;  %s701_s8 = sshll.u32 (%p46_p3), %s227_s30, 4 }
  0x10   : > { %s234_s11 = scalar_lea.vmem (%p46_p3), %s1008_s0, %s702_s7  ;;  %s229_s12 = scalar_lea.vmem (%p46_p3), [#allocation3], %s701_s8 }
  0x11   : > { %v250_v0 = vld [vmem:[%s234_s11] sm:$0xf] (%p46_p3)  ;;  %v252_v1 = vld [vmem:[%s234_s11 + $0xc] sm:$0xf] (%p46_p3)  ;;  %v254_v2 = vld [vmem:[%s234_s11 + $0x18] sm:$0xf] (%p46_p3) }
  0x12   : > { %251 = vst [vmem:[%s229_s12] sm:$0xf] (%p46_p3), %v250_v0  ;;  %253 = vst [vmem:[%s229_s12 + $0x4] sm:$0xf] (%p46_p3), %v252_v1  ;;  %v256_v3 = vld [vmem:[%s234_s11 + $0x24] sm:$0xf] (%p46_p3) }
  0x13   : > { %255 = vst [vmem:[%s229_s12 + $0x8] sm:$0xf] (%p46_p3), %v254_v2  ;;  %257 = vst [vmem:[%s229_s12 + $0xc] sm:$0xf] (%p46_p3), %v256_v3 }
  0x15 PF: > { %p703_p6 = scmp.ge.s32.totalorder %s870_s25, 1  ;;  %p308_p7 = scmp.lt.s32.totalorder %s870_s25, 4 }
  0x17   : > { %p309_p8 = pnand %p703_p6, %p308_p7 }
  0x18   : > { %s315_s13 = sand.u32 (!%p309_p8), 1, %s854_s21   ;;  %s705_s14 = sshll.u32 (!%p309_p8), %s862_s23, 4 }
  0x19   : > { %312 = sbr.rel (%p309_p8) target bundleno = 306 (0x132), region = 81  ;;  %s955_s15 = sshll.u32 (!%p309_p8), %s315_s13, 4 }
  0x1a   : > { %p357_p9 = scmp.lt.s32.totalorder (!%p309_p8), %s705_s14, 47  ;;  %p362_p10 = scmp.lt.s32.totalorder (!%p309_p8), %s862_s23, 2 }
  0x1b   : > { %s317_s9 = scalar_lea.vmem (!%p309_p8), [#allocation3], %s955_s15  ;;  %p707_p11 = scmp.ne.s32.totalorder (!%p309_p8), %s862_s23, 0 }
  0x20   : > { %s1022_s14 = smov (!%p357_p9, %s705_s14), 47  ;;  %378 = sbr.rel (%p707_p11) target bundleno = 39 (0x27), region = 89 }
  0x21   : > { %s363_s16 = scalar_select %p362_p10, %s862_s23, 2 }
  0x22   : > { %s706_s17 = sshll.u32 %s1022_s14, 2  ;;  %v872_v4 = vmov (!%p707_p11), 0.0  }
  0x23   : > { %s962_s20 = scalar_lea.vmem %s1009_s1, %s706_s17  ;;  %s364_s30 = scalar_lea.vmem %s1010_s2, %s363_s16  ;;  %379 = vst [vmem:[#allocation2] sm:$0xff] (!%p707_p11), %v872_v4  ;;  %380 = vst [vmem:[#allocation2 + $0x8] sm:$0xff] (!%p707_p11), %v872_v4 }
  0x24   : > { %s367_s8 = scalar_lea.vmem %s1011_s3, %s363_s16  ;;  %381 = vst [vmem:[#allocation2 + $0x10] sm:$0xff] (!%p707_p11), %v872_v4  ;;  %382 = vst [vmem:[#allocation2 + $0x18] sm:$0xff] (!%p707_p11), %v872_v4 }
  0x27 PF: > { %v824_v5 = vld [vmem:[%s962_s20] sm:$0xff]   ;;  %v825_v6 = vld [vmem:[%s962_s20 + $0x8] sm:$0xff]   ;;  %v826_v7 = vld [vmem:[%s962_s20 + $0x10] sm:$0xff]   ;;  %p718_p12 = scmp.ne.s32.totalorder %s862_s23, 2 }
  0x28   : > { %763 = vmatprep.subr.bf16.mxu0 %v824_v5  ;;  %v827_v8 = vld [vmem:[%s962_s20 + $0x18] sm:$0xff]   ;;  %v734_v9 = vld [vmem:[%s317_s9] sm:$0xff]   ;;  %v829_v24 = vld [vmem:[%s962_s20 + $0x28] sm:$0xff]  }
  0x29   : > { %764 = vmatpush3.bf16.msra.mxu0 %v824_v5  ;;  %v708_v10 = vld [vmem:[%s364_s30] ss:$0 sm:$0xff]  ;;  %v735_v11 = vunpack.c.l.bf16 %v734_v9  ;;  %v736_v12 = vunpack.c.h.bf16 %v734_v9  ;;  %v751_v16 = vld [vmem:[%s317_s9 + $0x8] sm:$0xff]   ;;  %v830_v28 = vld [vmem:[%s962_s20 + $0x30] sm:$0xff]  }
  0x2a   : > { %765 = vmatprep.subr.bf16.mxu0 %v825_v6  ;;  %v709_v13 = vld [vmem:[%s367_s8] ss:$0 sm:$0xff]  ;;  %v739_v20 = vunpack.c.l.bf16 %v751_v16  ;;  %v740_v21 = vunpack.c.h.bf16 %v751_v16  ;;  %v831_v31 = vld [vmem:[%s962_s20 + $0x38] sm:$0xff]   ;;  %v420_v41 = vld [vmem:[#allocation2 + $0x8] sm:$0xff] }
  0x2b   : > { %v398_v14 = vmul.f32 %v735_v11, %v708_v10  ;;  %v399_v15 = vmul.f32 %v736_v12, %v708_v10  ;;  %v828_v17 = vld [vmem:[%s962_s20 + $0x20] sm:$0xff]   ;;  %v421_v35 = vld [vmem:[#allocation2 + $0x10] sm:$0xff]  ;;  %v422_v38 = vld [vmem:[#allocation2 + $0x18] sm:$0xff] }
  0x2c   : > { %v400_v26 = vmul.f32 %v739_v20, %v708_v10  ;;  %v401_v27 = vmul.f32 %v740_v21, %v708_v10  ;;  %v419_v36 = vld [vmem:[#allocation2] sm:$0xff] }
  0x2d   : > { %766 = vmatpush3.bf16.msra.mxu0 %v825_v6  ;;  %v409_v18 = vadd.f32 %v709_v13, %v398_v14  ;;  %v410_v19 = vadd.f32 %v709_v13, %v399_v15  ;;  %v719_v49 = vld [vmem:[%s1012_s4] ss:$0 sm:$0xff] (!%p718_p12) }
  0x2e   : > { %767 = vmatprep.subr.bf16.mxu0 %v826_v7  ;;  %v411_v29 = vadd.f32 %v709_v13, %v400_v26  ;;  %v412_v30 = vadd.f32 %v709_v13, %v401_v27  ;;  %v720_v52 = vld [vmem:[%s1013_s5] ss:$0 sm:$0xff] (!%p718_p12) }
  0x2f   : > { %v413_v22 = vmax.f32 %v409_v18, 0.0  ;;  %v414_v23 = vmax.f32 %v410_v19, 0.0 }
  0x30   : > { %v415_v32 = vmax.f32 %v411_v29, 0.0  ;;  %v416_v33 = vmax.f32 %v412_v30, 0.0 }
  0x31   : > { %768 = vmatpush3.bf16.msra.mxu0 %v826_v7  ;;  %v417_v25 = vpack.c.bf16 %v414_v23, %v413_v22 }
  0x32   : > { %769 = vmatprep.subr.bf16.mxu0 %v827_v8  ;;  %v418_v34 = vpack.c.bf16 %v416_v33, %v415_v32 }
  0x33   : > { %779 = vmatprep.mubr.bf16.mxu0 %v417_v25 }
  0x35   : > { %770 = vmatpush3.bf16.msra.mxu0 %v827_v8 }
  0x36   : > { %771 = vmatprep.subr.bf16.mxu0 %v828_v17 }
  0x39   : > { %772 = vmatpush3.bf16.msra.mxu0 %v828_v17 }
  0x3a   : > { %773 = vmatprep.subr.bf16.mxu0 %v829_v24 }
  0x3d   : > { %774 = vmatpush3.bf16.msra.mxu0 %v829_v24 }
  0x3e   : > { %775 = vmatprep.subr.bf16.mxu0 %v830_v28 }
  0x41   : > { %776 = vmatpush3.bf16.msra.mxu0 %v830_v28 }
  0x42   : > { %777 = vmatprep.subr.bf16.mxu0 %v831_v31 }
  0x45   : > { %778 = vmatpush3.bf16.msra.mxu0 %v831_v31 }
  0x48   : > { %780 = vmatmul.mubr.bf16.vlgmr.msra.gmra.mrb[0].mxu0 %v418_v34 }
 0x11b   : > { %v781_v37 = vpop.f32.mrb[0].mxu0  ;;  %547 = sbr.rel (%p718_p12) target bundleno = 306 (0x132), region = 93 }
 0x11c   : > { %v538_v39 = vadd.f32 %v781_v37, %v421_v35  ;;  %v521_v40 = vpop.f32.mrb[1].mxu0 }
 0x11d   : > { %v536_v42 = vadd.f32 %v521_v40, %v419_v36  ;;  %v782_v43 = vpop.f32.mrb[2].mxu0 }
 0x11e   : > { %542 = vst [vmem:[#allocation2 + $0x10] sm:$0xff] %v538_v39  ;;  %v539_v44 = vadd.f32 %v782_v43, %v422_v38  ;;  %v524_v45 = vpop.f32.mrb[3].mxu0 }
 0x11f   : > { %540 = vst [vmem:[#allocation2] sm:$0xff] %v536_v42  ;;  %v537_v46 = vadd.f32 %v524_v45, %v420_v41 }
 0x120   : > { %543 = vst [vmem:[#allocation2 + $0x18] sm:$0xff] %v539_v44 }
 0x121   : > { %541 = vst [vmem:[#allocation2 + $0x8] sm:$0xff] %v537_v46 }
 0x125   : > { %v550_v53 = vld [vmem:[#allocation2 + $0x10] sm:$0xff] }
 0x126   : > { %v548_v47 = vld [vmem:[#allocation2] sm:$0xff]  ;;  %v561_v55 = vmul.f32 %v719_v49, %v550_v53 }
 0x127   : > { %v559_v50 = vmul.f32 %v719_v49, %v548_v47  ;;  %v551_v54 = vld [vmem:[#allocation2 + $0x18] sm:$0xff] }
 0x128   : > { %v549_v48 = vld [vmem:[#allocation2 + $0x8] sm:$0xff]  ;;  %v562_v56 = vmul.f32 %v719_v49, %v551_v54  ;;  %v572_v59 = vadd.f32 %v720_v52, %v561_v55 }
 0x129   : > { %v560_v51 = vmul.f32 %v719_v49, %v549_v48  ;;  %v570_v57 = vadd.f32 %v720_v52, %v559_v50 }
 0x12a   : > { %v573_v60 = vadd.f32 %v720_v52, %v562_v56  ;;  %v576_v63 = vmax.f32 %v572_v59, 0.0 }
 0x12b   : > { %v571_v58 = vadd.f32 %v720_v52, %v560_v51  ;;  %v574_v61 = vmax.f32 %v570_v57, 0.0 }
 0x12c   : > { %v577_v0 = vmax.f32 %v573_v60, 0.0 }
 0x12d   : > { %v575_v62 = vmax.f32 %v571_v58, 0.0 }
 0x12e   : > { %v749_v2 = vpack.c.bf16 %v577_v0, %v576_v63 }
 0x12f   : > { %v744_v1 = vpack.c.bf16 %v575_v62, %v574_v61 }
 0x130   : > { %752 = vst [vmem:[%s1014_s6 + $0x8] sm:$0xff] %v749_v2  }
 0x131   : > { %745 = vst [vmem:[%s1014_s6] sm:$0xff] %v744_v1  }
 0x132 PF: > { %s16_s25 = sadd.s32 1, %s870_s25   ;;  %s1015_s21 = smov %s858_s22 }
 0x133   : > { %p13_p13 = scmp.ge.s32.totalorder %s16_s25, 5   ;;  %s1016_s22 = smov %s943_s29 }
 0x134   : > { %s1017_s23 = smov %s866_s24  ;;  %s1018_s24 = smov %s1020_s26 }
 0x135   :  { %15 = sbr.rel (!%p13_p13) target bundleno = 3 (0x3), region = 137 }

// kernel: densenet121_forward.154
= control target key start
LH: loop header
LB: loop body
LE: loop exit
PB: predicated region body
PF: predicated region fallthrough
CT: control target
= control target key end

     0   :  { %s908_s21 = smov 0   ;;  %s910_s22 = smov 0   ;;  %s1008_s0 = inlined_call_operand.vmem [shape: bf16[32,512], index: 0, kind: input, shape index: {}]   ;;  %s1009_s1 = inlined_call_operand.vmem [shape: bf16[512,128], index: 1, kind: input, shape index: {}]   ;;  %s1010_s2 = inlined_call_operand.vmem [shape: f32[1,512], index: 2, kind: input, shape index: {}]   ;;  %s1011_s3 = inlined_call_operand.vmem [shape: f32[1,512], index: 3, kind: input, shape index: {}]   ;;  %s1012_s4 = inlined_call_operand.vmem [shape: f32[1,128], index: 4, kind: input, shape index: {}]   ;;  %s1013_s5 = inlined_call_operand.vmem [shape: f32[1,128], index: 5, kind: input, shape index: {}]   ;;  %s1014_s6 = inlined_call_operand.vmem [shape: bf16[32,128], index: 6, kind: output, shape index: {}]  }
   0x1   :  { %s912_s23 = smov 0   ;;  %s914_s24 = smov 0  }
   0x2   :  { %s916_s25 = smov 0  }
   0x3 LB: > { %s25_s26 = sadd.s32 1, %s866_s24  ;;  %p44_p1 = scmp.ne.s32.totalorder %s858_s22, %s854_s21  ;;  %s870_s25 = sphi %s916_s25, %s16_s25   ;;  %s866_s24 = sphi %s914_s24, %s1018_s24   ;;  %s862_s23 = sphi %s912_s23, %s1017_s23   ;;  %s858_s22 = sphi %s910_s22, %s1016_s22   ;;  %s854_s21 = sphi %s908_s21, %s1015_s21  }
   0x4   : > { %p26_p0 = scmp.ge.s32.totalorder %s25_s26, 4  ;;  %p45_p2 = scmp.eq.s32.totalorder %s870_s25, 0 }
   0x5   : > { %s37_s28 = sadd.s32 1, %s858_s22  ;;  %p700_p5 = scmp.ge.s32.totalorder %s870_s25, 4 }
   0x6   : > { %s1020_s26 = smov (%p26_p0, %s25_s26), 0  ;;  %p46_p3 = por %p45_p2, %p44_p1 }
   0x7   : > { %s33_s27 = ssub.s32 %s866_s24, %s1020_s26  ;;  %222 = sbr.rel (%p700_p5) target bundleno = 21 (0x15), region = 24 }
   0x8   : > { %p35_p4 = scmp.eq.s32.totalorder %s33_s27, 0 }
   0xa   : > { %s943_s29 = scalar_select %p35_p4, %s858_s22, %s37_s28  }
   0xe   : > { %225 = sbr.rel (!%p46_p3) target bundleno = 21 (0x15), region = 28  ;;  %s227_s30 = sand.u32 (%p46_p3), 1, %s858_s22  }
   0xf   : > { %s702_s7 = sshll.u32 (%p46_p3), %s866_s24, 2  ;;  %s701_s8 = sshll.u32 (%p46_p3), %s227_s30, 4 }
  0x10   : > { %s234_s11 = scalar_lea.vmem (%p46_p3), %s1008_s0, %s702_s7  ;;  %s229_s12 = scalar_lea.vmem (%p46_p3), [#allocation3], %s701_s8 }
  0x11   : > { %v250_v0 = vld [vmem:[%s234_s11] sm:$0xf] (%p46_p3)  ;;  %v252_v1 = vld [vmem:[%s234_s11 + $0x10] sm:$0xf] (%p46_p3) }
  0x12   : > { %251 = vst [vmem:[%s229_s12] sm:$0xf] (%p46_p3), %v250_v0  ;;  %253 = vst [vmem:[%s229_s12 + $0x4] sm:$0xf] (%p46_p3), %v252_v1  ;;  %v254_v2 = vld [vmem:[%s234_s11 + $0x20] sm:$0xf] (%p46_p3) }
  0x13   : > { %v256_v3 = vld [vmem:[%s234_s11 + $0x30] sm:$0xf] (%p46_p3)  ;;  %255 = vst [vmem:[%s229_s12 + $0x8] sm:$0xf] (%p46_p3), %v254_v2 }
  0x14   : > { %257 = vst [vmem:[%s229_s12 + $0xc] sm:$0xf] (%p46_p3), %v256_v3 }
  0x15 PF: > { %p703_p6 = scmp.ge.s32.totalorder %s870_s25, 1  ;;  %p308_p7 = scmp.lt.s32.totalorder %s870_s25, 5 }
  0x17   : > { %p309_p8 = pnand %p703_p6, %p308_p7 }
  0x18   : > { %s315_s13 = sand.u32 (!%p309_p8), 1, %s854_s21   ;;  %s705_s14 = sshll.u32 (!%p309_p8), %s862_s23, 4 }
  0x19   : > { %312 = sbr.rel (%p309_p8) target bundleno = 306 (0x132), region = 81  ;;  %s955_s15 = sshll.u32 (!%p309_p8), %s315_s13, 4 }
  0x1a   : > { %p357_p9 = scmp.lt.s32.totalorder (!%p309_p8), %s705_s14, 63  ;;  %p362_p10 = scmp.lt.s32.totalorder (!%p309_p8), %s862_s23, 3 }
  0x1b   : > { %s317_s9 = scalar_lea.vmem (!%p309_p8), [#allocation3], %s955_s15  ;;  %p707_p11 = scmp.ne.s32.totalorder (!%p309_p8), %s862_s23, 0 }
  0x20   : > { %s1022_s14 = smov (!%p357_p9, %s705_s14), 63  ;;  %378 = sbr.rel (%p707_p11) target bundleno = 39 (0x27), region = 89 }
  0x21   : > { %s363_s16 = scalar_select %p362_p10, %s862_s23, 3 }
  0x22   : > { %s706_s17 = sshll.u32 %s1022_s14, 2  ;;  %v872_v4 = vmov (!%p707_p11), 0.0  }
  0x23   : > { %s962_s20 = scalar_lea.vmem %s1009_s1, %s706_s17  ;;  %s364_s30 = scalar_lea.vmem %s1010_s2, %s363_s16  ;;  %379 = vst [vmem:[#allocation2] sm:$0xff] (!%p707_p11), %v872_v4  ;;  %380 = vst [vmem:[#allocation2 + $0x8] sm:$0xff] (!%p707_p11), %v872_v4 }
  0x24   : > { %s367_s8 = scalar_lea.vmem %s1011_s3, %s363_s16  ;;  %381 = vst [vmem:[#allocation2 + $0x10] sm:$0xff] (!%p707_p11), %v872_v4  ;;  %382 = vst [vmem:[#allocation2 + $0x18] sm:$0xff] (!%p707_p11), %v872_v4 }
  0x27 PF: > { %v824_v5 = vld [vmem:[%s962_s20] sm:$0xff]   ;;  %v825_v6 = vld [vmem:[%s962_s20 + $0x8] sm:$0xff]   ;;  %v826_v7 = vld [vmem:[%s962_s20 + $0x10] sm:$0xff]   ;;  %p718_p12 = scmp.ne.s32.totalorder %s862_s23, 3 }
  0x28   : > { %763 = vmatprep.subr.bf16.mxu0 %v824_v5  ;;  %v827_v8 = vld [vmem:[%s962_s20 + $0x18] sm:$0xff]   ;;  %v734_v9 = vld [vmem:[%s317_s9] sm:$0xff]   ;;  %v829_v24 = vld [vmem:[%s962_s20 + $0x28] sm:$0xff]  }
  0x29   : > { %764 = vmatpush3.bf16.msra.mxu0 %v824_v5  ;;  %v708_v10 = vld [vmem:[%s364_s30] ss:$0 sm:$0xff]  ;;  %v735_v11 = vunpack.c.l.bf16 %v734_v9  ;;  %v736_v12 = vunpack.c.h.bf16 %v734_v9  ;;  %v751_v16 = vld [vmem:[%s317_s9 + $0x8] sm:$0xff]   ;;  %v830_v28 = vld [vmem:[%s962_s20 + $0x30] sm:$0xff]  }
  0x2a   : > { %765 = vmatprep.subr.bf16.mxu0 %v825_v6  ;;  %v709_v13 = vld [vmem:[%s367_s8] ss:$0 sm:$0xff]  ;;  %v739_v20 = vunpack.c.l.bf16 %v751_v16  ;;  %v740_v21 = vunpack.c.h.bf16 %v751_v16  ;;  %v831_v31 = vld [vmem:[%s962_s20 + $0x38] sm:$0xff]   ;;  %v420_v41 = vld [vmem:[#allocation2 + $0x8] sm:$0xff] }
  0x2b   : > { %v398_v14 = vmul.f32 %v735_v11, %v708_v10  ;;  %v399_v15 = vmul.f32 %v736_v12, %v708_v10  ;;  %v828_v17 = vld [vmem:[%s962_s20 + $0x20] sm:$0xff]   ;;  %v421_v35 = vld [vmem:[#allocation2 + $0x10] sm:$0xff]  ;;  %v422_v38 = vld [vmem:[#allocation2 + $0x18] sm:$0xff] }
  0x2c   : > { %v400_v26 = vmul.f32 %v739_v20, %v708_v10  ;;  %v401_v27 = vmul.f32 %v740_v21, %v708_v10  ;;  %v419_v36 = vld [vmem:[#allocation2] sm:$0xff] }
  0x2d   : > { %766 = vmatpush3.bf16.msra.mxu0 %v825_v6  ;;  %v409_v18 = vadd.f32 %v709_v13, %v398_v14  ;;  %v410_v19 = vadd.f32 %v709_v13, %v399_v15  ;;  %v719_v49 = vld [vmem:[%s1012_s4] ss:$0 sm:$0xff] (!%p718_p12) }
  0x2e   : > { %767 = vmatprep.subr.bf16.mxu0 %v826_v7  ;;  %v411_v29 = vadd.f32 %v709_v13, %v400_v26  ;;  %v412_v30 = vadd.f32 %v709_v13, %v401_v27  ;;  %v720_v52 = vld [vmem:[%s1013_s5] ss:$0 sm:$0xff] (!%p718_p12) }
  0x2f   : > { %v413_v22 = vmax.f32 %v409_v18, 0.0  ;;  %v414_v23 = vmax.f32 %v410_v19, 0.0 }
  0x30   : > { %v415_v32 = vmax.f32 %v411_v29, 0.0  ;;  %v416_v33 = vmax.f32 %v412_v30, 0.0 }
  0x31   : > { %768 = vmatpush3.bf16.msra.mxu0 %v826_v7  ;;  %v417_v25 = vpack.c.bf16 %v414_v23, %v413_v22 }
  0x32   : > { %769 = vmatprep.subr.bf16.mxu0 %v827_v8  ;;  %v418_v34 = vpack.c.bf16 %v416_v33, %v415_v32 }
  0x33   : > { %779 = vmatprep.mubr.bf16.mxu0 %v417_v25 }
  0x35   : > { %770 = vmatpush3.bf16.msra.mxu0 %v827_v8 }
  0x36   : > { %771 = vmatprep.subr.bf16.mxu0 %v828_v17 }
  0x39   : > { %772 = vmatpush3.bf16.msra.mxu0 %v828_v17 }
  0x3a   : > { %773 = vmatprep.subr.bf16.mxu0 %v829_v24 }
  0x3d   : > { %774 = vmatpush3.bf16.msra.mxu0 %v829_v24 }
  0x3e   : > { %775 = vmatprep.subr.bf16.mxu0 %v830_v28 }
  0x41   : > { %776 = vmatpush3.bf16.msra.mxu0 %v830_v28 }
  0x42   : > { %777 = vmatprep.subr.bf16.mxu0 %v831_v31 }
  0x45   : > { %778 = vmatpush3.bf16.msra.mxu0 %v831_v31 }
  0x48   : > { %780 = vmatmul.mubr.bf16.vlgmr.msra.gmra.mrb[0].mxu0 %v418_v34 }
 0x11b   : > { %v781_v37 = vpop.f32.mrb[0].mxu0  ;;  %547 = sbr.rel (%p718_p12) target bundleno = 306 (0x132), region = 93 }
 0x11c   : > { %v538_v39 = vadd.f32 %v781_v37, %v421_v35  ;;  %v521_v40 = vpop.f32.mrb[1].mxu0 }
 0x11d   : > { %v536_v42 = vadd.f32 %v521_v40, %v419_v36  ;;  %v782_v43 = vpop.f32.mrb[2].mxu0 }
 0x11e   : > { %542 = vst [vmem:[#allocation2 + $0x10] sm:$0xff] %v538_v39  ;;  %v539_v44 = vadd.f32 %v782_v43, %v422_v38  ;;  %v524_v45 = vpop.f32.mrb[3].mxu0 }
 0x11f   : > { %540 = vst [vmem:[#allocation2] sm:$0xff] %v536_v42  ;;  %v537_v46 = vadd.f32 %v524_v45, %v420_v41 }
 0x120   : > { %543 = vst [vmem:[#allocation2 + $0x18] sm:$0xff] %v539_v44 }
 0x121   : > { %541 = vst [vmem:[#allocation2 + $0x8] sm:$0xff] %v537_v46 }
 0x125   : > { %v550_v53 = vld [vmem:[#allocation2 + $0x10] sm:$0xff] }
 0x126   : > { %v548_v47 = vld [vmem:[#allocation2] sm:$0xff]  ;;  %v561_v55 = vmul.f32 %v719_v49, %v550_v53 }
 0x127   : > { %v559_v50 = vmul.f32 %v719_v49, %v548_v47  ;;  %v551_v54 = vld [vmem:[#allocation2 + $0x18] sm:$0xff] }
 0x128   : > { %v549_v48 = vld [vmem:[#allocation2 + $0x8] sm:$0xff]  ;;  %v562_v56 = vmul.f32 %v719_v49, %v551_v54  ;;  %v572_v59 = vadd.f32 %v720_v52, %v561_v55 }
 0x129   : > { %v560_v51 = vmul.f32 %v719_v49, %v549_v48  ;;  %v570_v57 = vadd.f32 %v720_v52, %v559_v50 }
 0x12a   : > { %v573_v60 = vadd.f32 %v720_v52, %v562_v56  ;;  %v576_v63 = vmax.f32 %v572_v59, 0.0 }
 0x12b   : > { %v571_v58 = vadd.f32 %v720_v52, %v560_v51  ;;  %v574_v61 = vmax.f32 %v570_v57, 0.0 }
 0x12c   : > { %v577_v0 = vmax.f32 %v573_v60, 0.0 }
 0x12d   : > { %v575_v62 = vmax.f32 %v571_v58, 0.0 }
 0x12e   : > { %v749_v2 = vpack.c.bf16 %v577_v0, %v576_v63 }
 0x12f   : > { %v744_v1 = vpack.c.bf16 %v575_v62, %v574_v61 }
 0x130   : > { %752 = vst [vmem:[%s1014_s6 + $0x8] sm:$0xff] %v749_v2  }
 0x131   : > { %745 = vst [vmem:[%s1014_s6] sm:$0xff] %v744_v1  }
 0x132 PF: > { %s16_s25 = sadd.s32 1, %s870_s25   ;;  %s1015_s21 = smov %s858_s22 }
 0x133   : > { %p13_p13 = scmp.ge.s32.totalorder %s16_s25, 6   ;;  %s1016_s22 = smov %s943_s29 }
 0x134   : > { %s1017_s23 = smov %s866_s24  ;;  %s1018_s24 = smov %s1020_s26 }
 0x135   :  { %15 = sbr.rel (!%p13_p13) target bundleno = 3 (0x3), region = 137 }

// kernel: densenet121_forward.160
= control target key start
LH: loop header
LB: loop body
LE: loop exit
PB: predicated region body
PF: predicated region fallthrough
CT: control target
= control target key end

     0   :  { %s890_s15 = smov 0   ;;  %s892_s16 = smov 0   ;;  %s1016_s0 = inlined_call_operand.vmem [shape: bf16[32,512], index: 0, kind: input, shape index: {}]   ;;  %s1017_s1 = inlined_call_operand.vmem [shape: bf16[512,256], index: 1, kind: input, shape index: {}]   ;;  %s1018_s2 = inlined_call_operand.vmem [shape: f32[1,512], index: 2, kind: input, shape index: {}]   ;;  %s1019_s3 = inlined_call_operand.vmem [shape: f32[1,512], index: 3, kind: input, shape index: {}]   ;;  %s1020_s4 = inlined_call_operand.vmem [shape: bf16[32,256], index: 4, kind: output, shape index: {}]  }
   0x1   :  { %s894_s17 = smov 0   ;;  %s896_s18 = smov 0  }
   0x2   :  { %s898_s19 = smov 0  }
   0x3 LB: > { %s23_s20 = sadd.s32 1, %s857_s18  ;;  %p42_p1 = scmp.ne.s32.totalorder %s849_s16, %s845_s15  ;;  %s861_s19 = sphi %s898_s19, %s14_s19   ;;  %s857_s18 = sphi %s896_s18, %s1024_s18   ;;  %s853_s17 = sphi %s894_s17, %s1023_s17   ;;  %s849_s16 = sphi %s892_s16, %s1022_s16   ;;  %s845_s15 = sphi %s890_s15, %s1021_s15  }
   0x4   : > { %p24_p0 = scmp.ge.s32.totalorder %s23_s20, 4  ;;  %p43_p2 = scmp.eq.s32.totalorder %s861_s19, 0 }
   0x5   : > { %s35_s22 = sadd.s32 1, %s849_s16  ;;  %p691_p5 = scmp.ge.s32.totalorder %s861_s19, 4 }
   0x6   : > { %s1026_s20 = smov (%p24_p0, %s23_s20), 0  ;;  %p44_p3 = por %p43_p2, %p42_p1 }
   0x7   : > { %s31_s21 = ssub.s32 %s857_s18, %s1026_s20  ;;  %172 = sbr.rel (%p691_p5) target bundleno = 21 (0x15), region = 16 }
   0x8   : > { %p33_p4 = scmp.eq.s32.totalorder %s31_s21, 0 }
   0xa   : > { %s925_s23 = scalar_select %p33_p4, %s849_s16, %s35_s22  }
   0xe   : > { %175 = sbr.rel (!%p44_p3) target bundleno = 21 (0x15), region = 20  ;;  %s177_s24 = sand.u32 (%p44_p3), 1, %s849_s16  }
   0xf   : > { %s693_s25 = sshll.u32 (%p44_p3), %s857_s18, 2  ;;  %s692_s26 = sshll.u32 (%p44_p3), %s177_s24, 4 }
  0x10   : > { %s184_s29 = scalar_lea.vmem (%p44_p3), %s1016_s0, %s693_s25  ;;  %s179_s30 = scalar_lea.vmem (%p44_p3), [#allocation3], %s692_s26 }
  0x11   : > { %v200_v0 = vld [vmem:[%s184_s29] sm:$0xf] (%p44_p3)  ;;  %v202_v1 = vld [vmem:[%s184_s29 + $0x10] sm:$0xf] (%p44_p3) }
  0x12   : > { %201 = vst [vmem:[%s179_s30] sm:$0xf] (%p44_p3), %v200_v0  ;;  %203 = vst [vmem:[%s179_s30 + $0x4] sm:$0xf] (%p44_p3), %v202_v1  ;;  %v204_v2 = vld [vmem:[%s184_s29 + $0x20] sm:$0xf] (%p44_p3) }
  0x13   : > { %v206_v3 = vld [vmem:[%s184_s29 + $0x30] sm:$0xf] (%p44_p3)  ;;  %205 = vst [vmem:[%s179_s30 + $0x8] sm:$0xf] (%p44_p3), %v204_v2 }
  0x14   : > { %207 = vst [vmem:[%s179_s30 + $0xc] sm:$0xf] (%p44_p3), %v206_v3 }
  0x15 PF: > { %p694_p6 = scmp.ge.s32.totalorder %s861_s19, 1  ;;  %p259_p7 = scmp.lt.s32.totalorder %s861_s19, 5 }
  0x17   : > { %p260_p8 = pnand %p694_p6, %p259_p7 }
  0x18   : > { %s266_s5 = sand.u32 (!%p260_p8), 1, %s845_s15   ;;  %s696_s6 = sshll.u32 (!%p260_p8), %s853_s17, 4 }
  0x19   : > { %263 = sbr.rel (%p260_p8) target bundleno = 302 (0x12e), region = 73  ;;  %s937_s7 = sshll.u32 (!%p260_p8), %s266_s5, 4 }
  0x1a   : > { %p306_p9 = scmp.lt.s32.totalorder (!%p260_p8), %s696_s6, 63  ;;  %p312_p10 = scmp.lt.s32.totalorder (!%p260_p8), %s853_s17, 3 }
  0x1b   : > { %s268_s25 = scalar_lea.vmem (!%p260_p8), [#allocation3], %s937_s7  ;;  %p699_p11 = scmp.ne.s32.totalorder (!%p260_p8), %s853_s17, 0 }
  0x20   : > { %s1028_s6 = smov (!%p306_p9, %s696_s6), 63  ;;  %329 = sbr.rel (%p699_p11) target bundleno = 39 (0x27), region = 81 }
  0x21   : > { %s941_s8 = scalar_select %p312_p10, %s853_s17, 3 }
  0x22   : > { %s727_s9 = sshll.u32 %s1028_s6, 3  ;;  %v863_v4 = vmov (!%p699_p11), 0.0  }
  0x23   : > { %s946_s12 = scalar_lea.vmem %s1017_s1, %s727_s9  ;;  %s314_s15 = scalar_lea.vmem %s1018_s2, %s941_s8  ;;  %330 = vst [vmem:[#allocation2] sm:$0xff] (!%p699_p11), %v863_v4  ;;  %331 = vst [vmem:[#allocation2 + $0x8] sm:$0xff] (!%p699_p11), %v863_v4 }
  0x24   : > { %s317_s24 = scalar_lea.vmem %s1019_s3, %s941_s8  ;;  %332 = vst [vmem:[#allocation2 + $0x10] sm:$0xff] (!%p699_p11), %v863_v4  ;;  %333 = vst [vmem:[#allocation2 + $0x18] sm:$0xff] (!%p699_p11), %v863_v4 }
  0x25   : > { %334 = vst [vmem:[#allocation2 + $0x20] sm:$0xff] (!%p699_p11), %v863_v4  ;;  %335 = vst [vmem:[#allocation2 + $0x28] sm:$0xff] (!%p699_p11), %v863_v4 }
  0x26   : > { %336 = vst [vmem:[#allocation2 + $0x30] sm:$0xff] (!%p699_p11), %v863_v4  ;;  %337 = vst [vmem:[#allocation2 + $0x38] sm:$0xff] (!%p699_p11), %v863_v4 }
  0x27 PF: > { %v799_v5 = vld [vmem:[%s946_s12 + $0x4] ss:$8 sps:$4 sm:$0xff]   ;;  %v801_v6 = vld [vmem:[%s946_s12] ss:$8 sps:$4 sm:$0xff]   ;;  %v864_v7 = vmov 0   ;;  %p718_p12 = scmp.ne.s32.totalorder %s853_s17, 3 }
  0x28   : > { %510 = vmatprep.mubr.bf16.mxu0 %v864_v7  ;;  %520 = vmatprep.mubr.bf16.mxu1 %v864_v7  ;;  %v802_v8 = vld [vmem:[%s946_s12 + $0x14] ss:$8 sps:$4 sm:$0xff]   ;;  %v804_v9 = vld [vmem:[%s946_s12 + $0x10] ss:$8 sps:$4 sm:$0xff]   ;;  %v805_v10 = vld [vmem:[%s946_s12 + $0x24] ss:$8 sps:$4 sm:$0xff]  }
  0x29   : > { %478 = vmatprep.subr.bf16.mxu0 %v799_v5  ;;  %741 = vmatprep.subr.bf16.mxu1 %v799_v5  ;;  %v807_v11 = vld [vmem:[%s946_s12 + $0x20] ss:$8 sps:$4 sm:$0xff]   ;;  %v808_v12 = vld [vmem:[%s946_s12 + $0x34] ss:$8 sps:$4 sm:$0xff]   ;;  %v810_v13 = vld [vmem:[%s946_s12 + $0x30] ss:$8 sps:$4 sm:$0xff]  }
  0x2a   : > { %479 = vmatpush1.bf16.msra.mxu0 %v801_v6  ;;  %749 = vmatpush1.bf16.msra.mxu1 %v801_v6  ;;  %v733_v14 = vld [vmem:[%s268_s25] sm:$0xff]   ;;  %v740_v15 = vld [vmem:[%s268_s25 + $0x8] sm:$0xff]  }
  0x2b   : > { %480 = vmatprep.subr.bf16.mxu0 %v802_v8  ;;  %742 = vmatprep.subr.bf16.mxu1 %v802_v8  ;;  %v811_v16 = vld [vmem:[%s946_s12 + $0x44] ss:$8 sps:$4 sm:$0xff]   ;;  %v734_v17 = vunpack.c.l.bf16 %v733_v14  ;;  %v735_v18 = vunpack.c.h.bf16 %v733_v14  ;;  %v738_v19 = vunpack.c.l.bf16 %v740_v15  ;;  %v739_v20 = vunpack.c.h.bf16 %v740_v15  ;;  %v813_v21 = vld [vmem:[%s946_s12 + $0x40] ss:$8 sps:$4 sm:$0xff]   ;;  %v814_v23 = vld [vmem:[%s946_s12 + $0x54] ss:$8 sps:$4 sm:$0xff]  }
  0x2c   : > { %v700_v22 = vld [vmem:[%s314_s15] ss:$0 sm:$0xff]  ;;  %v816_v28 = vld [vmem:[%s946_s12 + $0x50] ss:$8 sps:$4 sm:$0xff]   ;;  %v817_v30 = vld [vmem:[%s946_s12 + $0x64] ss:$8 sps:$4 sm:$0xff]  }
  0x2d   : > { %v353_v24 = vmul.f32 %v734_v17, %v700_v22  ;;  %v354_v25 = vmul.f32 %v735_v18, %v700_v22  ;;  %v355_v26 = vmul.f32 %v738_v19, %v700_v22  ;;  %v356_v27 = vmul.f32 %v739_v20, %v700_v22  ;;  %v701_v29 = vld [vmem:[%s317_s24] ss:$0 sm:$0xff]  ;;  %v820_v36 = vld [vmem:[%s946_s12 + $0x74] ss:$8 sps:$4 sm:$0xff]   ;;  %v822_v41 = vld [vmem:[%s946_s12 + $0x70] ss:$8 sps:$4 sm:$0xff]  }
  0x2e   : > { %481 = vmatpush1.bf16.msra.mxu0 %v804_v9  ;;  %750 = vmatpush1.bf16.msra.mxu1 %v804_v9  ;;  %v819_v35 = vld [vmem:[%s946_s12 + $0x60] ss:$8 sps:$4 sm:$0xff]   ;;  %v376_v50 = vld [vmem:[#allocation2 + $0x10] sm:$0xff]  ;;  %v377_v56 = vld [vmem:[#allocation2 + $0x18] sm:$0xff] }
  0x2f   : > { %482 = vmatprep.subr.bf16.mxu0 %v805_v10  ;;  %743 = vmatprep.subr.bf16.mxu1 %v805_v10  ;;  %v364_v31 = vadd.f32 %v701_v29, %v353_v24  ;;  %v365_v32 = vadd.f32 %v701_v29, %v354_v25  ;;  %v366_v33 = vadd.f32 %v701_v29, %v355_v26  ;;  %v374_v44 = vld [vmem:[#allocation2] sm:$0xff]  ;;  %v375_v46 = vld [vmem:[#allocation2 + $0x8] sm:$0xff]  ;;  %v380_v51 = vld [vmem:[#allocation2 + $0x30] sm:$0xff] }
  0x30   : > { %v367_v34 = vadd.f32 %v701_v29, %v356_v27  ;;  %v378_v45 = vld [vmem:[#allocation2 + $0x20] sm:$0xff]  ;;  %v379_v47 = vld [vmem:[#allocation2 + $0x28] sm:$0xff]  ;;  %v381_v57 = vld [vmem:[#allocation2 + $0x38] sm:$0xff] }
  0x31   : > { %v368_v37 = vmax.f32 %v364_v31, 0.0  ;;  %v369_v38 = vmax.f32 %v365_v32, 0.0  ;;  %v370_v39 = vmax.f32 %v366_v33, 0.0 }
  0x32   : > { %483 = vmatpush1.bf16.msra.mxu0 %v807_v11  ;;  %751 = vmatpush1.bf16.msra.mxu1 %v807_v11  ;;  %v371_v40 = vmax.f32 %v367_v34, 0.0 }
  0x33   : > { %484 = vmatprep.subr.bf16.mxu0 %v808_v12  ;;  %744 = vmatprep.subr.bf16.mxu1 %v808_v12  ;;  %v372_v42 = vpack.c.bf16 %v369_v38, %v368_v37 }
  0x34   : > { %v373_v43 = vpack.c.bf16 %v371_v40, %v370_v39 }
  0x36   : > { %485 = vmatpush1.bf16.msra.mxu0 %v810_v13  ;;  %752 = vmatpush1.bf16.msra.mxu1 %v810_v13 }
  0x37   : > { %486 = vmatprep.subr.bf16.mxu0 %v811_v16  ;;  %745 = vmatprep.subr.bf16.mxu1 %v811_v16 }
  0x3a   : > { %487 = vmatpush1.bf16.msra.mxu0 %v813_v21  ;;  %753 = vmatpush1.bf16.msra.mxu1 %v813_v21 }
  0x3b   : > { %488 = vmatprep.subr.bf16.mxu0 %v814_v23  ;;  %746 = vmatprep.subr.bf16.mxu1 %v814_v23 }
  0x3e   : > { %489 = vmatpush1.bf16.msra.mxu0 %v816_v28  ;;  %754 = vmatpush1.bf16.msra.mxu1 %v816_v28 }
  0x3f   : > { %490 = vmatprep.subr.bf16.mxu0 %v817_v30  ;;  %747 = vmatprep.subr.bf16.mxu1 %v817_v30 }
  0x42   : > { %491 = vmatpush1.bf16.msra.mxu0 %v819_v35  ;;  %755 = vmatpush1.bf16.msra.mxu1 %v819_v35 }
  0x43   : > { %492 = vmatprep.subr.bf16.mxu0 %v820_v36  ;;  %748 = vmatprep.subr.bf16.mxu1 %v820_v36 }
  0x46   : > { %493 = vmatpush1.bf16.msra.mxu0 %v822_v41  ;;  %756 = vmatpush1.bf16.msra.mxu1 %v822_v41 }
  0x49   : > { %511 = vmatmul.mubr.bf16.vlgmr.msra.gmra.mrb[0].mxu0 %v372_v42  ;;  %521 = vmatmul.mubr.bf16.vlgmr.msra.gmra.mrb[0].mxu1 %v373_v43 }
 0x11c   : > { %v512_v48 = vpop.f32.mrb[0].mxu0  ;;  %v522_v49 = vpop.f32.mrb[0].mxu1  ;;  %550 = sbr.rel (%p718_p12) target bundleno = 302 (0x12e), region = 85 }
 0x11d   : > { %v531_v52 = vadd.f32 %v512_v48, %v374_v44  ;;  %v535_v53 = vadd.f32 %v522_v49, %v378_v45  ;;  %v514_v54 = vpop.f32.mrb[1].mxu0  ;;  %v524_v55 = vpop.f32.mrb[1].mxu1 }
 0x11e   : > { %v532_v58 = vadd.f32 %v514_v54, %v375_v46  ;;  %v536_v59 = vadd.f32 %v524_v55, %v379_v47  ;;  %v516_v60 = vpop.f32.mrb[2].mxu0  ;;  %v526_v61 = vpop.f32.mrb[2].mxu1 }
 0x11f   : > { %539 = vst [vmem:[#allocation2] sm:$0xff] %v531_v52  ;;  %543 = vst [vmem:[#allocation2 + $0x20] sm:$0xff] %v535_v53  ;;  %v533_v62 = vadd.f32 %v516_v60, %v376_v50  ;;  %v537_v63 = vadd.f32 %v526_v61, %v380_v51  ;;  %v518_v0 = vpop.f32.mrb[3].mxu0  ;;  %v528_v1 = vpop.f32.mrb[3].mxu1 }
 0x120   : > { %540 = vst [vmem:[#allocation2 + $0x8] sm:$0xff] %v532_v58  ;;  %544 = vst [vmem:[#allocation2 + $0x28] sm:$0xff] %v536_v59  ;;  %v534_v2 = vadd.f32 %v518_v0, %v377_v56  ;;  %v538_v3 = vadd.f32 %v528_v1, %v381_v57 }
 0x121   : > { %541 = vst [vmem:[#allocation2 + $0x10] sm:$0xff] %v533_v62  ;;  %545 = vst [vmem:[#allocation2 + $0x30] sm:$0xff] %v537_v63 }
 0x122   : > { %542 = vst [vmem:[#allocation2 + $0x18] sm:$0xff] %v534_v2  ;;  %546 = vst [vmem:[#allocation2 + $0x38] sm:$0xff] %v538_v3 }
 0x126   : > { %v551_v4 = vld [vmem:[#allocation2] sm:$0xff] }
 0x127   : > { %v552_v5 = vld [vmem:[#allocation2 + $0x8] sm:$0xff]  ;;  %v555_v9 = vld [vmem:[#allocation2 + $0x20] sm:$0xff] }
 0x128   : > { %v553_v6 = vld [vmem:[#allocation2 + $0x10] sm:$0xff]  ;;  %v728_v7 = vpack.c.bf16 %v552_v5, %v551_v4  ;;  %v556_v10 = vld [vmem:[#allocation2 + $0x28] sm:$0xff] }
 0x129   : > { %v554_v8 = vld [vmem:[#allocation2 + $0x18] sm:$0xff]  ;;  %v730_v12 = vpack.c.bf16 %v556_v10, %v555_v9  ;;  %v557_v13 = vld [vmem:[#allocation2 + $0x30] sm:$0xff] }
 0x12a   : > { %v729_v11 = vpack.c.bf16 %v554_v8, %v553_v6  ;;  %v558_v14 = vld [vmem:[#allocation2 + $0x38] sm:$0xff]  ;;  %583 = vst [vmem:[%s1020_s4] sm:$0xff] %v728_v7 }
 0x12b   : > { %v731_v15 = vpack.c.bf16 %v558_v14, %v557_v13  ;;  %585 = vst [vmem:[%s1020_s4 + $0x10] sm:$0xff] %v730_v12 }
 0x12c   : > { %584 = vst [vmem:[%s1020_s4 + $0x8] sm:$0xff] %v729_v11 }
 0x12d   : > { %586 = vst [vmem:[%s1020_s4 + $0x18] sm:$0xff] %v731_v15 }
 0x12e PF: > { %s14_s19 = sadd.s32 1, %s861_s19   ;;  %s1021_s15 = smov %s849_s16 }
 0x12f   : > { %p11_p13 = scmp.ge.s32.totalorder %s14_s19, 6   ;;  %s1022_s16 = smov %s925_s23 }
 0x130   : > { %s1023_s17 = smov %s857_s18  ;;  %s1024_s18 = smov %s1026_s20 }
 0x131   :  { %13 = sbr.rel (!%p11_p13) target bundleno = 3 (0x3), region = 129 }

// kernel: densenet121_forward.161
= control target key start
LH: loop header
LB: loop body
LE: loop exit
PB: predicated region body
PF: predicated region fallthrough
CT: control target
= control target key end

     0   :  { %s843_s21 = smov 0   ;;  %s845_s22 = smov 0   ;;  %s949_s0 = inlined_call_operand.vmem [shape: bf16[16,256], index: 0, kind: input, shape index: {}]   ;;  %s950_s1 = inlined_call_operand.vmem [shape: bf16[256,128], index: 1, kind: input, shape index: {}]   ;;  %s951_s2 = inlined_call_operand.vmem [shape: f32[1,256], index: 2, kind: input, shape index: {}]   ;;  %s952_s3 = inlined_call_operand.vmem [shape: f32[1,256], index: 3, kind: input, shape index: {}]   ;;  %s953_s4 = inlined_call_operand.vmem [shape: f32[1,128], index: 4, kind: input, shape index: {}]   ;;  %s954_s5 = inlined_call_operand.vmem [shape: f32[1,128], index: 5, kind: input, shape index: {}]   ;;  %s955_s6 = inlined_call_operand.vmem [shape: bf16[16,128], index: 6, kind: output, shape index: {}]  }
   0x1   :  { %s847_s23 = smov 0   ;;  %s849_s24 = smov 0  }
   0x2   :  { %s851_s25 = smov 0  }
   0x3 LB: > { %s25_s26 = sadd.s32 1, %s799_s24  ;;  %p44_p1 = scmp.ne.s32.totalorder %s791_s22, %s787_s21  ;;  %s803_s25 = sphi %s851_s25, %s16_s25   ;;  %s799_s24 = sphi %s849_s24, %s959_s24   ;;  %s795_s23 = sphi %s847_s23, %s958_s23   ;;  %s791_s22 = sphi %s845_s22, %s957_s22   ;;  %s787_s21 = sphi %s843_s21, %s956_s21  }
   0x4   : > { %p26_p0 = scmp.ge.s32.totalorder %s25_s26, 2  ;;  %p45_p2 = scmp.eq.s32.totalorder %s803_s25, 0 }
   0x5   : > { %s37_s28 = sadd.s32 1, %s791_s22  ;;  %p647_p5 = scmp.ge.s32.totalorder %s803_s25, 2 }
   0x6   : > { %s961_s26 = smov (%p26_p0, %s25_s26), 0  ;;  %p46_p3 = por %p45_p2, %p44_p1 }
   0x7   : > { %s33_s27 = ssub.s32 %s799_s24, %s961_s26  ;;  %222 = sbr.rel (%p647_p5) target bundleno = 21 (0x15), region = 24 }
   0x8   : > { %p35_p4 = scmp.eq.s32.totalorder %s33_s27, 0 }
   0xa   : > { %s878_s29 = scalar_select %p35_p4, %s791_s22, %s37_s28  }
   0xe   : > { %225 = sbr.rel (!%p46_p3) target bundleno = 21 (0x15), region = 28  ;;  %s227_s30 = sand.u32 (%p46_p3), 1, %s791_s22  }
   0xf   : > { %s649_s7 = sshll.u32 (%p46_p3), %s799_s24, 2  ;;  %s648_s8 = sshll.u32 (%p46_p3), %s227_s30, 3 }
  0x10   : > { %s234_s11 = scalar_lea.vmem (%p46_p3), %s949_s0, %s649_s7  ;;  %s229_s12 = scalar_lea.vmem (%p46_p3), [#allocation3], %s648_s8 }
  0x11   : > { %v250_v0 = vld [vmem:[%s234_s11] sm:$0xf] (%p46_p3)  ;;  %v252_v1 = vld [vmem:[%s234_s11 + $0x8] sm:$0xf] (%p46_p3) }
  0x12   : > { %251 = vst [vmem:[%s229_s12] sm:$0xf] (%p46_p3), %v250_v0  ;;  %253 = vst [vmem:[%s229_s12 + $0x4] sm:$0xf] (%p46_p3), %v252_v1 }
  0x15 PF: > { %p650_p6 = scmp.ge.s32.totalorder %s803_s25, 1  ;;  %p300_p7 = scmp.lt.s32.totalorder %s803_s25, 3 }
  0x17   : > { %p301_p8 = pnand %p650_p6, %p300_p7 }
  0x18   : > { %s307_s13 = sand.u32 (!%p301_p8), 1, %s787_s21   ;;  %s652_s14 = sshll.u32 (!%p301_p8), %s795_s23, 4 }
  0x19   : > { %304 = sbr.rel (%p301_p8) target bundleno = 305 (0x131), region = 81  ;;  %s890_s15 = sshll.u32 (!%p301_p8), %s307_s13, 3 }
  0x1a   : > { %p349_p9 = scmp.lt.s32.totalorder (!%p301_p8), %s652_s14, 31  ;;  %p354_p10 = scmp.lt.s32.totalorder (!%p301_p8), %s795_s23, 1 }
  0x1b   : > { %s309_s9 = scalar_lea.vmem (!%p301_p8), [#allocation3], %s890_s15  ;;  %p654_p11 = scmp.ne.s32.totalorder (!%p301_p8), %s795_s23, 0 }
  0x20   : > { %s963_s14 = smov (!%p349_p9, %s652_s14), 31  ;;  %370 = sbr.rel (%p654_p11) target bundleno = 39 (0x27), region = 89 }
  0x21   : > { %s894_s16 = scalar_select %p354_p10, %s795_s23, 1 }
  0x22   : > { %s653_s17 = sshll.u32 %s963_s14, 2  ;;  %v805_v2 = vmov (!%p654_p11), 0.0  }
  0x23   : > { %s899_s20 = scalar_lea.vmem %s950_s1, %s653_s17  ;;  %s356_s21 = scalar_lea.vmem %s951_s2, %s894_s16  ;;  %371 = vst [vmem:[#allocation2] sm:$0xff] (!%p654_p11), %v805_v2  ;;  %372 = vst [vmem:[#allocation2 + $0x8] sm:$0xff] (!%p654_p11), %v805_v2 }
  0x24   : > { %s359_s8 = scalar_lea.vmem %s952_s3, %s894_s16 }
  0x27 PF: > { %v757_v3 = vld [vmem:[%s899_s20] sm:$0xff]   ;;  %v806_v4 = vmov 0.0   ;;  %v758_v5 = vld [vmem:[%s899_s20 + $0x8] sm:$0xff]   ;;  %vm807_vm0 = vmmov 0   ;;  %v759_v6 = vld [vmem:[%s899_s20 + $0x10] sm:$0xff]   ;;  %p665_p12 = scmp.ne.s32.totalorder %s795_s23, 1 }
  0x28   : > { %694 = vmatprep.subr.bf16.mxu0 %v806_v4  ;;  %710 = vmatprep.mubr.msk.bf16.mxu0 %vm807_vm0, %v806_v4  ;;  %v760_v7 = vld [vmem:[%s899_s20 + $0x18] sm:$0xff]   ;;  %v761_v11 = vld [vmem:[%s899_s20 + $0x20] sm:$0xff]   ;;  %v762_v15 = vld [vmem:[%s899_s20 + $0x28] sm:$0xff]  }
  0x29   : > { %695 = vmatpush3.bf16.msra.mxu0 %v757_v3  ;;  %v677_v8 = vld [vmem:[%s309_s9] sm:$0xff]   ;;  %v655_v12 = vld [vmem:[%s356_s21] ss:$0 sm:$0xff] }
  0x2a   : > { %696 = vmatprep.subr.bf16.mxu0 %v806_v4  ;;  %v678_v9 = vunpack.c.l.bf16 %v677_v8  ;;  %v679_v10 = vunpack.c.h.bf16 %v677_v8  ;;  %v656_v16 = vld [vmem:[%s359_s8] ss:$0 sm:$0xff]  ;;  %v763_v19 = vld [vmem:[%s899_s20 + $0x30] sm:$0xff]   ;;  %v764_v22 = vld [vmem:[%s899_s20 + $0x38] sm:$0xff]  }
  0x2b   : > { %v398_v24 = vld [vmem:[#allocation2] sm:$0xff]  ;;  %v399_v26 = vld [vmem:[#allocation2 + $0x8] sm:$0xff] }
  0x2c   : > { %v384_v13 = vmul.f32 %v678_v9, %v655_v12  ;;  %v385_v14 = vmul.f32 %v679_v10, %v655_v12  ;;  %v666_v34 = vld [vmem:[%s953_s4] ss:$0 sm:$0xff] (!%p665_p12) }
  0x2d   : > { %697 = vmatpush3.bf16.msra.mxu0 %v758_v5  ;;  %v667_v37 = vld [vmem:[%s954_s5] ss:$0 sm:$0xff] (!%p665_p12) }
  0x2e   : > { %698 = vmatprep.subr.bf16.mxu0 %v806_v4  ;;  %v393_v17 = vadd.f32 %v656_v16, %v384_v13  ;;  %v394_v18 = vadd.f32 %v656_v16, %v385_v14 }
  0x30   : > { %v395_v20 = vmax.f32 %v393_v17, 0.0  ;;  %v396_v21 = vmax.f32 %v394_v18, 0.0 }
  0x31   : > { %699 = vmatpush3.bf16.msra.mxu0 %v759_v6 }
  0x32   : > { %700 = vmatprep.subr.bf16.mxu0 %v806_v4  ;;  %v397_v23 = vpack.c.bf16 %v396_v21, %v395_v20 }
  0x35   : > { %701 = vmatpush3.bf16.msra.mxu0 %v760_v7 }
  0x36   : > { %702 = vmatprep.subr.bf16.mxu0 %v806_v4 }
  0x39   : > { %703 = vmatpush3.bf16.msra.mxu0 %v761_v11 }
  0x3a   : > { %704 = vmatprep.subr.bf16.mxu0 %v806_v4 }
  0x3d   : > { %705 = vmatpush3.bf16.msra.mxu0 %v762_v15 }
  0x3e   : > { %706 = vmatprep.subr.bf16.mxu0 %v806_v4 }
  0x41   : > { %707 = vmatpush3.bf16.msra.mxu0 %v763_v19 }
  0x42   : > { %708 = vmatprep.subr.bf16.mxu0 %v806_v4 }
  0x45   : > { %709 = vmatpush3.bf16.msra.mxu0 %v764_v22 }
  0x48   : > { %711 = vmatmul.mubr.bf16.vlgmr.msra.gmra.mrb[0].mxu0 %v397_v23 }
 0x11a   : > { %512 = sbr.rel (%p665_p12) target bundleno = 305 (0x131), region = 93 }
 0x11b   : > { %v498_v25 = vpop.f32.mrb[0].mxu0 }
 0x11c   : > { %v505_v27 = vadd.f32 %v498_v25, %v398_v24  ;;  %v712_v28 = vpop.f32.mrb[1].mxu0 }
 0x11d   : > { %v501_v29 = vpop.f32.mrb[2].mxu0 }
 0x11e   : > { %507 = vst [vmem:[#allocation2] sm:$0xff] %v505_v27  ;;  %v506_v30 = vadd.f32 %v501_v29, %v399_v26  ;;  %v713_v31 = vpop.f32.mrb[3].mxu0 }
 0x120   : > { %508 = vst [vmem:[#allocation2 + $0x8] sm:$0xff] %v506_v30 }
 0x125   : > { %v513_v32 = vld [vmem:[#allocation2] sm:$0xff] }
 0x126   : > { %v522_v35 = vmul.f32 %v666_v34, %v513_v32 }
 0x127   : > { %v514_v33 = vld [vmem:[#allocation2 + $0x8] sm:$0xff] }
 0x128   : > { %v523_v36 = vmul.f32 %v666_v34, %v514_v33  ;;  %v531_v38 = vadd.f32 %v667_v37, %v522_v35 }
 0x12a   : > { %v532_v39 = vadd.f32 %v667_v37, %v523_v36  ;;  %v533_v40 = vmax.f32 %v531_v38, 0.0 }
 0x12c   : > { %v534_v41 = vmax.f32 %v532_v39, 0.0 }
 0x12e   : > { %v683_v42 = vpack.c.bf16 %v534_v41, %v533_v40 }
 0x130   : > { %684 = vst [vmem:[%s955_s6] sm:$0xff] %v683_v42  }
 0x131 PF: > { %s16_s25 = sadd.s32 1, %s803_s25   ;;  %s956_s21 = smov %s791_s22 }
 0x132   : > { %p13_p13 = scmp.ge.s32.totalorder %s16_s25, 4   ;;  %s957_s22 = smov %s878_s29 }
 0x133   : > { %s958_s23 = smov %s799_s24  ;;  %s959_s24 = smov %s961_s26 }
 0x134   :  { %15 = sbr.rel (!%p13_p13) target bundleno = 3 (0x3), region = 137 }

// kernel: densenet121_forward.162
= control target key start
LH: loop header
LB: loop body
LE: loop exit
PB: predicated region body
PF: predicated region fallthrough
CT: control target
= control target key end

     0   :  { %s626_s9 = smov 0   ;;  %s628_s10 = smov 0   ;;  %s711_s0 = inlined_call_operand.vmem [shape: bf16[16,1152], index: 0, kind: input, shape index: {}]   ;;  %s712_s1 = inlined_call_operand.vmem [shape: bf16[1152,128], index: 1, kind: input, shape index: {}]   ;;  %s713_s2 = inlined_call_operand.vmem [shape: bf16[16,128], index: 2, kind: output, shape index: {}]  }
   0x1   :  { %s630_s11 = smov 0   ;;  %s632_s12 = smov 0  }
   0x2   :  { %s634_s13 = smov 0  }
   0x3 LB: > { %s21_s14 = sadd.s32 1, %s602_s12  ;;  %p40_p1 = scmp.ne.s32.totalorder %s594_s10, %s590_s9  ;;  %s606_s13 = sphi %s634_s13, %s12_s13   ;;  %s602_s12 = sphi %s632_s12, %s717_s12   ;;  %s598_s11 = sphi %s630_s11, %s716_s11   ;;  %s594_s10 = sphi %s628_s10, %s715_s10   ;;  %s590_s9 = sphi %s626_s9, %s714_s9  }
   0x4   : > { %p22_p0 = scmp.ge.s32.totalorder %s21_s14, 9  ;;  %p41_p2 = scmp.eq.s32.totalorder %s606_s13, 0 }
   0x5   : > { %s33_s16 = sadd.s32 1, %s594_s10  ;;  %p456_p5 = scmp.ge.s32.totalorder %s606_s13, 9 }
   0x6   : > { %s719_s14 = smov (%p22_p0, %s21_s14), 0  ;;  %p42_p3 = por %p41_p2, %p40_p1 }
   0x7   : > { %s29_s15 = ssub.s32 %s602_s12, %s719_s14  ;;  %118 = sbr.rel (%p456_p5) target bundleno = 21 (0x15), region = 16 }
   0x8   : > { %p31_p4 = scmp.eq.s32.totalorder %s29_s15, 0 }
   0xa   : > { %s661_s17 = scalar_select %p31_p4, %s594_s10, %s33_s16  }
   0xe   : > { %121 = sbr.rel (!%p42_p3) target bundleno = 21 (0x15), region = 20  ;;  %s123_s18 = sand.u32 (%p42_p3), 1, %s594_s10  }
   0xf   : > { %s458_s19 = sshll.u32 (%p42_p3), %s602_s12, 2  ;;  %s457_s20 = sshll.u32 (%p42_p3), %s123_s18, 3 }
  0x10   : > { %s130_s23 = scalar_lea.vmem (%p42_p3), %s711_s0, %s458_s19  ;;  %s125_s24 = scalar_lea.vmem (%p42_p3), [#allocation3], %s457_s20 }
  0x11   : > { %v146_v0 = vld [vmem:[%s130_s23] sm:$0xf] (%p42_p3)  ;;  %v148_v1 = vld [vmem:[%s130_s23 + $0x24] sm:$0xf] (%p42_p3) }
  0x12   : > { %147 = vst [vmem:[%s125_s24] sm:$0xf] (%p42_p3), %v146_v0  ;;  %149 = vst [vmem:[%s125_s24 + $0x4] sm:$0xf] (%p42_p3), %v148_v1 }
  0x15 PF: > { %p459_p6 = scmp.ge.s32.totalorder %s606_s13, 1  ;;  %p184_p7 = scmp.lt.s32.totalorder %s606_s13, 10 }
  0x17   : > { %p185_p8 = pnand %p459_p6, %p184_p7 }
  0x18   : > { %s191_s25 = sand.u32 (!%p185_p8), 1, %s590_s9   ;;  %s461_s26 = sshll.u32 (!%p185_p8), %s598_s11, 4 }
  0x19   : > { %188 = sbr.rel (%p185_p8) target bundleno = 299 (0x12b), region = 65  ;;  %s673_s27 = sshll.u32 (!%p185_p8), %s191_s25, 3 }
  0x1a   : > { %p219_p9 = scmp.lt.s32.totalorder (!%p185_p8), %s461_s26, 143  ;;  %s193_s4 = scalar_lea.vmem (!%p185_p8), [#allocation3], %s673_s27 }
  0x1b   : > { %p463_p10 = scmp.ne.s32.totalorder (!%p185_p8), %s598_s11, 0 }
  0x20   : > { %s721_s26 = smov (!%p219_p9, %s461_s26), 143  ;;  %234 = sbr.rel (%p463_p10) target bundleno = 39 (0x27), region = 73 }
  0x21   : > { %s462_s28 = sshll.u32 %s721_s26, 2  ;;  %v608_v2 = vmov (!%p463_p10), 0.0  }
  0x22   : > { %s678_s3 = scalar_lea.vmem %s712_s1, %s462_s28  ;;  %235 = vst [vmem:[#allocation2] sm:$0xff] (!%p463_p10), %v608_v2  ;;  %236 = vst [vmem:[#allocation2 + $0x8] sm:$0xff] (!%p463_p10), %v608_v2 }
  0x27 PF: > { %v559_v3 = vld [vmem:[%s678_s3] sm:$0xff]   ;;  %v609_v4 = vmov 0.0   ;;  %v560_v5 = vld [vmem:[%s678_s3 + $0x8] sm:$0xff]   ;;  %vm610_vm0 = vmmov 0   ;;  %v561_v6 = vld [vmem:[%s678_s3 + $0x10] sm:$0xff]   ;;  %p473_p11 = scmp.ne.s32.totalorder %s598_s11, 8 }
  0x28   : > { %496 = vmatprep.subr.bf16.mxu0 %v609_v4  ;;  %512 = vmatprep.mubr.msk.bf16.mxu0 %vm610_vm0, %v609_v4  ;;  %v562_v7 = vld [vmem:[%s678_s3 + $0x18] sm:$0xff]   ;;  %v563_v8 = vld [vmem:[%s678_s3 + $0x20] sm:$0xff]   ;;  %v564_v9 = vld [vmem:[%s678_s3 + $0x28] sm:$0xff]  }
  0x29   : > { %497 = vmatpush3.bf16.msra.mxu0 %v559_v3  ;;  %v565_v10 = vld [vmem:[%s678_s3 + $0x30] sm:$0xff]   ;;  %v566_v11 = vld [vmem:[%s678_s3 + $0x38] sm:$0xff]   ;;  %v239_v13 = vld [vmem:[#allocation2] sm:$0xff] }
  0x2a   : > { %498 = vmatprep.subr.bf16.mxu0 %v609_v4  ;;  %v567_v12 = vld [vmem:[%s193_s4] sm:$0xff]   ;;  %v240_v15 = vld [vmem:[#allocation2 + $0x8] sm:$0xff] }
  0x2d   : > { %499 = vmatpush3.bf16.msra.mxu0 %v560_v5 }
  0x2e   : > { %500 = vmatprep.subr.bf16.mxu0 %v609_v4 }
  0x31   : > { %501 = vmatpush3.bf16.msra.mxu0 %v561_v6 }
  0x32   : > { %502 = vmatprep.subr.bf16.mxu0 %v609_v4 }
  0x35   : > { %503 = vmatpush3.bf16.msra.mxu0 %v562_v7 }
  0x36   : > { %504 = vmatprep.subr.bf16.mxu0 %v609_v4 }
  0x39   : > { %505 = vmatpush3.bf16.msra.mxu0 %v563_v8 }
  0x3a   : > { %506 = vmatprep.subr.bf16.mxu0 %v609_v4 }
  0x3d   : > { %507 = vmatpush3.bf16.msra.mxu0 %v564_v9 }
  0x3e   : > { %508 = vmatprep.subr.bf16.mxu0 %v609_v4 }
  0x41   : > { %509 = vmatpush3.bf16.msra.mxu0 %v565_v10 }
  0x42   : > { %510 = vmatprep.subr.bf16.mxu0 %v609_v4 }
  0x45   : > { %511 = vmatpush3.bf16.msra.mxu0 %v566_v11 }
  0x48   : > { %513 = vmatmul.mubr.bf16.vlgmr.msra.gmra.mrb[0].mxu0 %v567_v12 }
 0x11a   : > { %359 = sbr.rel (%p473_p11) target bundleno = 299 (0x12b), region = 77 }
 0x11b   : > { %v345_v14 = vpop.f32.mrb[0].mxu0 }
 0x11c   : > { %v352_v16 = vadd.f32 %v345_v14, %v239_v13  ;;  %v514_v17 = vpop.f32.mrb[1].mxu0 }
 0x11d   : > { %v348_v18 = vpop.f32.mrb[2].mxu0 }
 0x11e   : > { %354 = vst [vmem:[#allocation2] sm:$0xff] %v352_v16  ;;  %v353_v19 = vadd.f32 %v348_v18, %v240_v15  ;;  %v515_v20 = vpop.f32.mrb[3].mxu0 }
 0x120   : > { %355 = vst [vmem:[#allocation2 + $0x8] sm:$0xff] %v353_v19 }
 0x125   : > { %v360_v21 = vld [vmem:[#allocation2] sm:$0xff] }
 0x127   : > { %v361_v22 = vld [vmem:[#allocation2 + $0x8] sm:$0xff] }
 0x128   : > { %v485_v23 = vpack.c.bf16 %v361_v22, %v360_v21 }
 0x12a   : > { %486 = vst [vmem:[%s713_s2] sm:$0xff] %v485_v23  }
 0x12b PF: > { %s12_s13 = sadd.s32 1, %s606_s13   ;;  %s714_s9 = smov %s594_s10 }
 0x12c   : > { %p9_p12 = scmp.ge.s32.totalorder %s12_s13, 11   ;;  %s715_s10 = smov %s661_s17 }
 0x12d   : > { %s716_s11 = smov %s602_s12  ;;  %s717_s12 = smov %s719_s14 }
 0x12e   :  { %11 = sbr.rel (!%p9_p12) target bundleno = 3 (0x3), region = 115 }

// kernel: densenet121_forward.163
= control target key start
LH: loop header
LB: loop body
LE: loop exit
PB: predicated region body
PF: predicated region fallthrough
CT: control target
= control target key end

     0   :  { %s843_s21 = smov 0   ;;  %s845_s22 = smov 0   ;;  %s949_s0 = inlined_call_operand.vmem [shape: bf16[16,384], index: 0, kind: input, shape index: {}]   ;;  %s950_s1 = inlined_call_operand.vmem [shape: bf16[384,128], index: 1, kind: input, shape index: {}]   ;;  %s951_s2 = inlined_call_operand.vmem [shape: f32[1,384], index: 2, kind: input, shape index: {}]   ;;  %s952_s3 = inlined_call_operand.vmem [shape: f32[1,384], index: 3, kind: input, shape index: {}]   ;;  %s953_s4 = inlined_call_operand.vmem [shape: f32[1,128], index: 4, kind: input, shape index: {}]   ;;  %s954_s5 = inlined_call_operand.vmem [shape: f32[1,128], index: 5, kind: input, shape index: {}]   ;;  %s955_s6 = inlined_call_operand.vmem [shape: bf16[16,128], index: 6, kind: output, shape index: {}]  }
   0x1   :  { %s847_s23 = smov 0   ;;  %s849_s24 = smov 0  }
   0x2   :  { %s851_s25 = smov 0  }
   0x3 LB: > { %s25_s26 = sadd.s32 1, %s799_s24  ;;  %p44_p1 = scmp.ne.s32.totalorder %s791_s22, %s787_s21  ;;  %s803_s25 = sphi %s851_s25, %s16_s25   ;;  %s799_s24 = sphi %s849_s24, %s959_s24   ;;  %s795_s23 = sphi %s847_s23, %s958_s23   ;;  %s791_s22 = sphi %s845_s22, %s957_s22   ;;  %s787_s21 = sphi %s843_s21, %s956_s21  }
   0x4   : > { %p26_p0 = scmp.ge.s32.totalorder %s25_s26, 3  ;;  %p45_p2 = scmp.eq.s32.totalorder %s803_s25, 0 }
   0x5   : > { %s37_s28 = sadd.s32 1, %s791_s22  ;;  %p647_p5 = scmp.ge.s32.totalorder %s803_s25, 3 }
   0x6   : > { %s961_s26 = smov (%p26_p0, %s25_s26), 0  ;;  %p46_p3 = por %p45_p2, %p44_p1 }
   0x7   : > { %s33_s27 = ssub.s32 %s799_s24, %s961_s26  ;;  %222 = sbr.rel (%p647_p5) target bundleno = 21 (0x15), region = 24 }
   0x8   : > { %p35_p4 = scmp.eq.s32.totalorder %s33_s27, 0 }
   0xa   : > { %s878_s29 = scalar_select %p35_p4, %s791_s22, %s37_s28  }
   0xe   : > { %225 = sbr.rel (!%p46_p3) target bundleno = 21 (0x15), region = 28  ;;  %s227_s30 = sand.u32 (%p46_p3), 1, %s791_s22  }
   0xf   : > { %s649_s7 = sshll.u32 (%p46_p3), %s799_s24, 2  ;;  %s648_s8 = sshll.u32 (%p46_p3), %s227_s30, 3 }
  0x10   : > { %s234_s11 = scalar_lea.vmem (%p46_p3), %s949_s0, %s649_s7  ;;  %s229_s12 = scalar_lea.vmem (%p46_p3), [#allocation3], %s648_s8 }
  0x11   : > { %v250_v0 = vld [vmem:[%s234_s11] sm:$0xf] (%p46_p3)  ;;  %v252_v1 = vld [vmem:[%s234_s11 + $0xc] sm:$0xf] (%p46_p3) }
  0x12   : > { %251 = vst [vmem:[%s229_s12] sm:$0xf] (%p46_p3), %v250_v0  ;;  %253 = vst [vmem:[%s229_s12 + $0x4] sm:$0xf] (%p46_p3), %v252_v1 }
  0x15 PF: > { %p650_p6 = scmp.ge.s32.totalorder %s803_s25, 1  ;;  %p300_p7 = scmp.lt.s32.totalorder %s803_s25, 4 }
  0x17   : > { %p301_p8 = pnand %p650_p6, %p300_p7 }
  0x18   : > { %s307_s13 = sand.u32 (!%p301_p8), 1, %s787_s21   ;;  %s652_s14 = sshll.u32 (!%p301_p8), %s795_s23, 4 }
  0x19   : > { %304 = sbr.rel (%p301_p8) target bundleno = 305 (0x131), region = 81  ;;  %s890_s15 = sshll.u32 (!%p301_p8), %s307_s13, 3 }
  0x1a   : > { %p349_p9 = scmp.lt.s32.totalorder (!%p301_p8), %s652_s14, 47  ;;  %p354_p10 = scmp.lt.s32.totalorder (!%p301_p8), %s795_s23, 2 }
  0x1b   : > { %s309_s9 = scalar_lea.vmem (!%p301_p8), [#allocation3], %s890_s15  ;;  %p654_p11 = scmp.ne.s32.totalorder (!%p301_p8), %s795_s23, 0 }
  0x20   : > { %s963_s14 = smov (!%p349_p9, %s652_s14), 47  ;;  %370 = sbr.rel (%p654_p11) target bundleno = 39 (0x27), region = 89 }
  0x21   : > { %s894_s16 = scalar_select %p354_p10, %s795_s23, 2 }
  0x22   : > { %s653_s17 = sshll.u32 %s963_s14, 2  ;;  %v805_v2 = vmov (!%p654_p11), 0.0  }
  0x23   : > { %s899_s20 = scalar_lea.vmem %s950_s1, %s653_s17  ;;  %s356_s21 = scalar_lea.vmem %s951_s2, %s894_s16  ;;  %371 = vst [vmem:[#allocation2] sm:$0xff] (!%p654_p11), %v805_v2  ;;  %372 = vst [vmem:[#allocation2 + $0x8] sm:$0xff] (!%p654_p11), %v805_v2 }
  0x24   : > { %s359_s8 = scalar_lea.vmem %s952_s3, %s894_s16 }
  0x27 PF: > { %v757_v3 = vld [vmem:[%s899_s20] sm:$0xff]   ;;  %v806_v4 = vmov 0.0   ;;  %v758_v5 = vld [vmem:[%s899_s20 + $0x8] sm:$0xff]   ;;  %vm807_vm0 = vmmov 0   ;;  %v759_v6 = vld [vmem:[%s899_s20 + $0x10] sm:$0xff]   ;;  %p665_p12 = scmp.ne.s32.totalorder %s795_s23, 2 }
  0x28   : > { %694 = vmatprep.subr.bf16.mxu0 %v806_v4  ;;  %710 = vmatprep.mubr.msk.bf16.mxu0 %vm807_vm0, %v806_v4  ;;  %v760_v7 = vld [vmem:[%s899_s20 + $0x18] sm:$0xff]   ;;  %v761_v11 = vld [vmem:[%s899_s20 + $0x20] sm:$0xff]   ;;  %v762_v15 = vld [vmem:[%s899_s20 + $0x28] sm:$0xff]  }
  0x29   : > { %695 = vmatpush3.bf16.msra.mxu0 %v757_v3  ;;  %v677_v8 = vld [vmem:[%s309_s9] sm:$0xff]   ;;  %v655_v12 = vld [vmem:[%s356_s21] ss:$0 sm:$0xff] }
  0x2a   : > { %696 = vmatprep.subr.bf16.mxu0 %v806_v4  ;;  %v678_v9 = vunpack.c.l.bf16 %v677_v8  ;;  %v679_v10 = vunpack.c.h.bf16 %v677_v8  ;;  %v656_v16 = vld [vmem:[%s359_s8] ss:$0 sm:$0xff]  ;;  %v763_v19 = vld [vmem:[%s899_s20 + $0x30] sm:$0xff]   ;;  %v764_v22 = vld [vmem:[%s899_s20 + $0x38] sm:$0xff]  }
  0x2b   : > { %v398_v24 = vld [vmem:[#allocation2] sm:$0xff]  ;;  %v399_v26 = vld [vmem:[#allocation2 + $0x8] sm:$0xff] }
  0x2c   : > { %v384_v13 = vmul.f32 %v678_v9, %v655_v12  ;;  %v385_v14 = vmul.f32 %v679_v10, %v655_v12  ;;  %v666_v34 = vld [vmem:[%s953_s4] ss:$0 sm:$0xff] (!%p665_p12) }
  0x2d   : > { %697 = vmatpush3.bf16.msra.mxu0 %v758_v5  ;;  %v667_v37 = vld [vmem:[%s954_s5] ss:$0 sm:$0xff] (!%p665_p12) }
  0x2e   : > { %698 = vmatprep.subr.bf16.mxu0 %v806_v4  ;;  %v393_v17 = vadd.f32 %v656_v16, %v384_v13  ;;  %v394_v18 = vadd.f32 %v656_v16, %v385_v14 }
  0x30   : > { %v395_v20 = vmax.f32 %v393_v17, 0.0  ;;  %v396_v21 = vmax.f32 %v394_v18, 0.0 }
  0x31   : > { %699 = vmatpush3.bf16.msra.mxu0 %v759_v6 }
  0x32   : > { %700 = vmatprep.subr.bf16.mxu0 %v806_v4  ;;  %v397_v23 = vpack.c.bf16 %v396_v21, %v395_v20 }
  0x35   : > { %701 = vmatpush3.bf16.msra.mxu0 %v760_v7 }
  0x36   : > { %702 = vmatprep.subr.bf16.mxu0 %v806_v4 }
  0x39   : > { %703 = vmatpush3.bf16.msra.mxu0 %v761_v11 }
  0x3a   : > { %704 = vmatprep.subr.bf16.mxu0 %v806_v4 }
  0x3d   : > { %705 = vmatpush3.bf16.msra.mxu0 %v762_v15 }
  0x3e   : > { %706 = vmatprep.subr.bf16.mxu0 %v806_v4 }
  0x41   : > { %707 = vmatpush3.bf16.msra.mxu0 %v763_v19 }
  0x42   : > { %708 = vmatprep.subr.bf16.mxu0 %v806_v4 }
  0x45   : > { %709 = vmatpush3.bf16.msra.mxu0 %v764_v22 }
  0x48   : > { %711 = vmatmul.mubr.bf16.vlgmr.msra.gmra.mrb[0].mxu0 %v397_v23 }
 0x11a   : > { %512 = sbr.rel (%p665_p12) target bundleno = 305 (0x131), region = 93 }
 0x11b   : > { %v498_v25 = vpop.f32.mrb[0].mxu0 }
 0x11c   : > { %v505_v27 = vadd.f32 %v498_v25, %v398_v24  ;;  %v712_v28 = vpop.f32.mrb[1].mxu0 }
 0x11d   : > { %v501_v29 = vpop.f32.mrb[2].mxu0 }
 0x11e   : > { %507 = vst [vmem:[#allocation2] sm:$0xff] %v505_v27  ;;  %v506_v30 = vadd.f32 %v501_v29, %v399_v26  ;;  %v713_v31 = vpop.f32.mrb[3].mxu0 }
 0x120   : > { %508 = vst [vmem:[#allocation2 + $0x8] sm:$0xff] %v506_v30 }
 0x125   : > { %v513_v32 = vld [vmem:[#allocation2] sm:$0xff] }
 0x126   : > { %v522_v35 = vmul.f32 %v666_v34, %v513_v32 }
 0x127   : > { %v514_v33 = vld [vmem:[#allocation2 + $0x8] sm:$0xff] }
 0x128   : > { %v523_v36 = vmul.f32 %v666_v34, %v514_v33  ;;  %v531_v38 = vadd.f32 %v667_v37, %v522_v35 }
 0x12a   : > { %v532_v39 = vadd.f32 %v667_v37, %v523_v36  ;;  %v533_v40 = vmax.f32 %v531_v38, 0.0 }
 0x12c   : > { %v534_v41 = vmax.f32 %v532_v39, 0.0 }
 0x12e   : > { %v683_v42 = vpack.c.bf16 %v534_v41, %v533_v40 }
 0x130   : > { %684 = vst [vmem:[%s955_s6] sm:$0xff] %v683_v42  }
 0x131 PF: > { %s16_s25 = sadd.s32 1, %s803_s25   ;;  %s956_s21 = smov %s791_s22 }
 0x132   : > { %p13_p13 = scmp.ge.s32.totalorder %s16_s25, 5   ;;  %s957_s22 = smov %s878_s29 }
 0x133   : > { %s958_s23 = smov %s799_s24  ;;  %s959_s24 = smov %s961_s26 }
 0x134   :  { %15 = sbr.rel (!%p13_p13) target bundleno = 3 (0x3), region = 137 }

// kernel: densenet121_forward.171
= control target key start
LH: loop header
LB: loop body
LE: loop exit
PB: predicated region body
PF: predicated region fallthrough
CT: control target
= control target key end

     0   :  { %s843_s21 = smov 0   ;;  %s845_s22 = smov 0   ;;  %s949_s0 = inlined_call_operand.vmem [shape: bf16[16,512], index: 0, kind: input, shape index: {}]   ;;  %s950_s1 = inlined_call_operand.vmem [shape: bf16[512,128], index: 1, kind: input, shape index: {}]   ;;  %s951_s2 = inlined_call_operand.vmem [shape: f32[1,512], index: 2, kind: input, shape index: {}]   ;;  %s952_s3 = inlined_call_operand.vmem [shape: f32[1,512], index: 3, kind: input, shape index: {}]   ;;  %s953_s4 = inlined_call_operand.vmem [shape: f32[1,128], index: 4, kind: input, shape index: {}]   ;;  %s954_s5 = inlined_call_operand.vmem [shape: f32[1,128], index: 5, kind: input, shape index: {}]   ;;  %s955_s6 = inlined_call_operand.vmem [shape: bf16[16,128], index: 6, kind: output, shape index: {}]  }
   0x1   :  { %s847_s23 = smov 0   ;;  %s849_s24 = smov 0  }
   0x2   :  { %s851_s25 = smov 0  }
   0x3 LB: > { %s25_s26 = sadd.s32 1, %s799_s24  ;;  %p44_p1 = scmp.ne.s32.totalorder %s791_s22, %s787_s21  ;;  %s803_s25 = sphi %s851_s25, %s16_s25   ;;  %s799_s24 = sphi %s849_s24, %s959_s24   ;;  %s795_s23 = sphi %s847_s23, %s958_s23   ;;  %s791_s22 = sphi %s845_s22, %s957_s22   ;;  %s787_s21 = sphi %s843_s21, %s956_s21  }
   0x4   : > { %p26_p0 = scmp.ge.s32.totalorder %s25_s26, 4  ;;  %p45_p2 = scmp.eq.s32.totalorder %s803_s25, 0 }
   0x5   : > { %s37_s28 = sadd.s32 1, %s791_s22  ;;  %p647_p5 = scmp.ge.s32.totalorder %s803_s25, 4 }
   0x6   : > { %s961_s26 = smov (%p26_p0, %s25_s26), 0  ;;  %p46_p3 = por %p45_p2, %p44_p1 }
   0x7   : > { %s33_s27 = ssub.s32 %s799_s24, %s961_s26  ;;  %222 = sbr.rel (%p647_p5) target bundleno = 21 (0x15), region = 24 }
   0x8   : > { %p35_p4 = scmp.eq.s32.totalorder %s33_s27, 0 }
   0xa   : > { %s878_s29 = scalar_select %p35_p4, %s791_s22, %s37_s28  }
   0xe   : > { %225 = sbr.rel (!%p46_p3) target bundleno = 21 (0x15), region = 28  ;;  %s227_s30 = sand.u32 (%p46_p3), 1, %s791_s22  }
   0xf   : > { %s649_s7 = sshll.u32 (%p46_p3), %s799_s24, 2  ;;  %s648_s8 = sshll.u32 (%p46_p3), %s227_s30, 3 }
  0x10   : > { %s234_s11 = scalar_lea.vmem (%p46_p3), %s949_s0, %s649_s7  ;;  %s229_s12 = scalar_lea.vmem (%p46_p3), [#allocation3], %s648_s8 }
  0x11   : > { %v250_v0 = vld [vmem:[%s234_s11] sm:$0xf] (%p46_p3)  ;;  %v252_v1 = vld [vmem:[%s234_s11 + $0x10] sm:$0xf] (%p46_p3) }
  0x12   : > { %251 = vst [vmem:[%s229_s12] sm:$0xf] (%p46_p3), %v250_v0  ;;  %253 = vst [vmem:[%s229_s12 + $0x4] sm:$0xf] (%p46_p3), %v252_v1 }
  0x15 PF: > { %p650_p6 = scmp.ge.s32.totalorder %s803_s25, 1  ;;  %p300_p7 = scmp.lt.s32.totalorder %s803_s25, 5 }
  0x17   : > { %p301_p8 = pnand %p650_p6, %p300_p7 }
  0x18   : > { %s307_s13 = sand.u32 (!%p301_p8), 1, %s787_s21   ;;  %s652_s14 = sshll.u32 (!%p301_p8), %s795_s23, 4 }
  0x19   : > { %304 = sbr.rel (%p301_p8) target bundleno = 305 (0x131), region = 81  ;;  %s890_s15 = sshll.u32 (!%p301_p8), %s307_s13, 3 }
  0x1a   : > { %p349_p9 = scmp.lt.s32.totalorder (!%p301_p8), %s652_s14, 63  ;;  %p354_p10 = scmp.lt.s32.totalorder (!%p301_p8), %s795_s23, 3 }
  0x1b   : > { %s309_s9 = scalar_lea.vmem (!%p301_p8), [#allocation3], %s890_s15  ;;  %p654_p11 = scmp.ne.s32.totalorder (!%p301_p8), %s795_s23, 0 }
  0x20   : > { %s963_s14 = smov (!%p349_p9, %s652_s14), 63  ;;  %370 = sbr.rel (%p654_p11) target bundleno = 39 (0x27), region = 89 }
  0x21   : > { %s894_s16 = scalar_select %p354_p10, %s795_s23, 3 }
  0x22   : > { %s653_s17 = sshll.u32 %s963_s14, 2  ;;  %v805_v2 = vmov (!%p654_p11), 0.0  }
  0x23   : > { %s899_s20 = scalar_lea.vmem %s950_s1, %s653_s17  ;;  %s356_s21 = scalar_lea.vmem %s951_s2, %s894_s16  ;;  %371 = vst [vmem:[#allocation2] sm:$0xff] (!%p654_p11), %v805_v2  ;;  %372 = vst [vmem:[#allocation2 + $0x8] sm:$0xff] (!%p654_p11), %v805_v2 }
  0x24   : > { %s359_s8 = scalar_lea.vmem %s952_s3, %s894_s16 }
  0x27 PF: > { %v757_v3 = vld [vmem:[%s899_s20] sm:$0xff]   ;;  %v806_v4 = vmov 0.0   ;;  %v758_v5 = vld [vmem:[%s899_s20 + $0x8] sm:$0xff]   ;;  %vm807_vm0 = vmmov 0   ;;  %v759_v6 = vld [vmem:[%s899_s20 + $0x10] sm:$0xff]   ;;  %p665_p12 = scmp.ne.s32.totalorder %s795_s23, 3 }
  0x28   : > { %694 = vmatprep.subr.bf16.mxu0 %v806_v4  ;;  %710 = vmatprep.mubr.msk.bf16.mxu0 %vm807_vm0, %v806_v4  ;;  %v760_v7 = vld [vmem:[%s899_s20 + $0x18] sm:$0xff]   ;;  %v761_v11 = vld [vmem:[%s899_s20 + $0x20] sm:$0xff]   ;;  %v762_v15 = vld [vmem:[%s899_s20 + $0x28] sm:$0xff]  }
  0x29   : > { %695 = vmatpush3.bf16.msra.mxu0 %v757_v3  ;;  %v677_v8 = vld [vmem:[%s309_s9] sm:$0xff]   ;;  %v655_v12 = vld [vmem:[%s356_s21] ss:$0 sm:$0xff] }
  0x2a   : > { %696 = vmatprep.subr.bf16.mxu0 %v806_v4  ;;  %v678_v9 = vunpack.c.l.bf16 %v677_v8  ;;  %v679_v10 = vunpack.c.h.bf16 %v677_v8  ;;  %v656_v16 = vld [vmem:[%s359_s8] ss:$0 sm:$0xff]  ;;  %v763_v19 = vld [vmem:[%s899_s20 + $0x30] sm:$0xff]   ;;  %v764_v22 = vld [vmem:[%s899_s20 + $0x38] sm:$0xff]  }
  0x2b   : > { %v398_v24 = vld [vmem:[#allocation2] sm:$0xff]  ;;  %v399_v26 = vld [vmem:[#allocation2 + $0x8] sm:$0xff] }
  0x2c   : > { %v384_v13 = vmul.f32 %v678_v9, %v655_v12  ;;  %v385_v14 = vmul.f32 %v679_v10, %v655_v12  ;;  %v666_v34 = vld [vmem:[%s953_s4] ss:$0 sm:$0xff] (!%p665_p12) }
  0x2d   : > { %697 = vmatpush3.bf16.msra.mxu0 %v758_v5  ;;  %v667_v37 = vld [vmem:[%s954_s5] ss:$0 sm:$0xff] (!%p665_p12) }
  0x2e   : > { %698 = vmatprep.subr.bf16.mxu0 %v806_v4  ;;  %v393_v17 = vadd.f32 %v656_v16, %v384_v13  ;;  %v394_v18 = vadd.f32 %v656_v16, %v385_v14 }
  0x30   : > { %v395_v20 = vmax.f32 %v393_v17, 0.0  ;;  %v396_v21 = vmax.f32 %v394_v18, 0.0 }
  0x31   : > { %699 = vmatpush3.bf16.msra.mxu0 %v759_v6 }
  0x32   : > { %700 = vmatprep.subr.bf16.mxu0 %v806_v4  ;;  %v397_v23 = vpack.c.bf16 %v396_v21, %v395_v20 }
  0x35   : > { %701 = vmatpush3.bf16.msra.mxu0 %v760_v7 }
  0x36   : > { %702 = vmatprep.subr.bf16.mxu0 %v806_v4 }
  0x39   : > { %703 = vmatpush3.bf16.msra.mxu0 %v761_v11 }
  0x3a   : > { %704 = vmatprep.subr.bf16.mxu0 %v806_v4 }
  0x3d   : > { %705 = vmatpush3.bf16.msra.mxu0 %v762_v15 }
  0x3e   : > { %706 = vmatprep.subr.bf16.mxu0 %v806_v4 }
  0x41   : > { %707 = vmatpush3.bf16.msra.mxu0 %v763_v19 }
  0x42   : > { %708 = vmatprep.subr.bf16.mxu0 %v806_v4 }
  0x45   : > { %709 = vmatpush3.bf16.msra.mxu0 %v764_v22 }
  0x48   : > { %711 = vmatmul.mubr.bf16.vlgmr.msra.gmra.mrb[0].mxu0 %v397_v23 }
 0x11a   : > { %512 = sbr.rel (%p665_p12) target bundleno = 305 (0x131), region = 93 }
 0x11b   : > { %v498_v25 = vpop.f32.mrb[0].mxu0 }
 0x11c   : > { %v505_v27 = vadd.f32 %v498_v25, %v398_v24  ;;  %v712_v28 = vpop.f32.mrb[1].mxu0 }
 0x11d   : > { %v501_v29 = vpop.f32.mrb[2].mxu0 }
 0x11e   : > { %507 = vst [vmem:[#allocation2] sm:$0xff] %v505_v27  ;;  %v506_v30 = vadd.f32 %v501_v29, %v399_v26  ;;  %v713_v31 = vpop.f32.mrb[3].mxu0 }
 0x120   : > { %508 = vst [vmem:[#allocation2 + $0x8] sm:$0xff] %v506_v30 }
 0x125   : > { %v513_v32 = vld [vmem:[#allocation2] sm:$0xff] }
 0x126   : > { %v522_v35 = vmul.f32 %v666_v34, %v513_v32 }
 0x127   : > { %v514_v33 = vld [vmem:[#allocation2 + $0x8] sm:$0xff] }
 0x128   : > { %v523_v36 = vmul.f32 %v666_v34, %v514_v33  ;;  %v531_v38 = vadd.f32 %v667_v37, %v522_v35 }
 0x12a   : > { %v532_v39 = vadd.f32 %v667_v37, %v523_v36  ;;  %v533_v40 = vmax.f32 %v531_v38, 0.0 }
 0x12c   : > { %v534_v41 = vmax.f32 %v532_v39, 0.0 }
 0x12e   : > { %v683_v42 = vpack.c.bf16 %v534_v41, %v533_v40 }
 0x130   : > { %684 = vst [vmem:[%s955_s6] sm:$0xff] %v683_v42  }
 0x131 PF: > { %s16_s25 = sadd.s32 1, %s803_s25   ;;  %s956_s21 = smov %s791_s22 }
 0x132   : > { %p13_p13 = scmp.ge.s32.totalorder %s16_s25, 6   ;;  %s957_s22 = smov %s878_s29 }
 0x133   : > { %s958_s23 = smov %s799_s24  ;;  %s959_s24 = smov %s961_s26 }
 0x134   :  { %15 = sbr.rel (!%p13_p13) target bundleno = 3 (0x3), region = 137 }

// kernel: densenet121_forward.179
= control target key start
LH: loop header
LB: loop body
LE: loop exit
PB: predicated region body
PF: predicated region fallthrough
CT: control target
= control target key end

     0   :  { %s843_s21 = smov 0   ;;  %s845_s22 = smov 0   ;;  %s949_s0 = inlined_call_operand.vmem [shape: bf16[16,640], index: 0, kind: input, shape index: {}]   ;;  %s950_s1 = inlined_call_operand.vmem [shape: bf16[640,128], index: 1, kind: input, shape index: {}]   ;;  %s951_s2 = inlined_call_operand.vmem [shape: f32[1,640], index: 2, kind: input, shape index: {}]   ;;  %s952_s3 = inlined_call_operand.vmem [shape: f32[1,640], index: 3, kind: input, shape index: {}]   ;;  %s953_s4 = inlined_call_operand.vmem [shape: f32[1,128], index: 4, kind: input, shape index: {}]   ;;  %s954_s5 = inlined_call_operand.vmem [shape: f32[1,128], index: 5, kind: input, shape index: {}]   ;;  %s955_s6 = inlined_call_operand.vmem [shape: bf16[16,128], index: 6, kind: output, shape index: {}]  }
   0x1   :  { %s847_s23 = smov 0   ;;  %s849_s24 = smov 0  }
   0x2   :  { %s851_s25 = smov 0  }
   0x3 LB: > { %s25_s26 = sadd.s32 1, %s799_s24  ;;  %p44_p1 = scmp.ne.s32.totalorder %s791_s22, %s787_s21  ;;  %s803_s25 = sphi %s851_s25, %s16_s25   ;;  %s799_s24 = sphi %s849_s24, %s959_s24   ;;  %s795_s23 = sphi %s847_s23, %s958_s23   ;;  %s791_s22 = sphi %s845_s22, %s957_s22   ;;  %s787_s21 = sphi %s843_s21, %s956_s21  }
   0x4   : > { %p26_p0 = scmp.ge.s32.totalorder %s25_s26, 5  ;;  %p45_p2 = scmp.eq.s32.totalorder %s803_s25, 0 }
   0x5   : > { %s37_s28 = sadd.s32 1, %s791_s22  ;;  %p647_p5 = scmp.ge.s32.totalorder %s803_s25, 5 }
   0x6   : > { %s961_s26 = smov (%p26_p0, %s25_s26), 0  ;;  %p46_p3 = por %p45_p2, %p44_p1 }
   0x7   : > { %s33_s27 = ssub.s32 %s799_s24, %s961_s26  ;;  %222 = sbr.rel (%p647_p5) target bundleno = 21 (0x15), region = 24 }
   0x8   : > { %p35_p4 = scmp.eq.s32.totalorder %s33_s27, 0 }
   0xa   : > { %s878_s29 = scalar_select %p35_p4, %s791_s22, %s37_s28  }
   0xe   : > { %225 = sbr.rel (!%p46_p3) target bundleno = 21 (0x15), region = 28  ;;  %s227_s30 = sand.u32 (%p46_p3), 1, %s791_s22  }
   0xf   : > { %s649_s7 = sshll.u32 (%p46_p3), %s799_s24, 2  ;;  %s648_s8 = sshll.u32 (%p46_p3), %s227_s30, 3 }
  0x10   : > { %s234_s11 = scalar_lea.vmem (%p46_p3), %s949_s0, %s649_s7  ;;  %s229_s12 = scalar_lea.vmem (%p46_p3), [#allocation3], %s648_s8 }
  0x11   : > { %v250_v0 = vld [vmem:[%s234_s11] sm:$0xf] (%p46_p3)  ;;  %v252_v1 = vld [vmem:[%s234_s11 + $0x14] sm:$0xf] (%p46_p3) }
  0x12   : > { %251 = vst [vmem:[%s229_s12] sm:$0xf] (%p46_p3), %v250_v0  ;;  %253 = vst [vmem:[%s229_s12 + $0x4] sm:$0xf] (%p46_p3), %v252_v1 }
  0x15 PF: > { %p650_p6 = scmp.ge.s32.totalorder %s803_s25, 1  ;;  %p300_p7 = scmp.lt.s32.totalorder %s803_s25, 6 }
  0x17   : > { %p301_p8 = pnand %p650_p6, %p300_p7 }
  0x18   : > { %s307_s13 = sand.u32 (!%p301_p8), 1, %s787_s21   ;;  %s652_s14 = sshll.u32 (!%p301_p8), %s795_s23, 4 }
  0x19   : > { %304 = sbr.rel (%p301_p8) target bundleno = 305 (0x131), region = 81  ;;  %s890_s15 = sshll.u32 (!%p301_p8), %s307_s13, 3 }
  0x1a   : > { %p349_p9 = scmp.lt.s32.totalorder (!%p301_p8), %s652_s14, 79  ;;  %p354_p10 = scmp.lt.s32.totalorder (!%p301_p8), %s795_s23, 4 }
  0x1b   : > { %s309_s9 = scalar_lea.vmem (!%p301_p8), [#allocation3], %s890_s15  ;;  %p654_p11 = scmp.ne.s32.totalorder (!%p301_p8), %s795_s23, 0 }
  0x20   : > { %s963_s14 = smov (!%p349_p9, %s652_s14), 79  ;;  %370 = sbr.rel (%p654_p11) target bundleno = 39 (0x27), region = 89 }
  0x21   : > { %s894_s16 = scalar_select %p354_p10, %s795_s23, 4 }
  0x22   : > { %s653_s17 = sshll.u32 %s963_s14, 2  ;;  %v805_v2 = vmov (!%p654_p11), 0.0  }
  0x23   : > { %s899_s20 = scalar_lea.vmem %s950_s1, %s653_s17  ;;  %s356_s21 = scalar_lea.vmem %s951_s2, %s894_s16  ;;  %371 = vst [vmem:[#allocation2] sm:$0xff] (!%p654_p11), %v805_v2  ;;  %372 = vst [vmem:[#allocation2 + $0x8] sm:$0xff] (!%p654_p11), %v805_v2 }
  0x24   : > { %s359_s8 = scalar_lea.vmem %s952_s3, %s894_s16 }
  0x27 PF: > { %v757_v3 = vld [vmem:[%s899_s20] sm:$0xff]   ;;  %v806_v4 = vmov 0.0   ;;  %v758_v5 = vld [vmem:[%s899_s20 + $0x8] sm:$0xff]   ;;  %vm807_vm0 = vmmov 0   ;;  %v759_v6 = vld [vmem:[%s899_s20 + $0x10] sm:$0xff]   ;;  %p665_p12 = scmp.ne.s32.totalorder %s795_s23, 4 }
  0x28   : > { %694 = vmatprep.subr.bf16.mxu0 %v806_v4  ;;  %710 = vmatprep.mubr.msk.bf16.mxu0 %vm807_vm0, %v806_v4  ;;  %v760_v7 = vld [vmem:[%s899_s20 + $0x18] sm:$0xff]   ;;  %v761_v11 = vld [vmem:[%s899_s20 + $0x20] sm:$0xff]   ;;  %v762_v15 = vld [vmem:[%s899_s20 + $0x28] sm:$0xff]  }
  0x29   : > { %695 = vmatpush3.bf16.msra.mxu0 %v757_v3  ;;  %v677_v8 = vld [vmem:[%s309_s9] sm:$0xff]   ;;  %v655_v12 = vld [vmem:[%s356_s21] ss:$0 sm:$0xff] }
  0x2a   : > { %696 = vmatprep.subr.bf16.mxu0 %v806_v4  ;;  %v678_v9 = vunpack.c.l.bf16 %v677_v8  ;;  %v679_v10 = vunpack.c.h.bf16 %v677_v8  ;;  %v656_v16 = vld [vmem:[%s359_s8] ss:$0 sm:$0xff]  ;;  %v763_v19 = vld [vmem:[%s899_s20 + $0x30] sm:$0xff]   ;;  %v764_v22 = vld [vmem:[%s899_s20 + $0x38] sm:$0xff]  }
  0x2b   : > { %v398_v24 = vld [vmem:[#allocation2] sm:$0xff]  ;;  %v399_v26 = vld [vmem:[#allocation2 + $0x8] sm:$0xff] }
  0x2c   : > { %v384_v13 = vmul.f32 %v678_v9, %v655_v12  ;;  %v385_v14 = vmul.f32 %v679_v10, %v655_v12  ;;  %v666_v34 = vld [vmem:[%s953_s4] ss:$0 sm:$0xff] (!%p665_p12) }
  0x2d   : > { %697 = vmatpush3.bf16.msra.mxu0 %v758_v5  ;;  %v667_v37 = vld [vmem:[%s954_s5] ss:$0 sm:$0xff] (!%p665_p12) }
  0x2e   : > { %698 = vmatprep.subr.bf16.mxu0 %v806_v4  ;;  %v393_v17 = vadd.f32 %v656_v16, %v384_v13  ;;  %v394_v18 = vadd.f32 %v656_v16, %v385_v14 }
  0x30   : > { %v395_v20 = vmax.f32 %v393_v17, 0.0  ;;  %v396_v21 = vmax.f32 %v394_v18, 0.0 }
  0x31   : > { %699 = vmatpush3.bf16.msra.mxu0 %v759_v6 }
  0x32   : > { %700 = vmatprep.subr.bf16.mxu0 %v806_v4  ;;  %v397_v23 = vpack.c.bf16 %v396_v21, %v395_v20 }
  0x35   : > { %701 = vmatpush3.bf16.msra.mxu0 %v760_v7 }
  0x36   : > { %702 = vmatprep.subr.bf16.mxu0 %v806_v4 }
  0x39   : > { %703 = vmatpush3.bf16.msra.mxu0 %v761_v11 }
  0x3a   : > { %704 = vmatprep.subr.bf16.mxu0 %v806_v4 }
  0x3d   : > { %705 = vmatpush3.bf16.msra.mxu0 %v762_v15 }
  0x3e   : > { %706 = vmatprep.subr.bf16.mxu0 %v806_v4 }
  0x41   : > { %707 = vmatpush3.bf16.msra.mxu0 %v763_v19 }
  0x42   : > { %708 = vmatprep.subr.bf16.mxu0 %v806_v4 }
  0x45   : > { %709 = vmatpush3.bf16.msra.mxu0 %v764_v22 }
  0x48   : > { %711 = vmatmul.mubr.bf16.vlgmr.msra.gmra.mrb[0].mxu0 %v397_v23 }
 0x11a   : > { %512 = sbr.rel (%p665_p12) target bundleno = 305 (0x131), region = 93 }
 0x11b   : > { %v498_v25 = vpop.f32.mrb[0].mxu0 }
 0x11c   : > { %v505_v27 = vadd.f32 %v498_v25, %v398_v24  ;;  %v712_v28 = vpop.f32.mrb[1].mxu0 }
 0x11d   : > { %v501_v29 = vpop.f32.mrb[2].mxu0 }
 0x11e   : > { %507 = vst [vmem:[#allocation2] sm:$0xff] %v505_v27  ;;  %v506_v30 = vadd.f32 %v501_v29, %v399_v26  ;;  %v713_v31 = vpop.f32.mrb[3].mxu0 }
 0x120   : > { %508 = vst [vmem:[#allocation2 + $0x8] sm:$0xff] %v506_v30 }
 0x125   : > { %v513_v32 = vld [vmem:[#allocation2] sm:$0xff] }
 0x126   : > { %v522_v35 = vmul.f32 %v666_v34, %v513_v32 }
 0x127   : > { %v514_v33 = vld [vmem:[#allocation2 + $0x8] sm:$0xff] }
 0x128   : > { %v523_v36 = vmul.f32 %v666_v34, %v514_v33  ;;  %v531_v38 = vadd.f32 %v667_v37, %v522_v35 }
 0x12a   : > { %v532_v39 = vadd.f32 %v667_v37, %v523_v36  ;;  %v533_v40 = vmax.f32 %v531_v38, 0.0 }
 0x12c   : > { %v534_v41 = vmax.f32 %v532_v39, 0.0 }
 0x12e   : > { %v683_v42 = vpack.c.bf16 %v534_v41, %v533_v40 }
 0x130   : > { %684 = vst [vmem:[%s955_s6] sm:$0xff] %v683_v42  }
 0x131 PF: > { %s16_s25 = sadd.s32 1, %s803_s25   ;;  %s956_s21 = smov %s791_s22 }
 0x132   : > { %p13_p13 = scmp.ge.s32.totalorder %s16_s25, 7   ;;  %s957_s22 = smov %s878_s29 }
 0x133   : > { %s958_s23 = smov %s799_s24  ;;  %s959_s24 = smov %s961_s26 }
 0x134   :  { %15 = sbr.rel (!%p13_p13) target bundleno = 3 (0x3), region = 137 }

// kernel: densenet121_forward.187
= control target key start
LH: loop header
LB: loop body
LE: loop exit
PB: predicated region body
PF: predicated region fallthrough
CT: control target
= control target key end

     0   :  { %s843_s21 = smov 0   ;;  %s845_s22 = smov 0   ;;  %s949_s0 = inlined_call_operand.vmem [shape: bf16[16,768], index: 0, kind: input, shape index: {}]   ;;  %s950_s1 = inlined_call_operand.vmem [shape: bf16[768,128], index: 1, kind: input, shape index: {}]   ;;  %s951_s2 = inlined_call_operand.vmem [shape: f32[1,768], index: 2, kind: input, shape index: {}]   ;;  %s952_s3 = inlined_call_operand.vmem [shape: f32[1,768], index: 3, kind: input, shape index: {}]   ;;  %s953_s4 = inlined_call_operand.vmem [shape: f32[1,128], index: 4, kind: input, shape index: {}]   ;;  %s954_s5 = inlined_call_operand.vmem [shape: f32[1,128], index: 5, kind: input, shape index: {}]   ;;  %s955_s6 = inlined_call_operand.vmem [shape: bf16[16,128], index: 6, kind: output, shape index: {}]  }
   0x1   :  { %s847_s23 = smov 0   ;;  %s849_s24 = smov 0  }
   0x2   :  { %s851_s25 = smov 0  }
   0x3 LB: > { %s25_s26 = sadd.s32 1, %s799_s24  ;;  %p44_p1 = scmp.ne.s32.totalorder %s791_s22, %s787_s21  ;;  %s803_s25 = sphi %s851_s25, %s16_s25   ;;  %s799_s24 = sphi %s849_s24, %s959_s24   ;;  %s795_s23 = sphi %s847_s23, %s958_s23   ;;  %s791_s22 = sphi %s845_s22, %s957_s22   ;;  %s787_s21 = sphi %s843_s21, %s956_s21  }
   0x4   : > { %p26_p0 = scmp.ge.s32.totalorder %s25_s26, 6  ;;  %p45_p2 = scmp.eq.s32.totalorder %s803_s25, 0 }
   0x5   : > { %s37_s28 = sadd.s32 1, %s791_s22  ;;  %p647_p5 = scmp.ge.s32.totalorder %s803_s25, 6 }
   0x6   : > { %s961_s26 = smov (%p26_p0, %s25_s26), 0  ;;  %p46_p3 = por %p45_p2, %p44_p1 }
   0x7   : > { %s33_s27 = ssub.s32 %s799_s24, %s961_s26  ;;  %222 = sbr.rel (%p647_p5) target bundleno = 21 (0x15), region = 24 }
   0x8   : > { %p35_p4 = scmp.eq.s32.totalorder %s33_s27, 0 }
   0xa   : > { %s878_s29 = scalar_select %p35_p4, %s791_s22, %s37_s28  }
   0xe   : > { %225 = sbr.rel (!%p46_p3) target bundleno = 21 (0x15), region = 28  ;;  %s227_s30 = sand.u32 (%p46_p3), 1, %s791_s22  }
   0xf   : > { %s649_s7 = sshll.u32 (%p46_p3), %s799_s24, 2  ;;  %s648_s8 = sshll.u32 (%p46_p3), %s227_s30, 3 }
  0x10   : > { %s234_s11 = scalar_lea.vmem (%p46_p3), %s949_s0, %s649_s7  ;;  %s229_s12 = scalar_lea.vmem (%p46_p3), [#allocation3], %s648_s8 }
  0x11   : > { %v250_v0 = vld [vmem:[%s234_s11] sm:$0xf] (%p46_p3)  ;;  %v252_v1 = vld [vmem:[%s234_s11 + $0x18] sm:$0xf] (%p46_p3) }
  0x12   : > { %251 = vst [vmem:[%s229_s12] sm:$0xf] (%p46_p3), %v250_v0  ;;  %253 = vst [vmem:[%s229_s12 + $0x4] sm:$0xf] (%p46_p3), %v252_v1 }
  0x15 PF: > { %p650_p6 = scmp.ge.s32.totalorder %s803_s25, 1  ;;  %p300_p7 = scmp.lt.s32.totalorder %s803_s25, 7 }
  0x17   : > { %p301_p8 = pnand %p650_p6, %p300_p7 }
  0x18   : > { %s307_s13 = sand.u32 (!%p301_p8), 1, %s787_s21   ;;  %s652_s14 = sshll.u32 (!%p301_p8), %s795_s23, 4 }
  0x19   : > { %304 = sbr.rel (%p301_p8) target bundleno = 305 (0x131), region = 81  ;;  %s890_s15 = sshll.u32 (!%p301_p8), %s307_s13, 3 }
  0x1a   : > { %p349_p9 = scmp.lt.s32.totalorder (!%p301_p8), %s652_s14, 95  ;;  %p354_p10 = scmp.lt.s32.totalorder (!%p301_p8), %s795_s23, 5 }
  0x1b   : > { %s309_s9 = scalar_lea.vmem (!%p301_p8), [#allocation3], %s890_s15  ;;  %p654_p11 = scmp.ne.s32.totalorder (!%p301_p8), %s795_s23, 0 }
  0x20   : > { %s963_s14 = smov (!%p349_p9, %s652_s14), 95  ;;  %370 = sbr.rel (%p654_p11) target bundleno = 39 (0x27), region = 89 }
  0x21   : > { %s894_s16 = scalar_select %p354_p10, %s795_s23, 5 }
  0x22   : > { %s653_s17 = sshll.u32 %s963_s14, 2  ;;  %v805_v2 = vmov (!%p654_p11), 0.0  }
  0x23   : > { %s899_s20 = scalar_lea.vmem %s950_s1, %s653_s17  ;;  %s356_s21 = scalar_lea.vmem %s951_s2, %s894_s16  ;;  %371 = vst [vmem:[#allocation2] sm:$0xff] (!%p654_p11), %v805_v2  ;;  %372 = vst [vmem:[#allocation2 + $0x8] sm:$0xff] (!%p654_p11), %v805_v2 }
  0x24   : > { %s359_s8 = scalar_lea.vmem %s952_s3, %s894_s16 }
  0x27 PF: > { %v757_v3 = vld [vmem:[%s899_s20] sm:$0xff]   ;;  %v806_v4 = vmov 0.0   ;;  %v758_v5 = vld [vmem:[%s899_s20 + $0x8] sm:$0xff]   ;;  %vm807_vm0 = vmmov 0   ;;  %v759_v6 = vld [vmem:[%s899_s20 + $0x10] sm:$0xff]   ;;  %p665_p12 = scmp.ne.s32.totalorder %s795_s23, 5 }
  0x28   : > { %694 = vmatprep.subr.bf16.mxu0 %v806_v4  ;;  %710 = vmatprep.mubr.msk.bf16.mxu0 %vm807_vm0, %v806_v4  ;;  %v760_v7 = vld [vmem:[%s899_s20 + $0x18] sm:$0xff]   ;;  %v761_v11 = vld [vmem:[%s899_s20 + $0x20] sm:$0xff]   ;;  %v762_v15 = vld [vmem:[%s899_s20 + $0x28] sm:$0xff]  }
  0x29   : > { %695 = vmatpush3.bf16.msra.mxu0 %v757_v3  ;;  %v677_v8 = vld [vmem:[%s309_s9] sm:$0xff]   ;;  %v655_v12 = vld [vmem:[%s356_s21] ss:$0 sm:$0xff] }
  0x2a   : > { %696 = vmatprep.subr.bf16.mxu0 %v806_v4  ;;  %v678_v9 = vunpack.c.l.bf16 %v677_v8  ;;  %v679_v10 = vunpack.c.h.bf16 %v677_v8  ;;  %v656_v16 = vld [vmem:[%s359_s8] ss:$0 sm:$0xff]  ;;  %v763_v19 = vld [vmem:[%s899_s20 + $0x30] sm:$0xff]   ;;  %v764_v22 = vld [vmem:[%s899_s20 + $0x38] sm:$0xff]  }
  0x2b   : > { %v398_v24 = vld [vmem:[#allocation2] sm:$0xff]  ;;  %v399_v26 = vld [vmem:[#allocation2 + $0x8] sm:$0xff] }
  0x2c   : > { %v384_v13 = vmul.f32 %v678_v9, %v655_v12  ;;  %v385_v14 = vmul.f32 %v679_v10, %v655_v12  ;;  %v666_v34 = vld [vmem:[%s953_s4] ss:$0 sm:$0xff] (!%p665_p12) }
  0x2d   : > { %697 = vmatpush3.bf16.msra.mxu0 %v758_v5  ;;  %v667_v37 = vld [vmem:[%s954_s5] ss:$0 sm:$0xff] (!%p665_p12) }
  0x2e   : > { %698 = vmatprep.subr.bf16.mxu0 %v806_v4  ;;  %v393_v17 = vadd.f32 %v656_v16, %v384_v13  ;;  %v394_v18 = vadd.f32 %v656_v16, %v385_v14 }
  0x30   : > { %v395_v20 = vmax.f32 %v393_v17, 0.0  ;;  %v396_v21 = vmax.f32 %v394_v18, 0.0 }
  0x31   : > { %699 = vmatpush3.bf16.msra.mxu0 %v759_v6 }
  0x32   : > { %700 = vmatprep.subr.bf16.mxu0 %v806_v4  ;;  %v397_v23 = vpack.c.bf16 %v396_v21, %v395_v20 }
  0x35   : > { %701 = vmatpush3.bf16.msra.mxu0 %v760_v7 }
  0x36   : > { %702 = vmatprep.subr.bf16.mxu0 %v806_v4 }
  0x39   : > { %703 = vmatpush3.bf16.msra.mxu0 %v761_v11 }
  0x3a   : > { %704 = vmatprep.subr.bf16.mxu0 %v806_v4 }
  0x3d   : > { %705 = vmatpush3.bf16.msra.mxu0 %v762_v15 }
  0x3e   : > { %706 = vmatprep.subr.bf16.mxu0 %v806_v4 }
  0x41   : > { %707 = vmatpush3.bf16.msra.mxu0 %v763_v19 }
  0x42   : > { %708 = vmatprep.subr.bf16.mxu0 %v806_v4 }
  0x45   : > { %709 = vmatpush3.bf16.msra.mxu0 %v764_v22 }
  0x48   : > { %711 = vmatmul.mubr.bf16.vlgmr.msra.gmra.mrb[0].mxu0 %v397_v23 }
 0x11a   : > { %512 = sbr.rel (%p665_p12) target bundleno = 305 (0x131), region = 93 }
 0x11b   : > { %v498_v25 = vpop.f32.mrb[0].mxu0 }
 0x11c   : > { %v505_v27 = vadd.f32 %v498_v25, %v398_v24  ;;  %v712_v28 = vpop.f32.mrb[1].mxu0 }
 0x11d   : > { %v501_v29 = vpop.f32.mrb[2].mxu0 }
 0x11e   : > { %507 = vst [vmem:[#allocation2] sm:$0xff] %v505_v27  ;;  %v506_v30 = vadd.f32 %v501_v29, %v399_v26  ;;  %v713_v31 = vpop.f32.mrb[3].mxu0 }
 0x120   : > { %508 = vst [vmem:[#allocation2 + $0x8] sm:$0xff] %v506_v30 }
 0x125   : > { %v513_v32 = vld [vmem:[#allocation2] sm:$0xff] }
 0x126   : > { %v522_v35 = vmul.f32 %v666_v34, %v513_v32 }
 0x127   : > { %v514_v33 = vld [vmem:[#allocation2 + $0x8] sm:$0xff] }
 0x128   : > { %v523_v36 = vmul.f32 %v666_v34, %v514_v33  ;;  %v531_v38 = vadd.f32 %v667_v37, %v522_v35 }
 0x12a   : > { %v532_v39 = vadd.f32 %v667_v37, %v523_v36  ;;  %v533_v40 = vmax.f32 %v531_v38, 0.0 }
 0x12c   : > { %v534_v41 = vmax.f32 %v532_v39, 0.0 }
 0x12e   : > { %v683_v42 = vpack.c.bf16 %v534_v41, %v533_v40 }
 0x130   : > { %684 = vst [vmem:[%s955_s6] sm:$0xff] %v683_v42  }
 0x131 PF: > { %s16_s25 = sadd.s32 1, %s803_s25   ;;  %s956_s21 = smov %s791_s22 }
 0x132   : > { %p13_p13 = scmp.ge.s32.totalorder %s16_s25, 8   ;;  %s957_s22 = smov %s878_s29 }
 0x133   : > { %s958_s23 = smov %s799_s24  ;;  %s959_s24 = smov %s961_s26 }
 0x134   :  { %15 = sbr.rel (!%p13_p13) target bundleno = 3 (0x3), region = 137 }

// kernel: densenet121_forward.195
= control target key start
LH: loop header
LB: loop body
LE: loop exit
PB: predicated region body
PF: predicated region fallthrough
CT: control target
= control target key end

     0   :  { %s843_s21 = smov 0   ;;  %s845_s22 = smov 0   ;;  %s949_s0 = inlined_call_operand.vmem [shape: bf16[16,896], index: 0, kind: input, shape index: {}]   ;;  %s950_s1 = inlined_call_operand.vmem [shape: bf16[896,128], index: 1, kind: input, shape index: {}]   ;;  %s951_s2 = inlined_call_operand.vmem [shape: f32[1,896], index: 2, kind: input, shape index: {}]   ;;  %s952_s3 = inlined_call_operand.vmem [shape: f32[1,896], index: 3, kind: input, shape index: {}]   ;;  %s953_s4 = inlined_call_operand.vmem [shape: f32[1,128], index: 4, kind: input, shape index: {}]   ;;  %s954_s5 = inlined_call_operand.vmem [shape: f32[1,128], index: 5, kind: input, shape index: {}]   ;;  %s955_s6 = inlined_call_operand.vmem [shape: bf16[16,128], index: 6, kind: output, shape index: {}]  }
   0x1   :  { %s847_s23 = smov 0   ;;  %s849_s24 = smov 0  }
   0x2   :  { %s851_s25 = smov 0  }
   0x3 LB: > { %s25_s26 = sadd.s32 1, %s799_s24  ;;  %p44_p1 = scmp.ne.s32.totalorder %s791_s22, %s787_s21  ;;  %s803_s25 = sphi %s851_s25, %s16_s25   ;;  %s799_s24 = sphi %s849_s24, %s959_s24   ;;  %s795_s23 = sphi %s847_s23, %s958_s23   ;;  %s791_s22 = sphi %s845_s22, %s957_s22   ;;  %s787_s21 = sphi %s843_s21, %s956_s21  }
   0x4   : > { %p26_p0 = scmp.ge.s32.totalorder %s25_s26, 7  ;;  %p45_p2 = scmp.eq.s32.totalorder %s803_s25, 0 }
   0x5   : > { %s37_s28 = sadd.s32 1, %s791_s22  ;;  %p647_p5 = scmp.ge.s32.totalorder %s803_s25, 7 }
   0x6   : > { %s961_s26 = smov (%p26_p0, %s25_s26), 0  ;;  %p46_p3 = por %p45_p2, %p44_p1 }
   0x7   : > { %s33_s27 = ssub.s32 %s799_s24, %s961_s26  ;;  %222 = sbr.rel (%p647_p5) target bundleno = 21 (0x15), region = 24 }
   0x8   : > { %p35_p4 = scmp.eq.s32.totalorder %s33_s27, 0 }
   0xa   : > { %s878_s29 = scalar_select %p35_p4, %s791_s22, %s37_s28  }
   0xe   : > { %225 = sbr.rel (!%p46_p3) target bundleno = 21 (0x15), region = 28  ;;  %s227_s30 = sand.u32 (%p46_p3), 1, %s791_s22  }
   0xf   : > { %s649_s7 = sshll.u32 (%p46_p3), %s799_s24, 2  ;;  %s648_s8 = sshll.u32 (%p46_p3), %s227_s30, 3 }
  0x10   : > { %s234_s11 = scalar_lea.vmem (%p46_p3), %s949_s0, %s649_s7  ;;  %s229_s12 = scalar_lea.vmem (%p46_p3), [#allocation3], %s648_s8 }
  0x11   : > { %v250_v0 = vld [vmem:[%s234_s11] sm:$0xf] (%p46_p3)  ;;  %v252_v1 = vld [vmem:[%s234_s11 + $0x1c] sm:$0xf] (%p46_p3) }
  0x12   : > { %251 = vst [vmem:[%s229_s12] sm:$0xf] (%p46_p3), %v250_v0  ;;  %253 = vst [vmem:[%s229_s12 + $0x4] sm:$0xf] (%p46_p3), %v252_v1 }
  0x15 PF: > { %p650_p6 = scmp.ge.s32.totalorder %s803_s25, 1  ;;  %p300_p7 = scmp.lt.s32.totalorder %s803_s25, 8 }
  0x17   : > { %p301_p8 = pnand %p650_p6, %p300_p7 }
  0x18   : > { %s307_s13 = sand.u32 (!%p301_p8), 1, %s787_s21   ;;  %s652_s14 = sshll.u32 (!%p301_p8), %s795_s23, 4 }
  0x19   : > { %304 = sbr.rel (%p301_p8) target bundleno = 305 (0x131), region = 81  ;;  %s890_s15 = sshll.u32 (!%p301_p8), %s307_s13, 3 }
  0x1a   : > { %p349_p9 = scmp.lt.s32.totalorder (!%p301_p8), %s652_s14, 111  ;;  %p354_p10 = scmp.lt.s32.totalorder (!%p301_p8), %s795_s23, 6 }
  0x1b   : > { %s309_s9 = scalar_lea.vmem (!%p301_p8), [#allocation3], %s890_s15  ;;  %p654_p11 = scmp.ne.s32.totalorder (!%p301_p8), %s795_s23, 0 }
  0x20   : > { %s963_s14 = smov (!%p349_p9, %s652_s14), 111  ;;  %370 = sbr.rel (%p654_p11) target bundleno = 39 (0x27), region = 89 }
  0x21   : > { %s894_s16 = scalar_select %p354_p10, %s795_s23, 6 }
  0x22   : > { %s653_s17 = sshll.u32 %s963_s14, 2  ;;  %v805_v2 = vmov (!%p654_p11), 0.0  }
  0x23   : > { %s899_s20 = scalar_lea.vmem %s950_s1, %s653_s17  ;;  %s356_s21 = scalar_lea.vmem %s951_s2, %s894_s16  ;;  %371 = vst [vmem:[#allocation2] sm:$0xff] (!%p654_p11), %v805_v2  ;;  %372 = vst [vmem:[#allocation2 + $0x8] sm:$0xff] (!%p654_p11), %v805_v2 }
  0x24   : > { %s359_s8 = scalar_lea.vmem %s952_s3, %s894_s16 }
  0x27 PF: > { %v757_v3 = vld [vmem:[%s899_s20] sm:$0xff]   ;;  %v806_v4 = vmov 0.0   ;;  %v758_v5 = vld [vmem:[%s899_s20 + $0x8] sm:$0xff]   ;;  %vm807_vm0 = vmmov 0   ;;  %v759_v6 = vld [vmem:[%s899_s20 + $0x10] sm:$0xff]   ;;  %p665_p12 = scmp.ne.s32.totalorder %s795_s23, 6 }
  0x28   : > { %694 = vmatprep.subr.bf16.mxu0 %v806_v4  ;;  %710 = vmatprep.mubr.msk.bf16.mxu0 %vm807_vm0, %v806_v4  ;;  %v760_v7 = vld [vmem:[%s899_s20 + $0x18] sm:$0xff]   ;;  %v761_v11 = vld [vmem:[%s899_s20 + $0x20] sm:$0xff]   ;;  %v762_v15 = vld [vmem:[%s899_s20 + $0x28] sm:$0xff]  }
  0x29   : > { %695 = vmatpush3.bf16.msra.mxu0 %v757_v3  ;;  %v677_v8 = vld [vmem:[%s309_s9] sm:$0xff]   ;;  %v655_v12 = vld [vmem:[%s356_s21] ss:$0 sm:$0xff] }
  0x2a   : > { %696 = vmatprep.subr.bf16.mxu0 %v806_v4  ;;  %v678_v9 = vunpack.c.l.bf16 %v677_v8  ;;  %v679_v10 = vunpack.c.h.bf16 %v677_v8  ;;  %v656_v16 = vld [vmem:[%s359_s8] ss:$0 sm:$0xff]  ;;  %v763_v19 = vld [vmem:[%s899_s20 + $0x30] sm:$0xff]   ;;  %v764_v22 = vld [vmem:[%s899_s20 + $0x38] sm:$0xff]  }
  0x2b   : > { %v398_v24 = vld [vmem:[#allocation2] sm:$0xff]  ;;  %v399_v26 = vld [vmem:[#allocation2 + $0x8] sm:$0xff] }
  0x2c   : > { %v384_v13 = vmul.f32 %v678_v9, %v655_v12  ;;  %v385_v14 = vmul.f32 %v679_v10, %v655_v12  ;;  %v666_v34 = vld [vmem:[%s953_s4] ss:$0 sm:$0xff] (!%p665_p12) }
  0x2d   : > { %697 = vmatpush3.bf16.msra.mxu0 %v758_v5  ;;  %v667_v37 = vld [vmem:[%s954_s5] ss:$0 sm:$0xff] (!%p665_p12) }
  0x2e   : > { %698 = vmatprep.subr.bf16.mxu0 %v806_v4  ;;  %v393_v17 = vadd.f32 %v656_v16, %v384_v13  ;;  %v394_v18 = vadd.f32 %v656_v16, %v385_v14 }
  0x30   : > { %v395_v20 = vmax.f32 %v393_v17, 0.0  ;;  %v396_v21 = vmax.f32 %v394_v18, 0.0 }
  0x31   : > { %699 = vmatpush3.bf16.msra.mxu0 %v759_v6 }
  0x32   : > { %700 = vmatprep.subr.bf16.mxu0 %v806_v4  ;;  %v397_v23 = vpack.c.bf16 %v396_v21, %v395_v20 }
  0x35   : > { %701 = vmatpush3.bf16.msra.mxu0 %v760_v7 }
  0x36   : > { %702 = vmatprep.subr.bf16.mxu0 %v806_v4 }
  0x39   : > { %703 = vmatpush3.bf16.msra.mxu0 %v761_v11 }
  0x3a   : > { %704 = vmatprep.subr.bf16.mxu0 %v806_v4 }
  0x3d   : > { %705 = vmatpush3.bf16.msra.mxu0 %v762_v15 }
  0x3e   : > { %706 = vmatprep.subr.bf16.mxu0 %v806_v4 }
  0x41   : > { %707 = vmatpush3.bf16.msra.mxu0 %v763_v19 }
  0x42   : > { %708 = vmatprep.subr.bf16.mxu0 %v806_v4 }
  0x45   : > { %709 = vmatpush3.bf16.msra.mxu0 %v764_v22 }
  0x48   : > { %711 = vmatmul.mubr.bf16.vlgmr.msra.gmra.mrb[0].mxu0 %v397_v23 }
 0x11a   : > { %512 = sbr.rel (%p665_p12) target bundleno = 305 (0x131), region = 93 }
 0x11b   : > { %v498_v25 = vpop.f32.mrb[0].mxu0 }
 0x11c   : > { %v505_v27 = vadd.f32 %v498_v25, %v398_v24  ;;  %v712_v28 = vpop.f32.mrb[1].mxu0 }
 0x11d   : > { %v501_v29 = vpop.f32.mrb[2].mxu0 }
 0x11e   : > { %507 = vst [vmem:[#allocation2] sm:$0xff] %v505_v27  ;;  %v506_v30 = vadd.f32 %v501_v29, %v399_v26  ;;  %v713_v31 = vpop.f32.mrb[3].mxu0 }
 0x120   : > { %508 = vst [vmem:[#allocation2 + $0x8] sm:$0xff] %v506_v30 }
 0x125   : > { %v513_v32 = vld [vmem:[#allocation2] sm:$0xff] }
 0x126   : > { %v522_v35 = vmul.f32 %v666_v34, %v513_v32 }
 0x127   : > { %v514_v33 = vld [vmem:[#allocation2 + $0x8] sm:$0xff] }
 0x128   : > { %v523_v36 = vmul.f32 %v666_v34, %v514_v33  ;;  %v531_v38 = vadd.f32 %v667_v37, %v522_v35 }
 0x12a   : > { %v532_v39 = vadd.f32 %v667_v37, %v523_v36  ;;  %v533_v40 = vmax.f32 %v531_v38, 0.0 }
 0x12c   : > { %v534_v41 = vmax.f32 %v532_v39, 0.0 }
 0x12e   : > { %v683_v42 = vpack.c.bf16 %v534_v41, %v533_v40 }
 0x130   : > { %684 = vst [vmem:[%s955_s6] sm:$0xff] %v683_v42  }
 0x131 PF: > { %s16_s25 = sadd.s32 1, %s803_s25   ;;  %s956_s21 = smov %s791_s22 }
 0x132   : > { %p13_p13 = scmp.ge.s32.totalorder %s16_s25, 9   ;;  %s957_s22 = smov %s878_s29 }
 0x133   : > { %s958_s23 = smov %s799_s24  ;;  %s959_s24 = smov %s961_s26 }
 0x134   :  { %15 = sbr.rel (!%p13_p13) target bundleno = 3 (0x3), region = 137 }

// kernel: densenet121_forward.203
= control target key start
LH: loop header
LB: loop body
LE: loop exit
PB: predicated region body
PF: predicated region fallthrough
CT: control target
= control target key end

     0   :  { %s843_s21 = smov 0   ;;  %s845_s22 = smov 0   ;;  %s949_s0 = inlined_call_operand.vmem [shape: bf16[16,1024], index: 0, kind: input, shape index: {}]   ;;  %s950_s1 = inlined_call_operand.vmem [shape: bf16[1024,128], index: 1, kind: input, shape index: {}]   ;;  %s951_s2 = inlined_call_operand.vmem [shape: f32[1,1024], index: 2, kind: input, shape index: {}]   ;;  %s952_s3 = inlined_call_operand.vmem [shape: f32[1,1024], index: 3, kind: input, shape index: {}]   ;;  %s953_s4 = inlined_call_operand.vmem [shape: f32[1,128], index: 4, kind: input, shape index: {}]   ;;  %s954_s5 = inlined_call_operand.vmem [shape: f32[1,128], index: 5, kind: input, shape index: {}]   ;;  %s955_s6 = inlined_call_operand.vmem [shape: bf16[16,128], index: 6, kind: output, shape index: {}]  }
   0x1   :  { %s847_s23 = smov 0   ;;  %s849_s24 = smov 0  }
   0x2   :  { %s851_s25 = smov 0  }
   0x3 LB: > { %s25_s26 = sadd.s32 1, %s799_s24  ;;  %p44_p1 = scmp.ne.s32.totalorder %s791_s22, %s787_s21  ;;  %s803_s25 = sphi %s851_s25, %s16_s25   ;;  %s799_s24 = sphi %s849_s24, %s959_s24   ;;  %s795_s23 = sphi %s847_s23, %s958_s23   ;;  %s791_s22 = sphi %s845_s22, %s957_s22   ;;  %s787_s21 = sphi %s843_s21, %s956_s21  }
   0x4   : > { %p26_p0 = scmp.ge.s32.totalorder %s25_s26, 8  ;;  %p45_p2 = scmp.eq.s32.totalorder %s803_s25, 0 }
   0x5   : > { %s37_s28 = sadd.s32 1, %s791_s22  ;;  %p647_p5 = scmp.ge.s32.totalorder %s803_s25, 8 }
   0x6   : > { %s961_s26 = smov (%p26_p0, %s25_s26), 0  ;;  %p46_p3 = por %p45_p2, %p44_p1 }
   0x7   : > { %s33_s27 = ssub.s32 %s799_s24, %s961_s26  ;;  %222 = sbr.rel (%p647_p5) target bundleno = 21 (0x15), region = 24 }
   0x8   : > { %p35_p4 = scmp.eq.s32.totalorder %s33_s27, 0 }
   0xa   : > { %s878_s29 = scalar_select %p35_p4, %s791_s22, %s37_s28  }
   0xe   : > { %225 = sbr.rel (!%p46_p3) target bundleno = 21 (0x15), region = 28  ;;  %s227_s30 = sand.u32 (%p46_p3), 1, %s791_s22  }
   0xf   : > { %s649_s7 = sshll.u32 (%p46_p3), %s799_s24, 2  ;;  %s648_s8 = sshll.u32 (%p46_p3), %s227_s30, 3 }
  0x10   : > { %s234_s11 = scalar_lea.vmem (%p46_p3), %s949_s0, %s649_s7  ;;  %s229_s12 = scalar_lea.vmem (%p46_p3), [#allocation3], %s648_s8 }
  0x11   : > { %v250_v0 = vld [vmem:[%s234_s11] sm:$0xf] (%p46_p3) }
  0x12   : > { %v252_v1 = vld [vmem:[%s234_s11 + $0x20] sm:$0xf] (%p46_p3)  ;;  %251 = vst [vmem:[%s229_s12] sm:$0xf] (%p46_p3), %v250_v0 }
  0x13   : > { %253 = vst [vmem:[%s229_s12 + $0x4] sm:$0xf] (%p46_p3), %v252_v1 }
  0x15 PF: > { %p650_p6 = scmp.ge.s32.totalorder %s803_s25, 1  ;;  %p300_p7 = scmp.lt.s32.totalorder %s803_s25, 9 }
  0x17   : > { %p301_p8 = pnand %p650_p6, %p300_p7 }
  0x18   : > { %s307_s13 = sand.u32 (!%p301_p8), 1, %s787_s21   ;;  %s652_s14 = sshll.u32 (!%p301_p8), %s795_s23, 4 }
  0x19   : > { %304 = sbr.rel (%p301_p8) target bundleno = 305 (0x131), region = 81  ;;  %s890_s15 = sshll.u32 (!%p301_p8), %s307_s13, 3 }
  0x1a   : > { %p349_p9 = scmp.lt.s32.totalorder (!%p301_p8), %s652_s14, 127  ;;  %p354_p10 = scmp.lt.s32.totalorder (!%p301_p8), %s795_s23, 7 }
  0x1b   : > { %s309_s9 = scalar_lea.vmem (!%p301_p8), [#allocation3], %s890_s15  ;;  %p654_p11 = scmp.ne.s32.totalorder (!%p301_p8), %s795_s23, 0 }
  0x20   : > { %s963_s14 = smov (!%p349_p9, %s652_s14), 127  ;;  %370 = sbr.rel (%p654_p11) target bundleno = 39 (0x27), region = 89 }
  0x21   : > { %s894_s16 = scalar_select %p354_p10, %s795_s23, 7 }
  0x22   : > { %s653_s17 = sshll.u32 %s963_s14, 2  ;;  %v805_v2 = vmov (!%p654_p11), 0.0  }
  0x23   : > { %s899_s20 = scalar_lea.vmem %s950_s1, %s653_s17  ;;  %s356_s21 = scalar_lea.vmem %s951_s2, %s894_s16  ;;  %371 = vst [vmem:[#allocation2] sm:$0xff] (!%p654_p11), %v805_v2  ;;  %372 = vst [vmem:[#allocation2 + $0x8] sm:$0xff] (!%p654_p11), %v805_v2 }
  0x24   : > { %s359_s8 = scalar_lea.vmem %s952_s3, %s894_s16 }
  0x27 PF: > { %v757_v3 = vld [vmem:[%s899_s20] sm:$0xff]   ;;  %v806_v4 = vmov 0.0   ;;  %v758_v5 = vld [vmem:[%s899_s20 + $0x8] sm:$0xff]   ;;  %vm807_vm0 = vmmov 0   ;;  %v759_v6 = vld [vmem:[%s899_s20 + $0x10] sm:$0xff]   ;;  %p665_p12 = scmp.ne.s32.totalorder %s795_s23, 7 }
  0x28   : > { %694 = vmatprep.subr.bf16.mxu0 %v806_v4  ;;  %710 = vmatprep.mubr.msk.bf16.mxu0 %vm807_vm0, %v806_v4  ;;  %v760_v7 = vld [vmem:[%s899_s20 + $0x18] sm:$0xff]   ;;  %v761_v11 = vld [vmem:[%s899_s20 + $0x20] sm:$0xff]   ;;  %v762_v15 = vld [vmem:[%s899_s20 + $0x28] sm:$0xff]  }
  0x29   : > { %695 = vmatpush3.bf16.msra.mxu0 %v757_v3  ;;  %v677_v8 = vld [vmem:[%s309_s9] sm:$0xff]   ;;  %v655_v12 = vld [vmem:[%s356_s21] ss:$0 sm:$0xff] }
  0x2a   : > { %696 = vmatprep.subr.bf16.mxu0 %v806_v4  ;;  %v678_v9 = vunpack.c.l.bf16 %v677_v8  ;;  %v679_v10 = vunpack.c.h.bf16 %v677_v8  ;;  %v656_v16 = vld [vmem:[%s359_s8] ss:$0 sm:$0xff]  ;;  %v763_v19 = vld [vmem:[%s899_s20 + $0x30] sm:$0xff]   ;;  %v764_v22 = vld [vmem:[%s899_s20 + $0x38] sm:$0xff]  }
  0x2b   : > { %v398_v24 = vld [vmem:[#allocation2] sm:$0xff]  ;;  %v399_v26 = vld [vmem:[#allocation2 + $0x8] sm:$0xff] }
  0x2c   : > { %v384_v13 = vmul.f32 %v678_v9, %v655_v12  ;;  %v385_v14 = vmul.f32 %v679_v10, %v655_v12  ;;  %v666_v34 = vld [vmem:[%s953_s4] ss:$0 sm:$0xff] (!%p665_p12) }
  0x2d   : > { %697 = vmatpush3.bf16.msra.mxu0 %v758_v5  ;;  %v667_v37 = vld [vmem:[%s954_s5] ss:$0 sm:$0xff] (!%p665_p12) }
  0x2e   : > { %698 = vmatprep.subr.bf16.mxu0 %v806_v4  ;;  %v393_v17 = vadd.f32 %v656_v16, %v384_v13  ;;  %v394_v18 = vadd.f32 %v656_v16, %v385_v14 }
  0x30   : > { %v395_v20 = vmax.f32 %v393_v17, 0.0  ;;  %v396_v21 = vmax.f32 %v394_v18, 0.0 }
  0x31   : > { %699 = vmatpush3.bf16.msra.mxu0 %v759_v6 }
  0x32   : > { %700 = vmatprep.subr.bf16.mxu0 %v806_v4  ;;  %v397_v23 = vpack.c.bf16 %v396_v21, %v395_v20 }
  0x35   : > { %701 = vmatpush3.bf16.msra.mxu0 %v760_v7 }
  0x36   : > { %702 = vmatprep.subr.bf16.mxu0 %v806_v4 }
  0x39   : > { %703 = vmatpush3.bf16.msra.mxu0 %v761_v11 }
  0x3a   : > { %704 = vmatprep.subr.bf16.mxu0 %v806_v4 }
  0x3d   : > { %705 = vmatpush3.bf16.msra.mxu0 %v762_v15 }
  0x3e   : > { %706 = vmatprep.subr.bf16.mxu0 %v806_v4 }
  0x41   : > { %707 = vmatpush3.bf16.msra.mxu0 %v763_v19 }
  0x42   : > { %708 = vmatprep.subr.bf16.mxu0 %v806_v4 }
  0x45   : > { %709 = vmatpush3.bf16.msra.mxu0 %v764_v22 }
  0x48   : > { %711 = vmatmul.mubr.bf16.vlgmr.msra.gmra.mrb[0].mxu0 %v397_v23 }
 0x11a   : > { %512 = sbr.rel (%p665_p12) target bundleno = 305 (0x131), region = 93 }
 0x11b   : > { %v498_v25 = vpop.f32.mrb[0].mxu0 }
 0x11c   : > { %v505_v27 = vadd.f32 %v498_v25, %v398_v24  ;;  %v712_v28 = vpop.f32.mrb[1].mxu0 }
 0x11d   : > { %v501_v29 = vpop.f32.mrb[2].mxu0 }
 0x11e   : > { %507 = vst [vmem:[#allocation2] sm:$0xff] %v505_v27  ;;  %v506_v30 = vadd.f32 %v501_v29, %v399_v26  ;;  %v713_v31 = vpop.f32.mrb[3].mxu0 }
 0x120   : > { %508 = vst [vmem:[#allocation2 + $0x8] sm:$0xff] %v506_v30 }
 0x125   : > { %v513_v32 = vld [vmem:[#allocation2] sm:$0xff] }
 0x126   : > { %v522_v35 = vmul.f32 %v666_v34, %v513_v32 }
 0x127   : > { %v514_v33 = vld [vmem:[#allocation2 + $0x8] sm:$0xff] }
 0x128   : > { %v523_v36 = vmul.f32 %v666_v34, %v514_v33  ;;  %v531_v38 = vadd.f32 %v667_v37, %v522_v35 }
 0x12a   : > { %v532_v39 = vadd.f32 %v667_v37, %v523_v36  ;;  %v533_v40 = vmax.f32 %v531_v38, 0.0 }
 0x12c   : > { %v534_v41 = vmax.f32 %v532_v39, 0.0 }
 0x12e   : > { %v683_v42 = vpack.c.bf16 %v534_v41, %v533_v40 }
 0x130   : > { %684 = vst [vmem:[%s955_s6] sm:$0xff] %v683_v42  }
 0x131 PF: > { %s16_s25 = sadd.s32 1, %s803_s25   ;;  %s956_s21 = smov %s791_s22 }
 0x132   : > { %p13_p13 = scmp.ge.s32.totalorder %s16_s25, 10   ;;  %s957_s22 = smov %s878_s29 }
 0x133   : > { %s958_s23 = smov %s799_s24  ;;  %s959_s24 = smov %s961_s26 }
 0x134   :  { %15 = sbr.rel (!%p13_p13) target bundleno = 3 (0x3), region = 137 }

// kernel: densenet121_forward.209
= control target key start
LH: loop header
LB: loop body
LE: loop exit
PB: predicated region body
PF: predicated region fallthrough
CT: control target
= control target key end

     0   :  { %s1019_s15 = smov 0   ;;  %s1021_s16 = smov 0   ;;  %s1159_s0 = inlined_call_operand.vmem [shape: bf16[16,1024], index: 0, kind: input, shape index: {}]   ;;  %s1160_s1 = inlined_call_operand.vmem [shape: bf16[1024,512], index: 1, kind: input, shape index: {}]   ;;  %s1161_s2 = inlined_call_operand.vmem [shape: f32[1,1024], index: 2, kind: input, shape index: {}]   ;;  %s1162_s3 = inlined_call_operand.vmem [shape: f32[1,1024], index: 3, kind: input, shape index: {}]   ;;  %s1163_s4 = inlined_call_operand.vmem [shape: bf16[16,512], index: 4, kind: output, shape index: {}]  }
   0x1   :  { %s1023_s17 = smov 0   ;;  %s1025_s18 = smov 0  }
   0x2   :  { %s1027_s19 = smov 0  }
   0x3 LB: > { %s23_s20 = sadd.s32 1, %s986_s18  ;;  %p42_p1 = scmp.ne.s32.totalorder %s978_s16, %s974_s15  ;;  %s990_s19 = sphi %s1027_s19, %s14_s19   ;;  %s986_s18 = sphi %s1025_s18, %s1167_s18   ;;  %s982_s17 = sphi %s1023_s17, %s1166_s17   ;;  %s978_s16 = sphi %s1021_s16, %s1165_s16   ;;  %s974_s15 = sphi %s1019_s15, %s1164_s15  }
   0x4   : > { %p24_p0 = scmp.ge.s32.totalorder %s23_s20, 8  ;;  %p43_p2 = scmp.eq.s32.totalorder %s990_s19, 0 }
   0x5   : > { %s35_s22 = sadd.s32 1, %s978_s16  ;;  %p801_p5 = scmp.ge.s32.totalorder %s990_s19, 8 }
   0x6   : > { %s1169_s20 = smov (%p24_p0, %s23_s20), 0  ;;  %p44_p3 = por %p43_p2, %p42_p1 }
   0x7   : > { %s31_s21 = ssub.s32 %s986_s18, %s1169_s20  ;;  %172 = sbr.rel (%p801_p5) target bundleno = 21 (0x15), region = 16 }
   0x8   : > { %p33_p4 = scmp.eq.s32.totalorder %s31_s21, 0 }
   0xa   : > { %s1054_s23 = scalar_select %p33_p4, %s978_s16, %s35_s22  }
   0xe   : > { %175 = sbr.rel (!%p44_p3) target bundleno = 21 (0x15), region = 20  ;;  %s177_s24 = sand.u32 (%p44_p3), 1, %s978_s16  }
   0xf   : > { %s803_s25 = sshll.u32 (%p44_p3), %s986_s18, 2  ;;  %s802_s26 = sshll.u32 (%p44_p3), %s177_s24, 3 }
  0x10   : > { %s184_s29 = scalar_lea.vmem (%p44_p3), %s1159_s0, %s803_s25  ;;  %s179_s30 = scalar_lea.vmem (%p44_p3), [#allocation3], %s802_s26 }
  0x11   : > { %v200_v0 = vld [vmem:[%s184_s29] sm:$0xf] (%p44_p3) }
  0x12   : > { %v202_v1 = vld [vmem:[%s184_s29 + $0x20] sm:$0xf] (%p44_p3)  ;;  %201 = vst [vmem:[%s179_s30] sm:$0xf] (%p44_p3), %v200_v0 }
  0x13   : > { %203 = vst [vmem:[%s179_s30 + $0x4] sm:$0xf] (%p44_p3), %v202_v1 }
  0x15 PF: > { %p804_p6 = scmp.ge.s32.totalorder %s990_s19, 1  ;;  %p251_p7 = scmp.lt.s32.totalorder %s990_s19, 9 }
  0x17   : > { %p252_p8 = pnand %p804_p6, %p251_p7 }
  0x18   : > { %s258_s5 = sand.u32 (!%p252_p8), 1, %s974_s15   ;;  %s806_s6 = sshll.u32 (!%p252_p8), %s982_s17, 4 }
  0x19   : > { %255 = sbr.rel (%p252_p8) target bundleno = 301 (0x12d), region = 73  ;;  %s1066_s7 = sshll.u32 (!%p252_p8), %s258_s5, 3 }
  0x1a   : > { %p298_p9 = scmp.lt.s32.totalorder (!%p252_p8), %s806_s6, 127  ;;  %p304_p10 = scmp.lt.s32.totalorder (!%p252_p8), %s982_s17, 7 }
  0x1b   : > { %s260_s25 = scalar_lea.vmem (!%p252_p8), [#allocation3], %s1066_s7  ;;  %p809_p11 = scmp.ne.s32.totalorder (!%p252_p8), %s982_s17, 0 }
  0x20   : > { %s1171_s6 = smov (!%p298_p9, %s806_s6), 127  ;;  %321 = sbr.rel (%p809_p11) target bundleno = 39 (0x27), region = 81 }
  0x21   : > { %s1070_s8 = scalar_select %p304_p10, %s982_s17, 7 }
  0x22   : > { %s853_s9 = sshll.u32 %s1171_s6, 4  ;;  %v992_v2 = vmov (!%p809_p11), 0.0  }
  0x23   : > { %s1075_s12 = scalar_lea.vmem %s1160_s1, %s853_s9  ;;  %s306_s15 = scalar_lea.vmem %s1161_s2, %s1070_s8  ;;  %322 = vst [vmem:[#allocation2] sm:$0xff] (!%p809_p11), %v992_v2  ;;  %323 = vst [vmem:[#allocation2 + $0x8] sm:$0xff] (!%p809_p11), %v992_v2 }
  0x24   : > { %s309_s24 = scalar_lea.vmem %s1162_s3, %s1070_s8  ;;  %324 = vst [vmem:[#allocation2 + $0x10] sm:$0xff] (!%p809_p11), %v992_v2  ;;  %325 = vst [vmem:[#allocation2 + $0x18] sm:$0xff] (!%p809_p11), %v992_v2 }
  0x25   : > { %326 = vst [vmem:[#allocation2 + $0x20] sm:$0xff] (!%p809_p11), %v992_v2  ;;  %327 = vst [vmem:[#allocation2 + $0x28] sm:$0xff] (!%p809_p11), %v992_v2 }
  0x26   : > { %328 = vst [vmem:[#allocation2 + $0x30] sm:$0xff] (!%p809_p11), %v992_v2  ;;  %329 = vst [vmem:[#allocation2 + $0x38] sm:$0xff] (!%p809_p11), %v992_v2 }
  0x27 PF: > { %v904_v3 = vld [vmem:[%s1075_s12 + $0x4] ss:$16 sps:$4 sm:$0xff]   ;;  %v906_v4 = vld [vmem:[%s1075_s12 + $0xc] ss:$16 sps:$4 sm:$0xff]   ;;  %v993_v5 = vmov 0   ;;  %p844_p12 = scmp.ne.s32.totalorder %s982_s17, 7 }
  0x28   : > { %587 = vmatprep.mubr.bf16.mxu0 %v993_v5  ;;  %630 = vmatprep.mubr.bf16.mxu1 %v993_v5  ;;  %v908_v6 = vld [vmem:[%s1075_s12] ss:$16 sps:$4 sm:$0xff]   ;;  %v909_v7 = vld [vmem:[%s1075_s12 + $0x8] ss:$16 sps:$4 sm:$0xff]   ;;  %v910_v8 = vld [vmem:[%s1075_s12 + $0x24] ss:$16 sps:$4 sm:$0xff]  }
  0x29   : > { %555 = vmatprep.subr.bf16.mxu0 %v904_v3  ;;  %598 = vmatprep.subr.bf16.mxu1 %v906_v4  ;;  %v912_v9 = vld [vmem:[%s1075_s12 + $0x2c] ss:$16 sps:$4 sm:$0xff]   ;;  %v914_v10 = vld [vmem:[%s1075_s12 + $0x20] ss:$16 sps:$4 sm:$0xff]   ;;  %v915_v11 = vld [vmem:[%s1075_s12 + $0x28] ss:$16 sps:$4 sm:$0xff]  }
  0x2a   : > { %556 = vmatpush1.bf16.msra.mxu0 %v908_v6  ;;  %599 = vmatpush1.bf16.msra.mxu1 %v909_v7  ;;  %v916_v12 = vld [vmem:[%s1075_s12 + $0x44] ss:$16 sps:$4 sm:$0xff]   ;;  %v918_v13 = vld [vmem:[%s1075_s12 + $0x4c] ss:$16 sps:$4 sm:$0xff]   ;;  %v920_v14 = vld [vmem:[%s1075_s12 + $0x40] ss:$16 sps:$4 sm:$0xff]  }
  0x2b   : > { %557 = vmatprep.subr.bf16.mxu0 %v910_v8  ;;  %600 = vmatprep.subr.bf16.mxu1 %v912_v9  ;;  %v921_v15 = vld [vmem:[%s1075_s12 + $0x48] ss:$16 sps:$4 sm:$0xff]   ;;  %v922_v16 = vld [vmem:[%s1075_s12 + $0x64] ss:$16 sps:$4 sm:$0xff]   ;;  %v924_v17 = vld [vmem:[%s1075_s12 + $0x6c] ss:$16 sps:$4 sm:$0xff]  }
  0x2c   : > { %v926_v18 = vld [vmem:[%s1075_s12 + $0x60] ss:$16 sps:$4 sm:$0xff]   ;;  %v927_v19 = vld [vmem:[%s1075_s12 + $0x68] ss:$16 sps:$4 sm:$0xff]   ;;  %v928_v20 = vld [vmem:[%s1075_s12 + $0x84] ss:$16 sps:$4 sm:$0xff]  }
  0x2d   : > { %v930_v21 = vld [vmem:[%s1075_s12 + $0x8c] ss:$16 sps:$4 sm:$0xff]   ;;  %v932_v22 = vld [vmem:[%s1075_s12 + $0x80] ss:$16 sps:$4 sm:$0xff]   ;;  %v933_v23 = vld [vmem:[%s1075_s12 + $0x88] ss:$16 sps:$4 sm:$0xff]  }
  0x2e   : > { %558 = vmatpush1.bf16.msra.mxu0 %v914_v10  ;;  %601 = vmatpush1.bf16.msra.mxu1 %v915_v11  ;;  %v934_v24 = vld [vmem:[%s1075_s12 + $0xa4] ss:$16 sps:$4 sm:$0xff]   ;;  %v936_v25 = vld [vmem:[%s1075_s12 + $0xac] ss:$16 sps:$4 sm:$0xff]   ;;  %v938_v26 = vld [vmem:[%s1075_s12 + $0xa0] ss:$16 sps:$4 sm:$0xff]  }
  0x2f   : > { %559 = vmatprep.subr.bf16.mxu0 %v916_v12  ;;  %602 = vmatprep.subr.bf16.mxu1 %v918_v13  ;;  %v939_v27 = vld [vmem:[%s1075_s12 + $0xa8] ss:$16 sps:$4 sm:$0xff]   ;;  %v940_v28 = vld [vmem:[%s1075_s12 + $0xc4] ss:$16 sps:$4 sm:$0xff]   ;;  %v942_v29 = vld [vmem:[%s1075_s12 + $0xcc] ss:$16 sps:$4 sm:$0xff]  }
  0x30   : > { %v859_v30 = vld [vmem:[%s260_s25] sm:$0xff]   ;;  %v357_v49 = vld [vmem:[#allocation2 + $0x10] sm:$0xff]  ;;  %v358_v51 = vld [vmem:[#allocation2 + $0x18] sm:$0xff] }
  0x31   : > { %v810_v31 = vld [vmem:[%s306_s15] ss:$0 sm:$0xff]  ;;  %v860_v32 = vunpack.c.l.bf16 %v859_v30  ;;  %v861_v33 = vunpack.c.h.bf16 %v859_v30  ;;  %v945_v36 = vld [vmem:[%s1075_s12 + $0xc8] ss:$16 sps:$4 sm:$0xff]   ;;  %v946_v39 = vld [vmem:[%s1075_s12 + $0xe4] ss:$16 sps:$4 sm:$0xff]  }
  0x32   : > { %560 = vmatpush1.bf16.msra.mxu0 %v920_v14  ;;  %603 = vmatpush1.bf16.msra.mxu1 %v921_v15  ;;  %v811_v34 = vld [vmem:[%s309_s24] ss:$0 sm:$0xff]  ;;  %v948_v40 = vld [vmem:[%s1075_s12 + $0xec] ss:$16 sps:$4 sm:$0xff]   ;;  %v951_v44 = vld [vmem:[%s1075_s12 + $0xe8] ss:$16 sps:$4 sm:$0xff]  }
  0x33   : > { %561 = vmatprep.subr.bf16.mxu0 %v922_v16  ;;  %604 = vmatprep.subr.bf16.mxu1 %v924_v17  ;;  %v944_v35 = vld [vmem:[%s1075_s12 + $0xc0] ss:$16 sps:$4 sm:$0xff]   ;;  %v341_v37 = vmul.f32 %v860_v32, %v810_v31  ;;  %v342_v38 = vmul.f32 %v861_v33, %v810_v31  ;;  %v356_v50 = vld [vmem:[#allocation2 + $0x8] sm:$0xff]  ;;  %v362_v61 = vld [vmem:[#allocation2 + $0x38] sm:$0xff] }
  0x34   : > { %v950_v43 = vld [vmem:[%s1075_s12 + $0xe0] ss:$16 sps:$4 sm:$0xff]   ;;  %v360_v60 = vld [vmem:[#allocation2 + $0x28] sm:$0xff] }
  0x35   : > { %v350_v41 = vadd.f32 %v811_v34, %v341_v37  ;;  %v351_v42 = vadd.f32 %v811_v34, %v342_v38  ;;  %v355_v48 = vld [vmem:[#allocation2] sm:$0xff]  ;;  %v361_v55 = vld [vmem:[#allocation2 + $0x30] sm:$0xff] }
  0x36   : > { %562 = vmatpush1.bf16.msra.mxu0 %v926_v18  ;;  %605 = vmatpush1.bf16.msra.mxu1 %v927_v19  ;;  %v359_v54 = vld [vmem:[#allocation2 + $0x20] sm:$0xff] }
  0x37   : > { %563 = vmatprep.subr.bf16.mxu0 %v928_v20  ;;  %606 = vmatprep.subr.bf16.mxu1 %v930_v21  ;;  %v352_v45 = vmax.f32 %v350_v41, 0.0  ;;  %v353_v46 = vmax.f32 %v351_v42, 0.0 }
  0x39   : > { %v354_v47 = vpack.c.bf16 %v353_v46, %v352_v45 }
  0x3a   : > { %564 = vmatpush1.bf16.msra.mxu0 %v932_v22  ;;  %607 = vmatpush1.bf16.msra.mxu1 %v933_v23 }
  0x3b   : > { %565 = vmatprep.subr.bf16.mxu0 %v934_v24  ;;  %608 = vmatprep.subr.bf16.mxu1 %v936_v25 }
  0x3e   : > { %566 = vmatpush1.bf16.msra.mxu0 %v938_v26  ;;  %609 = vmatpush1.bf16.msra.mxu1 %v939_v27 }
  0x3f   : > { %567 = vmatprep.subr.bf16.mxu0 %v940_v28  ;;  %610 = vmatprep.subr.bf16.mxu1 %v942_v29 }
  0x42   : > { %568 = vmatpush1.bf16.msra.mxu0 %v944_v35  ;;  %611 = vmatpush1.bf16.msra.mxu1 %v945_v36 }
  0x43   : > { %569 = vmatprep.subr.bf16.mxu0 %v946_v39  ;;  %612 = vmatprep.subr.bf16.mxu1 %v948_v40 }
  0x46   : > { %570 = vmatpush1.bf16.msra.mxu0 %v950_v43  ;;  %613 = vmatpush1.bf16.msra.mxu1 %v951_v44 }
  0x49   : > { %588 = vmatmul.mubr.bf16.vlgmr.msra.gmra.mrb[0].mxu0 %v354_v47  ;;  %631 = vmatmul.mubr.bf16.vlgmr.msra.gmra.mrb[0].mxu1 %v354_v47 }
 0x11c   : > { %v589_v52 = vpop.f32.mrb[0].mxu0  ;;  %v632_v53 = vpop.f32.mrb[0].mxu1  ;;  %660 = sbr.rel (%p844_p12) target bundleno = 301 (0x12d), region = 85 }
 0x11d   : > { %v641_v56 = vadd.f32 %v589_v52, %v355_v48  ;;  %v643_v57 = vadd.f32 %v632_v53, %v357_v49  ;;  %v591_v58 = vpop.f32.mrb[1].mxu0  ;;  %v634_v59 = vpop.f32.mrb[1].mxu1 }
 0x11e   : > { %v642_v62 = vadd.f32 %v591_v58, %v356_v50  ;;  %v644_v63 = vadd.f32 %v634_v59, %v358_v51  ;;  %v593_v0 = vpop.f32.mrb[2].mxu0  ;;  %v636_v1 = vpop.f32.mrb[2].mxu1 }
 0x11f   : > { %649 = vst [vmem:[#allocation2] sm:$0xff] %v641_v56  ;;  %651 = vst [vmem:[#allocation2 + $0x10] sm:$0xff] %v643_v57  ;;  %v645_v2 = vadd.f32 %v593_v0, %v359_v54  ;;  %v647_v3 = vadd.f32 %v636_v1, %v361_v55  ;;  %v595_v4 = vpop.f32.mrb[3].mxu0  ;;  %v638_v5 = vpop.f32.mrb[3].mxu1 }
 0x120   : > { %650 = vst [vmem:[#allocation2 + $0x8] sm:$0xff] %v642_v62  ;;  %652 = vst [vmem:[#allocation2 + $0x18] sm:$0xff] %v644_v63  ;;  %v646_v6 = vadd.f32 %v595_v4, %v360_v60  ;;  %v648_v7 = vadd.f32 %v638_v5, %v362_v61 }
 0x121   : > { %653 = vst [vmem:[#allocation2 + $0x20] sm:$0xff] %v645_v2  ;;  %655 = vst [vmem:[#allocation2 + $0x30] sm:$0xff] %v647_v3 }
 0x122   : > { %654 = vst [vmem:[#allocation2 + $0x28] sm:$0xff] %v646_v6  ;;  %656 = vst [vmem:[#allocation2 + $0x38] sm:$0xff] %v648_v7 }
 0x126   : > { %v661_v8 = vld [vmem:[#allocation2] sm:$0xff]  ;;  %v663_v10 = vld [vmem:[#allocation2 + $0x10] sm:$0xff] }
 0x127   : > { %v662_v9 = vld [vmem:[#allocation2 + $0x8] sm:$0xff]  ;;  %v664_v12 = vld [vmem:[#allocation2 + $0x18] sm:$0xff] }
 0x128   : > { %v854_v11 = vpack.c.bf16 %v662_v9, %v661_v8  ;;  %v665_v13 = vld [vmem:[#allocation2 + $0x20] sm:$0xff]  ;;  %v855_v15 = vpack.c.bf16 %v664_v12, %v663_v10  ;;  %v667_v17 = vld [vmem:[#allocation2 + $0x30] sm:$0xff] }
 0x129   : > { %v666_v14 = vld [vmem:[#allocation2 + $0x28] sm:$0xff]  ;;  %v668_v18 = vld [vmem:[#allocation2 + $0x38] sm:$0xff] }
 0x12a   : > { %v856_v16 = vpack.c.bf16 %v666_v14, %v665_v13  ;;  %693 = vst [vmem:[%s1163_s4] sm:$0xff] %v854_v11  ;;  %v857_v19 = vpack.c.bf16 %v668_v18, %v667_v17  ;;  %694 = vst [vmem:[%s1163_s4 + $0x8] sm:$0xff] %v855_v15 }
 0x12c   : > { %695 = vst [vmem:[%s1163_s4 + $0x10] sm:$0xff] %v856_v16  ;;  %696 = vst [vmem:[%s1163_s4 + $0x18] sm:$0xff] %v857_v19 }
 0x12d PF: > { %s14_s19 = sadd.s32 1, %s990_s19   ;;  %s1164_s15 = smov %s978_s16 }
 0x12e   : > { %p11_p13 = scmp.ge.s32.totalorder %s14_s19, 10   ;;  %s1165_s16 = smov %s1054_s23 }
 0x12f   : > { %s1166_s17 = smov %s986_s18  ;;  %s1167_s18 = smov %s1169_s20 }
 0x130   :  { %13 = sbr.rel (!%p11_p13) target bundleno = 3 (0x3), region = 129 }

// kernel: densenet121_forward.242
= control target key start
LH: loop header
LB: loop body
LE: loop exit
PB: predicated region body
PF: predicated region fallthrough
CT: control target
= control target key end

     0   :  { %v40_v0 = vlaneseq  ;;  %s330_s0 = inlined_call_operand.vmem [shape: bf16[16,1024], index: 0, kind: input, shape index: {}]   ;;  %s331_s1 = inlined_call_operand.vmem [shape: f32[1,1024], index: 1, kind: input, shape index: {}]   ;;  %s332_s2 = inlined_call_operand.vmem [shape: f32[1,1024], index: 2, kind: input, shape index: {}]   ;;  %s333_s3 = inlined_call_operand.vmem [shape: f32[16,1024], index: 3, kind: output, shape index: {}]  }
   0x1   :  { %v14_v1 = vld [vmem:[%s330_s0] sm:$0xff]  ;;  %v15_v5 = vld [vmem:[%s330_s0 + $0x8] sm:$0xff]  ;;  %v16_v6 = vld [vmem:[%s330_s0 + $0x10] sm:$0xff] }
   0x2   :  { %v22_v2 = vunpack.c.l.bf16 %v14_v1  ;;  %v213_v3 = vshrl.u32 %v40_v0, 7  ;;  %v23_v4 = vunpack.c.h.bf16 %v14_v1  ;;  %v224_v7 = vld [vmem:[%s330_s0 + $0x18] sm:$0xff]  ;;  %v229_v8 = vld [vmem:[%s331_s1] sm:$0xff]  ;;  %v24_v10 = vunpack.c.l.bf16 %v15_v5  ;;  %v19_v51 = vld [vmem:[%s330_s0 + $0x28] sm:$0xff] }
   0x3   :  { %v234_v9 = vld [vmem:[%s332_s2] sm:$0xff]  ;;  %v25_v11 = vunpack.c.h.bf16 %v15_v5  ;;  %v26_v12 = vunpack.c.l.bf16 %v16_v6  ;;  %v27_v13 = vunpack.c.h.bf16 %v16_v6  ;;  %v28_v20 = vunpack.c.l.bf16 %v224_v7  ;;  %v20_v60 = vld [vmem:[%s330_s0 + $0x30] sm:$0xff]  ;;  %v21_v1 = vld [vmem:[%s330_s0 + $0x38] sm:$0xff] }
   0x4   :  { %v42_v14 = vsub.s32 0, %v213_v3  ;;  %v46_v15 = vsub.s32 1, %v213_v3  ;;  %v50_v16 = vsub.s32 2, %v213_v3  ;;  %v54_v17 = vsub.s32 3, %v213_v3  ;;  %v18_v46 = vld [vmem:[%s330_s0 + $0x20] sm:$0xff] }
   0x5   :  { %v58_v18 = vsub.s32 4, %v213_v3  ;;  %v62_v19 = vsub.s32 5, %v213_v3  ;;  %v66_v21 = vsub.s32 6, %v213_v3  ;;  %v29_v55 = vunpack.c.h.bf16 %v224_v7 }
   0x6   :  { %v43_v22 = vrot.slane %v229_v8, %v42_v14  ;;  %v101_v23 = vrot.slane %v234_v9, %v42_v14  ;;  %v47_v24 = vrot.slane %v229_v8, %v46_v15  ;;  %v105_v25 = vrot.slane %v234_v9, %v46_v15 }
   0x7   :  { %v51_v26 = vrot.slane %v229_v8, %v50_v16  ;;  %v109_v27 = vrot.slane %v234_v9, %v50_v16  ;;  %v55_v28 = vrot.slane %v229_v8, %v54_v17  ;;  %v113_v29 = vrot.slane %v234_v9, %v54_v17 }
   0x8   :  { %v80_v30 = vmul.f32 %v43_v22, %v22_v2  ;;  %v81_v31 = vmul.f32 %v47_v24, %v23_v4  ;;  %v59_v32 = vrot.slane %v229_v8, %v58_v18  ;;  %v254_v33 = vrot.slane %v234_v9, %v58_v18 }
   0x9   :  { %v82_v34 = vmul.f32 %v51_v26, %v24_v10  ;;  %v83_v35 = vmul.f32 %v55_v28, %v25_v11  ;;  %v63_v36 = vrot.slane %v229_v8, %v62_v19  ;;  %v258_v37 = vrot.slane %v234_v9, %v62_v19 }
   0xa   :  { %v138_v38 = vadd.f32 %v101_v23, %v80_v30  ;;  %v139_v39 = vadd.f32 %v105_v25, %v81_v31  ;;  %v84_v40 = vmul.f32 %v59_v32, %v26_v12  ;;  %v67_v41 = vrot.slane %v229_v8, %v66_v21 }
   0xb   :  { %v140_v42 = vadd.f32 %v109_v27, %v82_v34  ;;  %v141_v43 = vadd.f32 %v113_v29, %v83_v35  ;;  %v85_v44 = vmul.f32 %v63_v36, %v27_v13  ;;  %v125_v45 = vrot.slane %v234_v9, %v66_v21 }
   0xc   :  { %v154_v47 = vmax.f32 %v138_v38, 0.0  ;;  %v155_v48 = vmax.f32 %v139_v39, 0.0  ;;  %v142_v49 = vadd.f32 %v254_v33, %v84_v40  ;;  %v86_v50 = vmul.f32 %v67_v41, %v28_v20 }
   0xd   :  { %v156_v52 = vmax.f32 %v140_v42, 0.0  ;;  %v157_v53 = vmax.f32 %v141_v43, 0.0  ;;  %v143_v54 = vadd.f32 %v258_v37, %v85_v44  ;;  %v70_v58 = vsub.s32 7, %v213_v3 }
   0xe   :  { %170 = vst [vmem:[%s333_s3] sm:$0xff] %v154_v47  ;;  %171 = vst [vmem:[%s333_s3 + $0x8] sm:$0xff] %v155_v48  ;;  %v158_v56 = vmax.f32 %v142_v49, 0.0  ;;  %v144_v57 = vadd.f32 %v125_v45, %v86_v50  ;;  %v30_v59 = vunpack.c.l.bf16 %v18_v46  ;;  %v31_v62 = vunpack.c.h.bf16 %v18_v46 }
   0xf   :  { %172 = vst [vmem:[%s333_s3 + $0x10] sm:$0xff] %v156_v52  ;;  %173 = vst [vmem:[%s333_s3 + $0x18] sm:$0xff] %v157_v53  ;;  %v159_v61 = vmax.f32 %v143_v54, 0.0  ;;  %v32_v63 = vunpack.c.l.bf16 %v19_v51  ;;  %v33_v0 = vunpack.c.h.bf16 %v19_v51  ;;  %v71_v3 = vrot.slane %v229_v8, %v70_v58 }
  0x10   :  { %174 = vst [vmem:[%s333_s3 + $0x20] sm:$0xff] %v158_v56  ;;  %v160_v2 = vmax.f32 %v144_v57, 0.0  ;;  %v129_v4 = vrot.slane %v234_v9, %v70_v58  ;;  %v88_v5 = vmul.f32 %v43_v22, %v30_v59  ;;  %v89_v6 = vmul.f32 %v47_v24, %v31_v62 }
  0x11   :  { %175 = vst [vmem:[%s333_s3 + $0x28] sm:$0xff] %v159_v61  ;;  %v90_v7 = vmul.f32 %v51_v26, %v32_v63  ;;  %v91_v10 = vmul.f32 %v55_v28, %v33_v0  ;;  %v34_v11 = vunpack.c.l.bf16 %v20_v60  ;;  %v87_v12 = vmul.f32 %v71_v3, %v29_v55 }
  0x12   :  { %176 = vst [vmem:[%s333_s3 + $0x30] sm:$0xff] %v160_v2  ;;  %v146_v13 = vadd.f32 %v101_v23, %v88_v5  ;;  %v35_v14 = vunpack.c.h.bf16 %v20_v60  ;;  %v36_v15 = vunpack.c.l.bf16 %v21_v1  ;;  %v147_v8 = vadd.f32 %v105_v25, %v89_v6 }
  0x13   :  { %v148_v16 = vadd.f32 %v109_v27, %v90_v7  ;;  %v149_v9 = vadd.f32 %v113_v29, %v91_v10  ;;  %v92_v17 = vmul.f32 %v59_v32, %v34_v11  ;;  %v145_v18 = vadd.f32 %v129_v4, %v87_v12 }
  0x14   :  { %v162_v19 = vmax.f32 %v146_v13, 0.0  ;;  %v93_v20 = vmul.f32 %v63_v36, %v35_v14  ;;  %v94_v21 = vmul.f32 %v67_v41, %v36_v15  ;;  %v163_v22 = vmax.f32 %v147_v8, 0.0 }
  0x15   :  { %v164_v24 = vmax.f32 %v148_v16, 0.0  ;;  %v165_v26 = vmax.f32 %v149_v9, 0.0  ;;  %v150_v28 = vadd.f32 %v254_v33, %v92_v17  ;;  %v161_v30 = vmax.f32 %v145_v18, 0.0 }
  0x16   :  { %178 = vst [vmem:[%s333_s3 + $0x40] sm:$0xff] %v162_v19  ;;  %v151_v23 = vadd.f32 %v258_v37, %v93_v20  ;;  %v152_v25 = vadd.f32 %v125_v45, %v94_v21  ;;  %v37_v27 = vunpack.c.h.bf16 %v21_v1  ;;  %179 = vst [vmem:[%s333_s3 + $0x48] sm:$0xff] %v163_v22 }
  0x17   :  { %180 = vst [vmem:[%s333_s3 + $0x50] sm:$0xff] %v164_v24  ;;  %181 = vst [vmem:[%s333_s3 + $0x58] sm:$0xff] %v165_v26  ;;  %v166_v29 = vmax.f32 %v150_v28, 0.0 }
  0x18   :  { %177 = vst [vmem:[%s333_s3 + $0x38] sm:$0xff] %v161_v30  ;;  %v167_v31 = vmax.f32 %v151_v23, 0.0  ;;  %v168_v32 = vmax.f32 %v152_v25, 0.0  ;;  %v95_v33 = vmul.f32 %v71_v3, %v37_v27 }
  0x19   :  { %182 = vst [vmem:[%s333_s3 + $0x60] sm:$0xff] %v166_v29 }
  0x1a   :  { %183 = vst [vmem:[%s333_s3 + $0x68] sm:$0xff] %v167_v31  ;;  %184 = vst [vmem:[%s333_s3 + $0x70] sm:$0xff] %v168_v32  ;;  %v153_v34 = vadd.f32 %v129_v4, %v95_v33 }
  0x1c   :  { %v169_v35 = vmax.f32 %v153_v34, 0.0 }
  0x1e   :  { %185 = vst [vmem:[%s333_s3 + $0x78] sm:$0xff] %v169_v35 }

// kernel: densenet121_forward.243
= control target key start
LH: loop header
LB: loop body
LE: loop exit
PB: predicated region body
PF: predicated region fallthrough
CT: control target
= control target key end

     0   :  { %s713_s15 = smov 0   ;;  %s715_s16 = smov 0   ;;  %s807_s0 = inlined_call_operand.vmem [shape: bf16[16,1024], index: 0, kind: input, shape index: {}]   ;;  %s808_s1 = inlined_call_operand.vmem [shape: bf16[1024,128], index: 1, kind: input, shape index: {}]   ;;  %s809_s2 = inlined_call_operand.vmem [shape: f32[1,128], index: 2, kind: input, shape index: {}]   ;;  %s810_s3 = inlined_call_operand.vmem [shape: f32[1,128], index: 3, kind: input, shape index: {}]   ;;  %s811_s4 = inlined_call_operand.vmem [shape: f32[16,128], index: 4, kind: output, shape index: {}]  }
   0x1   :  { %s717_s17 = smov 0   ;;  %s719_s18 = smov 0  }
   0x2   :  { %s721_s19 = smov 0  }
   0x3 LB: > { %s23_s20 = sadd.s32 1, %s679_s18  ;;  %p42_p1 = scmp.ne.s32.totalorder %s671_s16, %s667_s15  ;;  %s683_s19 = sphi %s721_s19, %s14_s19   ;;  %s679_s18 = sphi %s719_s18, %s815_s18   ;;  %s675_s17 = sphi %s717_s17, %s814_s17   ;;  %s671_s16 = sphi %s715_s16, %s813_s16   ;;  %s667_s15 = sphi %s713_s15, %s812_s15  }
   0x4   : > { %p24_p0 = scmp.ge.s32.totalorder %s23_s20, 8  ;;  %p43_p2 = scmp.eq.s32.totalorder %s683_s19, 0 }
   0x5   : > { %s35_s22 = sadd.s32 1, %s671_s16  ;;  %p532_p5 = scmp.ge.s32.totalorder %s683_s19, 8 }
   0x6   : > { %s817_s20 = smov (%p24_p0, %s23_s20), 0  ;;  %p44_p3 = por %p43_p2, %p42_p1 }
   0x7   : > { %s31_s21 = ssub.s32 %s679_s18, %s817_s20  ;;  %168 = sbr.rel (%p532_p5) target bundleno = 21 (0x15), region = 24 }
   0x8   : > { %p33_p4 = scmp.eq.s32.totalorder %s31_s21, 0 }
   0xa   : > { %s748_s23 = scalar_select %p33_p4, %s671_s16, %s35_s22  }
   0xe   : > { %171 = sbr.rel (!%p44_p3) target bundleno = 21 (0x15), region = 28  ;;  %s173_s24 = sand.u32 (%p44_p3), 1, %s671_s16  }
   0xf   : > { %s534_s25 = sshll.u32 (%p44_p3), %s679_s18, 2  ;;  %s533_s26 = sshll.u32 (%p44_p3), %s173_s24, 3 }
  0x10   : > { %s180_s29 = scalar_lea.vmem (%p44_p3), %s807_s0, %s534_s25  ;;  %s175_s30 = scalar_lea.vmem (%p44_p3), [#allocation3], %s533_s26 }
  0x11   : > { %v196_v0 = vld [vmem:[%s180_s29] sm:$0xf] (%p44_p3) }
  0x12   : > { %v198_v1 = vld [vmem:[%s180_s29 + $0x20] sm:$0xf] (%p44_p3)  ;;  %197 = vst [vmem:[%s175_s30] sm:$0xf] (%p44_p3), %v196_v0 }
  0x13   : > { %199 = vst [vmem:[%s175_s30 + $0x4] sm:$0xf] (%p44_p3), %v198_v1 }
  0x15 PF: > { %p535_p6 = scmp.ge.s32.totalorder %s683_s19, 1  ;;  %p234_p7 = scmp.lt.s32.totalorder %s683_s19, 9 }
  0x17   : > { %p235_p8 = pnand %p535_p6, %p234_p7 }
  0x18   : > { %s241_s5 = sand.u32 (!%p235_p8), 1, %s667_s15   ;;  %s537_s6 = sshll.u32 (!%p235_p8), %s675_s17, 4 }
  0x19   : > { %238 = sbr.rel (%p235_p8) target bundleno = 329 (0x149), region = 73  ;;  %s760_s7 = sshll.u32 (!%p235_p8), %s241_s5, 3 }
  0x1a   : > { %p273_p9 = scmp.lt.s32.totalorder (!%p235_p8), %s537_s6, 127  ;;  %s243_s12 = scalar_lea.vmem (!%p235_p8), [#allocation3], %s760_s7 }
  0x1b   : > { %p539_p10 = scmp.ne.s32.totalorder (!%p235_p8), %s675_s17, 0 }
  0x20   : > { %s819_s6 = smov (!%p273_p9, %s537_s6), 127  ;;  %288 = sbr.rel (%p539_p10) target bundleno = 39 (0x27), region = 81 }
  0x21   : > { %s538_s8 = sshll.u32 %s819_s6, 2  ;;  %v685_v2 = vmov (!%p539_p10), 0.0  }
  0x22   : > { %s765_s11 = scalar_lea.vmem %s808_s1, %s538_s8  ;;  %289 = vst [vmem:[#allocation2] sm:$0xff] (!%p539_p10), %v685_v2  ;;  %290 = vst [vmem:[#allocation2 + $0x8] sm:$0xff] (!%p539_p10), %v685_v2 }
  0x27 PF: > { %v628_v3 = vld [vmem:[%s765_s11] sm:$0xff]   ;;  %v686_v4 = vmov 0.0   ;;  %v629_v5 = vld [vmem:[%s765_s11 + $0x8] sm:$0xff]   ;;  %vm687_vm0 = vmmov 0   ;;  %v630_v6 = vld [vmem:[%s765_s11 + $0x10] sm:$0xff]   ;;  %p549_p11 = scmp.ne.s32.totalorder %s675_s17, 7 }
  0x28   : > { %565 = vmatprep.subr.bf16.mxu0 %v686_v4  ;;  %581 = vmatprep.mubr.msk.bf16.mxu0 %vm687_vm0, %v686_v4  ;;  %v631_v7 = vld [vmem:[%s765_s11 + $0x18] sm:$0xff]   ;;  %v632_v8 = vld [vmem:[%s765_s11 + $0x20] sm:$0xff]   ;;  %v633_v9 = vld [vmem:[%s765_s11 + $0x28] sm:$0xff]  }
  0x29   : > { %566 = vmatpush3.bf16.msra.mxu0 %v628_v3  ;;  %v634_v10 = vld [vmem:[%s765_s11 + $0x30] sm:$0xff]   ;;  %v635_v11 = vld [vmem:[%s765_s11 + $0x38] sm:$0xff]   ;;  %v293_v13 = vld [vmem:[#allocation2] sm:$0xff] }
  0x2a   : > { %567 = vmatprep.subr.bf16.mxu0 %v686_v4  ;;  %v636_v12 = vld [vmem:[%s243_s12] sm:$0xff]   ;;  %v294_v15 = vld [vmem:[#allocation2 + $0x8] sm:$0xff]  ;;  %v550_v22 = vld [vmem:[%s809_s2] ss:$0 sm:$0xff] (!%p549_p11) }
  0x2b   : > { %v551_v23 = vld [vmem:[%s810_s3] ss:$0 sm:$0xff] (!%p549_p11) }
  0x2d   : > { %568 = vmatpush3.bf16.msra.mxu0 %v629_v5 }
  0x2e   : > { %569 = vmatprep.subr.bf16.mxu0 %v686_v4 }
  0x31   : > { %570 = vmatpush3.bf16.msra.mxu0 %v630_v6 }
  0x32   : > { %571 = vmatprep.subr.bf16.mxu0 %v686_v4 }
  0x35   : > { %572 = vmatpush3.bf16.msra.mxu0 %v631_v7 }
  0x36   : > { %573 = vmatprep.subr.bf16.mxu0 %v686_v4 }
  0x39   : > { %574 = vmatpush3.bf16.msra.mxu0 %v632_v8 }
  0x3a   : > { %575 = vmatprep.subr.bf16.mxu0 %v686_v4 }
  0x3d   : > { %576 = vmatpush3.bf16.msra.mxu0 %v633_v9 }
  0x3e   : > { %577 = vmatprep.subr.bf16.mxu0 %v686_v4 }
  0x41   : > { %578 = vmatpush3.bf16.msra.mxu0 %v634_v10 }
  0x42   : > { %579 = vmatprep.subr.bf16.mxu0 %v686_v4 }
  0x45   : > { %580 = vmatpush3.bf16.msra.mxu0 %v635_v11 }
  0x48   : > { %582 = vmatmul.mubr.bf16.vlgmr.msra.gmra.mrb[0].mxu0 %v636_v12 }
 0x11a   : > { %413 = sbr.rel (%p549_p11) target bundleno = 329 (0x149), region = 85 }
 0x11b   : > { %v399_v14 = vpop.f32.mrb[0].mxu0 }
 0x11c   : > { %v406_v16 = vadd.f32 %v399_v14, %v293_v13  ;;  %v583_v17 = vpop.f32.mrb[1].mxu0 }
 0x11d   : > { %v402_v18 = vpop.f32.mrb[2].mxu0 }
 0x11e   : > { %408 = vst [vmem:[#allocation2] sm:$0xff] %v406_v16  ;;  %v407_v19 = vadd.f32 %v402_v18, %v294_v15  ;;  %v584_v20 = vpop.f32.mrb[3].mxu0 }
 0x120   : > { %409 = vst [vmem:[#allocation2 + $0x8] sm:$0xff] %v407_v19 }
 0x125   : > { %v414_v21 = vld [vmem:[#allocation2] sm:$0xff] }
 0x126   : > { %v423_v24 = vmul.f32 %v550_v22, %v414_v21 }
 0x127   : > { %v415_v25 = vld [vmem:[#allocation2 + $0x8] sm:$0xff] }
 0x128   : > { %v424_v26 = vmul.f32 %v550_v22, %v415_v25  ;;  %v432_v27 = vadd.f32 %v551_v23, %v423_v24 }
 0x12a   : > { %v433_v28 = vadd.f32 %v551_v23, %v424_v26  ;;  %v434_v29 = vsub.f32 0.0, %v432_v27 }
 0x12c   : > { %v435_v30 = vsub.f32 0.0, %v433_v28  ;;  %v436_v31 = vmul.f32 1.442695, %v434_v29 }
 0x12e   : > { %v438_v32 = vmul.f32 1.442695, %v435_v30  ;;  %637 = vpow2.f32 %v436_v31 }
 0x130   : > { %639 = vpow2.f32 %v438_v32 }
 0x138   : > { %v638_v33 = vpop.eup %637 }
 0x139   : > { %v440_v35 = vadd.f32 1.0, %v638_v33 }
 0x13a   : > { %v640_v34 = vpop.eup %639 }
 0x13b   : > { %v441_v36 = vadd.f32 1.0, %v640_v34  ;;  %641 = vrcp.f32 %v440_v35 }
 0x13d   : > { %643 = vrcp.f32 %v441_v36 }
 0x145   : > { %v642_v37 = vpop.eup %641 }
 0x146   : > { %446 = vst [vmem:[%s811_s4] sm:$0xff] %v642_v37 }
 0x147   : > { %v644_v38 = vpop.eup %643 }
 0x148   : > { %447 = vst [vmem:[%s811_s4 + $0x8] sm:$0xff] %v644_v38 }
 0x149 PF: > { %s14_s19 = sadd.s32 1, %s683_s19   ;;  %s812_s15 = smov %s671_s16 }
 0x14a   : > { %p11_p12 = scmp.ge.s32.totalorder %s14_s19, 10   ;;  %s813_s16 = smov %s748_s23 }
 0x14b   : > { %s814_s17 = smov %s679_s18  ;;  %s815_s18 = smov %s817_s20 }
 0x14c   :  { %13 = sbr.rel (!%p11_p12) target bundleno = 3 (0x3), region = 123 }

</bundles_post_ra>
